<compile_context>
chip_gen: v6e
topology: v6e:2x2x1
jax: 0.10.0
libtpu: 0.0.40
codegen_flags: <defaults>
</compile_context>

<pallas_src>
import math

import jax
import jax.numpy as jnp
from jax.experimental import pallas as pl
from jax.experimental.pallas import tpu as pltpu


# ----------------------------------------------------------------------------
# Fused BasicBlock kernel
# ----------------------------------------------------------------------------
def _basic_block_kernel(xp_ref, w1_ref, b1_ref, w2_ref, b2_ref, o_ref,
                        hpad_ref, acc_ref):
    """One batch element per grid step.

    xp_ref : (1, H+2, W+2, C) bf16   halo-padded input (MXU operand + residual)
    w1_ref : (9, C, C) bf16          conv1 weights, tap-major, BN1 scale folded
    b1_ref : (1, C) f32              conv1 bias (BN1 folded)
    w2_ref : (9, C, C) bf16          conv2 weights, tap-major, BN2 scale folded
    b2_ref : (1, C) f32              conv2 bias (BN2 folded)
    o_ref  : (1, H, W, C) f32        output
    hpad_ref : VMEM (H+2, W+2, C) f32  halo-padded intermediate activation
    acc_ref  : VMEM (H*W, C) f32       matmul accumulator
    """
    _, H, W, C = o_ref.shape

    # ---- conv1 (3x3, pad 1) + folded BN1, as 9 shifted matmuls on the MXU.
    acc_ref[...] = jnp.broadcast_to(b1_ref[...], acc_ref.shape)
    for t in range(9):
        di, dj = divmod(t, 3)
        patch = xp_ref[0, di:di + H, dj:dj + W, :].reshape(H * W, C)
        acc_ref[...] += jnp.dot(patch, w1_ref[t],
                                preferred_element_type=jnp.float32)
    h = jnp.maximum(acc_ref[...], 0.0)                       # ReLU, f32 (H*W, C)

    # ---- stage the zero-padded intermediate in VMEM (no HBM round-trip).
    hpad_ref[...] = jnp.zeros_like(hpad_ref)
    hpad_ref[1:H + 1, 1:W + 1, :] = h.reshape(H, W, C)

    # ---- conv2 (3x3, pad 1) + folded BN2 + residual + ReLU.
    acc_ref[...] = jnp.broadcast_to(b2_ref[...], acc_ref.shape)
    for t in range(9):
        di, dj = divmod(t, 3)
        patch = hpad_ref[di:di + H, dj:dj + W, :].astype(jnp.bfloat16)
        acc_ref[...] += jnp.dot(patch.reshape(H * W, C), w2_ref[t],
                                preferred_element_type=jnp.float32)
    res = xp_ref[0, 1:H + 1, 1:W + 1, :].astype(jnp.float32).reshape(H * W, C)
    out = jnp.maximum(acc_ref[...] + res, 0.0)
    o_ref[0] = out.reshape(H, W, C).astype(o_ref.dtype)


@jax.jit
def basic_block_forward(params, x_nchw):
    """BasicBlock forward. x: (N, C, H, W) f32 -> (N, C, H, W) f32 (NCHW API)."""
    N, C, H, W = x_nchw.shape
    x = jnp.transpose(x_nchw, (0, 2, 3, 1)).astype(jnp.bfloat16)   # NHWC, bf16
    xp = jnp.pad(x, ((0, 0), (1, 1), (1, 1), (0, 0)))              # halo pad

    out = pl.pallas_call(
        _basic_block_kernel,
        out_shape=jax.ShapeDtypeStruct((N, H, W, C), jnp.float32),
        grid=(N,),
        in_specs=[
            pl.BlockSpec((1, H + 2, W + 2, C), lambda n: (n, 0, 0, 0)),
            pl.BlockSpec((9, C, C), lambda n: (0, 0, 0)),
            pl.BlockSpec((1, C), lambda n: (0, 0)),
            pl.BlockSpec((9, C, C), lambda n: (0, 0, 0)),
            pl.BlockSpec((1, C), lambda n: (0, 0)),
        ],
        out_specs=pl.BlockSpec((1, H, W, C), lambda n: (n, 0, 0, 0)),
        scratch_shapes=[
            pltpu.VMEM((H + 2, W + 2, C), jnp.float32),   # padded intermediate
            pltpu.VMEM((H * W, C), jnp.float32),          # f32 accumulator
        ],
        compiler_params=pltpu.CompilerParams(
            dimension_semantics=("parallel",)),
    )(xp, params["w1"], params["b1"], params["w2"], params["b2"])

    return jnp.transpose(out, (0, 3, 1, 2))


# ----------------------------------------------------------------------------
# Deterministic parameters (PyTorch-default conv init, eval-mode BN folded)
# ----------------------------------------------------------------------------
def _fold_conv_bn(w_oihw, conv_b, gamma, beta, rmean, rvar, eps=1e-5):
    """Fold eval-mode BatchNorm into the conv. Returns:
       w_taps: (9, Cin, Cout) bf16 (tap-major, HWIO order), bias: (1, Cout) f32."""
    cout, cin = w_oihw.shape[0], w_oihw.shape[1]
    scale = gamma / jnp.sqrt(rvar + eps)                        # (Cout,)
    wf = w_oihw * scale[:, None, None, None]
    bf = (conv_b - rmean) * scale + beta
    w_taps = jnp.transpose(wf, (2, 3, 1, 0)).reshape(9, cin, cout)
    return w_taps.astype(jnp.bfloat16), bf.reshape(1, cout).astype(jnp.float32)


def init_basic_block_params(key, c):
    ks = jax.random.split(key, 8)
    fan_in = 9 * c
    bound = 1.0 / math.sqrt(fan_in)            # == PyTorch kaiming_uniform(a=sqrt(5))
    w1 = jax.random.uniform(ks[0], (c, c, 3, 3), jnp.float32, -bound, bound)
    cb1 = jax.random.uniform(ks[1], (c,), jnp.float32, -bound, bound)
    w2 = jax.random.uniform(ks[2], (c, c, 3, 3), jnp.float32, -bound, bound)
    cb2 = jax.random.uniform(ks[3], (c,), jnp.float32, -bound, bound)
    g1 = 1.0 + 0.02 * jax.random.normal(ks[4], (c,), jnp.float32)
    g2 = 1.0 + 0.02 * jax.random.normal(ks[5], (c,), jnp.float32)
    be1 = 0.01 * jax.random.normal(ks[6], (c,), jnp.float32)
    be2 = 0.01 * jax.random.normal(ks[7], (c,), jnp.float32)
    zeros = jnp.zeros((c,), jnp.float32)
    ones = jnp.ones((c,), jnp.float32)
    w1t, b1 = _fold_conv_bn(w1, cb1, g1, be1, zeros, ones)
    w2t, b2 = _fold_conv_bn(w2, cb2, g2, be2, zeros, ones)
    return {"w1": w1t, "b1": b1, "w2": w2t, "b2": b2}


# ----------------------------------------------------------------------------
# Pure-JAX reference (same bf16-operand / f32-accumulate numerics)
# ----------------------------------------------------------------------------
def _conv3x3_ref(x_bf16, w_taps, b):
    cin = x_bf16.shape[-1]
    cout = w_taps.shape[-1]
    w_hwio = w_taps.reshape(3, 3, cin, cout)
    y = jax.lax.conv_general_dilated(
        x_bf16, w_hwio, window_strides=(1, 1), padding="SAME",
        dimension_numbers=("NHWC", "HWIO", "NHWC"),
        preferred_element_type=jnp.float32)
    return y + b.reshape(1, 1, 1, cout)


@jax.jit
def basic_block_reference(params, x_nchw):
    x = jnp.transpose(x_nchw, (0, 2, 3, 1)).astype(jnp.bfloat16)
    h = jnp.maximum(_conv3x3_ref(x, params["w1"], params["b1"]), 0.0)
    y = _conv3x3_ref(h.astype(jnp.bfloat16), params["w2"], params["b2"])
    y = jnp.maximum(y + x.astype(jnp.float32), 0.0)
    return jnp.transpose(y, (0, 3, 1, 2))


# ----------------------------------------------------------------------------
if __name__ == "__main__":
    configs = [
        (2, 128, 16, 16),   # lane-dense config: C=128 -> unmasked stores, full MXU cols
        (2, 32, 8, 8),      # small-channel config: masked-lane path still correct
    ]
    key = jax.random.PRNGKey(0)
    for idx, (N, C, H, W) in enumerate(configs):
        pkey, xkey = jax.random.split(jax.random.fold_in(key, idx))
        params = init_basic_block_params(pkey, C)
        x = jax.random.normal(xkey, (N, C, H, W), jnp.float32)

        out = jax.block_until_ready(basic_block_forward(params, x))
        ref = jax.block_until_ready(basic_block_reference(params, x))

        assert out.shape == (N, C, H, W)
        assert bool(jnp.all(jnp.isfinite(out)))
        max_err = float(jnp.max(jnp.abs(out - ref)))
        assert max_err < 1e-2, f"config {(N, C, H, W)}: max abs err {max_err}"
    print("KERNEL_OK")
</pallas_src>

<mosaic_0001>
module attributes {stable_mosaic.version = 11 : i64} {
  func.func @_basic_block_kernel(%arg0: i32, %arg1: memref<1x18x18x128xbf16, #tpu.memory_space<vmem>>, %arg2: memref<9x128x128xbf16, #tpu.memory_space<vmem>>, %arg3: memref<1x128xf32, #tpu.memory_space<vmem>>, %arg4: memref<9x128x128xbf16, #tpu.memory_space<vmem>>, %arg5: memref<1x128xf32, #tpu.memory_space<vmem>>, %arg6: memref<1x16x16x128xf32, #tpu.memory_space<vmem>>, %arg7: memref<18x18x128xf32, #tpu.memory_space<vmem>>, %arg8: memref<256x128xf32, #tpu.memory_space<vmem>>) attributes {dimension_semantics = [#tpu.dimension_semantics<parallel>], iteration_bounds = array<i64: 2>, scalar_prefetch = 0 : i64, scratch_operands = 2 : i64, tpu.core_type = #tpu.core_type<tc>, window_params = [{transform_indices = @transform_0, window_bounds = array<i64: 1, 18, 18, 128>}, {pipeline_mode = #tpu.pipeline_mode<synchronous>, transform_indices = @transform_1, window_bounds = array<i64: 9, 128, 128>}, {pipeline_mode = #tpu.pipeline_mode<synchronous>, transform_indices = @transform_2, window_bounds = array<i64: 1, 128>}, {pipeline_mode = #tpu.pipeline_mode<synchronous>, transform_indices = @transform_3, window_bounds = array<i64: 9, 128, 128>}, {pipeline_mode = #tpu.pipeline_mode<synchronous>, transform_indices = @transform_4, window_bounds = array<i64: 1, 128>}, {transform_indices = @transform_5, window_bounds = array<i64: 1, 16, 16, 128>}]} {
    %c0 = arith.constant 0 : index
    %c0_0 = arith.constant 0 : index
    %0 = vector.load %arg3[%c0, %c0_0] : memref<1x128xf32, #tpu.memory_space<vmem>>, vector<1x128xf32>
    %1 = vector.shape_cast %0 : vector<1x128xf32> to vector<1x128xf32>
    %2 = vector.broadcast %1 : vector<1x128xf32> to vector<256x128xf32>
    %c0_1 = arith.constant 0 : index
    %c0_2 = arith.constant 0 : index
    %3 = vector.load %arg8[%c0_1, %c0_2] : memref<256x128xf32, #tpu.memory_space<vmem>>, vector<256x128xf32>
    tpu.vector_store %arg8[%c0_1, %c0_2], %2 {strides = array<i32>} : memref<256x128xf32, #tpu.memory_space<vmem>>, vector<256x128xf32>,
    %c0_3 = arith.constant 0 : index
    %c0_4 = arith.constant 0 : index
    %c0_5 = arith.constant 0 : index
    %c0_6 = arith.constant 0 : index
    %4 = vector.load %arg1[%c0_3, %c0_4, %c0_5, %c0_6] : memref<1x18x18x128xbf16, #tpu.memory_space<vmem>>, vector<1x16x16x128xbf16>
    %5 = vector.shape_cast %4 : vector<1x16x16x128xbf16> to vector<16x16x128xbf16>
    %6 = vector.shape_cast %5 : vector<16x16x128xbf16> to vector<256x128xbf16>
    %c0_7 = arith.constant 0 : index
    %c0_8 = arith.constant 0 : index
    %7 = vector.load %arg8[%c0_7, %c0_8] : memref<256x128xf32, #tpu.memory_space<vmem>>, vector<256x128xf32>
    %c0_9 = arith.constant 0 : index
    %c0_10 = arith.constant 0 : index
    %c0_11 = arith.constant 0 : index
    %8 = vector.load %arg2[%c0_9, %c0_10, %c0_11] : memref<9x128x128xbf16, #tpu.memory_space<vmem>>, vector<1x128x128xbf16>
    %9 = vector.shape_cast %8 : vector<1x128x128xbf16> to vector<128x128xbf16>
    %cst = arith.constant dense<0.000000e+00> : vector<256x128xf32>
    %10 = tpu.matmul %6, %9, %cst {dimension_numbers = #tpu.dot_dimension_numbers<[1], [0], [0], [1], [0, 0, 1, 1], [], []>} : vector<256x128xbf16>, vector<128x128xbf16>, vector<256x128xf32> -> vector<256x128xf32>
    %11 = arith.addf %7, %10 : vector<256x128xf32>
    %c0_12 = arith.constant 0 : index
    %c0_13 = arith.constant 0 : index
    %12 = vector.load %arg8[%c0_12, %c0_13] : memref<256x128xf32, #tpu.memory_space<vmem>>, vector<256x128xf32>
    tpu.vector_store %arg8[%c0_12, %c0_13], %11 {strides = array<i32>} : memref<256x128xf32, #tpu.memory_space<vmem>>, vector<256x128xf32>,
    %c0_14 = arith.constant 0 : index
    %c0_15 = arith.constant 0 : index
    %c1 = arith.constant 1 : index
    %c0_16 = arith.constant 0 : index
    %13 = vector.load %arg1[%c0_14, %c0_15, %c1, %c0_16] : memref<1x18x18x128xbf16, #tpu.memory_space<vmem>>, vector<1x16x16x128xbf16>
    %14 = vector.shape_cast %13 : vector<1x16x16x128xbf16> to vector<16x16x128xbf16>
    %15 = vector.shape_cast %14 : vector<16x16x128xbf16> to vector<256x128xbf16>
    %c0_17 = arith.constant 0 : index
    %c0_18 = arith.constant 0 : index
    %16 = vector.load %arg8[%c0_17, %c0_18] : memref<256x128xf32, #tpu.memory_space<vmem>>, vector<256x128xf32>
    %c1_19 = arith.constant 1 : index
    %c0_20 = arith.constant 0 : index
    %c0_21 = arith.constant 0 : index
    %17 = vector.load %arg2[%c1_19, %c0_20, %c0_21] : memref<9x128x128xbf16, #tpu.memory_space<vmem>>, vector<1x128x128xbf16>
    %18 = vector.shape_cast %17 : vector<1x128x128xbf16> to vector<128x128xbf16>
    %cst_22 = arith.constant dense<0.000000e+00> : vector<256x128xf32>
    %19 = tpu.matmul %15, %18, %cst_22 {dimension_numbers = #tpu.dot_dimension_numbers<[1], [0], [0], [1], [0, 0, 1, 1], [], []>} : vector<256x128xbf16>, vector<128x128xbf16>, vector<256x128xf32> -> vector<256x128xf32>
    %20 = arith.addf %16, %19 : vector<256x128xf32>
    %c0_23 = arith.constant 0 : index
    %c0_24 = arith.constant 0 : index
    %21 = vector.load %arg8[%c0_23, %c0_24] : memref<256x128xf32, #tpu.memory_space<vmem>>, vector<256x128xf32>
    tpu.vector_store %arg8[%c0_23, %c0_24], %20 {strides = array<i32>} : memref<256x128xf32, #tpu.memory_space<vmem>>, vector<256x128xf32>,
    %c0_25 = arith.constant 0 : index
    %c0_26 = arith.constant 0 : index
    %c2 = arith.constant 2 : index
    %c0_27 = arith.constant 0 : index
    %22 = vector.load %arg1[%c0_25, %c0_26, %c2, %c0_27] : memref<1x18x18x128xbf16, #tpu.memory_space<vmem>>, vector<1x16x16x128xbf16>
    %23 = vector.shape_cast %22 : vector<1x16x16x128xbf16> to vector<16x16x128xbf16>
    %24 = vector.shape_cast %23 : vector<16x16x128xbf16> to vector<256x128xbf16>
    %c0_28 = arith.constant 0 : index
    %c0_29 = arith.constant 0 : index
    %25 = vector.load %arg8[%c0_28, %c0_29] : memref<256x128xf32, #tpu.memory_space<vmem>>, vector<256x128xf32>
    %c2_30 = arith.constant 2 : index
    %c0_31 = arith.constant 0 : index
    %c0_32 = arith.constant 0 : index
    %26 = vector.load %arg2[%c2_30, %c0_31, %c0_32] : memref<9x128x128xbf16, #tpu.memory_space<vmem>>, vector<1x128x128xbf16>
    %27 = vector.shape_cast %26 : vector<1x128x128xbf16> to vector<128x128xbf16>
    %cst_33 = arith.constant dense<0.000000e+00> : vector<256x128xf32>
    %28 = tpu.matmul %24, %27, %cst_33 {dimension_numbers = #tpu.dot_dimension_numbers<[1], [0], [0], [1], [0, 0, 1, 1], [], []>} : vector<256x128xbf16>, vector<128x128xbf16>, vector<256x128xf32> -> vector<256x128xf32>
    %29 = arith.addf %25, %28 : vector<256x128xf32>
    %c0_34 = arith.constant 0 : index
    %c0_35 = arith.constant 0 : index
    %30 = vector.load %arg8[%c0_34, %c0_35] : memref<256x128xf32, #tpu.memory_space<vmem>>, vector<256x128xf32>
    tpu.vector_store %arg8[%c0_34, %c0_35], %29 {strides = array<i32>} : memref<256x128xf32, #tpu.memory_space<vmem>>, vector<256x128xf32>,
    %c0_36 = arith.constant 0 : index
    %c1_37 = arith.constant 1 : index
    %c0_38 = arith.constant 0 : index
    %c0_39 = arith.constant 0 : index
    %31 = vector.load %arg1[%c0_36, %c1_37, %c0_38, %c0_39] : memref<1x18x18x128xbf16, #tpu.memory_space<vmem>>, vector<1x16x16x128xbf16>
    %32 = vector.shape_cast %31 : vector<1x16x16x128xbf16> to vector<16x16x128xbf16>
    %33 = vector.shape_cast %32 : vector<16x16x128xbf16> to vector<256x128xbf16>
    %c0_40 = arith.constant 0 : index
    %c0_41 = arith.constant 0 : index
    %34 = vector.load %arg8[%c0_40, %c0_41] : memref<256x128xf32, #tpu.memory_space<vmem>>, vector<256x128xf32>
    %c3 = arith.constant 3 : index
    %c0_42 = arith.constant 0 : index
    %c0_43 = arith.constant 0 : index
    %35 = vector.load %arg2[%c3, %c0_42, %c0_43] : memref<9x128x128xbf16, #tpu.memory_space<vmem>>, vector<1x128x128xbf16>
    %36 = vector.shape_cast %35 : vector<1x128x128xbf16> to vector<128x128xbf16>
    %cst_44 = arith.constant dense<0.000000e+00> : vector<256x128xf32>
    %37 = tpu.matmul %33, %36, %cst_44 {dimension_numbers = #tpu.dot_dimension_numbers<[1], [0], [0], [1], [0, 0, 1, 1], [], []>} : vector<256x128xbf16>, vector<128x128xbf16>, vector<256x128xf32> -> vector<256x128xf32>
    %38 = arith.addf %34, %37 : vector<256x128xf32>
    %c0_45 = arith.constant 0 : index
    %c0_46 = arith.constant 0 : index
    %39 = vector.load %arg8[%c0_45, %c0_46] : memref<256x128xf32, #tpu.memory_space<vmem>>, vector<256x128xf32>
    tpu.vector_store %arg8[%c0_45, %c0_46], %38 {strides = array<i32>} : memref<256x128xf32, #tpu.memory_space<vmem>>, vector<256x128xf32>,
    %c0_47 = arith.constant 0 : index
    %c1_48 = arith.constant 1 : index
    %c1_49 = arith.constant 1 : index
    %c0_50 = arith.constant 0 : index
    %40 = vector.load %arg1[%c0_47, %c1_48, %c1_49, %c0_50] : memref<1x18x18x128xbf16, #tpu.memory_space<vmem>>, vector<1x16x16x128xbf16>
    %41 = vector.shape_cast %40 : vector<1x16x16x128xbf16> to vector<16x16x128xbf16>
    %42 = vector.shape_cast %41 : vector<16x16x128xbf16> to vector<256x128xbf16>
    %c0_51 = arith.constant 0 : index
    %c0_52 = arith.constant 0 : index
    %43 = vector.load %arg8[%c0_51, %c0_52] : memref<256x128xf32, #tpu.memory_space<vmem>>, vector<256x128xf32>
    %c4 = arith.constant 4 : index
    %c0_53 = arith.constant 0 : index
    %c0_54 = arith.constant 0 : index
    %44 = vector.load %arg2[%c4, %c0_53, %c0_54] : memref<9x128x128xbf16, #tpu.memory_space<vmem>>, vector<1x128x128xbf16>
    %45 = vector.shape_cast %44 : vector<1x128x128xbf16> to vector<128x128xbf16>
    %cst_55 = arith.constant dense<0.000000e+00> : vector<256x128xf32>
    %46 = tpu.matmul %42, %45, %cst_55 {dimension_numbers = #tpu.dot_dimension_numbers<[1], [0], [0], [1], [0, 0, 1, 1], [], []>} : vector<256x128xbf16>, vector<128x128xbf16>, vector<256x128xf32> -> vector<256x128xf32>
    %47 = arith.addf %43, %46 : vector<256x128xf32>
    %c0_56 = arith.constant 0 : index
    %c0_57 = arith.constant 0 : index
    %48 = vector.load %arg8[%c0_56, %c0_57] : memref<256x128xf32, #tpu.memory_space<vmem>>, vector<256x128xf32>
    tpu.vector_store %arg8[%c0_56, %c0_57], %47 {strides = array<i32>} : memref<256x128xf32, #tpu.memory_space<vmem>>, vector<256x128xf32>,
    %c0_58 = arith.constant 0 : index
    %c1_59 = arith.constant 1 : index
    %c2_60 = arith.constant 2 : index
    %c0_61 = arith.constant 0 : index
    %49 = vector.load %arg1[%c0_58, %c1_59, %c2_60, %c0_61] : memref<1x18x18x128xbf16, #tpu.memory_space<vmem>>, vector<1x16x16x128xbf16>
    %50 = vector.shape_cast %49 : vector<1x16x16x128xbf16> to vector<16x16x128xbf16>
    %51 = vector.shape_cast %50 : vector<16x16x128xbf16> to vector<256x128xbf16>
    %c0_62 = arith.constant 0 : index
    %c0_63 = arith.constant 0 : index
    %52 = vector.load %arg8[%c0_62, %c0_63] : memref<256x128xf32, #tpu.memory_space<vmem>>, vector<256x128xf32>
    %c5 = arith.constant 5 : index
    %c0_64 = arith.constant 0 : index
    %c0_65 = arith.constant 0 : index
    %53 = vector.load %arg2[%c5, %c0_64, %c0_65] : memref<9x128x128xbf16, #tpu.memory_space<vmem>>, vector<1x128x128xbf16>
    %54 = vector.shape_cast %53 : vector<1x128x128xbf16> to vector<128x128xbf16>
    %cst_66 = arith.constant dense<0.000000e+00> : vector<256x128xf32>
    %55 = tpu.matmul %51, %54, %cst_66 {dimension_numbers = #tpu.dot_dimension_numbers<[1], [0], [0], [1], [0, 0, 1, 1], [], []>} : vector<256x128xbf16>, vector<128x128xbf16>, vector<256x128xf32> -> vector<256x128xf32>
    %56 = arith.addf %52, %55 : vector<256x128xf32>
    %c0_67 = arith.constant 0 : index
    %c0_68 = arith.constant 0 : index
    %57 = vector.load %arg8[%c0_67, %c0_68] : memref<256x128xf32, #tpu.memory_space<vmem>>, vector<256x128xf32>
    tpu.vector_store %arg8[%c0_67, %c0_68], %56 {strides = array<i32>} : memref<256x128xf32, #tpu.memory_space<vmem>>, vector<256x128xf32>,
    %c0_69 = arith.constant 0 : index
    %c2_70 = arith.constant 2 : index
    %c0_71 = arith.constant 0 : index
    %c0_72 = arith.constant 0 : index
    %58 = vector.load %arg1[%c0_69, %c2_70, %c0_71, %c0_72] : memref<1x18x18x128xbf16, #tpu.memory_space<vmem>>, vector<1x16x16x128xbf16>
    %59 = vector.shape_cast %58 : vector<1x16x16x128xbf16> to vector<16x16x128xbf16>
    %60 = vector.shape_cast %59 : vector<16x16x128xbf16> to vector<256x128xbf16>
    %c0_73 = arith.constant 0 : index
    %c0_74 = arith.constant 0 : index
    %61 = vector.load %arg8[%c0_73, %c0_74] : memref<256x128xf32, #tpu.memory_space<vmem>>, vector<256x128xf32>
    %c6 = arith.constant 6 : index
    %c0_75 = arith.constant 0 : index
    %c0_76 = arith.constant 0 : index
    %62 = vector.load %arg2[%c6, %c0_75, %c0_76] : memref<9x128x128xbf16, #tpu.memory_space<vmem>>, vector<1x128x128xbf16>
    %63 = vector.shape_cast %62 : vector<1x128x128xbf16> to vector<128x128xbf16>
    %cst_77 = arith.constant dense<0.000000e+00> : vector<256x128xf32>
    %64 = tpu.matmul %60, %63, %cst_77 {dimension_numbers = #tpu.dot_dimension_numbers<[1], [0], [0], [1], [0, 0, 1, 1], [], []>} : vector<256x128xbf16>, vector<128x128xbf16>, vector<256x128xf32> -> vector<256x128xf32>
    %65 = arith.addf %61, %64 : vector<256x128xf32>
    %c0_78 = arith.constant 0 : index
    %c0_79 = arith.constant 0 : index
    %66 = vector.load %arg8[%c0_78, %c0_79] : memref<256x128xf32, #tpu.memory_space<vmem>>, vector<256x128xf32>
    tpu.vector_store %arg8[%c0_78, %c0_79], %65 {strides = array<i32>} : memref<256x128xf32, #tpu.memory_space<vmem>>, vector<256x128xf32>,
    %c0_80 = arith.constant 0 : index
    %c2_81 = arith.constant 2 : index
    %c1_82 = arith.constant 1 : index
    %c0_83 = arith.constant 0 : index
    %67 = vector.load %arg1[%c0_80, %c2_81, %c1_82, %c0_83] : memref<1x18x18x128xbf16, #tpu.memory_space<vmem>>, vector<1x16x16x128xbf16>
    %68 = vector.shape_cast %67 : vector<1x16x16x128xbf16> to vector<16x16x128xbf16>
    %69 = vector.shape_cast %68 : vector<16x16x128xbf16> to vector<256x128xbf16>
    %c0_84 = arith.constant 0 : index
    %c0_85 = arith.constant 0 : index
    %70 = vector.load %arg8[%c0_84, %c0_85] : memref<256x128xf32, #tpu.memory_space<vmem>>, vector<256x128xf32>
    %c7 = arith.constant 7 : index
    %c0_86 = arith.constant 0 : index
    %c0_87 = arith.constant 0 : index
    %71 = vector.load %arg2[%c7, %c0_86, %c0_87] : memref<9x128x128xbf16, #tpu.memory_space<vmem>>, vector<1x128x128xbf16>
    %72 = vector.shape_cast %71 : vector<1x128x128xbf16> to vector<128x128xbf16>
    %cst_88 = arith.constant dense<0.000000e+00> : vector<256x128xf32>
    %73 = tpu.matmul %69, %72, %cst_88 {dimension_numbers = #tpu.dot_dimension_numbers<[1], [0], [0], [1], [0, 0, 1, 1], [], []>} : vector<256x128xbf16>, vector<128x128xbf16>, vector<256x128xf32> -> vector<256x128xf32>
    %74 = arith.addf %70, %73 : vector<256x128xf32>
    %c0_89 = arith.constant 0 : index
    %c0_90 = arith.constant 0 : index
    %75 = vector.load %arg8[%c0_89, %c0_90] : memref<256x128xf32, #tpu.memory_space<vmem>>, vector<256x128xf32>
    tpu.vector_store %arg8[%c0_89, %c0_90], %74 {strides = array<i32>} : memref<256x128xf32, #tpu.memory_space<vmem>>, vector<256x128xf32>,
    %c0_91 = arith.constant 0 : index
    %c2_92 = arith.constant 2 : index
    %c2_93 = arith.constant 2 : index
    %c0_94 = arith.constant 0 : index
    %76 = vector.load %arg1[%c0_91, %c2_92, %c2_93, %c0_94] : memref<1x18x18x128xbf16, #tpu.memory_space<vmem>>, vector<1x16x16x128xbf16>
    %77 = vector.shape_cast %76 : vector<1x16x16x128xbf16> to vector<16x16x128xbf16>
    %78 = vector.shape_cast %77 : vector<16x16x128xbf16> to vector<256x128xbf16>
    %c0_95 = arith.constant 0 : index
    %c0_96 = arith.constant 0 : index
    %79 = vector.load %arg8[%c0_95, %c0_96] : memref<256x128xf32, #tpu.memory_space<vmem>>, vector<256x128xf32>
    %c8 = arith.constant 8 : index
    %c0_97 = arith.constant 0 : index
    %c0_98 = arith.constant 0 : index
    %80 = vector.load %arg2[%c8, %c0_97, %c0_98] : memref<9x128x128xbf16, #tpu.memory_space<vmem>>, vector<1x128x128xbf16>
    %81 = vector.shape_cast %80 : vector<1x128x128xbf16> to vector<128x128xbf16>
    %cst_99 = arith.constant dense<0.000000e+00> : vector<256x128xf32>
    %82 = tpu.matmul %78, %81, %cst_99 {dimension_numbers = #tpu.dot_dimension_numbers<[1], [0], [0], [1], [0, 0, 1, 1], [], []>} : vector<256x128xbf16>, vector<128x128xbf16>, vector<256x128xf32> -> vector<256x128xf32>
    %83 = arith.addf %79, %82 : vector<256x128xf32>
    %c0_100 = arith.constant 0 : index
    %c0_101 = arith.constant 0 : index
    %84 = vector.load %arg8[%c0_100, %c0_101] : memref<256x128xf32, #tpu.memory_space<vmem>>, vector<256x128xf32>
    tpu.vector_store %arg8[%c0_100, %c0_101], %83 {strides = array<i32>} : memref<256x128xf32, #tpu.memory_space<vmem>>, vector<256x128xf32>,
    %c0_102 = arith.constant 0 : index
    %c0_103 = arith.constant 0 : index
    %85 = vector.load %arg8[%c0_102, %c0_103] : memref<256x128xf32, #tpu.memory_space<vmem>>, vector<256x128xf32>
    %cst_104 = arith.constant 0.000000e+00 : f32
    %86 = vector.broadcast %cst_104 : f32 to vector<256x128xf32>
    %87 = arith.maximumf %85, %86 : vector<256x128xf32>
    %cst_105 = arith.constant 0.000000e+00 : f32
    %88 = vector.broadcast %cst_105 : f32 to vector<18x18x128xf32>
    %c0_106 = arith.constant 0 : index
    %c0_107 = arith.constant 0 : index
    %c0_108 = arith.constant 0 : index
    %89 = vector.load %arg7[%c0_106, %c0_107, %c0_108] : memref<18x18x128xf32, #tpu.memory_space<vmem>>, vector<18x18x128xf32>
    tpu.vector_store %arg7[%c0_106, %c0_107, %c0_108], %88 {strides = array<i32>} : memref<18x18x128xf32, #tpu.memory_space<vmem>>, vector<18x18x128xf32>,
    %90 = vector.shape_cast %87 : vector<256x128xf32> to vector<16x16x128xf32>
    %c1_109 = arith.constant 1 : index
    %c1_110 = arith.constant 1 : index
    %c0_111 = arith.constant 0 : index
    %91 = vector.load %arg7[%c1_109, %c1_110, %c0_111] : memref<18x18x128xf32, #tpu.memory_space<vmem>>, vector<16x16x128xf32>
    tpu.vector_store %arg7[%c1_109, %c1_110, %c0_111], %90 {strides = array<i32>} : memref<18x18x128xf32, #tpu.memory_space<vmem>>, vector<16x16x128xf32>,
    %c0_112 = arith.constant 0 : index
    %c0_113 = arith.constant 0 : index
    %92 = vector.load %arg5[%c0_112, %c0_113] : memref<1x128xf32, #tpu.memory_space<vmem>>, vector<1x128xf32>
    %93 = vector.shape_cast %92 : vector<1x128xf32> to vector<1x128xf32>
    %94 = vector.broadcast %93 : vector<1x128xf32> to vector<256x128xf32>
    %c0_114 = arith.constant 0 : index
    %c0_115 = arith.constant 0 : index
    %95 = vector.load %arg8[%c0_114, %c0_115] : memref<256x128xf32, #tpu.memory_space<vmem>>, vector<256x128xf32>
    tpu.vector_store %arg8[%c0_114, %c0_115], %94 {strides = array<i32>} : memref<256x128xf32, #tpu.memory_space<vmem>>, vector<256x128xf32>,
    %c0_116 = arith.constant 0 : index
    %c0_117 = arith.constant 0 : index
    %c0_118 = arith.constant 0 : index
    %96 = vector.load %arg7[%c0_116, %c0_117, %c0_118] : memref<18x18x128xf32, #tpu.memory_space<vmem>>, vector<16x16x128xf32>
    %97 = arith.truncf %96 : vector<16x16x128xf32> to vector<16x16x128xbf16>
    %c0_119 = arith.constant 0 : index
    %c0_120 = arith.constant 0 : index
    %98 = vector.load %arg8[%c0_119, %c0_120] : memref<256x128xf32, #tpu.memory_space<vmem>>, vector<256x128xf32>
    %99 = vector.shape_cast %97 : vector<16x16x128xbf16> to vector<256x128xbf16>
    %c0_121 = arith.constant 0 : index
    %c0_122 = arith.constant 0 : index
    %c0_123 = arith.constant 0 : index
    %100 = vector.load %arg4[%c0_121, %c0_122, %c0_123] : memref<9x128x128xbf16, #tpu.memory_space<vmem>>, vector<1x128x128xbf16>
    %101 = vector.shape_cast %100 : vector<1x128x128xbf16> to vector<128x128xbf16>
    %cst_124 = arith.constant dense<0.000000e+00> : vector<256x128xf32>
    %102 = tpu.matmul %99, %101, %cst_124 {dimension_numbers = #tpu.dot_dimension_numbers<[1], [0], [0], [1], [0, 0, 1, 1], [], []>} : vector<256x128xbf16>, vector<128x128xbf16>, vector<256x128xf32> -> vector<256x128xf32>
    %103 = arith.addf %98, %102 : vector<256x128xf32>
    %c0_125 = arith.constant 0 : index
    %c0_126 = arith.constant 0 : index
    %104 = vector.load %arg8[%c0_125, %c0_126] : memref<256x128xf32, #tpu.memory_space<vmem>>, vector<256x128xf32>
    tpu.vector_store %arg8[%c0_125, %c0_126], %103 {strides = array<i32>} : memref<256x128xf32, #tpu.memory_space<vmem>>, vector<256x128xf32>,
    %c0_127 = arith.constant 0 : index
    %c1_128 = arith.constant 1 : index
    %c0_129 = arith.constant 0 : index
    %105 = vector.load %arg7[%c0_127, %c1_128, %c0_129] : memref<18x18x128xf32, #tpu.memory_space<vmem>>, vector<16x16x128xf32>
    %106 = arith.truncf %105 : vector<16x16x128xf32> to vector<16x16x128xbf16>
    %c0_130 = arith.constant 0 : index
    %c0_131 = arith.constant 0 : index
    %107 = vector.load %arg8[%c0_130, %c0_131] : memref<256x128xf32, #tpu.memory_space<vmem>>, vector<256x128xf32>
    %108 = vector.shape_cast %106 : vector<16x16x128xbf16> to vector<256x128xbf16>
    %c1_132 = arith.constant 1 : index
    %c0_133 = arith.constant 0 : index
    %c0_134 = arith.constant 0 : index
    %109 = vector.load %arg4[%c1_132, %c0_133, %c0_134] : memref<9x128x128xbf16, #tpu.memory_space<vmem>>, vector<1x128x128xbf16>
    %110 = vector.shape_cast %109 : vector<1x128x128xbf16> to vector<128x128xbf16>
    %cst_135 = arith.constant dense<0.000000e+00> : vector<256x128xf32>
    %111 = tpu.matmul %108, %110, %cst_135 {dimension_numbers = #tpu.dot_dimension_numbers<[1], [0], [0], [1], [0, 0, 1, 1], [], []>} : vector<256x128xbf16>, vector<128x128xbf16>, vector<256x128xf32> -> vector<256x128xf32>
    %112 = arith.addf %107, %111 : vector<256x128xf32>
    %c0_136 = arith.constant 0 : index
    %c0_137 = arith.constant 0 : index
    %113 = vector.load %arg8[%c0_136, %c0_137] : memref<256x128xf32, #tpu.memory_space<vmem>>, vector<256x128xf32>
    tpu.vector_store %arg8[%c0_136, %c0_137], %112 {strides = array<i32>} : memref<256x128xf32, #tpu.memory_space<vmem>>, vector<256x128xf32>,
    %c0_138 = arith.constant 0 : index
    %c2_139 = arith.constant 2 : index
    %c0_140 = arith.constant 0 : index
    %114 = vector.load %arg7[%c0_138, %c2_139, %c0_140] : memref<18x18x128xf32, #tpu.memory_space<vmem>>, vector<16x16x128xf32>
    %115 = arith.truncf %114 : vector<16x16x128xf32> to vector<16x16x128xbf16>
    %c0_141 = arith.constant 0 : index
    %c0_142 = arith.constant 0 : index
    %116 = vector.load %arg8[%c0_141, %c0_142] : memref<256x128xf32, #tpu.memory_space<vmem>>, vector<256x128xf32>
    %117 = vector.shape_cast %115 : vector<16x16x128xbf16> to vector<256x128xbf16>
    %c2_143 = arith.constant 2 : index
    %c0_144 = arith.constant 0 : index
    %c0_145 = arith.constant 0 : index
    %118 = vector.load %arg4[%c2_143, %c0_144, %c0_145] : memref<9x128x128xbf16, #tpu.memory_space<vmem>>, vector<1x128x128xbf16>
    %119 = vector.shape_cast %118 : vector<1x128x128xbf16> to vector<128x128xbf16>
    %cst_146 = arith.constant dense<0.000000e+00> : vector<256x128xf32>
    %120 = tpu.matmul %117, %119, %cst_146 {dimension_numbers = #tpu.dot_dimension_numbers<[1], [0], [0], [1], [0, 0, 1, 1], [], []>} : vector<256x128xbf16>, vector<128x128xbf16>, vector<256x128xf32> -> vector<256x128xf32>
    %121 = arith.addf %116, %120 : vector<256x128xf32>
    %c0_147 = arith.constant 0 : index
    %c0_148 = arith.constant 0 : index
    %122 = vector.load %arg8[%c0_147, %c0_148] : memref<256x128xf32, #tpu.memory_space<vmem>>, vector<256x128xf32>
    tpu.vector_store %arg8[%c0_147, %c0_148], %121 {strides = array<i32>} : memref<256x128xf32, #tpu.memory_space<vmem>>, vector<256x128xf32>,
    %c1_149 = arith.constant 1 : index
    %c0_150 = arith.constant 0 : index
    %c0_151 = arith.constant 0 : index
    %123 = vector.load %arg7[%c1_149, %c0_150, %c0_151] : memref<18x18x128xf32, #tpu.memory_space<vmem>>, vector<16x16x128xf32>
    %124 = arith.truncf %123 : vector<16x16x128xf32> to vector<16x16x128xbf16>
    %c0_152 = arith.constant 0 : index
    %c0_153 = arith.constant 0 : index
    %125 = vector.load %arg8[%c0_152, %c0_153] : memref<256x128xf32, #tpu.memory_space<vmem>>, vector<256x128xf32>
    %126 = vector.shape_cast %124 : vector<16x16x128xbf16> to vector<256x128xbf16>
    %c3_154 = arith.constant 3 : index
    %c0_155 = arith.constant 0 : index
    %c0_156 = arith.constant 0 : index
    %127 = vector.load %arg4[%c3_154, %c0_155, %c0_156] : memref<9x128x128xbf16, #tpu.memory_space<vmem>>, vector<1x128x128xbf16>
    %128 = vector.shape_cast %127 : vector<1x128x128xbf16> to vector<128x128xbf16>
    %cst_157 = arith.constant dense<0.000000e+00> : vector<256x128xf32>
    %129 = tpu.matmul %126, %128, %cst_157 {dimension_numbers = #tpu.dot_dimension_numbers<[1], [0], [0], [1], [0, 0, 1, 1], [], []>} : vector<256x128xbf16>, vector<128x128xbf16>, vector<256x128xf32> -> vector<256x128xf32>
    %130 = arith.addf %125, %129 : vector<256x128xf32>
    %c0_158 = arith.constant 0 : index
    %c0_159 = arith.constant 0 : index
    %131 = vector.load %arg8[%c0_158, %c0_159] : memref<256x128xf32, #tpu.memory_space<vmem>>, vector<256x128xf32>
    tpu.vector_store %arg8[%c0_158, %c0_159], %130 {strides = array<i32>} : memref<256x128xf32, #tpu.memory_space<vmem>>, vector<256x128xf32>,
    %c1_160 = arith.constant 1 : index
    %c1_161 = arith.constant 1 : index
    %c0_162 = arith.constant 0 : index
    %132 = vector.load %arg7[%c1_160, %c1_161, %c0_162] : memref<18x18x128xf32, #tpu.memory_space<vmem>>, vector<16x16x128xf32>
    %133 = arith.truncf %132 : vector<16x16x128xf32> to vector<16x16x128xbf16>
    %c0_163 = arith.constant 0 : index
    %c0_164 = arith.constant 0 : index
    %134 = vector.load %arg8[%c0_163, %c0_164] : memref<256x128xf32, #tpu.memory_space<vmem>>, vector<256x128xf32>
    %135 = vector.shape_cast %133 : vector<16x16x128xbf16> to vector<256x128xbf16>
    %c4_165 = arith.constant 4 : index
    %c0_166 = arith.constant 0 : index
    %c0_167 = arith.constant 0 : index
    %136 = vector.load %arg4[%c4_165, %c0_166, %c0_167] : memref<9x128x128xbf16, #tpu.memory_space<vmem>>, vector<1x128x128xbf16>
    %137 = vector.shape_cast %136 : vector<1x128x128xbf16> to vector<128x128xbf16>
    %cst_168 = arith.constant dense<0.000000e+00> : vector<256x128xf32>
    %138 = tpu.matmul %135, %137, %cst_168 {dimension_numbers = #tpu.dot_dimension_numbers<[1], [0], [0], [1], [0, 0, 1, 1], [], []>} : vector<256x128xbf16>, vector<128x128xbf16>, vector<256x128xf32> -> vector<256x128xf32>
    %139 = arith.addf %134, %138 : vector<256x128xf32>
    %c0_169 = arith.constant 0 : index
    %c0_170 = arith.constant 0 : index
    %140 = vector.load %arg8[%c0_169, %c0_170] : memref<256x128xf32, #tpu.memory_space<vmem>>, vector<256x128xf32>
    tpu.vector_store %arg8[%c0_169, %c0_170], %139 {strides = array<i32>} : memref<256x128xf32, #tpu.memory_space<vmem>>, vector<256x128xf32>,
    %c1_171 = arith.constant 1 : index
    %c2_172 = arith.constant 2 : index
    %c0_173 = arith.constant 0 : index
    %141 = vector.load %arg7[%c1_171, %c2_172, %c0_173] : memref<18x18x128xf32, #tpu.memory_space<vmem>>, vector<16x16x128xf32>
    %142 = arith.truncf %141 : vector<16x16x128xf32> to vector<16x16x128xbf16>
    %c0_174 = arith.constant 0 : index
    %c0_175 = arith.constant 0 : index
    %143 = vector.load %arg8[%c0_174, %c0_175] : memref<256x128xf32, #tpu.memory_space<vmem>>, vector<256x128xf32>
    %144 = vector.shape_cast %142 : vector<16x16x128xbf16> to vector<256x128xbf16>
    %c5_176 = arith.constant 5 : index
    %c0_177 = arith.constant 0 : index
    %c0_178 = arith.constant 0 : index
    %145 = vector.load %arg4[%c5_176, %c0_177, %c0_178] : memref<9x128x128xbf16, #tpu.memory_space<vmem>>, vector<1x128x128xbf16>
    %146 = vector.shape_cast %145 : vector<1x128x128xbf16> to vector<128x128xbf16>
    %cst_179 = arith.constant dense<0.000000e+00> : vector<256x128xf32>
    %147 = tpu.matmul %144, %146, %cst_179 {dimension_numbers = #tpu.dot_dimension_numbers<[1], [0], [0], [1], [0, 0, 1, 1], [], []>} : vector<256x128xbf16>, vector<128x128xbf16>, vector<256x128xf32> -> vector<256x128xf32>
    %148 = arith.addf %143, %147 : vector<256x128xf32>
    %c0_180 = arith.constant 0 : index
    %c0_181 = arith.constant 0 : index
    %149 = vector.load %arg8[%c0_180, %c0_181] : memref<256x128xf32, #tpu.memory_space<vmem>>, vector<256x128xf32>
    tpu.vector_store %arg8[%c0_180, %c0_181], %148 {strides = array<i32>} : memref<256x128xf32, #tpu.memory_space<vmem>>, vector<256x128xf32>,
    %c2_182 = arith.constant 2 : index
    %c0_183 = arith.constant 0 : index
    %c0_184 = arith.constant 0 : index
    %150 = vector.load %arg7[%c2_182, %c0_183, %c0_184] : memref<18x18x128xf32, #tpu.memory_space<vmem>>, vector<16x16x128xf32>
    %151 = arith.truncf %150 : vector<16x16x128xf32> to vector<16x16x128xbf16>
    %c0_185 = arith.constant 0 : index
    %c0_186 = arith.constant 0 : index
    %152 = vector.load %arg8[%c0_185, %c0_186] : memref<256x128xf32, #tpu.memory_space<vmem>>, vector<256x128xf32>
    %153 = vector.shape_cast %151 : vector<16x16x128xbf16> to vector<256x128xbf16>
    %c6_187 = arith.constant 6 : index
    %c0_188 = arith.constant 0 : index
    %c0_189 = arith.constant 0 : index
    %154 = vector.load %arg4[%c6_187, %c0_188, %c0_189] : memref<9x128x128xbf16, #tpu.memory_space<vmem>>, vector<1x128x128xbf16>
    %155 = vector.shape_cast %154 : vector<1x128x128xbf16> to vector<128x128xbf16>
    %cst_190 = arith.constant dense<0.000000e+00> : vector<256x128xf32>
    %156 = tpu.matmul %153, %155, %cst_190 {dimension_numbers = #tpu.dot_dimension_numbers<[1], [0], [0], [1], [0, 0, 1, 1], [], []>} : vector<256x128xbf16>, vector<128x128xbf16>, vector<256x128xf32> -> vector<256x128xf32>
    %157 = arith.addf %152, %156 : vector<256x128xf32>
    %c0_191 = arith.constant 0 : index
    %c0_192 = arith.constant 0 : index
    %158 = vector.load %arg8[%c0_191, %c0_192] : memref<256x128xf32, #tpu.memory_space<vmem>>, vector<256x128xf32>
    tpu.vector_store %arg8[%c0_191, %c0_192], %157 {strides = array<i32>} : memref<256x128xf32, #tpu.memory_space<vmem>>, vector<256x128xf32>,
    %c2_193 = arith.constant 2 : index
    %c1_194 = arith.constant 1 : index
    %c0_195 = arith.constant 0 : index
    %159 = vector.load %arg7[%c2_193, %c1_194, %c0_195] : memref<18x18x128xf32, #tpu.memory_space<vmem>>, vector<16x16x128xf32>
    %160 = arith.truncf %159 : vector<16x16x128xf32> to vector<16x16x128xbf16>
    %c0_196 = arith.constant 0 : index
    %c0_197 = arith.constant 0 : index
    %161 = vector.load %arg8[%c0_196, %c0_197] : memref<256x128xf32, #tpu.memory_space<vmem>>, vector<256x128xf32>
    %162 = vector.shape_cast %160 : vector<16x16x128xbf16> to vector<256x128xbf16>
    %c7_198 = arith.constant 7 : index
    %c0_199 = arith.constant 0 : index
    %c0_200 = arith.constant 0 : index
    %163 = vector.load %arg4[%c7_198, %c0_199, %c0_200] : memref<9x128x128xbf16, #tpu.memory_space<vmem>>, vector<1x128x128xbf16>
    %164 = vector.shape_cast %163 : vector<1x128x128xbf16> to vector<128x128xbf16>
    %cst_201 = arith.constant dense<0.000000e+00> : vector<256x128xf32>
    %165 = tpu.matmul %162, %164, %cst_201 {dimension_numbers = #tpu.dot_dimension_numbers<[1], [0], [0], [1], [0, 0, 1, 1], [], []>} : vector<256x128xbf16>, vector<128x128xbf16>, vector<256x128xf32> -> vector<256x128xf32>
    %166 = arith.addf %161, %165 : vector<256x128xf32>
    %c0_202 = arith.constant 0 : index
    %c0_203 = arith.constant 0 : index
    %167 = vector.load %arg8[%c0_202, %c0_203] : memref<256x128xf32, #tpu.memory_space<vmem>>, vector<256x128xf32>
    tpu.vector_store %arg8[%c0_202, %c0_203], %166 {strides = array<i32>} : memref<256x128xf32, #tpu.memory_space<vmem>>, vector<256x128xf32>,
    %c2_204 = arith.constant 2 : index
    %c2_205 = arith.constant 2 : index
    %c0_206 = arith.constant 0 : index
    %168 = vector.load %arg7[%c2_204, %c2_205, %c0_206] : memref<18x18x128xf32, #tpu.memory_space<vmem>>, vector<16x16x128xf32>
    %169 = arith.truncf %168 : vector<16x16x128xf32> to vector<16x16x128xbf16>
    %c0_207 = arith.constant 0 : index
    %c0_208 = arith.constant 0 : index
    %170 = vector.load %arg8[%c0_207, %c0_208] : memref<256x128xf32, #tpu.memory_space<vmem>>, vector<256x128xf32>
    %171 = vector.shape_cast %169 : vector<16x16x128xbf16> to vector<256x128xbf16>
    %c8_209 = arith.constant 8 : index
    %c0_210 = arith.constant 0 : index
    %c0_211 = arith.constant 0 : index
    %172 = vector.load %arg4[%c8_209, %c0_210, %c0_211] : memref<9x128x128xbf16, #tpu.memory_space<vmem>>, vector<1x128x128xbf16>
    %173 = vector.shape_cast %172 : vector<1x128x128xbf16> to vector<128x128xbf16>
    %cst_212 = arith.constant dense<0.000000e+00> : vector<256x128xf32>
    %174 = tpu.matmul %171, %173, %cst_212 {dimension_numbers = #tpu.dot_dimension_numbers<[1], [0], [0], [1], [0, 0, 1, 1], [], []>} : vector<256x128xbf16>, vector<128x128xbf16>, vector<256x128xf32> -> vector<256x128xf32>
    %175 = arith.addf %170, %174 : vector<256x128xf32>
    %c0_213 = arith.constant 0 : index
    %c0_214 = arith.constant 0 : index
    %176 = vector.load %arg8[%c0_213, %c0_214] : memref<256x128xf32, #tpu.memory_space<vmem>>, vector<256x128xf32>
    tpu.vector_store %arg8[%c0_213, %c0_214], %175 {strides = array<i32>} : memref<256x128xf32, #tpu.memory_space<vmem>>, vector<256x128xf32>,
    %c0_215 = arith.constant 0 : index
    %c1_216 = arith.constant 1 : index
    %c1_217 = arith.constant 1 : index
    %c0_218 = arith.constant 0 : index
    %177 = vector.load %arg1[%c0_215, %c1_216, %c1_217, %c0_218] : memref<1x18x18x128xbf16, #tpu.memory_space<vmem>>, vector<1x16x16x128xbf16>
    %178 = vector.shape_cast %177 : vector<1x16x16x128xbf16> to vector<16x16x128xbf16>
    %179 = arith.extf %178 : vector<16x16x128xbf16> to vector<16x16x128xf32>
    %180 = vector.shape_cast %179 : vector<16x16x128xf32> to vector<256x128xf32>
    %c0_219 = arith.constant 0 : index
    %c0_220 = arith.constant 0 : index
    %181 = vector.load %arg8[%c0_219, %c0_220] : memref<256x128xf32, #tpu.memory_space<vmem>>, vector<256x128xf32>
    %182 = arith.addf %181, %180 : vector<256x128xf32>
    %cst_221 = arith.constant 0.000000e+00 : f32
    %183 = vector.broadcast %cst_221 : f32 to vector<256x128xf32>
    %184 = arith.maximumf %182, %183 : vector<256x128xf32>
    %185 = vector.shape_cast %184 : vector<256x128xf32> to vector<16x16x128xf32>
    %c0_222 = arith.constant 0 : index
    %c0_223 = arith.constant 0 : index
    %c0_224 = arith.constant 0 : index
    %c0_225 = arith.constant 0 : index
    %186 = vector.load %arg6[%c0_222, %c0_223, %c0_224, %c0_225] : memref<1x16x16x128xf32, #tpu.memory_space<vmem>>, vector<1x16x16x128xf32>
    %187 = vector.shape_cast %186 : vector<1x16x16x128xf32> to vector<16x16x128xf32>
    %188 = vector.shape_cast %185 : vector<16x16x128xf32> to vector<1x16x16x128xf32>
    tpu.vector_store %arg6[%c0_222, %c0_223, %c0_224, %c0_225], %188 {strides = array<i32>} : memref<1x16x16x128xf32, #tpu.memory_space<vmem>>, vector<1x16x16x128xf32>,
    return
  }
  func.func @transform_0(%arg0: i32) -> (i32, i32, i32, i32) {
    %c0_i32 = arith.constant 0 : i32
    %c0_i32_0 = arith.constant 0 : i32
    %c0_i32_1 = arith.constant 0 : i32
    %c0_i32_2 = arith.constant 0 : i32
    return %arg0, %c0_i32, %c0_i32_0, %c0_i32_1 : i32, i32, i32, i32
  }
  func.func @transform_1(%arg0: i32) -> (i32, i32, i32) {
    %c0_i32 = arith.constant 0 : i32
    %c0_i32_0 = arith.constant 0 : i32
    %c0_i32_1 = arith.constant 0 : i32
    %c0_i32_2 = arith.constant 0 : i32
    return %c0_i32, %c0_i32_0, %c0_i32_1 : i32, i32, i32
  }
  func.func @transform_2(%arg0: i32) -> (i32, i32) {
    %c0_i32 = arith.constant 0 : i32
    %c0_i32_0 = arith.constant 0 : i32
    %c0_i32_1 = arith.constant 0 : i32
    return %c0_i32, %c0_i32_0 : i32, i32
  }
  func.func @transform_3(%arg0: i32) -> (i32, i32, i32) {
    %c0_i32 = arith.constant 0 : i32
    %c0_i32_0 = arith.constant 0 : i32
    %c0_i32_1 = arith.constant 0 : i32
    %c0_i32_2 = arith.constant 0 : i32
    return %c0_i32, %c0_i32_0, %c0_i32_1 : i32, i32, i32
  }
  func.func @transform_4(%arg0: i32) -> (i32, i32) {
    %c0_i32 = arith.constant 0 : i32
    %c0_i32_0 = arith.constant 0 : i32
    %c0_i32_1 = arith.constant 0 : i32
    return %c0_i32, %c0_i32_0 : i32, i32
  }
  func.func @transform_5(%arg0: i32) -> (i32, i32, i32, i32) {
    %c0_i32 = arith.constant 0 : i32
    %c0_i32_0 = arith.constant 0 : i32
    %c0_i32_1 = arith.constant 0 : i32
    %c0_i32_2 = arith.constant 0 : i32
    return %arg0, %c0_i32, %c0_i32_0, %c0_i32_1 : i32, i32, i32, i32
  }
}

</mosaic_0001>

<bundles_post_ra>
// kernel: basic_block_forward.1
= control target key start
LH: loop header
LB: loop body
LE: loop exit
PB: predicated region body
PF: predicated region fallthrough
CT: control target
= control target key end

     0   :  { %10 = vsyncpa [#allocation5], 0  ;;  %s15776_s0 = inlined_call_operand.vmem [shape: bf16[2,18,18,128], index: 0, kind: input, shape index: {}]   ;;  %s15777_s1 = inlined_call_operand.vmem [shape: bf16[9,128,128], index: 1, kind: input, shape index: {}]   ;;  %s15778_s2 = inlined_call_operand.vmem [shape: f32[1,128], index: 2, kind: input, shape index: {}]   ;;  %s15779_s3 = inlined_call_operand.vmem [shape: bf16[9,128,128], index: 3, kind: input, shape index: {}]   ;;  %s15780_s4 = inlined_call_operand.vmem [shape: f32[1,128], index: 4, kind: input, shape index: {}]   ;;  %s15781_s5 = inlined_call_operand.hbm [shape: f32[2,16,16,128], index: 5, kind: output, shape index: {}]  }
   0x1   :  { %12 = vsyncpa [#allocation5 + $0x1], 0  ;;  %s12418_s18 = smov 0   ;;  %s12420_s19 = smov 0  }
   0x2   :  { %s12422_s20 = smov 0   ;;  %s12424_s21 = smov 0  }
   0x3 LB: > { %s12439_s22 = sadd.s32 4294967295, %s12381_s21   ;;  %s9837_s23 = sadd.s32 4294967294, %s12381_s21   ;;  %s12381_s21 = sphi %s12424_s21, %s16134_s21   ;;  %s12377_s20 = sphi %s12422_s20, %s16133_s20   ;;  %s12373_s19 = sphi %s12420_s19, %s16132_s19   ;;  %s12369_s18 = sphi %s12418_s18, %s16131_s18  }
   0x4   : > { %s12443_s24 = sadd.s32 1, %s12381_s21   ;;  %s135_s25 = sadd.s32 1, %s12377_s20 }
   0x5   : > { %s132_s26 = ssub.s32 %s12381_s21, %s12443_s24  ;;  %p145_p0 = scmp.ne.s32.totalorder %s12377_s20, %s12373_s19 }
   0x6   : > { %p133_p1 = scmp.eq.s32.totalorder %s132_s26, 0  ;;  %p146_p2 = scmp.eq.s32.totalorder %s12439_s22, 1 }
   0x7   : > { %p151_p3 = scmp.ne.s32.totalorder %s12373_s19, %s12369_s18  ;;  %p152_p4 = scmp.eq.s32.totalorder %s9837_s23, 1 }
   0x8   : > { %s12454_s27 = scalar_select %p133_p1, %s12377_s20, %s135_s25  }
   0x9   : > { %p12456_p5 = por %p146_p2, %p145_p0  ;;  %p12460_p6 = por %p152_p4, %p151_p3 }
   0xa   : > { %p9840_p7 = scmp.ge.s32.totalorder %s12381_s21, 1  ;;  %p190_p8 = scmp.lt.s32.totalorder %s12381_s21, 3 }
   0xc   : > { %p191_p9 = pnand %p9840_p7, %p190_p8 }
   0xe   : > { %194 = sbr.rel (%p191_p9) target bundleno = 1088 (0x440), region = 40 }
  0x13   : > { %v12126_v0 = vld [vmem:[%s15777_s1 + $0x38] sm:$0xff]   ;;  %v12128_v2 = vld [vmem:[%s15777_s1 + $0x30] sm:$0xff]   ;;  %p218_p10 = scmp.lt.s32.totalorder %s12439_s22, 1  ;;  %v12130_v4 = vld [vmem:[%s15777_s1 + $0x28] sm:$0xff]   ;;  %vm760_vm0 = vsmask.f32 3328 }
  0x14   : > { %v12127_v1 = vld [vmem:[%s15777_s1 + $0x78] sm:$0xff]   ;;  %11219 = vmatprep.subr.bf16.mxu0 %v12126_v0  ;;  %v12129_v3 = vld [vmem:[%s15777_s1 + $0x70] sm:$0xff]   ;;  %v12131_v5 = vld [vmem:[%s15777_s1 + $0x68] sm:$0xff]   ;;  %vm761_vm1 = vsmask.f32 7440  ;;  %vm1629_vm3 = vcmask 1042432  }
  0x15   : > { %11220 = vmatpush3.bf16.msra.mxu0 %v12126_v0  ;;  %11267 = vmatprep.subr.bf16.mxu1 %v12127_v1  ;;  %s219_s17 = scalar_select %p218_p10, %s12439_s22, 1  ;;  %v12132_v6 = vld [vmem:[%s15777_s1 + $0x20] sm:$0xff]   ;;  %v12134_v8 = vld [vmem:[%s15777_s1 + $0x18] sm:$0xff]   ;;  %v12136_v10 = vld [vmem:[%s15777_s1 + $0x10] sm:$0xff]   ;;  %vm1630_vm4 = vcmask 1046532   ;;  %vm9520_vm6 = vcmask 1046528  }
  0x16   : > { %11268 = vmatpush3.bf16.msra.mxu1 %v12127_v1  ;;  %11221 = vmatprep.subr.bf16.mxu0 %v12128_v2  ;;  %v12133_v7 = vld [vmem:[%s15777_s1 + $0x60] sm:$0xff]   ;;  %v12135_v9 = vld [vmem:[%s15777_s1 + $0x58] sm:$0xff]   ;;  %v12137_v12 = vld [vmem:[%s15777_s1 + $0x50] sm:$0xff]   ;;  %s215_s26 = sand.u32 1, %s12373_s19   ;;  %s12385_s12 = smov [#allocation4]  }
  0x17   : > { %11269 = vmatprep.subr.bf16.mxu1 %v12129_v3  ;;  %s12083_s6 = smul.u32 216, %s219_s17  ;;  %v12138_v13 = vld [vmem:[%s15777_s1 + $0x8] sm:$0xff]   ;;  %v12140_v24 = vld [vmem:[%s15777_s1] sm:$0xff]   ;;  %vm12530_vm2 = vmor %vm760_vm0, %vm761_vm1  ;;  %s9841_s30 = sshll.u32 %s215_s26, 8 }
  0x18   : > { %v12139_v19 = vld [vmem:[%s15777_s1 + $0x48] sm:$0xff]   ;;  %v12141_v33 = vld [vmem:[%s15777_s1 + $0x40] sm:$0xff]   ;;  %v12144_v46 = vld [vmem:[%s15777_s1 + $0xb8] sm:$0xff]   ;;  %s15736_s11 = scalar_lea.sflag [#allocation5], %s215_s26  ;;  %s12325_s13 = sshll.u32 %s12385_s12, 4  ;;  %s12326_s13 = int_to_ptr.vmem [resolvable:$false] %s12325_s13 }
  0x19   : > { %11222 = vmatpush3.bf16.msra.mxu0 %v12128_v2  ;;  %s12504_s15 = scalar_lea.vmem %s15776_s0, %s12083_s6  ;;  %v12147_v1 = vld [vmem:[%s15777_s1 + $0xb0] sm:$0xff]   ;;  %vm12705_vm5 = vmor %vm1629_vm3, %vm1630_vm4  ;;  %s15491_s6 = scalar_lea.vmem [#allocation4], %s9841_s30 }
  0x1a   : > { %11270 = vmatpush3.bf16.msra.mxu1 %v12129_v3  ;;  %11223 = vmatprep.subr.bf16.mxu0 %v12130_v4  ;;  %v12142_v11 = vld [vmem:[%s12504_s15] sm:$0xff]   ;;  %v714_v16 = vld [vmem:[%s12504_s15 + $0x8] sm:$0x1]  ;;  %v715_v23 = vld [vmem:[%s12504_s15 + $0xc] sm:$0xf]  ;;  %s9775_s7 = sshll.u32 %s15491_s6, 4  ;;  %s15730_s7 = int_to_ptr.vmem [resolvable:$true] %s9775_s7 }
  0x1b   : > { %11271 = vmatprep.subr.bf16.mxu1 %v12131_v5  ;;  %11235 = vmatprep.mubr.bf16.mxu0 %v12142_v11  ;;  %v712_v14 = vld [vmem:[%s12504_s15] sm:$0xf]  ;;  %v713_v15 = vld [vmem:[%s12504_s15 + $0x4] sm:$0xf]  ;;  %v783_v22 = vshll.u32 %v714_v16, 16  ;;  %v788_v32 = vshrl.u32 %v715_v23, 16  ;;  %p12328_p0 = scmp.lt.s32.totalorder %s15730_s7, %s12326_s13 }
  0x1c   : > { %v764_v17 = vshrl.u32 %v712_v14, 16  ;;  %v767_v18 = vshll.u32 %v712_v14, 16  ;;  %v773_v20 = vshll.u32 %v713_v15, 16  ;;  %v777_v21 = vshrl.u32 %v713_v15, 16  ;;  %v716_v27 = vld [vmem:[%s12504_s15 + $0x10] sm:$0xf] }
  0x1d   : > { %11224 = vmatpush3.bf16.msra.mxu0 %v12130_v4  ;;  %v717_v28 = vld [vmem:[%s12504_s15 + $0x14] sm:$0x1]  ;;  %v785_v31 = vrot.slane %v783_v22, 5  ;;  %v791_v35 = vshll.u32 %v715_v23, 16  ;;  %v797_v36 = vshll.u32 %v716_v27, 16  ;;  %v801_v37 = vshrl.u32 %v716_v27, 16 }
  0x1e   : > { %11272 = vmatpush3.bf16.msra.mxu1 %v12131_v5  ;;  %11225 = vmatprep.subr.bf16.mxu0 %v12132_v6  ;;  %v766_v25 = vrot.slane %v764_v17, 4  ;;  %v769_v26 = vrot.slane %v767_v18, 5  ;;  %v775_v29 = vrot.slane %v773_v20, 5  ;;  %v779_v30 = vrot.slane %v777_v21, 4  ;;  %v718_v52 = vld [vmem:[%s12504_s15 + $0x18] sm:$0xf] }
  0x1f   : > { %11273 = vmatprep.subr.bf16.mxu1 %v12133_v7  ;;  %v790_v40 = vrot.slane %v788_v32, 4  ;;  %v807_v41 = vshll.u32 %v717_v28, 16  ;;  %v793_v43 = vrot.slane %v791_v35, 5  ;;  %v799_v44 = vrot.slane %v797_v36, 5  ;;  %v719_v53 = vld [vmem:[%s12504_s15 + $0x1c] sm:$0xf] }
  0x20   : > { %v770_v34 = vor.u32 %v769_v26, %v766_v25  ;;  %v780_v39 = vor.u32 %v779_v30, %v775_v29  ;;  %v803_v45 = vrot.slane %v801_v37, 4  ;;  %v720_v54 = vld [vmem:[%s12504_s15 + $0x20] sm:$0x1]  ;;  %v12143_v55 = vld [vmem:[%s12504_s15 + $0xc] sm:$0xff]   ;;  %v812_v57 = vshrl.u32 %v718_v52, 16  ;;  %v12145_v0 = vld [vmem:[%s12504_s15 + $0x18] sm:$0xff]  }
  0x21   : > { %11226 = vmatpush3.bf16.msra.mxu0 %v12132_v6  ;;  %v809_v48 = vrot.slane %v807_v41, 5  ;;  %v794_v50 = vor.u32 %v793_v43, %v790_v40  ;;  %v815_v58 = vshll.u32 %v718_v52, 16  ;;  %v821_v59 = vshll.u32 %v719_v53, 16  ;;  %v721_v60 = vld [vmem:[%s12504_s15 + $0x24] sm:$0xf]  ;;  %v12150_v28 = vld [vmem:[%s15777_s1 + $0xa8] sm:$0xff]  }
  0x22   : > { %11274 = vmatpush3.bf16.msra.mxu1 %v12133_v7  ;;  %11227 = vmatprep.subr.bf16.mxu0 %v12134_v8  ;;  %v771_v42 = vrot.slane %v770_v34, 4  ;;  %v781_v47 = vrot.slane %v780_v39, 4  ;;  %v804_v51 = vor.u32 %v803_v45, %v799_v44  ;;  %v825_v2 = vshrl.u32 %v719_v53, 16  ;;  %v722_v3 = vld [vmem:[%s12504_s15 + $0x28] sm:$0xf]  ;;  %s12327_s14 = scalar_lea.vmem %s12326_s13, 8192 }
  0x23   : > { %11275 = vmatprep.subr.bf16.mxu1 %v12135_v9  ;;  %v795_v62 = vrot.slane %v794_v50, 4  ;;  %v814_v4 = vrot.slane %v812_v57, 4  ;;  %v817_v5 = vrot.slane %v815_v58, 5  ;;  %v823_v6 = vrot.slane %v821_v59, 5  ;;  %v725_v34 = vld [vmem:[%s12504_s15 + $0x34] sm:$0xf] }
  0x24   : > { %v776_v49 = vsel %vm12530_vm2, %v771_v42, %v775_v29  ;;  %v786_v56 = vsel %vm12530_vm2, %v781_v47, %v785_v31  ;;  %v805_v63 = vrot.slane %v804_v51, 4  ;;  %v831_v7 = vshll.u32 %v720_v54, 16  ;;  %v724_v29 = vld [vmem:[%s12504_s15 + $0x30] sm:$0xf]  ;;  %v726_v35 = vld [vmem:[%s12504_s15 + $0x38] sm:$0x1] }
  0x25   : > { %11228 = vmatpush3.bf16.msra.mxu0 %v12134_v8  ;;  %v9884_v61 = vcombine.low %v776_v49, %v786_v56  ;;  %v723_v8 = vld [vmem:[%s12504_s15 + $0x2c] sm:$0x1]  ;;  %v827_v11 = vrot.slane %v825_v2, 4  ;;  %v818_v14 = vor.u32 %v817_v5, %v814_v4  ;;  %v839_v16 = vshll.u32 %v721_v60, 16  ;;  %v727_v42 = vld [vmem:[%s12504_s15 + $0x3c] sm:$0xf] }
  0x26   : > { %11276 = vmatpush3.bf16.msra.mxu1 %v12135_v9  ;;  %11229 = vmatprep.subr.bf16.mxu0 %v12136_v10  ;;  %v800_v9 = vsel %vm12530_vm2, %v795_v62, %v799_v44  ;;  %v833_v15 = vrot.slane %v831_v7, 5  ;;  %v849_v20 = vshrl.u32 %v722_v3, 16  ;;  %v855_v23 = vshll.u32 %v723_v8, 16  ;;  %v728_v43 = vld [vmem:[%s12504_s15 + $0x40] sm:$0xf] }
  0x27   : > { %11277 = vmatprep.subr.bf16.mxu1 %v12137_v12  ;;  %11283 = vmatprep.mubr.bf16.mxu1 %v9884_v61  ;;  %v828_v17 = vor.u32 %v827_v11, %v823_v6  ;;  %v819_v21 = vrot.slane %v818_v14, 4  ;;  %v841_v22 = vrot.slane %v839_v16, 5  ;;  %v860_v36 = vshrl.u32 %v724_v29, 16  ;;  %v12153_v49 = vld [vmem:[%s15777_s1 + $0xa0] sm:$0xff]   ;;  %v730_v7 = vld [vmem:[%s12504_s15 + $0x48] sm:$0xf] }
  0x28   : > { %v851_v27 = vrot.slane %v849_v20, 4  ;;  %v857_v32 = vrot.slane %v855_v23, 5  ;;  %v863_v40 = vshll.u32 %v724_v29, 16  ;;  %v869_v41 = vshll.u32 %v725_v34, 16  ;;  %v12149_v2 = vld [vmem:[%s12504_s15 + $0x3c] sm:$0xff]  }
  0x29   : > { %11230 = vmatpush3.bf16.msra.mxu0 %v12136_v10  ;;  %v810_v10 = vsel %vm12530_vm2, %v805_v63, %v809_v48  ;;  %v829_v25 = vrot.slane %v828_v17, 4  ;;  %v824_v30 = vsel %vm12530_vm2, %v819_v21, %v823_v6  ;;  %v873_v47 = vshrl.u32 %v725_v34, 16  ;;  %v729_v48 = vld [vmem:[%s12504_s15 + $0x44] sm:$0x1]  ;;  %v731_v11 = vld [vmem:[%s12504_s15 + $0x4c] sm:$0xf] }
  0x2a   : > { %11278 = vmatpush3.bf16.msra.mxu1 %v12137_v12  ;;  %11231 = vmatprep.subr.bf16.mxu0 %v12138_v13  ;;  %v836_v12 = vshrl.u32 %v721_v60, 16  ;;  %v865_v51 = vrot.slane %v863_v40, 5  ;;  %v871_v52 = vrot.slane %v869_v41, 5  ;;  %v879_v53 = vshll.u32 %v726_v35, 16  ;;  %v12158_v35 = vld [vmem:[%s15777_s1 + $0xf0] sm:$0xff]  }
  0x2b   : > { %11279 = vmatprep.subr.bf16.mxu1 %v12139_v19  ;;  %v834_v37 = vsel %vm12530_vm2, %v829_v25, %v833_v15  ;;  %v884_v56 = vshrl.u32 %v727_v42, 16  ;;  %v887_v57 = vshll.u32 %v727_v42, 16  ;;  %v893_v61 = vshll.u32 %v728_v43, 16  ;;  %v12157_v25 = vld [vmem:[%s15777_s1 + $0xf8] sm:$0xff]  }
  0x2c   : > { %v838_v18 = vrot.slane %v836_v12, 4  ;;  %v9886_v44 = vcombine.low %v824_v30, %v834_v37  ;;  %v881_v60 = vrot.slane %v879_v53, 5  ;;  %v897_v5 = vshrl.u32 %v728_v43, 16  ;;  %v732_v12 = vld [vmem:[%s12504_s15 + $0x50] sm:$0x1] }
  0x2d   : > { %11232 = vmatpush3.bf16.msra.mxu0 %v12138_v13  ;;  %v9885_v13 = vcombine.low %v800_v9, %v810_v10  ;;  %v895_v4 = vrot.slane %v893_v61, 5  ;;  %v903_v6 = vshll.u32 %v729_v48, 16  ;;  %v12151_v10 = vld [vmem:[%s12504_s15 + $0x48] sm:$0xff]   ;;  %v911_v17 = vshll.u32 %v730_v7, 16  ;;  %v735_v30 = vld [vmem:[%s12504_s15 + $0x5c] sm:$0x1] }
  0x2e   : > { %11280 = vmatpush3.bf16.msra.mxu1 %v12139_v19  ;;  %11233 = vmatprep.subr.bf16.mxu0 %v12140_v24  ;;  %v845_v19 = vshll.u32 %v722_v3, 16  ;;  %v842_v31 = vor.u32 %v841_v22, %v838_v18  ;;  %v899_v15 = vrot.slane %v897_v5, 4  ;;  %v733_v18 = vld [vmem:[%s12504_s15 + $0x54] sm:$0xf]  ;;  %v917_v23 = vshll.u32 %v731_v11, 16 }
  0x2f   : > { %11281 = vmatprep.subr.bf16.mxu1 %v12141_v33  ;;  %v905_v16 = vrot.slane %v903_v6, 5  ;;  %v921_v29 = vshrl.u32 %v731_v11, 16  ;;  %v932_v34 = vshrl.u32 %v733_v18, 16  ;;  %v935_v40 = vshll.u32 %v733_v18, 16 }
  0x30   : > { %v847_v26 = vrot.slane %v845_v19, 5  ;;  %v843_v45 = vrot.slane %v842_v31, 4  ;;  %v12156_v19 = vld [vmem:[%s15777_s1 + $0x98] sm:$0xff]   ;;  %v951_v53 = vshll.u32 %v735_v30, 16 }
  0x31   : > { %11234 = vmatpush3.bf16.msra.mxu0 %v12140_v24  ;;  %v12146_v24 = vld [vmem:[%s12504_s15 + $0x24] sm:$0xff]   ;;  %v934_v42 = vrot.slane %v932_v34, 4 }
  0x32   : > { %11282 = vmatpush3.bf16.msra.mxu1 %v12141_v33  ;;  %11315 = vmatprep.subr.bf16.mxu0 %v12144_v46  ;;  %v12148_v33 = vld [vmem:[%s12504_s15 + $0x30] sm:$0xff]   ;;  %v852_v39 = vor.u32 %v851_v27, %v847_v26  ;;  %v848_v54 = vsel %vm12530_vm2, %v843_v45, %v847_v26  ;;  %v900_v27 = vor.u32 %v899_v15, %v895_v4  ;;  %v12163_v15 = vld [vmem:[%s15777_s1 + $0xe0] sm:$0xff]  }
  0x33   : > { %11363 = vmatprep.subr.bf16.mxu1 %v12157_v25 }
  0x34   : > { %11236 = vmatmul.mubr.bf16.vlgmr.msra.gmra.mxu0 %v12143_v55  ;;  %v853_v50 = vrot.slane %v852_v39, 4  ;;  %v875_v55 = vrot.slane %v873_v47, 4  ;;  %v923_v39 = vrot.slane %v921_v29, 4 }
  0x35   : > { %11316 = vmatpush3.bf16.msra.mxu0 %v12144_v46  ;;  %11284 = vmatmul.mubr.bf16.vlgmr.msra.gmra.mxu1 %v9885_v13  ;;  %v862_v46 = vrot.slane %v860_v36, 4  ;;  %v908_v13 = vshrl.u32 %v730_v7, 16  ;;  %v901_v36 = vrot.slane %v900_v27, 4 }
  0x36   : > { %11239 = vmatprep.mubr.bf16.mxu0 %v12145_v0  ;;  %11317 = vmatprep.subr.bf16.mxu0 %v12147_v1  ;;  %v858_v58 = vsel %vm12530_vm2, %v853_v50, %v857_v32  ;;  %v876_v63 = vor.u32 %v875_v55, %v871_v52  ;;  %v886_v0 = vrot.slane %v884_v56, 4  ;;  %v919_v32 = vrot.slane %v917_v23, 5  ;;  %v736_v55 = vld [vmem:[%s12504_s15 + $0x60] sm:$0xf] }
  0x37   : > { %11287 = vmatprep.mubr.bf16.mxu1 %v9886_v44  ;;  %v866_v59 = vor.u32 %v865_v51, %v862_v46  ;;  %v9887_v62 = vcombine.low %v848_v54, %v858_v58  ;;  %v910_v22 = vrot.slane %v908_v13, 4  ;;  %v906_v45 = vsel %vm12530_vm2, %v901_v36, %v905_v16  ;;  %v12152_v46 = vld [vmem:[%s12504_s15 + $0x54] sm:$0xff]   ;;  %11364 = vmatpush3.bf16.msra.mxu1 %v12157_v25  ;;  %v12154_v54 = vld [vmem:[%s12504_s15 + $0x60] sm:$0xff]   ;;  %v12155_v25 = vld [vmem:[%s12504_s15 + $0x6c] sm:$0xff]  }
  0x38   : > { %v877_v8 = vrot.slane %v876_v63, 4  ;;  %v924_v48 = vor.u32 %v923_v39, %v919_v32  ;;  %11365 = vmatprep.subr.bf16.mxu1 %v12158_v35  ;;  %v956_v61 = vshrl.u32 %v736_v55, 16  ;;  %v953_v63 = vrot.slane %v951_v53, 5  ;;  %v12159_v39 = vld [vmem:[%s12504_s15 + $0x78] sm:$0xff]  }
  0x39   : > { %11318 = vmatpush3.bf16.msra.mxu0 %v12147_v1  ;;  %v889_v1 = vrot.slane %v887_v57, 5  ;;  %v867_v3 = vrot.slane %v866_v59, 4  ;;  %v737_v59 = vld [vmem:[%s12504_s15 + $0x64] sm:$0xf] }
  0x3a   : > { %11319 = vmatprep.subr.bf16.mxu0 %v12150_v28  ;;  %v882_v20 = vsel %vm12530_vm2, %v877_v8, %v881_v60  ;;  %v925_v57 = vrot.slane %v924_v48, 4  ;;  %v738_v60 = vld [vmem:[%s12504_s15 + $0x68] sm:$0x1]  ;;  %v958_v6 = vrot.slane %v956_v61, 4  ;;  %v969_v7 = vshrl.u32 %v737_v59, 16  ;;  %v12167_v61 = vld [vmem:[%s15777_s1 + $0xd8] sm:$0xff]  }
  0x3b   : > { %v890_v9 = vor.u32 %v889_v1, %v886_v0  ;;  %v872_v14 = vsel %vm12530_vm2, %v867_v3, %v871_v52  ;;  %v959_v0 = vshll.u32 %v736_v55, 16  ;;  %v965_v1 = vshll.u32 %v737_v59, 16  ;;  %v12161_v3 = vld [vmem:[%s15777_s1 + $0x90] sm:$0xff]   ;;  %11366 = vmatpush3.bf16.msra.mxu1 %v12158_v35  ;;  %v744_v48 = vld [vmem:[%s12504_s15 + $0x80] sm:$0x1] }
  0x3c   : > { %11240 = vmatmul.mubr.bf16.gmra.mxu0 %v12146_v24  ;;  %v734_v24 = vld [vmem:[%s12504_s15 + $0x58] sm:$0xf]  ;;  %v9888_v26 = vcombine.low %v872_v14, %v882_v20  ;;  %v740_v8 = vld [vmem:[%s12504_s15 + $0x70] sm:$0xf]  ;;  %v741_v14 = vld [vmem:[%s12504_s15 + $0x74] sm:$0x1] }
  0x3d   : > { %11243 = vmatprep.mubr.bf16.mxu0 %v12148_v33  ;;  %11320 = vmatpush3.bf16.msra.mxu0 %v12150_v28  ;;  %v891_v21 = vrot.slane %v890_v9, 4  ;;  %v913_v28 = vrot.slane %v911_v17, 5  ;;  %v927_v33 = vshll.u32 %v732_v12, 16  ;;  %v941_v43 = vshll.u32 %v734_v24, 16  ;;  %v12162_v9 = vld [vmem:[%s15777_s1 + $0xe8] sm:$0xff]  }
  0x3e   : > { %11321 = vmatprep.subr.bf16.mxu0 %v12153_v49  ;;  %11288 = vmatmul.mubr.bf16.gmra.mxu1 %v9887_v62  ;;  %v945_v44 = vshrl.u32 %v734_v24, 16  ;;  %v961_v12 = vrot.slane %v959_v0, 5  ;;  %v967_v13 = vrot.slane %v965_v1, 5  ;;  %v971_v17 = vrot.slane %v969_v7, 4  ;;  %v746_v55 = vld [vmem:[%s12504_s15 + $0x88] sm:$0xf] }
  0x3f   : > { %v896_v31 = vsel %vm12530_vm2, %v891_v21, %v895_v4  ;;  %11291 = vmatprep.mubr.bf16.mxu1 %v9888_v26  ;;  %v914_v37 = vor.u32 %v913_v28, %v910_v22  ;;  %v929_v41 = vrot.slane %v927_v33, 5  ;;  %v943_v51 = vrot.slane %v941_v43, 5  ;;  %11367 = vmatprep.subr.bf16.mxu1 %v12162_v9  ;;  %v743_v43 = vld [vmem:[%s12504_s15 + $0x7c] sm:$0xf]  ;;  %v747_v59 = vld [vmem:[%s12504_s15 + $0x8c] sm:$0x1] }
  0x40   : > { %v9889_v50 = vcombine.low %v896_v31, %v906_v45  ;;  %v947_v52 = vrot.slane %v945_v44, 4  ;;  %v975_v18 = vshll.u32 %v738_v60, 16  ;;  %v962_v21 = vor.u32 %v961_v12, %v958_v6  ;;  %11368 = vmatpush3.bf16.msra.mxu1 %v12162_v9  ;;  %v12166_v44 = vld [vmem:[%s15777_s1 + $0x88] sm:$0xff]   ;;  %v12168_v6 = vld [vmem:[%s15777_s1 + $0xd0] sm:$0xff]  }
  0x41   : > { %11322 = vmatpush3.bf16.msra.mxu0 %v12153_v49  ;;  %v915_v47 = vrot.slane %v914_v37, 4  ;;  %v937_v49 = vrot.slane %v935_v40, 5  ;;  %v930_v4 = vsel %vm12530_vm2, %v925_v57, %v929_v41  ;;  %v989_v23 = vshll.u32 %v740_v8, 16  ;;  %11369 = vmatprep.subr.bf16.mxu1 %v12163_v15 }
  0x42   : > { %11323 = vmatprep.subr.bf16.mxu0 %v12156_v19  ;;  %v948_v62 = vor.u32 %v947_v52, %v943_v51  ;;  %v972_v26 = vor.u32 %v971_v17, %v967_v13  ;;  %v977_v27 = vrot.slane %v975_v18, 5  ;;  %v963_v29 = vrot.slane %v962_v21, 4 }
  0x43   : > { %v920_v56 = vsel %vm12530_vm2, %v915_v47, %v919_v32  ;;  %v938_v58 = vor.u32 %v937_v49, %v934_v42  ;;  %v991_v31 = vrot.slane %v989_v23, 5  ;;  %v993_v32 = vshrl.u32 %v740_v8, 16  ;;  %v742_v42 = vld [vmem:[%s12504_s15 + $0x78] sm:$0xf]  ;;  %v12160_v8 = vld [vmem:[%s12504_s15 + $0x84] sm:$0xff]  }
  0x44   : > { %11244 = vmatmul.mubr.bf16.gmra.mxu0 %v12149_v2  ;;  %v739_v2 = vld [vmem:[%s12504_s15 + $0x6c] sm:$0xf]  ;;  %v949_v11 = vrot.slane %v948_v62, 4  ;;  %v973_v33 = vrot.slane %v972_v26, 4  ;;  %v999_v34 = vshll.u32 %v741_v14, 16  ;;  %v968_v35 = vsel %vm12530_vm2, %v963_v29, %v967_v13  ;;  %11370 = vmatpush3.bf16.msra.mxu1 %v12163_v15  ;;  %v12164_v15 = vld [vmem:[%s12504_s15 + $0x90] sm:$0xff]  }
  0x45   : > { %11247 = vmatprep.mubr.bf16.mxu0 %v12151_v10  ;;  %11324 = vmatpush3.bf16.msra.mxu0 %v12156_v19  ;;  %v939_v5 = vrot.slane %v938_v58, 4  ;;  %v9890_v10 = vcombine.low %v920_v56, %v930_v4  ;;  %v980_v19 = vshrl.u32 %v739_v2, 16  ;;  %v983_v22 = vshll.u32 %v739_v2, 16  ;;  %v748_v26 = vld [vmem:[%s12504_s15 + $0x90] sm:$0xf] }
  0x46   : > { %11292 = vmatmul.mubr.bf16.gmra.mxu1 %v9889_v50  ;;  %11325 = vmatprep.subr.bf16.mxu0 %v12161_v3  ;;  %v954_v20 = vsel %vm12530_vm2, %v949_v11, %v953_v63  ;;  %v995_v37 = vrot.slane %v993_v32, 4  ;;  %v978_v40 = vsel %vm12530_vm2, %v973_v33, %v977_v27  ;;  %v1001_v41 = vrot.slane %v999_v34, 5  ;;  %v745_v50 = vld [vmem:[%s12504_s15 + $0x84] sm:$0xf]  ;;  %v749_v29 = vld [vmem:[%s12504_s15 + $0x94] sm:$0xf] }
  0x47   : > { %v944_v16 = vsel %vm12530_vm2, %v939_v5, %v943_v51  ;;  %11295 = vmatprep.mubr.bf16.mxu1 %v9890_v10  ;;  %v982_v28 = vrot.slane %v980_v19, 4  ;;  %v985_v30 = vrot.slane %v983_v22, 5  ;;  %v9892_v45 = vcombine.low %v968_v35, %v978_v40  ;;  %11371 = vmatprep.subr.bf16.mxu1 %v12167_v61  ;;  %v12171_v19 = vld [vmem:[%s15777_s1 + $0x80] sm:$0xff]   ;;  %v12172_v22 = vld [vmem:[%s15777_s1 + $0xc8] sm:$0xff]  }
  0x48   : > { %v9891_v24 = vcombine.low %v944_v16, %v954_v20  ;;  %v996_v47 = vor.u32 %v995_v37, %v991_v31  ;;  %v1004_v49 = vshrl.u32 %v742_v42, 16  ;;  %v1007_v51 = vshll.u32 %v742_v42, 16  ;;  %11372 = vmatpush3.bf16.msra.mxu1 %v12167_v61  ;;  %v12165_v33 = vld [vmem:[%s12504_s15 + $0x9c] sm:$0xff]  }
  0x49   : > { %11326 = vmatpush3.bf16.msra.mxu0 %v12161_v3  ;;  %v986_v36 = vor.u32 %v985_v30, %v982_v28  ;;  %v1013_v52 = vshll.u32 %v743_v43, 16  ;;  %v1017_v53 = vshrl.u32 %v743_v43, 16  ;;  %v1028_v60 = vshrl.u32 %v745_v50, 16  ;;  %11373 = vmatprep.subr.bf16.mxu1 %v12168_v6  ;;  %v750_v30 = vld [vmem:[%s12504_s15 + $0x98] sm:$0x1] }
  0x4a   : > { %11327 = vmatprep.subr.bf16.mxu0 %v12166_v44  ;;  %v997_v57 = vrot.slane %v996_v47, 4  ;;  %v1006_v58 = vrot.slane %v1004_v49, 4  ;;  %v1009_v62 = vrot.slane %v1007_v51, 5  ;;  %v1031_v4 = vshll.u32 %v745_v50, 16  ;;  %v751_v37 = vld [vmem:[%s12504_s15 + $0x9c] sm:$0xf] }
  0x4b   : > { %v1015_v63 = vrot.slane %v1013_v52, 5  ;;  %v1019_v0 = vrot.slane %v1017_v53, 4  ;;  %v1030_v3 = vrot.slane %v1028_v60, 4  ;;  %v1037_v5 = vshll.u32 %v746_v55, 16  ;;  %v752_v42 = vld [vmem:[%s12504_s15 + $0xa0] sm:$0xf] }
  0x4c   : > { %11248 = vmatmul.mubr.bf16.gmra.mxu0 %v12152_v46  ;;  %v987_v46 = vrot.slane %v986_v36, 4  ;;  %v1002_v2 = vsel %vm12530_vm2, %v997_v57, %v1001_v41  ;;  %v1010_v9 = vor.u32 %v1009_v62, %v1006_v58  ;;  %v1041_v11 = vshrl.u32 %v746_v55, 16  ;;  %11374 = vmatpush3.bf16.msra.mxu1 %v12168_v6  ;;  %v753_v43 = vld [vmem:[%s12504_s15 + $0xa4] sm:$0x1] }
  0x4d   : > { %11251 = vmatprep.mubr.bf16.mxu0 %v12154_v54  ;;  %v1023_v54 = vshll.u32 %v744_v48, 16  ;;  %11328 = vmatpush3.bf16.msra.mxu0 %v12166_v44  ;;  %v1020_v10 = vor.u32 %v1019_v0, %v1015_v63  ;;  %v1033_v12 = vrot.slane %v1031_v4, 5  ;;  %v1039_v13 = vrot.slane %v1037_v5, 5  ;;  %v12169_v44 = vld [vmem:[%s12504_s15 + $0xa8] sm:$0xff]   ;;  %v12173_v49 = vld [vmem:[%s15777_s1 + $0xc0] sm:$0xff]  }
  0x4e   : > { %11296 = vmatmul.mubr.bf16.gmra.mxu1 %v9891_v24  ;;  %v992_v56 = vsel %vm12530_vm2, %v987_v46, %v991_v31  ;;  %v1047_v14 = vshll.u32 %v747_v59, 16  ;;  %v1011_v16 = vrot.slane %v1010_v9, 4  ;;  %v1043_v18 = vrot.slane %v1041_v11, 4  ;;  %11329 = vmatprep.subr.bf16.mxu0 %v12171_v19  ;;  %v755_v11 = vld [vmem:[%s12504_s15 + $0xac] sm:$0xf] }
  0x4f   : > { %11299 = vmatprep.mubr.bf16.mxu1 %v9892_v45  ;;  %v1025_v1 = vrot.slane %v1023_v54, 5  ;;  %v9893_v7 = vcombine.low %v992_v56, %v1002_v2  ;;  %v1021_v17 = vrot.slane %v1020_v10, 4  ;;  %v1034_v20 = vor.u32 %v1033_v12, %v1030_v3  ;;  %11375 = vmatprep.subr.bf16.mxu1 %v12172_v22  ;;  %v12683_v54 = vld [vmem:[%s15777_s1 + $0x138] sm:$0xff]   ;;  %v756_v12 = vld [vmem:[%s12504_s15 + $0xb0] sm:$0x1] }
  0x50   : > { %v1049_v21 = vrot.slane %v1047_v14, 5  ;;  %v1016_v23 = vsel %vm12530_vm2, %v1011_v16, %v1015_v63  ;;  %v1052_v31 = vshrl.u32 %v748_v26, 16  ;;  %v1055_v34 = vshll.u32 %v748_v26, 16  ;;  %11376 = vmatpush3.bf16.msra.mxu1 %v12172_v22  ;;  %v758_v22 = vld [vmem:[%s12504_s15 + $0xb8] sm:$0xf] }
  0x51   : > { %v1026_v24 = vsel %vm12530_vm2, %v1021_v17, %v1025_v1  ;;  %v1035_v28 = vrot.slane %v1034_v20, 4  ;;  %v1061_v35 = vshll.u32 %v749_v29, 16  ;;  %v1065_v36 = vshrl.u32 %v749_v29, 16  ;;  %11330 = vmatpush3.bf16.msra.mxu0 %v12171_v19  ;;  %11377 = vmatprep.subr.bf16.mxu1 %v12173_v49 }
  0x52   : > { %v9894_v27 = vcombine.low %v1016_v23, %v1026_v24  ;;  %v1054_v40 = vrot.slane %v1052_v31, 4  ;;  %v1071_v41 = vshll.u32 %v750_v30, 16  ;;  %v1057_v46 = vrot.slane %v1055_v34, 5  ;;  %11411 = vmatprep.subr.bf16.mxu0 %v12683_v54  ;;  %v759_v23 = vld [vmem:[%s12504_s15 + $0xbc] sm:$0x1] }
  0x53   : > { %v1063_v47 = vrot.slane %v1061_v35, 5  ;;  %v1067_v48 = vrot.slane %v1065_v36, 4  ;;  %v1076_v52 = vshrl.u32 %v751_v37, 16  ;;  %v1079_v53 = vshll.u32 %v751_v37, 16 }
  0x54   : > { %11252 = vmatmul.mubr.bf16.gmra.mxu0 %v12155_v25  ;;  %v1044_v25 = vor.u32 %v1043_v18, %v1039_v13  ;;  %v1073_v51 = vrot.slane %v1071_v41, 5  ;;  %v1058_v55 = vor.u32 %v1057_v46, %v1054_v40  ;;  %v1085_v57 = vshll.u32 %v752_v42, 16  ;;  %11378 = vmatpush3.bf16.msra.mxu1 %v12173_v49  ;;  %v757_v18 = vld [vmem:[%s12504_s15 + $0xb4] sm:$0xf]  ;;  %v1533_v40 = vld [vmem:[%s12504_s15] sm:$0xe] }
  0x55   : > { %11255 = vmatprep.mubr.bf16.mxu0 %v12159_v39  ;;  %v1040_v39 = vsel %vm12530_vm2, %v1035_v28, %v1039_v13  ;;  %v1068_v56 = vor.u32 %v1067_v48, %v1063_v47  ;;  %v1089_v58 = vshrl.u32 %v752_v42, 16  ;;  %v1078_v59 = vrot.slane %v1076_v52, 4  ;;  %v1535_v49 = vld [vmem:[%s12504_s15 + $0x8] sm:$0x1] }
  0x56   : > { %11300 = vmatmul.mubr.bf16.gmra.mxu1 %v9893_v7  ;;  %v1045_v32 = vrot.slane %v1044_v25, 4  ;;  %v1081_v60 = vrot.slane %v1079_v53, 5  ;;  %v1095_v61 = vshll.u32 %v753_v43, 16  ;;  %v1059_v62 = vrot.slane %v1058_v55, 4  ;;  %v12170_v7 = vld [vmem:[%s12504_s15 + $0xb4] sm:$0xff]   ;;  %v12254_v46 = vld [vmem:[%s15779_s3 + $0x68] sm:$0xff]  }
  0x57   : > { %11303 = vmatprep.mubr.bf16.mxu1 %v9894_v27  ;;  %v1069_v63 = vrot.slane %v1068_v56, 4  ;;  %v1087_v0 = vrot.slane %v1085_v57, 5  ;;  %v1091_v1 = vrot.slane %v1089_v58, 4  ;;  %v1109_v16 = vshll.u32 %v755_v11, 16  ;;  %v1536_v57 = vld [vmem:[%s12504_s15 + $0xc] sm:$0xe] }
  0x58   : > { %v1050_v45 = vsel %vm12530_vm2, %v1045_v32, %v1049_v21  ;;  %v1082_v2 = vor.u32 %v1081_v60, %v1078_v59  ;;  %v1097_v3 = vrot.slane %v1095_v61, 5  ;;  %v1064_v4 = vsel %vm12530_vm2, %v1059_v62, %v1063_v47  ;;  %v1537_v58 = vld [vmem:[%s12504_s15 + $0x10] sm:$0xf] }
  0x59   : > { %v9895_v50 = vcombine.low %v1040_v39, %v1050_v45  ;;  %v1074_v5 = vsel %vm12530_vm2, %v1069_v63, %v1073_v51  ;;  %v1092_v6 = vor.u32 %v1091_v1, %v1087_v0  ;;  %v1113_v17 = vshrl.u32 %v755_v11, 16  ;;  %v1534_v45 = vld [vmem:[%s12504_s15 + $0x4] sm:$0xf]  ;;  %v1538_v63 = vld [vmem:[%s12504_s15 + $0x14] sm:$0x1] }
  0x5a   : > { %v9896_v9 = vcombine.low %v1064_v4, %v1074_v5  ;;  %v1083_v10 = vrot.slane %v1082_v2, 4  ;;  %v1119_v21 = vshll.u32 %v756_v12, 16  ;;  %v1111_v26 = vrot.slane %v1109_v16, 5  ;;  %v1539_v11 = vld [vmem:[%s12504_s15 + $0x18] sm:$0xe]  ;;  %v12177_v16 = vld [vmem:[%s15777_s1 + $0x130] sm:$0xff]  }
  0x5b   : > { %v1093_v14 = vrot.slane %v1092_v6, 4  ;;  %v1115_v27 = vrot.slane %v1113_v17, 4  ;;  %v1124_v30 = vshrl.u32 %v757_v18, 16  ;;  %v1127_v31 = vshll.u32 %v757_v18, 16 }
  0x5c   : > { %11256 = vmatmul.mubr.bf16.gmra.mxu0 %v12160_v8  ;;  %v754_v8 = vld [vmem:[%s12504_s15 + $0xa8] sm:$0xf]  ;;  %v1088_v19 = vsel %vm12530_vm2, %v1083_v10, %v1087_v0  ;;  %v1121_v29 = vrot.slane %v1119_v21, 5  ;;  %v1133_v34 = vshll.u32 %v758_v22, 16  ;;  %v1137_v35 = vshrl.u32 %v758_v22, 16  ;;  %v12175_v10 = vld [vmem:[%s12504_s15 + $0xc] sm:$0xff]  }
  0x5d   : > { %11259 = vmatprep.mubr.bf16.mxu0 %v12164_v15  ;;  %v1100_v13 = vshrl.u32 %v754_v8, 16  ;;  %v1103_v15 = vshll.u32 %v754_v8, 16  ;;  %v1098_v24 = vsel %vm12530_vm2, %v1093_v14, %v1097_v3  ;;  %v1126_v36 = vrot.slane %v1124_v30, 4  ;;  %v1541_v14 = vld [vmem:[%s12504_s15 + $0x20] sm:$0x1] }
  0x5e   : > { %11304 = vmatmul.mubr.bf16.gmra.mxu1 %v9895_v50  ;;  %v9897_v28 = vcombine.low %v1088_v19, %v1098_v24  ;;  %v1129_v37 = vrot.slane %v1127_v31, 5  ;;  %v1143_v39 = vshll.u32 %v759_v23, 16  ;;  %v1135_v43 = vrot.slane %v1133_v34, 5  ;;  %v1543_v21 = vld [vmem:[%s12504_s15 + $0x28] sm:$0xf] }
  0x5f   : > { %11307 = vmatprep.mubr.bf16.mxu1 %v9896_v9  ;;  %v1102_v20 = vrot.slane %v1100_v13, 4  ;;  %v1105_v25 = vrot.slane %v1103_v15, 5  ;;  %v9908_v50 = vrot.slane %v1533_v40, 9  ;;  %v1634_v51 = vrot.slane %v1534_v45, 5  ;;  %v1540_v13 = vld [vmem:[%s12504_s15 + $0x1c] sm:$0xf] }
  0x60   : > { %v1130_v47 = vor.u32 %v1129_v37, %v1126_v36  ;;  %v1145_v48 = vrot.slane %v1143_v39, 5  ;;  %v1637_v56 = vrot.slane %v1535_v49, 5  ;;  %v9909_v1 = vrot.slane %v1536_v57, 9  ;;  %v1544_v23 = vld [vmem:[%s12504_s15 + $0x2c] sm:$0x1]  ;;  %v12178_v34 = vld [vmem:[%s12504_s15 + $0x24] sm:$0xff]  }
  0x61   : > { %v1106_v32 = vor.u32 %v1105_v25, %v1102_v20  ;;  %v1635_v61 = vsel %vm12705_vm5, %v9908_v50, %v1634_v51  ;;  %v1636_v62 = vrot.slane %v1634_v51, 4  ;;  %v1641_v2 = vrot.slane %v1537_v58, 5  ;;  %v1542_v20 = vld [vmem:[%s12504_s15 + $0x24] sm:$0xe]  ;;  %v1546_v36 = vld [vmem:[%s12504_s15 + $0x34] sm:$0xf] }
  0x62   : > { %v1131_v60 = vrot.slane %v1130_v47, 4  ;;  %v1644_v3 = vrot.slane %v1538_v63, 5  ;;  %v9910_v15 = vrot.slane %v1539_v11, 9  ;;  %v1648_v18 = vrot.slane %v1540_v13, 5  ;;  %v1547_v40 = vld [vmem:[%s12504_s15 + $0x38] sm:$0x1] }
  0x63   : > { %v1107_v41 = vrot.slane %v1106_v32, 4  ;;  %v1638_v5 = vsel %vm12705_vm5, %v1636_v62, %v1637_v56  ;;  %v1642_v8 = vsel %vm12705_vm5, %v9909_v1, %v1641_v2  ;;  %v1643_v9 = vrot.slane %v1641_v2, 4  ;;  %v12180_v32 = vld [vmem:[%s15777_s1 + $0x128] sm:$0xff]   ;;  %v1549_v47 = vld [vmem:[%s12504_s15 + $0x40] sm:$0xf]  ;;  %v12189_v13 = vld [vmem:[%s15777_s1 + $0x178] sm:$0xff]  }
  0x64   : > { %11260 = vmatmul.mubr.bf16.gmra.mxu0 %v12165_v33  ;;  %v1116_v33 = vor.u32 %v1115_v27, %v1111_v26  ;;  %v1136_v4 = vsel %vm12530_vm2, %v1131_v60, %v1135_v43  ;;  %v1651_v19 = vrot.slane %v1541_v14, 5  ;;  %v9911_v24 = vrot.slane %v1542_v20, 9  ;;  %v12183_v56 = vld [vmem:[%s15777_s1 + $0x120] sm:$0xff]   ;;  %v1551_v58 = vld [vmem:[%s12504_s15 + $0x48] sm:$0xe]  ;;  %11459 = vmatprep.subr.bf16.mxu1 %v12189_v13 }
  0x65   : > { %11263 = vmatprep.mubr.bf16.mxu0 %v12169_v44  ;;  %v1139_v44 = vrot.slane %v1137_v35, 4  ;;  %v1112_v52 = vsel %vm12530_vm2, %v1107_v41, %v1111_v26  ;;  %v1645_v17 = vsel %vm12705_vm5, %v1643_v9, %v1644_v3  ;;  %v1655_v25 = vrot.slane %v1543_v21, 5  ;;  %v1545_v35 = vld [vmem:[%s12504_s15 + $0x30] sm:$0xe]  ;;  %v1553_v60 = vld [vmem:[%s12504_s15 + $0x50] sm:$0x1] }
  0x66   : > { %11308 = vmatmul.mubr.bf16.gmra.mxu1 %v9897_v28  ;;  %v1117_v42 = vrot.slane %v1116_v33, 4  ;;  %v9941_v22 = vcombine.low %v1642_v8, %v1645_v17  ;;  %v1649_v26 = vsel %vm12705_vm5, %v9910_v15, %v1648_v18  ;;  %v1650_v27 = vrot.slane %v1648_v18, 4  ;;  %v1554_v1 = vld [vmem:[%s12504_s15 + $0x54] sm:$0xe]  ;;  %v12186_v8 = vld [vmem:[%s15777_s1 + $0x118] sm:$0xff]  }
  0x67   : > { %v1140_v55 = vor.u32 %v1139_v44, %v1135_v43  ;;  %v1658_v28 = vrot.slane %v1544_v23, 5  ;;  %v1656_v30 = vsel %vm12705_vm5, %v9911_v24, %v1655_v25  ;;  %v1657_v31 = vrot.slane %v1655_v25, 4  ;;  %v1548_v43 = vld [vmem:[%s12504_s15 + $0x3c] sm:$0xe]  ;;  %v12190_v17 = vld [vmem:[%s15777_s1 + $0x170] sm:$0xff]  }
  0x68   : > { %v1122_v53 = vsel %vm12530_vm2, %v1117_v42, %v1121_v29  ;;  %v12176_v29 = vld [vmem:[%s12504_s15 + $0x18] sm:$0xff]   ;;  %v1652_v33 = vsel %vm12705_vm5, %v1650_v27, %v1651_v19  ;;  %v9912_v41 = vrot.slane %v1545_v35, 9  ;;  %v1662_v42 = vrot.slane %v1546_v36, 5  ;;  %v1557_v19 = vld [vmem:[%s12504_s15 + $0x60] sm:$0xe]  ;;  %v12191_v25 = vld [vmem:[%s15777_s1 + $0x110] sm:$0xff]  }
  0x69   : > { %v9898_v59 = vcombine.low %v1112_v52, %v1122_v53  ;;  %v1141_v0 = vrot.slane %v1140_v55, 4  ;;  %v9942_v37 = vcombine.low %v1649_v26, %v1652_v33  ;;  %v1659_v39 = vsel %vm12705_vm5, %v1657_v31, %v1658_v28  ;;  %v1558_v20 = vld [vmem:[%s12504_s15 + $0x64] sm:$0xf]  ;;  %v1559_v21 = vld [vmem:[%s12504_s15 + $0x68] sm:$0x1] }
  0x6a   : > { %v9943_v44 = vcombine.low %v1656_v30, %v1659_v39  ;;  %v1665_v45 = vrot.slane %v1547_v40, 5  ;;  %v1663_v49 = vsel %vm12705_vm5, %v9912_v41, %v1662_v42  ;;  %v1664_v50 = vrot.slane %v1662_v42, 4  ;;  %v1560_v26 = vld [vmem:[%s12504_s15 + $0x6c] sm:$0xe]  ;;  %v1561_v27 = vld [vmem:[%s12504_s15 + $0x70] sm:$0xf] }
  0x6b   : > { %11311 = vmatprep.mubr.bf16.mxu1 %v9898_v59  ;;  %v1146_v6 = vsel %vm12530_vm2, %v1141_v0, %v1145_v48  ;;  %v9913_v48 = vrot.slane %v1548_v43, 9  ;;  %v1669_v51 = vrot.slane %v1549_v47, 5  ;;  %v1552_v59 = vld [vmem:[%s12504_s15 + $0x4c] sm:$0xf]  ;;  %v9914_v62 = vrot.slane %v1551_v58, 9 }
  0x6c   : > { %11264 = vmatmul.mubr.bf16.gmra.mxu0 %v12170_v7  ;;  %v9940_v7 = vcombine.low %v1635_v61, %v1638_v5  ;;  %v9899_v12 = vcombine.low %v1136_v4, %v1146_v6  ;;  %v1666_v53 = vsel %vm12705_vm5, %v1664_v50, %v1665_v45  ;;  %v12179_v61 = vld [vmem:[%s12504_s15 + $0x30] sm:$0xff]   ;;  %v1676_v63 = vrot.slane %v1552_v59, 5  ;;  %v12181_v4 = vld [vmem:[%s12504_s15 + $0x3c] sm:$0xff]   ;;  %v1555_v5 = vld [vmem:[%s12504_s15 + $0x58] sm:$0xf] }
  0x6d   : > { %v1671_v55 = vrot.slane %v1669_v51, 4  ;;  %v9944_v57 = vcombine.low %v1663_v49, %v1666_v53  ;;  %v1679_v0 = vrot.slane %v1553_v60, 5  ;;  %v1670_v2 = vsel %vm12705_vm5, %v9913_v48, %v1669_v51  ;;  %v1556_v6 = vld [vmem:[%s12504_s15 + $0x5c] sm:$0x1]  ;;  %v12182_v28 = vld [vmem:[%s12504_s15 + $0x48] sm:$0xff]   ;;  %v12195_v53 = vld [vmem:[%s15777_s1 + $0x160] sm:$0xff]  }
  0x6e   : > { %11331 = vmatprep.mubr.bf16.mxu0 %v9940_v7  ;;  %11312 = vmatmul.mubr.bf16.gmra.mxu1 %v9899_v12  ;;  %v9915_v7 = vrot.slane %v1554_v1, 9  ;;  %v1677_v9 = vsel %vm12705_vm5, %v9914_v62, %v1676_v63  ;;  %v1683_v11 = vrot.slane %v1555_v5, 5  ;;  %v1686_v12 = vrot.slane %v1556_v6, 5  ;;  %v1562_v30 = vld [vmem:[%s12504_s15 + $0x74] sm:$0x1]  ;;  %v12194_v39 = vld [vmem:[%s15777_s1 + $0x168] sm:$0xff]  }
  0x6f   : > { %11379 = vmatprep.mubr.bf16.mxu1 %v12175_v10  ;;  %v1678_v10 = vrot.slane %v1676_v63, 4  ;;  %v1690_v23 = vrot.slane %v1558_v20, 5  ;;  %v1693_v24 = vrot.slane %v1559_v21, 5  ;;  %v1697_v31 = vrot.slane %v1561_v27, 5  ;;  %v1563_v41 = vld [vmem:[%s12504_s15 + $0x78] sm:$0xe] }
  0x70   : > { %v1564_v42 = vld [vmem:[%s12504_s15 + $0x7c] sm:$0xf]  ;;  %v1700_v45 = vrot.slane %v1562_v30, 5  ;;  %v1565_v47 = vld [vmem:[%s12504_s15 + $0x80] sm:$0x1]  ;;  %v9918_v48 = vrot.slane %v1563_v41, 9 }
  0x71   : > { %v1680_v15 = vsel %vm12705_vm5, %v1678_v10, %v1679_v0  ;;  %v1707_v49 = vrot.slane %v1565_v47, 5  ;;  %v1567_v50 = vld [vmem:[%s12504_s15 + $0x88] sm:$0xf]  ;;  %v12187_v59 = vld [vmem:[%s12504_s15 + $0x6c] sm:$0xff]   ;;  %v1570_v1 = vld [vmem:[%s12504_s15 + $0x94] sm:$0xf] }
  0x72   : > { %v9946_v18 = vcombine.low %v1677_v9, %v1680_v15  ;;  %v1711_v60 = vrot.slane %v1567_v50, 5  ;;  %v1569_v0 = vld [vmem:[%s12504_s15 + $0x90] sm:$0xe]  ;;  %v1718_v5 = vrot.slane %v1570_v1, 5  ;;  %v1573_v10 = vld [vmem:[%s12504_s15 + $0xa0] sm:$0xf] }
  0x73   : > { %v9920_v9 = vrot.slane %v1569_v0, 9  ;;  %v12188_v15 = vld [vmem:[%s12504_s15 + $0x78] sm:$0xff]   ;;  %v1577_v27 = vld [vmem:[%s12504_s15 + $0xb0] sm:$0x1] }
  0x74   : > { %11332 = vmatmul.mubr.bf16.vlgmr.msra.gmra.mxu0 %v9941_v22  ;;  %v9916_v22 = vrot.slane %v1557_v19, 9  ;;  %v12192_v19 = vld [vmem:[%s12504_s15 + $0x84] sm:$0xff]   ;;  %v12199_v20 = vld [vmem:[%s15777_s1 + $0x158] sm:$0xff]  }
  0x75   : > { %11412 = vmatpush3.bf16.msra.mxu0 %v12683_v54  ;;  %v1550_v54 = vld [vmem:[%s12504_s15 + $0x44] sm:$0x1]  ;;  %11335 = vmatprep.mubr.bf16.mxu0 %v9942_v37  ;;  %v9917_v37 = vrot.slane %v1560_v26, 9  ;;  %v1719_v21 = vsel %vm12705_vm5, %v9920_v9, %v1718_v5  ;;  %v1576_v26 = vld [vmem:[%s12504_s15 + $0xac] sm:$0xf]  ;;  %v12893_v1 = vld [vmem:[%s15777_s1 + $0x1b8] sm:$0xff]  }
  0x76   : > { %11413 = vmatprep.subr.bf16.mxu0 %v12177_v16  ;;  %v1672_v52 = vrot.slane %v1550_v54, 5  ;;  %11380 = vmatmul.mubr.bf16.vlgmr.msra.gmra.mxu1 %v12176_v29  ;;  %v1692_v29 = vrot.slane %v1690_v23, 4  ;;  %v1691_v35 = vsel %vm12705_vm5, %v9916_v22, %v1690_v23  ;;  %v1704_v54 = vrot.slane %v1564_v42, 5  ;;  %v10039_v0 = vld [vmem:[%s12504_s15 + $0x18] sm:$0xf] }
  0x77   : > { %11383 = vmatprep.mubr.bf16.mxu1 %v12178_v34  ;;  %11460 = vmatpush3.bf16.msra.mxu1 %v12189_v13  ;;  %v12184_v34 = vld [vmem:[%s12504_s15 + $0x54] sm:$0xff]   ;;  %v1572_v13 = vld [vmem:[%s12504_s15 + $0x9c] sm:$0xe] }
  0x78   : > { %v1673_v3 = vsel %vm12705_vm5, %v1671_v55, %v1672_v52  ;;  %11461 = vmatprep.subr.bf16.mxu1 %v12190_v17  ;;  %v1694_v36 = vsel %vm12705_vm5, %v1692_v29, %v1693_v24  ;;  %v1706_v51 = vrot.slane %v1704_v54, 4  ;;  %v1566_v52 = vld [vmem:[%s12504_s15 + $0x84] sm:$0xe]  ;;  %v1705_v62 = vsel %vm12705_vm5, %v9918_v48, %v1704_v54  ;;  %v12200_v24 = vld [vmem:[%s15777_s1 + $0x150] sm:$0xff]   ;;  %v12204_v48 = vld [vmem:[%s15777_s1 + $0x148] sm:$0xff]  }
  0x79   : > { %11414 = vmatpush3.bf16.msra.mxu0 %v12177_v16  ;;  %v9945_v14 = vcombine.low %v1670_v2, %v1673_v3  ;;  %v1685_v16 = vrot.slane %v1683_v11, 4  ;;  %v9948_v43 = vcombine.low %v1691_v35, %v1694_v36  ;;  %v12185_v55 = vld [vmem:[%s12504_s15 + $0x60] sm:$0xff]   ;;  %v9919_v3 = vrot.slane %v1566_v52, 9 }
  0x7a   : > { %11415 = vmatprep.subr.bf16.mxu0 %v12180_v32  ;;  %v1708_v63 = vsel %vm12705_vm5, %v1706_v51, %v1707_v49  ;;  %v9921_v23 = vrot.slane %v1572_v13, 9  ;;  %v1735_v36 = vrot.slane %v1577_v27, 5  ;;  %v12197_v49 = vld [vmem:[%s12504_s15 + $0x9c] sm:$0xff]   ;;  %v2657_v13 = vshll.u32 %v10039_v0, 16  ;;  %v10126_v27 = vld [vmem:[%s12504_s15 + $0x14] sm:$0x1] }
  0x7b   : > { %v1687_v33 = vsel %vm12705_vm5, %v1685_v16, %v1686_v12  ;;  %11462 = vmatpush3.bf16.msra.mxu1 %v12190_v17  ;;  %v9950_v6 = vcombine.low %v1705_v62, %v1708_v63  ;;  %v1725_v16 = vrot.slane %v1573_v10, 5  ;;  %v1712_v17 = vsel %vm12705_vm5, %v9919_v3, %v1711_v60  ;;  %v12205_v52 = vld [vmem:[%s15777_s1 + $0x140] sm:$0xff]  }
  0x7c   : > { %11336 = vmatmul.mubr.bf16.gmra.mxu0 %v9943_v44  ;;  %11463 = vmatprep.subr.bf16.mxu1 %v12194_v39  ;;  %v1699_v44 = vrot.slane %v1697_v31, 4 }
  0x7d   : > { %11339 = vmatprep.mubr.bf16.mxu0 %v9944_v57  ;;  %11416 = vmatpush3.bf16.msra.mxu0 %v12180_v32  ;;  %v1684_v32 = vsel %vm12705_vm5, %v9915_v7, %v1683_v11  ;;  %v1698_v57 = vsel %vm12705_vm5, %v9917_v37, %v1697_v31  ;;  %v1713_v7 = vrot.slane %v1711_v60, 4  ;;  %v1720_v11 = vrot.slane %v1718_v5, 4  ;;  %v1579_v37 = vld [vmem:[%s12504_s15 + $0xb8] sm:$0xf] }
  0x7e   : > { %11417 = vmatprep.subr.bf16.mxu0 %v12183_v56  ;;  %11384 = vmatmul.mubr.bf16.gmra.mxu1 %v12179_v61  ;;  %v9947_v40 = vcombine.low %v1684_v32, %v1687_v33  ;;  %v1701_v58 = vsel %vm12705_vm5, %v1699_v44, %v1700_v45  ;;  %v12196_v61 = vld [vmem:[%s15777_s1 + $0x108] sm:$0xff]   ;;  %v1727_v29 = vrot.slane %v1725_v16, 4  ;;  %v1732_v31 = vrot.slane %v1576_v26, 5  ;;  %v1578_v32 = vld [vmem:[%s12504_s15 + $0xb4] sm:$0xe]  ;;  %v12201_v33 = vld [vmem:[%s15777_s1 + $0x100] sm:$0xff]  }
  0x7f   : > { %11387 = vmatprep.mubr.bf16.mxu1 %v12181_v4  ;;  %11464 = vmatpush3.bf16.msra.mxu1 %v12194_v39  ;;  %v9949_v2 = vcombine.low %v1698_v57, %v1701_v58  ;;  %v1571_v4 = vld [vmem:[%s12504_s15 + $0x98] sm:$0x1]  ;;  %v1580_v39 = vld [vmem:[%s12504_s15 + $0xbc] sm:$0x1]  ;;  %v9923_v41 = vrot.slane %v1578_v32, 9  ;;  %v1739_v42 = vrot.slane %v1579_v37, 5  ;;  %v1726_v45 = vsel %vm12705_vm5, %v9921_v23, %v1725_v16 }
  0x80   : > { %11465 = vmatprep.subr.bf16.mxu1 %v12195_v53  ;;  %v1721_v12 = vrot.slane %v1571_v4, 5  ;;  %v12193_v44 = vld [vmem:[%s12504_s15 + $0x90] sm:$0xff]   ;;  %v12198_v16 = vld [vmem:[%s12504_s15 + $0xa8] sm:$0xff]   ;;  %v10127_v32 = vld [vmem:[%s12504_s15 + $0x18] sm:$0xe]  ;;  %v3500_v37 = vrot.slane %v10126_v27, 5 }
  0x81   : > { %11418 = vmatpush3.bf16.msra.mxu0 %v12183_v56  ;;  %v1568_v56 = vld [vmem:[%s12504_s15 + $0x8c] sm:$0x1]  ;;  %v1741_v54 = vrot.slane %v1739_v42, 4  ;;  %v10038_v57 = vld [vmem:[%s12504_s15 + $0x14] sm:$0x1]  ;;  %v12887_v60 = vsel %vm12705_vm5, %v9923_v41, %v1739_v42 }
  0x82   : > { %11419 = vmatprep.subr.bf16.mxu0 %v12186_v8  ;;  %v1722_v22 = vsel %vm12705_vm5, %v1720_v11, %v1721_v12  ;;  %v2649_v63 = vshll.u32 %v10038_v57, 16  ;;  %v2654_v11 = vshrl.u32 %v10039_v0, 16  ;;  %v10045_v57 = vld [vmem:[%s12504_s15 + $0x30] sm:$0xf] }
  0x83   : > { %11466 = vmatpush3.bf16.msra.mxu1 %v12195_v53  ;;  %v10036_v53 = vld [vmem:[%s12504_s15 + $0xc] sm:$0xf] }
  0x84   : > { %11340 = vmatmul.mubr.bf16.gmra.mxu0 %v9945_v14  ;;  %v1574_v14 = vld [vmem:[%s12504_s15 + $0xa4] sm:$0x1]  ;;  %11467 = vmatprep.subr.bf16.mxu1 %v12199_v20  ;;  %v2630_v58 = vshrl.u32 %v10036_v53, 16  ;;  %v2651_v10 = vrot.slane %v2649_v63, 5 }
  0x85   : > { %11343 = vmatprep.mubr.bf16.mxu0 %v9946_v18  ;;  %11420 = vmatpush3.bf16.msra.mxu0 %v12186_v8  ;;  %v1714_v8 = vrot.slane %v1568_v56, 5  ;;  %v1728_v30 = vrot.slane %v1574_v14, 5  ;;  %v10037_v56 = vld [vmem:[%s12504_s15 + $0x10] sm:$0xf]  ;;  %v12203_v63 = vld [vmem:[%s12504_s15 + $0xc0] sm:$0xff]  }
  0x86   : > { %11421 = vmatprep.subr.bf16.mxu0 %v12191_v25  ;;  %11388 = vmatmul.mubr.bf16.gmra.mxu1 %v12182_v28  ;;  %v2643_v62 = vshrl.u32 %v10037_v56, 16  ;;  %v2632_v4 = vrot.slane %v2630_v58, 4 }
  0x87   : > { %11391 = vmatprep.mubr.bf16.mxu1 %v12184_v34  ;;  %v1715_v18 = vsel %vm12705_vm5, %v1713_v7, %v1714_v8  ;;  %11468 = vmatpush3.bf16.msra.mxu1 %v12199_v20  ;;  %v9952_v34 = vcombine.low %v1719_v21, %v1722_v22  ;;  %v1729_v47 = vsel %vm12705_vm5, %v1727_v29, %v1728_v30  ;;  %v10041_v7 = vld [vmem:[%s12504_s15 + $0x20] sm:$0x1]  ;;  %v10124_v21 = vld [vmem:[%s12504_s15 + $0xc] sm:$0xe]  ;;  %v10125_v22 = vld [vmem:[%s12504_s15 + $0x10] sm:$0xf] }
  0x88   : > { %v9951_v28 = vcombine.low %v1712_v17, %v1715_v18  ;;  %11469 = vmatprep.subr.bf16.mxu1 %v12200_v24  ;;  %v2645_v9 = vrot.slane %v2643_v62, 4  ;;  %v2673_v20 = vshll.u32 %v10041_v7, 16  ;;  %v10172_v30 = vrot.slane %v10124_v21, 9  ;;  %v10046_v62 = vld [vmem:[%s12504_s15 + $0x34] sm:$0xf] }
  0x89   : > { %11422 = vmatpush3.bf16.msra.mxu0 %v12191_v25  ;;  %v1575_v25 = vld [vmem:[%s12504_s15 + $0xa8] sm:$0xe]  ;;  %v10132_v21 = vld [vmem:[%s12504_s15 + $0x2c] sm:$0x1] }
  0x8a   : > { %11423 = vmatprep.subr.bf16.mxu0 %v12196_v61  ;;  %v9922_v35 = vrot.slane %v1575_v25, 9  ;;  %v2675_v29 = vrot.slane %v2673_v20, 5 }
  0x8b   : > { %11470 = vmatpush3.bf16.msra.mxu1 %v12200_v24  ;;  %v2659_v24 = vrot.slane %v2657_v13, 5  ;;  %v2705_v13 = vshll.u32 %v10045_v57, 16 }
  0x8c   : > { %11344 = vmatmul.mubr.bf16.gmra.mxu0 %v9947_v40  ;;  %v1734_v40 = vrot.slane %v1732_v31, 4  ;;  %v1733_v50 = vsel %vm12705_vm5, %v9922_v35, %v1732_v31  ;;  %11471 = vmatprep.subr.bf16.mxu1 %v12204_v48  ;;  %v3497_v31 = vrot.slane %v10125_v22, 5 }
  0x8d   : > { %11347 = vmatprep.mubr.bf16.mxu0 %v9948_v43  ;;  %11424 = vmatpush3.bf16.msra.mxu0 %v12196_v61  ;;  %v1742_v43 = vrot.slane %v1580_v39, 5  ;;  %v2639_v61 = vshll.u32 %v10037_v56, 16  ;;  %v10128_v39 = vld [vmem:[%s12504_s15 + $0x1c] sm:$0xf] }
  0x8e   : > { %11392 = vmatmul.mubr.bf16.gmra.mxu1 %v12185_v55  ;;  %11425 = vmatprep.subr.bf16.mxu0 %v12201_v33  ;;  %v1736_v51 = vsel %vm12705_vm5, %v1734_v40, %v1735_v36  ;;  %v9953_v55 = vcombine.low %v1726_v45, %v1729_v47  ;;  %v10129_v40 = vld [vmem:[%s12504_s15 + $0x20] sm:$0x1]  ;;  %v12918_v42 = vsel %vm12705_vm5, %v10172_v30, %v3497_v31  ;;  %v10042_v45 = vld [vmem:[%s12504_s15 + $0x24] sm:$0xf]  ;;  %v10043_v47 = vld [vmem:[%s12504_s15 + $0x28] sm:$0xf] }
  0x8f   : > { %11395 = vmatprep.mubr.bf16.mxu1 %v12187_v59  ;;  %v2633_v59 = vshll.u32 %v10036_v53, 16  ;;  %11472 = vmatpush3.bf16.msra.mxu1 %v12204_v48  ;;  %v12897_v3 = vsel %vm12705_vm5, %v1741_v54, %v1742_v43  ;;  %v2641_v8 = vrot.slane %v2639_v61, 5  ;;  %v3499_v43 = vrot.slane %v3497_v31, 4  ;;  %v12207_v30 = vld [vmem:[%s15777_s1 + $0x1b0] sm:$0xff]  }
  0x90   : > { %11473 = vmatprep.subr.bf16.mxu1 %v12205_v52  ;;  %v9955_v17 = vcombine.low %v12887_v60, %v12897_v3  ;;  %v3507_v53 = vrot.slane %v10129_v40, 5  ;;  %v2681_v56 = vshll.u32 %v10042_v45, 16  ;;  %v2691_v7 = vshrl.u32 %v10043_v47, 16 }
  0x91   : > { %11426 = vmatpush3.bf16.msra.mxu0 %v12201_v33  ;;  %v2635_v5 = vrot.slane %v2633_v59, 5  ;;  %v2646_v18 = vor.u32 %v2645_v9, %v2641_v8  ;;  %v12202_v33 = vld [vmem:[%s12504_s15 + $0xb4] sm:$0xff]  }
  0x92   : > { %11507 = vmatprep.subr.bf16.mxu0 %v12893_v1  ;;  %v10047_v9 = vld [vmem:[%s12504_s15 + $0x38] sm:$0x1] }
  0x93   : > { %v2636_v12 = vor.u32 %v2635_v5, %v2632_v4  ;;  %11474 = vmatpush3.bf16.msra.mxu1 %v12205_v52  ;;  %v3501_v52 = vsel %vm12705_vm5, %v3499_v43, %v3500_v37  ;;  %v2683_v4 = vrot.slane %v2681_v56, 5  ;;  %v12940_v5 = vld [vmem:[%s15777_s1 + $0x1f8] sm:$0xff]  }
  0x94   : > { %11348 = vmatmul.mubr.bf16.gmra.mxu0 %v9949_v2  ;;  %v9954_v2 = vcombine.low %v1733_v50, %v1736_v51  ;;  %v3504_v50 = vrot.slane %v10128_v39, 5  ;;  %v10044_v51 = vld [vmem:[%s12504_s15 + $0x2c] sm:$0x1]  ;;  %v10204_v60 = vcombine.low %v12918_v42, %v3501_v52  ;;  %11555 = vmatprep.subr.bf16.mxu1 %v12940_v5  ;;  %v10135_v37 = vld [vmem:[%s12504_s15 + $0x38] sm:$0x1] }
  0x95   : > { %11351 = vmatprep.mubr.bf16.mxu0 %v9950_v6  ;;  %v10040_v6 = vld [vmem:[%s12504_s15 + $0x1c] sm:$0xf]  ;;  %v2637_v23 = vrot.slane %v2636_v12, 4  ;;  %v10049_v52 = vld [vmem:[%s12504_s15 + $0x40] sm:$0xf] }
  0x96   : > { %11396 = vmatmul.mubr.bf16.gmra.mxu1 %v12188_v15  ;;  %v2663_v14 = vshll.u32 %v10040_v6, 16  ;;  %v2667_v15 = vshrl.u32 %v10040_v6, 16  ;;  %v2687_v6 = vshll.u32 %v10043_v47, 16  ;;  %v10048_v39 = vld [vmem:[%s12504_s15 + $0x3c] sm:$0xf] }
  0x97   : > { %11399 = vmatprep.mubr.bf16.mxu1 %v12192_v19  ;;  %v2656_v19 = vrot.slane %v2654_v11, 4 }
  0x98   : > { %v2665_v25 = vrot.slane %v2663_v14, 5  ;;  %v2669_v26 = vrot.slane %v2667_v15, 4  ;;  %v2711_v14 = vshll.u32 %v10046_v62, 16  ;;  %v10130_v15 = vld [vmem:[%s12504_s15 + $0x24] sm:$0xe] }
  0x99   : > { %v2660_v35 = vor.u32 %v2659_v24, %v2656_v19  ;;  %v2693_v19 = vrot.slane %v2691_v7, 4  ;;  %v2707_v24 = vrot.slane %v2705_v13, 5  ;;  %v10174_v31 = vrot.slane %v10130_v15, 9  ;;  %v12209_v7 = vld [vmem:[%s15777_s1 + $0x1a0] sm:$0xff]   ;;  %v10053_v13 = vld [vmem:[%s12504_s15 + $0x50] sm:$0x1] }
  0x9a   : > { %v2670_v36 = vor.u32 %v2669_v26, %v2665_v25  ;;  %v10133_v26 = vld [vmem:[%s12504_s15 + $0x30] sm:$0xe] }
  0x9b   : > { %v2661_v48 = vrot.slane %v2660_v35, 4  ;;  %v10175_v43 = vrot.slane %v10133_v26, 9 }
  0x9c   : > { %11352 = vmatmul.mubr.bf16.gmra.mxu0 %v9951_v28  ;;  %v2647_v28 = vrot.slane %v2646_v18, 4  ;;  %v2689_v18 = vrot.slane %v2687_v6, 5 }
  0x9d   : > { %11355 = vmatprep.mubr.bf16.mxu0 %v9952_v34  ;;  %v2642_v34 = vsel %vm12530_vm2, %v2637_v23, %v2641_v8  ;;  %v2666_v58 = vsel %vm12530_vm2, %v2661_v48, %v2665_v25  ;;  %v2697_v8 = vshll.u32 %v10044_v51, 16  ;;  %v2713_v25 = vrot.slane %v2711_v14, 5  ;;  %v12208_v48 = vld [vmem:[%s15777_s1 + $0x1a8] sm:$0xff]  }
  0x9e   : > { %11400 = vmatmul.mubr.bf16.gmra.mxu1 %v12193_v44  ;;  %v2652_v41 = vsel %vm12530_vm2, %v2647_v28, %v2651_v10  ;;  %v10173_v44 = vrot.slane %v10127_v32, 9  ;;  %v2702_v10 = vshrl.u32 %v10045_v57, 16  ;;  %v2694_v27 = vor.u32 %v2693_v19, %v2689_v18  ;;  %v10134_v32 = vld [vmem:[%s12504_s15 + $0x34] sm:$0xf] }
  0x9f   : > { %11403 = vmatprep.mubr.bf16.mxu1 %v12197_v49  ;;  %v10100_v54 = vcombine.low %v2642_v34, %v2652_v41  ;;  %v2671_v49 = vrot.slane %v2670_v36, 4  ;;  %v2699_v20 = vrot.slane %v2697_v8, 5  ;;  %v2715_v28 = vshrl.u32 %v10046_v62, 16  ;;  %v12212_v8 = vld [vmem:[%s15777_s1 + $0x1f0] sm:$0xff]  }
  0xa0   : > { %v12933_v61 = vsel %vm12705_vm5, %v10173_v44, %v3504_v50  ;;  %v2704_v23 = vrot.slane %v2702_v10, 4  ;;  %v3514_v36 = vrot.slane %v10132_v21, 5  ;;  %v2695_v40 = vrot.slane %v2694_v27, 4  ;;  %v10136_v21 = vld [vmem:[%s12504_s15 + $0x3c] sm:$0xe] }
  0xa1   : > { %v2676_v59 = vsel %vm12530_vm2, %v2671_v49, %v2675_v29  ;;  %v2721_v29 = vshll.u32 %v10047_v9, 16  ;;  %v2717_v41 = vrot.slane %v2715_v28, 4  ;;  %v3521_v51 = vrot.slane %v10135_v37, 5  ;;  %v10138_v27 = vld [vmem:[%s12504_s15 + $0x44] sm:$0x1] }
  0xa2   : > { %v10101_v0 = vcombine.low %v2666_v58, %v2676_v59  ;;  %v2708_v34 = vor.u32 %v2707_v24, %v2704_v23  ;;  %v2700_v49 = vsel %vm12530_vm2, %v2695_v40, %v2699_v20  ;;  %v2769_v28 = vshll.u32 %v10053_v13, 16  ;;  %v10059_v13 = vld [vmem:[%s12504_s15 + $0x68] sm:$0x1] }
  0xa3   : > { %v2723_v42 = vrot.slane %v2721_v29, 5  ;;  %v10139_v29 = vld [vmem:[%s12504_s15 + $0x48] sm:$0xe] }
  0xa4   : > { %11356 = vmatmul.mubr.bf16.gmra.mxu0 %v9953_v55  ;;  %v2678_v55 = vshrl.u32 %v10042_v45, 16  ;;  %v2709_v44 = vrot.slane %v2708_v34, 4 }
  0xa5   : > { %11359 = vmatprep.mubr.bf16.mxu0 %v9954_v2  ;;  %v3506_v2 = vrot.slane %v3504_v50, 4  ;;  %v2718_v50 = vor.u32 %v2717_v41, %v2713_v25  ;;  %v2771_v41 = vrot.slane %v2769_v28, 5 }
  0xa6   : > { %11404 = vmatmul.mubr.bf16.gmra.mxu1 %v12198_v16  ;;  %v2680_v3 = vrot.slane %v2678_v55, 4  ;;  %v10131_v16 = vld [vmem:[%s12504_s15 + $0x28] sm:$0xf]  ;;  %v2726_v55 = vshrl.u32 %v10048_v39, 16  ;;  %v2714_v57 = vsel %vm12530_vm2, %v2709_v44, %v2713_v25 }
  0xa7   : > { %11407 = vmatprep.mubr.bf16.mxu1 %v12202_v33  ;;  %v12945_v11 = vsel %vm12705_vm5, %v3506_v2, %v3507_v53  ;;  %v3511_v35 = vrot.slane %v10131_v16, 5  ;;  %v10050_v53 = vld [vmem:[%s12504_s15 + $0x44] sm:$0x1]  ;;  %v2729_v2 = vshll.u32 %v10048_v39, 16 }
  0xa8   : > { %v2684_v12 = vor.u32 %v2683_v4, %v2680_v3  ;;  %v2735_v3 = vshll.u32 %v10049_v52, 16  ;;  %v2739_v4 = vshrl.u32 %v10049_v52, 16  ;;  %v2745_v6 = vshll.u32 %v10050_v53, 16 }
  0xa9   : > { %v3512_v45 = vsel %vm12705_vm5, %v10174_v31, %v3511_v35  ;;  %v3513_v47 = vrot.slane %v3511_v35, 4  ;;  %v2731_v19 = vrot.slane %v2729_v2, 5  ;;  %v12214_v31 = vld [vmem:[%s15777_s1 + $0x1e8] sm:$0xff]  }
  0xaa   : > { %v2685_v22 = vrot.slane %v2684_v12, 4  ;;  %v10052_v12 = vld [vmem:[%s12504_s15 + $0x4c] sm:$0xf]  ;;  %v2737_v20 = vrot.slane %v2735_v3, 5  ;;  %v2741_v23 = vrot.slane %v2739_v4, 4  ;;  %v2747_v24 = vrot.slane %v2745_v6, 5 }
  0xab   : > { %v3515_v58 = vsel %vm12705_vm5, %v3513_v47, %v3514_v36  ;;  %v10140_v35 = vld [vmem:[%s12504_s15 + $0x4c] sm:$0xf]  ;;  %v10141_v36 = vld [vmem:[%s12504_s15 + $0x50] sm:$0x1]  ;;  %v10057_v6 = vld [vmem:[%s12504_s15 + $0x60] sm:$0xf] }
  0xac   : > { %11360 = vmatmul.mubr.bf16.gmra.mxu0 %v9955_v17  ;;  %v10205_v17 = vcombine.low %v12933_v61, %v12945_v11  ;;  %v2690_v33 = vsel %vm12530_vm2, %v2685_v22, %v2689_v18  ;;  %v10206_v62 = vcombine.low %v3512_v45, %v3515_v58  ;;  %v10137_v22 = vld [vmem:[%s12504_s15 + $0x40] sm:$0xf]  ;;  %v2759_v11 = vshll.u32 %v10052_v12, 16 }
  0xad   : > { %11427 = vmatprep.mubr.bf16.mxu0 %v10100_v54  ;;  %v3518_v54 = vrot.slane %v10134_v32, 5  ;;  %v10102_v56 = vcombine.low %v2690_v33, %v2700_v49  ;;  %v2742_v32 = vor.u32 %v2741_v23, %v2737_v20  ;;  %v3525_v34 = vrot.slane %v10137_v22, 5 }
  0xae   : > { %11408 = vmatmul.mubr.bf16.gmra.mxu1 %v12203_v63  ;;  %v2761_v39 = vrot.slane %v2759_v11, 5  ;;  %v3528_v49 = vrot.slane %v10138_v27, 5  ;;  %v12216_v27 = vld [vmem:[%s15777_s1 + $0x188] sm:$0xff]  }
  0xaf   : > { %11475 = vmatprep.mubr.bf16.mxu1 %v10204_v60  ;;  %v12978_v59 = vsel %vm12705_vm5, %v10175_v43, %v3518_v54  ;;  %v2719_v60 = vrot.slane %v2718_v50, 4  ;;  %v3520_v63 = vrot.slane %v3518_v54, 4  ;;  %v2743_v43 = vrot.slane %v2742_v32, 4 }
  0xb0   : > { %v3527_v47 = vrot.slane %v3525_v34, 4  ;;  %v10177_v50 = vrot.slane %v10139_v29, 9  ;;  %v10145_v29 = vld [vmem:[%s12504_s15 + $0x60] sm:$0xe] }
  0xb1   : > { %v2724_v9 = vsel %vm12530_vm2, %v2719_v60, %v2723_v42  ;;  %v3522_v10 = vsel %vm12705_vm5, %v3520_v63, %v3521_v51  ;;  %v10054_v42 = vld [vmem:[%s12504_s15 + $0x54] sm:$0xf]  ;;  %v12215_v51 = vld [vmem:[%s15777_s1 + $0x1e0] sm:$0xff]   ;;  %v2748_v52 = vsel %vm12530_vm2, %v2743_v43, %v2747_v24  ;;  %v10056_v60 = vld [vmem:[%s12504_s15 + $0x5c] sm:$0x1] }
  0xb2   : > { %v10103_v16 = vcombine.low %v2714_v57, %v2724_v9  ;;  %v10207_v18 = vcombine.low %v12978_v59, %v3522_v10  ;;  %v10055_v57 = vld [vmem:[%s12504_s15 + $0x58] sm:$0xf]  ;;  %v12213_v63 = vld [vmem:[%s15777_s1 + $0x190] sm:$0xff]   ;;  %v2777_v4 = vshll.u32 %v10054_v42, 16 }
  0xb3   : > { %v2783_v10 = vshll.u32 %v10055_v57, 16 }
  0xb4   : > { %11428 = vmatmul.mubr.bf16.vlgmr.msra.gmra.mxu0 %v10101_v0  ;;  %v2728_v0 = vrot.slane %v2726_v55, 4  ;;  %v3532_v55 = vrot.slane %v10140_v35, 5  ;;  %v12218_v35 = vld [vmem:[%s15777_s1 + $0x1d0] sm:$0xff]  }
  0xb5   : > { %11508 = vmatpush3.bf16.msra.mxu0 %v12893_v1  ;;  %v10051_v1 = vld [vmem:[%s12504_s15 + $0x48] sm:$0xf]  ;;  %11431 = vmatprep.mubr.bf16.mxu0 %v10102_v56  ;;  %v3535_v56 = vrot.slane %v10141_v36, 5  ;;  %v2785_v23 = vrot.slane %v2783_v10, 5 }
  0xb6   : > { %11509 = vmatprep.subr.bf16.mxu0 %v12207_v30  ;;  %v2750_v14 = vshrl.u32 %v10051_v1, 16  ;;  %v2753_v15 = vshll.u32 %v10051_v1, 16  ;;  %11476 = vmatmul.mubr.bf16.vlgmr.msra.gmra.mxu1 %v10205_v17  ;;  %v2732_v61 = vor.u32 %v2731_v19, %v2728_v0  ;;  %v2763_v17 = vshrl.u32 %v10052_v12, 16 }
  0xb7   : > { %11479 = vmatprep.mubr.bf16.mxu1 %v10206_v62  ;;  %11556 = vmatpush3.bf16.msra.mxu1 %v12940_v5  ;;  %v10176_v5 = vrot.slane %v10136_v21, 9  ;;  %v3529_v1 = vsel %vm12705_vm5, %v3527_v47, %v3528_v49  ;;  %v2774_v62 = vshrl.u32 %v10054_v42, 16  ;;  %v3533_v2 = vsel %vm12705_vm5, %v10177_v50, %v3532_v55  ;;  %v10143_v21 = vld [vmem:[%s12504_s15 + $0x58] sm:$0xf]  ;;  %v10060_v50 = vld [vmem:[%s12504_s15 + $0x6c] sm:$0xf] }
  0xb8   : > { %v2752_v25 = vrot.slane %v2750_v14, 4  ;;  %v2755_v26 = vrot.slane %v2753_v15, 5  ;;  %11557 = vmatprep.subr.bf16.mxu1 %v12212_v8  ;;  %v2733_v37 = vrot.slane %v2732_v61, 4  ;;  %v2765_v40 = vrot.slane %v2763_v17, 4  ;;  %v12217_v14 = vld [vmem:[%s15777_s1 + $0x1d8] sm:$0xff]  }
  0xb9   : > { %11510 = vmatpush3.bf16.msra.mxu0 %v12207_v30  ;;  %v12210_v30 = vld [vmem:[%s15777_s1 + $0x198] sm:$0xff]   ;;  %v3526_v45 = vsel %vm12705_vm5, %v10176_v5, %v3525_v34  ;;  %v3534_v3 = vrot.slane %v3532_v55, 4  ;;  %v2776_v9 = vrot.slane %v2774_v62, 4  ;;  %v2787_v12 = vshrl.u32 %v10055_v57, 16  ;;  %v10146_v5 = vld [vmem:[%s12504_s15 + $0x64] sm:$0xf] }
  0xba   : > { %11511 = vmatprep.subr.bf16.mxu0 %v12208_v48  ;;  %v2756_v33 = vor.u32 %v2755_v26, %v2752_v25  ;;  %v2738_v54 = vsel %vm12530_vm2, %v2733_v37, %v2737_v20  ;;  %v10208_v0 = vcombine.low %v3526_v45, %v3529_v1  ;;  %v2793_v19 = vshll.u32 %v10056_v60, 16  ;;  %v10142_v20 = vld [vmem:[%s12504_s15 + $0x54] sm:$0xe]  ;;  %v10144_v26 = vld [vmem:[%s12504_s15 + $0x5c] sm:$0x1]  ;;  %v12219_v45 = vld [vmem:[%s15777_s1 + $0x180] sm:$0xff]  }
  0xbb   : > { %11558 = vmatpush3.bf16.msra.mxu1 %v12212_v8  ;;  %v10104_v58 = vcombine.low %v2738_v54, %v2748_v52  ;;  %v2789_v24 = vrot.slane %v2787_v12, 4  ;;  %v2798_v25 = vshrl.u32 %v10057_v6, 16  ;;  %v2801_v17 = vshll.u32 %v10057_v6, 16  ;;  %v10147_v34 = vld [vmem:[%s12504_s15 + $0x68] sm:$0x1] }
  0xbc   : > { %11432 = vmatmul.mubr.bf16.gmra.mxu0 %v10103_v16  ;;  %v2757_v44 = vrot.slane %v2756_v33, 4  ;;  %11559 = vmatprep.subr.bf16.mxu1 %v12214_v31  ;;  %v3536_v16 = vsel %vm12705_vm5, %v3534_v3, %v3535_v56  ;;  %v2795_v11 = vrot.slane %v2793_v19, 5  ;;  %v2817_v33 = vshll.u32 %v10059_v13, 16  ;;  %v10061_v56 = vld [vmem:[%s12504_s15 + $0x70] sm:$0xf]  ;;  %v12221_v19 = vld [vmem:[%s15777_s1 + $0x1c0] sm:$0xff]  }
  0xbd   : > { %11512 = vmatpush3.bf16.msra.mxu0 %v12208_v48  ;;  %v2766_v48 = vor.u32 %v2765_v40, %v2761_v39  ;;  %11435 = vmatprep.mubr.bf16.mxu0 %v10104_v58  ;;  %v10209_v22 = vcombine.low %v3533_v2, %v3536_v16  ;;  %v2803_v37 = vrot.slane %v2801_v17, 5  ;;  %v10178_v40 = vrot.slane %v10142_v20, 9  ;;  %v10062_v57 = vld [vmem:[%s12504_s15 + $0x74] sm:$0x1]  ;;  %v12220_v58 = vld [vmem:[%s15777_s1 + $0x1c8] sm:$0xff]  }
  0xbe   : > { %11513 = vmatprep.subr.bf16.mxu0 %v12209_v7  ;;  %v2762_v53 = vsel %vm12530_vm2, %v2757_v44, %v2761_v39  ;;  %11480 = vmatmul.mubr.bf16.gmra.mxu1 %v10207_v18  ;;  %v2779_v18 = vrot.slane %v2777_v4, 5  ;;  %v2819_v43 = vrot.slane %v2817_v33, 5  ;;  %v3539_v44 = vrot.slane %v10143_v21, 5  ;;  %v10064_v6 = vld [vmem:[%s12504_s15 + $0x7c] sm:$0xf] }
  0xbf   : > { %v2767_v59 = vrot.slane %v2766_v48, 4  ;;  %11560 = vmatpush3.bf16.msra.mxu1 %v12214_v31  ;;  %11483 = vmatprep.mubr.bf16.mxu1 %v10208_v0  ;;  %v2800_v31 = vrot.slane %v2798_v25, 4  ;;  %v3542_v48 = vrot.slane %v10144_v26, 5  ;;  %v10179_v49 = vrot.slane %v10145_v29, 9  ;;  %v10065_v13 = vld [vmem:[%s12504_s15 + $0x80] sm:$0x1] }
  0xc0   : > { %11561 = vmatprep.subr.bf16.mxu1 %v12215_v51  ;;  %v2780_v61 = vor.u32 %v2779_v18, %v2776_v9  ;;  %v3541_v55 = vrot.slane %v3539_v44, 4  ;;  %v3546_v60 = vrot.slane %v10146_v5, 5  ;;  %v3549_v62 = vrot.slane %v10147_v34, 5  ;;  %v10149_v25 = vld [vmem:[%s12504_s15 + $0x70] sm:$0xf] }
  0xc1   : > { %11514 = vmatpush3.bf16.msra.mxu0 %v12209_v7  ;;  %v10058_v7 = vld [vmem:[%s12504_s15 + $0x64] sm:$0xf]  ;;  %v2772_v8 = vsel %vm12530_vm2, %v2767_v59, %v2771_v41  ;;  %v2804_v54 = vor.u32 %v2803_v37, %v2800_v31  ;;  %v2822_v3 = vshrl.u32 %v10060_v50, 16  ;;  %v2825_v4 = vshll.u32 %v10060_v50, 16  ;;  %v10150_v17 = vld [vmem:[%s12504_s15 + $0x74] sm:$0x1] }
  0xc2   : > { %11515 = vmatprep.subr.bf16.mxu0 %v12210_v30  ;;  %v10105_v15 = vcombine.low %v2762_v53, %v2772_v8  ;;  %v2807_v28 = vshll.u32 %v10058_v7, 16  ;;  %v2811_v32 = vshrl.u32 %v10058_v7, 16  ;;  %v2781_v36 = vrot.slane %v2780_v61, 4  ;;  %v13075_v7 = vld [vmem:[%s15777_s1 + $0x238] sm:$0xff]   ;;  %v10153_v37 = vld [vmem:[%s12504_s15 + $0x80] sm:$0x1] }
  0xc3   : > { %11562 = vmatpush3.bf16.msra.mxu1 %v12215_v51  ;;  %v3540_v53 = vsel %vm12705_vm5, %v10178_v40, %v3539_v44  ;;  %v2805_v1 = vrot.slane %v2804_v54, 4  ;;  %v3543_v2 = vsel %vm12705_vm5, %v3541_v55, %v3542_v48  ;;  %v3547_v10 = vsel %vm12705_vm5, %v10179_v49, %v3546_v60  ;;  %v10152_v33 = vld [vmem:[%s12504_s15 + $0x7c] sm:$0xf] }
  0xc4   : > { %11436 = vmatmul.mubr.bf16.gmra.mxu0 %v10105_v15  ;;  %11563 = vmatprep.subr.bf16.mxu1 %v12217_v14  ;;  %v2809_v39 = vrot.slane %v2807_v28, 5  ;;  %v2813_v42 = vrot.slane %v2811_v32, 4  ;;  %v2786_v47 = vsel %vm12530_vm2, %v2781_v36, %v2785_v23  ;;  %v10210_v9 = vcombine.low %v3540_v53, %v3543_v2  ;;  %v10151_v28 = vld [vmem:[%s12504_s15 + $0x78] sm:$0xe] }
  0xc5   : > { %11516 = vmatpush3.bf16.msra.mxu0 %v12210_v30  ;;  %v2790_v30 = vor.u32 %v2789_v24, %v2785_v23  ;;  %v3548_v12 = vrot.slane %v3546_v60, 4  ;;  %v2824_v15 = vrot.slane %v2822_v3, 4  ;;  %v2827_v16 = vrot.slane %v2825_v4, 5  ;;  %v10148_v24 = vld [vmem:[%s12504_s15 + $0x6c] sm:$0xe] }
  0xc6   : > { %11517 = vmatprep.subr.bf16.mxu0 %v12213_v63  ;;  %11484 = vmatmul.mubr.bf16.gmra.mxu1 %v10209_v22  ;;  %v2814_v52 = vor.u32 %v2813_v42, %v2809_v39  ;;  %v2810_v8 = vsel %vm12530_vm2, %v2805_v1, %v2809_v39  ;;  %v2831_v18 = vshll.u32 %v10061_v56, 16  ;;  %v2835_v22 = vshrl.u32 %v10061_v56, 16  ;;  %v10066_v39 = vld [vmem:[%s12504_s15 + $0x84] sm:$0xf]  ;;  %v10068_v60 = vld [vmem:[%s12504_s15 + $0x8c] sm:$0x1] }
  0xc7   : > { %v2791_v41 = vrot.slane %v2790_v30, 4  ;;  %11564 = vmatpush3.bf16.msra.mxu1 %v12217_v14  ;;  %11487 = vmatprep.mubr.bf16.mxu1 %v10210_v9  ;;  %v3550_v21 = vsel %vm12705_vm5, %v3548_v12, %v3549_v62  ;;  %v2841_v23 = vshll.u32 %v10062_v57, 16  ;;  %v2855_v32 = vshll.u32 %v10064_v6, 16  ;;  %v10067_v57 = vld [vmem:[%s12504_s15 + $0x88] sm:$0xf] }
  0xc8   : > { %11565 = vmatprep.subr.bf16.mxu1 %v12218_v35  ;;  %v2815_v0 = vrot.slane %v2814_v52, 4  ;;  %v10211_v26 = vcombine.low %v3547_v10, %v3550_v21  ;;  %v2833_v61 = vrot.slane %v2831_v18, 5  ;;  %v2837_v29 = vrot.slane %v2835_v22, 4  ;;  %v10069_v4 = vld [vmem:[%s12504_s15 + $0x90] sm:$0xf] }
  0xc9   : > { %11518 = vmatpush3.bf16.msra.mxu0 %v12213_v63  ;;  %v2796_v51 = vsel %vm12530_vm2, %v2791_v41, %v2795_v11  ;;  %v10063_v63 = vld [vmem:[%s12504_s15 + $0x78] sm:$0xf]  ;;  %v2843_v30 = vrot.slane %v2841_v23, 5  ;;  %v2865_v36 = vshll.u32 %v10065_v13, 16  ;;  %v2857_v42 = vrot.slane %v2855_v32, 5 }
  0xca   : > { %11519 = vmatprep.subr.bf16.mxu0 %v12216_v27  ;;  %v10106_v59 = vcombine.low %v2786_v47, %v2796_v51  ;;  %v2820_v14 = vsel %vm12530_vm2, %v2815_v0, %v2819_v43  ;;  %v2846_v11 = vshrl.u32 %v10063_v63, 16  ;;  %v2849_v31 = vshll.u32 %v10063_v63, 16  ;;  %v10071_v13 = vld [vmem:[%s12504_s15 + $0x98] sm:$0x1]  ;;  %v10154_v23 = vld [vmem:[%s12504_s15 + $0x84] sm:$0xe] }
  0xcb   : > { %11566 = vmatpush3.bf16.msra.mxu1 %v12218_v35  ;;  %v10107_v20 = vcombine.low %v2810_v8, %v2820_v14  ;;  %v2859_v35 = vshrl.u32 %v10064_v6, 16  ;;  %v2838_v40 = vor.u32 %v2837_v29, %v2833_v61  ;;  %v10180_v43 = vrot.slane %v10148_v24, 9  ;;  %v10070_v6 = vld [vmem:[%s12504_s15 + $0x94] sm:$0xf] }
  0xcc   : > { %11439 = vmatprep.mubr.bf16.mxu0 %v10106_v59  ;;  %11567 = vmatprep.subr.bf16.mxu1 %v12220_v58  ;;  %v2848_v34 = vrot.slane %v2846_v11, 4  ;;  %v2851_v41 = vrot.slane %v2849_v31, 5  ;;  %v2867_v47 = vrot.slane %v2865_v36, 5  ;;  %v3553_v54 = vrot.slane %v10149_v25, 5 }
  0xcd   : > { %11520 = vmatpush3.bf16.msra.mxu0 %v12216_v27  ;;  %v2828_v27 = vor.u32 %v2827_v16, %v2824_v15  ;;  %v2839_v48 = vrot.slane %v2838_v40, 4  ;;  %v3556_v50 = vrot.slane %v10150_v17, 5  ;;  %v10181_v51 = vrot.slane %v10151_v28, 9 }
  0xce   : > { %11521 = vmatprep.subr.bf16.mxu0 %v12219_v45  ;;  %11440 = vmatmul.mubr.bf16.gmra.mxu0 %v10107_v20  ;;  %v2852_v49 = vor.u32 %v2851_v41, %v2848_v34  ;;  %v3554_v53 = vsel %vm12705_vm5, %v10180_v43, %v3553_v54  ;;  %v3555_v55 = vrot.slane %v3553_v54, 4  ;;  %v3560_v56 = vrot.slane %v10152_v33, 5  ;;  %v10157_v34 = vld [vmem:[%s12504_s15 + $0x90] sm:$0xe]  ;;  %v10159_v41 = vld [vmem:[%s12504_s15 + $0x98] sm:$0x1] }
  0xcf   : > { %11568 = vmatpush3.bf16.msra.mxu1 %v12220_v58  ;;  %v2829_v5 = vrot.slane %v2828_v27, 4  ;;  %v2844_v58 = vsel %vm12530_vm2, %v2839_v48, %v2843_v30  ;;  %v3563_v1 = vrot.slane %v10153_v37, 5  ;;  %v2870_v62 = vshrl.u32 %v10066_v39, 16  ;;  %v10156_v30 = vld [vmem:[%s12504_s15 + $0x8c] sm:$0x1] }
  0xd0   : > { %11488 = vmatmul.mubr.bf16.gmra.mxu1 %v10211_v26  ;;  %11569 = vmatprep.subr.bf16.mxu1 %v12221_v19  ;;  %v2853_v59 = vrot.slane %v2852_v49, 4  ;;  %v3557_v2 = vsel %vm12705_vm5, %v3555_v55, %v3556_v50  ;;  %v3561_v3 = vsel %vm12705_vm5, %v10181_v51, %v3560_v56  ;;  %v3562_v10 = vrot.slane %v3560_v56, 4  ;;  %v10072_v50 = vld [vmem:[%s12504_s15 + $0x9c] sm:$0xf]  ;;  %v10073_v56 = vld [vmem:[%s12504_s15 + $0xa0] sm:$0xf] }
  0xd1   : > { %11522 = vmatpush3.bf16.msra.mxu0 %v12219_v45  ;;  %v2834_v44 = vsel %vm12530_vm2, %v2829_v5, %v2833_v61  ;;  %v2861_v45 = vrot.slane %v2859_v35, 4  ;;  %v10212_v9 = vcombine.low %v3554_v53, %v3557_v2  ;;  %v2872_v12 = vrot.slane %v2870_v62, 4  ;;  %v10155_v61 = vld [vmem:[%s12504_s15 + $0x88] sm:$0xf]  ;;  %v10158_v35 = vld [vmem:[%s12504_s15 + $0x94] sm:$0xf] }
  0xd2   : > { %11603 = vmatprep.subr.bf16.mxu0 %v13075_v7  ;;  %v10108_v63 = vcombine.low %v2834_v44, %v2844_v58  ;;  %v2858_v8 = vsel %vm12530_vm2, %v2853_v59, %v2857_v42  ;;  %v2873_v15 = vshll.u32 %v10066_v39, 16  ;;  %v2879_v16 = vshll.u32 %v10067_v57, 16  ;;  %v10075_v62 = vld [vmem:[%s12504_s15 + $0xa8] sm:$0xf] }
  0xd3   : > { %11570 = vmatpush3.bf16.msra.mxu1 %v12221_v19  ;;  %v2862_v52 = vor.u32 %v2861_v45, %v2857_v42  ;;  %v2883_v18 = vshrl.u32 %v10067_v57, 16  ;;  %11491 = vmatprep.mubr.bf16.mxu1 %v10212_v9  ;;  %v3564_v20 = vsel %vm12705_vm5, %v3562_v10, %v3563_v1  ;;  %v2889_v21 = vshll.u32 %v10068_v60, 16  ;;  %v10074_v60 = vld [vmem:[%s12504_s15 + $0xa4] sm:$0x1] }
  0xd4   : > { %11443 = vmatprep.mubr.bf16.mxu0 %v10108_v63  ;;  %v2894_v22 = vshrl.u32 %v10069_v4, 16  ;;  %v10213_v24 = vcombine.low %v3561_v3, %v3564_v20  ;;  %v2875_v25 = vrot.slane %v2873_v15, 5  ;;  %v2881_v26 = vrot.slane %v2879_v16, 5 }
  0xd5   : > { %v2863_v0 = vrot.slane %v2862_v52, 4  ;;  %v2885_v27 = vrot.slane %v2883_v18, 4  ;;  %v2891_v11 = vrot.slane %v2889_v21, 5  ;;  %v2897_v28 = vshll.u32 %v10069_v4, 16  ;;  %v10076_v4 = vld [vmem:[%s12504_s15 + $0xac] sm:$0xf] }
  0xd6   : > { %v2896_v17 = vrot.slane %v2894_v22, 4  ;;  %v2903_v29 = vshll.u32 %v10070_v6, 16  ;;  %v2876_v31 = vor.u32 %v2875_v25, %v2872_v12  ;;  %v2907_v33 = vshrl.u32 %v10070_v6, 16  ;;  %v10077_v12 = vld [vmem:[%s12504_s15 + $0xb0] sm:$0x1] }
  0xd7   : > { %v2868_v14 = vsel %vm12530_vm2, %v2863_v0, %v2867_v47  ;;  %v2886_v32 = vor.u32 %v2885_v27, %v2881_v26  ;;  %v2913_v5 = vshll.u32 %v10071_v13, 16  ;;  %v2899_v36 = vrot.slane %v2897_v28, 5  ;;  %v10160_v18 = vld [vmem:[%s12504_s15 + $0x9c] sm:$0xe] }
  0xd8   : > { %v10109_v19 = vcombine.low %v2858_v8, %v2868_v14  ;;  %11492 = vmatmul.mubr.bf16.gmra.mxu1 %v10213_v24  ;;  %v2905_v37 = vrot.slane %v2903_v29, 5  ;;  %v10182_v39 = vrot.slane %v10154_v23, 9  ;;  %v3567_v40 = vrot.slane %v10155_v61, 5  ;;  %v10161_v23 = vld [vmem:[%s12504_s15 + $0xa0] sm:$0xf] }
  0xd9   : > { %v2877_v42 = vrot.slane %v2876_v31, 4  ;;  %v2887_v43 = vrot.slane %v2886_v32, 4  ;;  %v2909_v44 = vrot.slane %v2907_v33, 4  ;;  %v2915_v45 = vrot.slane %v2913_v5, 5  ;;  %v10162_v61 = vld [vmem:[%s12504_s15 + $0xa4] sm:$0x1] }
  0xda   : > { %11444 = vmatmul.mubr.bf16.gmra.mxu0 %v10109_v19  ;;  %v2900_v47 = vor.u32 %v2899_v36, %v2896_v17  ;;  %v3568_v54 = vsel %vm12705_vm5, %v10182_v39, %v3567_v40  ;;  %v3569_v48 = vrot.slane %v3567_v40, 4  ;;  %v3570_v49 = vrot.slane %v10156_v30, 5  ;;  %v10163_v30 = vld [vmem:[%s12504_s15 + $0xa8] sm:$0xe]  ;;  %v10165_v40 = vld [vmem:[%s12504_s15 + $0xb0] sm:$0x1] }
  0xdb   : > { %v2882_v51 = vsel %vm12530_vm2, %v2877_v42, %v2881_v26  ;;  %v2892_v52 = vsel %vm12530_vm2, %v2887_v43, %v2891_v11  ;;  %v2910_v53 = vor.u32 %v2909_v44, %v2905_v37  ;;  %v10183_v55 = vrot.slane %v10157_v34, 9  ;;  %v10164_v34 = vld [vmem:[%s12504_s15 + $0xac] sm:$0xf] }
  0xdc   : > { %v10110_v57 = vcombine.low %v2882_v51, %v2892_v52  ;;  %v2901_v58 = vrot.slane %v2900_v47, 4  ;;  %v3571_v59 = vsel %vm12705_vm5, %v3569_v48, %v3570_v49  ;;  %v3574_v1 = vrot.slane %v10158_v35, 5 }
  0xdd   : > { %v2911_v63 = vrot.slane %v2910_v53, 4  ;;  %v10214_v0 = vcombine.low %v3568_v54, %v3571_v59  ;;  %v3577_v2 = vrot.slane %v10159_v41, 5  ;;  %v2918_v3 = vshrl.u32 %v10072_v50, 16 }
  0xde   : > { %11447 = vmatprep.mubr.bf16.mxu0 %v10110_v57  ;;  %v2906_v6 = vsel %vm12530_vm2, %v2901_v58, %v2905_v37  ;;  %v3575_v8 = vsel %vm12705_vm5, %v10183_v55, %v3574_v1  ;;  %v3576_v9 = vrot.slane %v3574_v1, 4  ;;  %v2921_v10 = vshll.u32 %v10072_v50, 16 }
  0xdf   : > { %v2916_v13 = vsel %vm12530_vm2, %v2911_v63, %v2915_v45  ;;  %11495 = vmatprep.mubr.bf16.mxu1 %v10214_v0  ;;  %v2920_v14 = vrot.slane %v2918_v3, 4  ;;  %v2927_v15 = vshll.u32 %v10073_v56, 16  ;;  %v2931_v16 = vshrl.u32 %v10073_v56, 16  ;;  %v10078_v45 = vld [vmem:[%s12504_s15 + $0xb4] sm:$0xf] }
  0xe0   : > { %v10111_v19 = vcombine.low %v2906_v6, %v2916_v13  ;;  %v3578_v20 = vsel %vm12705_vm5, %v3576_v9, %v3577_v2  ;;  %v2923_v21 = vrot.slane %v2921_v10, 5  ;;  %v2937_v22 = vshll.u32 %v10074_v60, 16  ;;  %v10079_v56 = vld [vmem:[%s12504_s15 + $0xb8] sm:$0xf]  ;;  %v10081_v6 = vld [vmem:[%s12504_s15 + $0xc0] sm:$0xf] }
  0xe1   : > { %v10215_v24 = vcombine.low %v3575_v8, %v3578_v20  ;;  %v2929_v25 = vrot.slane %v2927_v15, 5  ;;  %v2933_v26 = vrot.slane %v2931_v16, 4  ;;  %v2942_v27 = vshrl.u32 %v10075_v62, 16  ;;  %v10083_v15 = vld [vmem:[%s12504_s15 + $0xc8] sm:$0x1] }
  0xe2   : > { %11448 = vmatmul.mubr.bf16.gmra.mxu0 %v10111_v19  ;;  %v2924_v11 = vor.u32 %v2923_v21, %v2920_v14  ;;  %v2939_v17 = vrot.slane %v2937_v22, 5  ;;  %v2945_v28 = vshll.u32 %v10075_v62, 16  ;;  %v2951_v29 = vshll.u32 %v10076_v4, 16  ;;  %v10080_v62 = vld [vmem:[%s12504_s15 + $0xbc] sm:$0x1] }
  0xe3   : > { %11496 = vmatmul.mubr.bf16.gmra.mxu1 %v10215_v24  ;;  %v2934_v31 = vor.u32 %v2933_v26, %v2929_v25  ;;  %v2944_v32 = vrot.slane %v2942_v27, 4  ;;  %v2955_v33 = vshrl.u32 %v10076_v4, 16  ;;  %v2961_v5 = vshll.u32 %v10077_v12, 16  ;;  %v10082_v14 = vld [vmem:[%s12504_s15 + $0xc4] sm:$0xf] }
  0xe4   : > { %v2925_v35 = vrot.slane %v2924_v11, 4  ;;  %v2947_v36 = vrot.slane %v2945_v28, 5  ;;  %v2953_v37 = vrot.slane %v2951_v29, 5  ;;  %v10184_v39 = vrot.slane %v10160_v18, 9  ;;  %v10166_v22 = vld [vmem:[%s12504_s15 + $0xb4] sm:$0xe] }
  0xe5   : > { %v2935_v41 = vrot.slane %v2934_v31, 4  ;;  %v2957_v42 = vrot.slane %v2955_v33, 4  ;;  %v2963_v43 = vrot.slane %v2961_v5, 5  ;;  %v3581_v44 = vrot.slane %v10161_v23, 5  ;;  %v10168_v31 = vld [vmem:[%s12504_s15 + $0xbc] sm:$0x1] }
  0xe6   : > { %v2930_v47 = vsel %vm12530_vm2, %v2925_v35, %v2929_v25  ;;  %v2948_v54 = vor.u32 %v2947_v36, %v2944_v32  ;;  %v3584_v48 = vrot.slane %v10162_v61, 5  ;;  %v10185_v49 = vrot.slane %v10163_v30, 9  ;;  %v10167_v61 = vld [vmem:[%s12504_s15 + $0xb8] sm:$0xf]  ;;  %v10169_v32 = vld [vmem:[%s12504_s15 + $0xc0] sm:$0xe] }
  0xe7   : > { %v2940_v51 = vsel %vm12530_vm2, %v2935_v41, %v2939_v17  ;;  %v2958_v52 = vor.u32 %v2957_v42, %v2953_v37  ;;  %v3582_v53 = vsel %vm12705_vm5, %v10184_v39, %v3581_v44  ;;  %v3583_v55 = vrot.slane %v3581_v44, 4  ;;  %v10171_v44 = vld [vmem:[%s12504_s15 + $0xc8] sm:$0x1] }
  0xe8   : > { %v10112_v58 = vcombine.low %v2930_v47, %v2940_v51  ;;  %v2949_v59 = vrot.slane %v2948_v54, 4  ;;  %v3588_v1 = vrot.slane %v10164_v34, 5  ;;  %v3591_v60 = vrot.slane %v10165_v40, 5 }
  0xe9   : > { %v2959_v0 = vrot.slane %v2958_v52, 4  ;;  %v3585_v2 = vsel %vm12705_vm5, %v3583_v55, %v3584_v48  ;;  %v2966_v3 = vshrl.u32 %v10078_v45, 16  ;;  %v2969_v4 = vshll.u32 %v10078_v45, 16  ;;  %v13201_v45 = vld [vmem:[%s15778_s2] ss:$0 sm:$0xff] }
  0xea   : > { %11451 = vmatprep.mubr.bf16.mxu0 %v10112_v58  ;;  %v2954_v9 = vsel %vm12530_vm2, %v2949_v59, %v2953_v37  ;;  %v10216_v10 = vcombine.low %v3582_v53, %v3585_v2  ;;  %v3589_v12 = vsel %vm12705_vm5, %v10185_v49, %v3588_v1  ;;  %v3590_v13 = vrot.slane %v3588_v1, 4  ;;  %v10170_v37 = vld [vmem:[%s12504_s15 + $0xc4] sm:$0xf] }
  0xeb   : > { %v2964_v18 = vsel %vm12530_vm2, %v2959_v0, %v2963_v43  ;;  %v2968_v19 = vrot.slane %v2966_v3, 4  ;;  %v2971_v20 = vrot.slane %v2969_v4, 5  ;;  %v2975_v21 = vshll.u32 %v10079_v56, 16 }
  0xec   : > { %v10113_v24 = vcombine.low %v2954_v9, %v2964_v18  ;;  %11499 = vmatprep.mubr.bf16.mxu1 %v10216_v10  ;;  %v3592_v25 = vsel %vm12705_vm5, %v3590_v13, %v3591_v60  ;;  %v2979_v26 = vshrl.u32 %v10079_v56, 16  ;;  %v2985_v27 = vshll.u32 %v10080_v62, 16  ;;  %v10300_v9 = vld [vmem:[%s12504_s15 + $0x18] sm:$0xf]  ;;  %v10301_v18 = vld [vmem:[%s12504_s15 + $0x1c] sm:$0xf] }
  0xed   : > { %v10217_v17 = vcombine.low %v3589_v12, %v3592_v25  ;;  %v2972_v28 = vor.u32 %v2971_v20, %v2968_v19  ;;  %v2977_v29 = vrot.slane %v2975_v21, 5  ;;  %v2990_v30 = vshrl.u32 %v10081_v6, 16  ;;  %v10302_v25 = vld [vmem:[%s12504_s15 + $0x20] sm:$0x1] }
  0xee   : > { %11452 = vmatmul.mubr.bf16.gmra.mxu0 %v10113_v24  ;;  %v2981_v5 = vrot.slane %v2979_v26, 4  ;;  %v2987_v34 = vrot.slane %v2985_v27, 5  ;;  %v2993_v35 = vshll.u32 %v10081_v6, 16  ;;  %v2999_v36 = vshll.u32 %v10082_v14, 16  ;;  %v10303_v26 = vld [vmem:[%s12504_s15 + $0x24] sm:$0xf] }
  0xef   : > { %11500 = vmatmul.mubr.bf16.gmra.mxu1 %v10217_v17  ;;  %v2973_v40 = vrot.slane %v2972_v28, 4  ;;  %v2992_v41 = vrot.slane %v2990_v30, 4  ;;  %v3003_v42 = vshrl.u32 %v10082_v14, 16  ;;  %v3009_v43 = vshll.u32 %v10083_v15, 16 }
  0xf0   : > { %v2982_v47 = vor.u32 %v2981_v5, %v2977_v29  ;;  %v2995_v54 = vrot.slane %v2993_v35, 5  ;;  %v3001_v48 = vrot.slane %v2999_v36, 5  ;;  %v10186_v49 = vrot.slane %v10166_v22, 9  ;;  %v10305_v36 = vld [vmem:[%s12504_s15 + $0x2c] sm:$0x1] }
  0xf1   : > { %v2978_v52 = vsel %vm12530_vm2, %v2973_v40, %v2977_v29  ;;  %v3005_v53 = vrot.slane %v3003_v42, 4  ;;  %v3011_v55 = vrot.slane %v3009_v43, 5  ;;  %v3595_v56 = vrot.slane %v10167_v61, 5  ;;  %v10304_v29 = vld [vmem:[%s12504_s15 + $0x28] sm:$0xf] }
  0xf2   : > { %v2983_v59 = vrot.slane %v2982_v47, 4  ;;  %v2996_v1 = vor.u32 %v2995_v54, %v2992_v41  ;;  %v3598_v60 = vrot.slane %v10168_v31, 5  ;;  %v10187_v62 = vrot.slane %v10169_v32, 9  ;;  %v12222_v32 = vld [vmem:[%s12504_s15 + $0x18] sm:$0xff]  }
  0xf3   : > { %v3006_v2 = vor.u32 %v3005_v53, %v3001_v48  ;;  %v3596_v3 = vsel %vm12705_vm5, %v10186_v49, %v3595_v56  ;;  %v3597_v4 = vrot.slane %v3595_v56, 4  ;;  %v3602_v6 = vrot.slane %v10170_v37, 5 }
  0xf4   : > { %v13155_v50 = vpop.f32.mrf.mxu0  ;;  %v2988_v12 = vsel %vm12530_vm2, %v2983_v59, %v2987_v34  ;;  %v2997_v13 = vrot.slane %v2996_v1, 4  ;;  %v3605_v14 = vrot.slane %v10171_v44, 5  ;;  %v4493_v28 = vshrl.u32 %v10300_v9, 16 }
  0xf5   : > { %v13162_v57 = vpop.f32.mrf.mxu1  ;;  %v650_v15 = vadd.f32 %v13155_v50, %v13201_v45  ;;  %v10114_v20 = vcombine.low %v2978_v52, %v2988_v12  ;;  %v3007_v21 = vrot.slane %v3006_v2, 4  ;;  %v3599_v22 = vsel %vm12705_vm5, %v3597_v4, %v3598_v60  ;;  %v12223_v4 = vld [vmem:[%s12504_s15 + $0x24] sm:$0xff]   ;;  %v10306_v12 = vld [vmem:[%s12504_s15 + $0x30] sm:$0xf] }
  0xf6   : > { %v13165_v63 = vpop.f32.mrf.mxu0  ;;  %v3603_v24 = vsel %vm12705_vm5, %v10187_v62, %v3602_v6  ;;  %v3002_v50 = vsel %vm12530_vm2, %v2997_v13, %v3001_v48  ;;  %v10218_v61 = vcombine.low %v3596_v3, %v3599_v22  ;;  %v3604_v17 = vrot.slane %v3602_v6, 4  ;;  %v10307_v22 = vld [vmem:[%s12504_s15 + $0x34] sm:$0xf] }
  0xf7   : > { %v13170_v8 = vpop.f32.mrf.mxu1  ;;  %11455 = vmatprep.mubr.bf16.mxu0 %v10114_v20  ;;  %v3012_v31 = vsel %vm12530_vm2, %v3007_v21, %v3011_v55  ;;  %v4496_v5 = vshll.u32 %v10300_v9, 16  ;;  %v4502_v34 = vshll.u32 %v10301_v18, 16  ;;  %v4506_v35 = vshrl.u32 %v10301_v18, 16  ;;  %v12225_v21 = vld [vmem:[%s12504_s15 + $0x30] sm:$0xff]  }
  0xf8   : > { %v13178_v16 = vpop.f32.mrf.mxu0  ;;  %v10115_v40 = vcombine.low %v3002_v50, %v3012_v31  ;;  %11503 = vmatprep.mubr.bf16.mxu1 %v10218_v61  ;;  %v3606_v41 = vsel %vm12705_vm5, %v3604_v17, %v3605_v14  ;;  %v4495_v42 = vrot.slane %v4493_v28, 4  ;;  %v4512_v43 = vshll.u32 %v10302_v25, 16 }
  0xf9   : > { %v13183_v23 = vpop.f32.mrf.mxu1  ;;  %v10219_v47 = vcombine.low %v3603_v24, %v3606_v41  ;;  %v4498_v54 = vrot.slane %v4496_v5, 5  ;;  %v4504_v48 = vrot.slane %v4502_v34, 5  ;;  %v4508_v49 = vrot.slane %v4506_v35, 4 }
  0xfa   : > { %v13188_v11 = vpop.f32.mrf.mxu0  ;;  %11456 = vmatmul.mubr.bf16.gmra.mxu0 %v10115_v40  ;;  %v4514_v52 = vrot.slane %v4512_v43, 5  ;;  %v648_v53 = vadd.f32 %v13201_v45, %v13165_v63  ;;  %v13249_v55 = vadd.f32 %v13162_v57, %v650_v15  ;;  %v4517_v56 = vshrl.u32 %v10303_v26, 16 }
  0xfb   : > { %v13192_v33 = vpop.f32.mrf.mxu1  ;;  %11504 = vmatmul.mubr.bf16.gmra.mxu1 %v10219_v47  ;;  %11523 = vmatprep.mubr.bf16.mxu0 %v12222_v32  ;;  %v4499_v1 = vor.u32 %v4498_v54, %v4495_v42  ;;  %v4509_v60 = vor.u32 %v4508_v49, %v4504_v48  ;;  %v4520_v62 = vshll.u32 %v10303_v26, 16  ;;  %v4526_v2 = vshll.u32 %v10304_v29, 16  ;;  %v10309_v47 = vld [vmem:[%s12504_s15 + $0x3c] sm:$0xf] }
  0xfc   : > { %v13195_v39 = vpop.f32.mrf.mxu0  ;;  %v4519_v6 = vrot.slane %v4517_v56, 4  ;;  %v4530_v63 = vshrl.u32 %v10304_v29, 16  ;;  %v4536_v9 = vshll.u32 %v10305_v36, 16  ;;  %v651_v57 = vadd.f32 %v13178_v16, %v13201_v45  ;;  %v10308_v16 = vld [vmem:[%s12504_s15 + $0x38] sm:$0x1]  ;;  %v12227_v36 = vld [vmem:[%s15777_s1 + $0x230] sm:$0xff]  }
  0xfd   : > { %v4500_v14 = vrot.slane %v4499_v1, 4  ;;  %v4510_v15 = vrot.slane %v4509_v60, 4  ;;  %v4522_v18 = vrot.slane %v4520_v62, 5  ;;  %v4528_v20 = vrot.slane %v4526_v2, 5  ;;  %v10311_v2 = vld [vmem:[%s12504_s15 + $0x44] sm:$0x1] }
  0xfe   : > { %v13203_v51 = vpop.f32.mrf.mxu0  ;;  %v13207_v58 = vpop.f32.mrf.mxu1  ;;  %v4532_v25 = vrot.slane %v4530_v63, 4  ;;  %v4538_v26 = vrot.slane %v4536_v9, 5  ;;  %v13266_v50 = vadd.f32 %v13170_v8, %v648_v53  ;;  %v649_v61 = vadd.f32 %v13201_v45, %v13188_v11  ;;  %v12226_v63 = vld [vmem:[%s12504_s15 + $0x3c] sm:$0xff]  }
  0xff   : > { %v4505_v28 = vsel %vm12530_vm2, %v4500_v14, %v4504_v48  ;;  %v4515_v29 = vsel %vm12530_vm2, %v4510_v15, %v4514_v52  ;;  %v4523_v31 = vor.u32 %v4522_v18, %v4519_v6  ;;  %v13278_v32 = vadd.f32 %v13183_v23, %v651_v57  ;;  %v10310_v52 = vld [vmem:[%s12504_s15 + $0x40] sm:$0xf]  ;;  %v12230_v57 = vld [vmem:[%s15777_s1 + $0x228] sm:$0xff]  }
 0x100   : > { %v13209_v0 = vpop.f32.mrf.mxu0  ;;  %v13214_v10 = vpop.f32.mrf.mxu1  ;;  %v10364_v8 = vcombine.low %v4505_v28, %v4515_v29  ;;  %v4533_v34 = vor.u32 %v4532_v25, %v4528_v20  ;;  %v654_v11 = vadd.f32 %v13195_v39, %v13201_v45  ;;  %v13285_v35 = vadd.f32 %v13192_v33, %v649_v61  ;;  %v10312_v28 = vld [vmem:[%s12504_s15 + $0x48] sm:$0xf] }
 0x101   : > { %v4524_v41 = vrot.slane %v4523_v31, 4  ;;  %v4541_v23 = vshrl.u32 %v10306_v12, 16  ;;  %v4544_v42 = vshll.u32 %v10306_v12, 16  ;;  %v4550_v43 = vshll.u32 %v10307_v22, 16 }
 0x102   : > { %v13221_v19 = vpop.f32.mrf.mxu0  ;;  %v13229_v27 = vpop.f32.mrf.mxu1  ;;  %11524 = vmatmul.mubr.bf16.vlgmr.msra.gmra.mxu0 %v12223_v4  ;;  %11571 = vmatprep.mubr.bf16.mxu1 %v10364_v8  ;;  %v4534_v39 = vrot.slane %v4533_v34, 4  ;;  %v4554_v33 = vshrl.u32 %v10307_v22, 16  ;;  %v4560_v48 = vshll.u32 %v10308_v16, 16  ;;  %v652_v49 = vadd.f32 %v13201_v45, %v13203_v51  ;;  %v12228_v16 = vld [vmem:[%s12504_s15 + $0x48] sm:$0xff]  }
 0x103   : > { %11604 = vmatpush3.bf16.msra.mxu0 %v13075_v7  ;;  %v4529_v56 = vsel %vm12530_vm2, %v4524_v41, %v4528_v20  ;;  %11527 = vmatprep.mubr.bf16.mxu0 %v12225_v21  ;;  %v4543_v1 = vrot.slane %v4541_v23, 4  ;;  %v4546_v60 = vrot.slane %v4544_v42, 5  ;;  %v4552_v62 = vrot.slane %v4550_v43, 5 }
 0x104   : > { %v13234_v30 = vpop.f32.mrf.mxu0  ;;  %v13240_v37 = vpop.f32.mrf.mxu1  ;;  %v4539_v6 = vsel %vm12530_vm2, %v4534_v39, %v4538_v26  ;;  %11605 = vmatprep.subr.bf16.mxu0 %v12227_v36  ;;  %v4556_v51 = vrot.slane %v4554_v33, 4  ;;  %v4562_v9 = vrot.slane %v4560_v48, 5  ;;  %v13310_v7 = vadd.f32 %v13207_v58, %v654_v11  ;;  %v12233_v11 = vld [vmem:[%s15777_s1 + $0x220] sm:$0xff]  }
 0x105   : > { %v10365_v14 = vcombine.low %v4529_v56, %v4539_v6  ;;  %v4547_v15 = vor.u32 %v4546_v60, %v4543_v1  ;;  %v4565_v18 = vshrl.u32 %v10309_v47, 16  ;;  %v4568_v20 = vshll.u32 %v10309_v47, 16 }
 0x106   : > { %v13244_v44 = vpop.f32.mrf.mxu0  ;;  %v13253_v3 = vpop.f32.mrf.mxu1  ;;  %v4557_v22 = vor.u32 %v4556_v51, %v4552_v62  ;;  %v4574_v25 = vshll.u32 %v10310_v52, 16  ;;  %v4578_v26 = vshrl.u32 %v10310_v52, 16  ;;  %v4584_v61 = vshll.u32 %v10311_v2, 16  ;;  %v10313_v52 = vld [vmem:[%s12504_s15 + $0x4c] sm:$0xf] }
 0x107   : > { %11572 = vmatmul.mubr.bf16.vlgmr.msra.gmra.mxu1 %v10365_v14  ;;  %v4548_v29 = vrot.slane %v4547_v15, 4  ;;  %11606 = vmatpush3.bf16.msra.mxu0 %v12227_v36  ;;  %v4567_v31 = vrot.slane %v4565_v18, 4  ;;  %v4570_v8 = vrot.slane %v4568_v20, 5  ;;  %v655_v34 = vadd.f32 %v13209_v0, %v13201_v45  ;;  %v10316_v14 = vld [vmem:[%s12504_s15 + $0x58] sm:$0xf] }
 0x108   : > { %v13251_v59 = vpop.f32.mrf.mxu0  ;;  %v13263_v24 = vpop.f32.mrf.mxu1  ;;  %v4558_v23 = vrot.slane %v4557_v22, 4  ;;  %v4576_v42 = vrot.slane %v4574_v25, 5  ;;  %v4580_v43 = vrot.slane %v4578_v26, 4  ;;  %v4586_v47 = vrot.slane %v4584_v61, 5  ;;  %11607 = vmatprep.subr.bf16.mxu0 %v12230_v57  ;;  %v10317_v22 = vld [vmem:[%s12504_s15 + $0x5c] sm:$0x1] }
 0x109   : > { %v4553_v39 = vsel %vm12530_vm2, %v4548_v29, %v4552_v62  ;;  %v4571_v33 = vor.u32 %v4570_v8, %v4567_v31  ;;  %v13335_v0 = vadd.f32 %v13214_v10, %v652_v49  ;;  %v653_v48 = vadd.f32 %v13201_v45, %v13221_v19  ;;  %v10314_v10 = vld [vmem:[%s12504_s15 + $0x50] sm:$0x1]  ;;  %v10315_v49 = vld [vmem:[%s12504_s15 + $0x54] sm:$0xf]  ;;  %v12236_v19 = vld [vmem:[%s15777_s1 + $0x218] sm:$0xff]  }
 0x10a   : > { %v13259_v13 = vpop.f32.mrf.mxu0  ;;  %v13280_v5 = vpop.f32.mrf.mxu1  ;;  %11528 = vmatmul.mubr.bf16.gmra.mxu0 %v12226_v63  ;;  %v4563_v1 = vsel %vm12530_vm2, %v4558_v23, %v4562_v9  ;;  %v4581_v60 = vor.u32 %v4580_v43, %v4576_v42  ;;  %v13345_v2 = vadd.f32 %v13229_v27, %v655_v34  ;;  %v658_v62 = vadd.f32 %v13234_v30, %v13201_v45  ;;  %v12229_v29 = vld [vmem:[%s12504_s15 + $0x54] sm:$0xff]  }
 0x10b   : > { %v10366_v63 = vcombine.low %v4553_v39, %v4563_v1  ;;  %v4572_v51 = vrot.slane %v4571_v33, 4  ;;  %11531 = vmatprep.mubr.bf16.mxu0 %v12228_v16  ;;  %v13357_v9 = vadd.f32 %v13240_v37, %v653_v48  ;;  %v4589_v27 = vshrl.u32 %v10312_v28, 16  ;;  %11608 = vmatpush3.bf16.msra.mxu0 %v12230_v57 }
 0x10c   : > { %v13271_v17 = vpop.f32.mrf.mxu0  ;;  %v13293_v54 = vpop.f32.mrf.mxu1  ;;  %v4582_v30 = vrot.slane %v4581_v60, 4  ;;  %v4592_v15 = vshll.u32 %v10312_v28, 16  ;;  %v4598_v18 = vshll.u32 %v10313_v52, 16  ;;  %v4602_v20 = vshrl.u32 %v10313_v52, 16  ;;  %11609 = vmatprep.subr.bf16.mxu0 %v12233_v11  ;;  %v12231_v52 = vld [vmem:[%s12504_s15 + $0x60] sm:$0xff]  }
 0x10d   : > { %11575 = vmatprep.mubr.bf16.mxu1 %v10366_v63  ;;  %v4577_v37 = vsel %vm12530_vm2, %v4572_v51, %v4576_v42  ;;  %v4591_v61 = vrot.slane %v4589_v27, 4  ;;  %v4608_v16 = vshll.u32 %v10314_v10, 16  ;;  %v656_v57 = vadd.f32 %v13201_v45, %v13244_v44  ;;  %v12239_v63 = vld [vmem:[%s15777_s1 + $0x210] sm:$0xff]  }
 0x10e   : > { %v13290_v40 = vpop.f32.mrf.mxu0  ;;  %v13304_v4 = vpop.f32.mrf.mxu1  ;;  %v4587_v28 = vsel %vm12530_vm2, %v4582_v30, %v4586_v47  ;;  %v4594_v31 = vrot.slane %v4592_v15, 5  ;;  %v4600_v8 = vrot.slane %v4598_v18, 5  ;;  %v4604_v34 = vrot.slane %v4602_v20, 4 }
 0x10f   : > { %v10367_v39 = vcombine.low %v4577_v37, %v4587_v28  ;;  %v4610_v33 = vrot.slane %v4608_v16, 5  ;;  %v13377_v42 = vadd.f32 %v13253_v3, %v658_v62  ;;  %v4613_v48 = vshrl.u32 %v10315_v49, 16  ;;  %11610 = vmatpush3.bf16.msra.mxu0 %v12233_v11  ;;  %v10319_v37 = vld [vmem:[%s12504_s15 + $0x64] sm:$0xf] }
 0x110   : > { %v13298_v53 = vpop.f32.mrf.mxu0  ;;  %v13317_v21 = vpop.f32.mrf.mxu1  ;;  %v4595_v44 = vor.u32 %v4594_v31, %v4591_v61  ;;  %v4605_v1 = vor.u32 %v4604_v34, %v4600_v8  ;;  %v4616_v47 = vshll.u32 %v10315_v49, 16  ;;  %v4622_v60 = vshll.u32 %v10316_v14, 16  ;;  %11611 = vmatprep.subr.bf16.mxu0 %v12236_v19  ;;  %v10318_v49 = vld [vmem:[%s12504_s15 + $0x60] sm:$0xf] }
 0x111   : > { %11576 = vmatmul.mubr.bf16.gmra.mxu1 %v10367_v39  ;;  %v4615_v3 = vrot.slane %v4613_v48, 4  ;;  %v4626_v62 = vshrl.u32 %v10316_v14, 16  ;;  %v4632_v27 = vshll.u32 %v10317_v22, 16  ;;  %v659_v11 = vadd.f32 %v13251_v59, %v13201_v45  ;;  %v10320_v14 = vld [vmem:[%s12504_s15 + $0x68] sm:$0x1] }
 0x112   : > { %v13315_v12 = vpop.f32.mrf.mxu0  ;;  %v13328_v41 = vpop.f32.mrf.mxu1  ;;  %11532 = vmatmul.mubr.bf16.gmra.mxu0 %v12229_v29  ;;  %v4596_v30 = vrot.slane %v4595_v44, 4  ;;  %v4606_v15 = vrot.slane %v4605_v1, 4  ;;  %v4618_v18 = vrot.slane %v4616_v47, 5  ;;  %v4624_v20 = vrot.slane %v4622_v60, 5  ;;  %v12242_v59 = vld [vmem:[%s15777_s1 + $0x208] sm:$0xff]  }
 0x113   : > { %v4628_v28 = vrot.slane %v4626_v62, 4  ;;  %v13396_v31 = vadd.f32 %v13263_v24, %v656_v57  ;;  %11535 = vmatprep.mubr.bf16.mxu0 %v12231_v52  ;;  %11612 = vmatpush3.bf16.msra.mxu0 %v12236_v19  ;;  %v13407_v39 = vadd.f32 %v13280_v5, %v659_v11  ;;  %v4634_v48 = vrot.slane %v4632_v27, 5  ;;  %v10321_v5 = vld [vmem:[%s12504_s15 + $0x6c] sm:$0xf] }
 0x114   : > { %v13321_v58 = vpop.f32.mrf.mxu0  ;;  %v13340_v56 = vpop.f32.mrf.mxu1  ;;  %v4601_v22 = vsel %vm12530_vm2, %v4596_v30, %v4600_v8  ;;  %v4611_v29 = vsel %vm12530_vm2, %v4606_v15, %v4610_v33  ;;  %v4619_v34 = vor.u32 %v4618_v18, %v4615_v3  ;;  %11613 = vmatprep.subr.bf16.mxu0 %v12239_v63  ;;  %v662_v52 = vadd.f32 %v13271_v17, %v13201_v45  ;;  %v12232_v8 = vld [vmem:[%s12504_s15 + $0x6c] sm:$0xff]   ;;  %v12234_v17 = vld [vmem:[%s12504_s15 + $0x78] sm:$0xff]  }
 0x115   : > { %15789 = vst [vmem:[#allocation7_spill] sm:$0xff] %v13340_v56  ;;  %15792 = vst [vmem:[#allocation10_spill] sm:$0xff] %v13407_v39  ;;  %v10368_v57 = vcombine.low %v4601_v22, %v4611_v29  ;;  %v4629_v19 = vor.u32 %v4628_v28, %v4624_v20  ;;  %v4637_v33 = vshrl.u32 %v10318_v49, 16  ;;  %v4640_v47 = vshll.u32 %v10318_v49, 16  ;;  %v10322_v15 = vld [vmem:[%s12504_s15 + $0x70] sm:$0xf] }
 0x116   : > { %v13330_v36 = vpop.f32.mrf.mxu0  ;;  %v13361_v25 = vpop.f32.mrf.mxu1  ;;  %v4620_v1 = vrot.slane %v4619_v34, 4  ;;  %v4646_v60 = vshll.u32 %v10319_v37, 16  ;;  %v4650_v11 = vshrl.u32 %v10319_v37, 16  ;;  %v4656_v30 = vshll.u32 %v10320_v14, 16  ;;  %v10323_v34 = vld [vmem:[%s12504_s15 + $0x74] sm:$0x1] }
 0x117   : > { %11579 = vmatprep.mubr.bf16.mxu1 %v10368_v57  ;;  %v4630_v62 = vrot.slane %v4629_v19, 4  ;;  %v660_v27 = vadd.f32 %v13201_v45, %v13290_v40  ;;  %11614 = vmatpush3.bf16.msra.mxu0 %v12239_v63  ;;  %v4639_v28 = vrot.slane %v4637_v33, 4  ;;  %v4642_v22 = vrot.slane %v4640_v47, 5  ;;  %v12245_v37 = vld [vmem:[%s15777_s1 + $0x200] sm:$0xff]  }
 0x118   : > { %v13354_v6 = vpop.f32.mrf.mxu0  ;;  %v13372_v23 = vpop.f32.mrf.mxu1  ;;  %v4625_v49 = vsel %vm12530_vm2, %v4620_v1, %v4624_v20  ;;  %v4648_v29 = vrot.slane %v4646_v60, 5  ;;  %11615 = vmatprep.subr.bf16.mxu0 %v12242_v59  ;;  %v4652_v63 = vrot.slane %v4650_v11, 4  ;;  %v4658_v14 = vrot.slane %v4656_v30, 5 }
 0x119   : > { %v4635_v40 = vsel %vm12530_vm2, %v4630_v62, %v4634_v48  ;;  %v13436_v19 = vadd.f32 %v13304_v4, %v662_v52  ;;  %v4643_v33 = vor.u32 %v4642_v22, %v4639_v28  ;;  %v4661_v47 = vshrl.u32 %v10321_v5, 16  ;;  %v10324_v48 = vld [vmem:[%s12504_s15 + $0x78] sm:$0xf]  ;;  %v12235_v22 = vld [vmem:[%s12504_s15 + $0x84] sm:$0xff]  }
 0x11a   : > { %v13363_v26 = vpop.f32.mrf.mxu0  ;;  %v13380_v10 = vpop.f32.mrf.mxu1  ;;  %v10369_v1 = vcombine.low %v4625_v49, %v4635_v40  ;;  %11536 = vmatmul.mubr.bf16.gmra.mxu0 %v12232_v8  ;;  %v4664_v60 = vshll.u32 %v10321_v5, 16  ;;  %v4674_v56 = vshrl.u32 %v10322_v15, 16  ;;  %v4680_v39 = vshll.u32 %v10323_v34, 16  ;;  %v10325_v34 = vld [vmem:[%s12504_s15 + $0x7c] sm:$0xf] }
 0x11b   : > { %15790 = vst [vmem:[#allocation8_spill] sm:$0xff] %v13363_v26  ;;  %15794 = vst [vmem:[#allocation12_spill] sm:$0xff] %v13436_v19  ;;  %v4670_v26 = vshll.u32 %v10322_v15, 16  ;;  %11539 = vmatprep.mubr.bf16.mxu0 %v12234_v17  ;;  %11616 = vmatpush3.bf16.msra.mxu0 %v12242_v59  ;;  %v4644_v4 = vrot.slane %v4643_v33, 4  ;;  %v4663_v52 = vrot.slane %v4661_v47, 4  ;;  %v663_v5 = vadd.f32 %v13298_v53, %v13201_v45 }
 0x11c   : > { %v13374_v43 = vpop.f32.mrf.mxu0  ;;  %v13391_v61 = vpop.f32.mrf.mxu1  ;;  %11580 = vmatmul.mubr.bf16.gmra.mxu1 %v10369_v1  ;;  %v4666_v8 = vrot.slane %v4664_v60, 5  ;;  %11617 = vmatprep.subr.bf16.mxu0 %v12245_v37  ;;  %v4676_v17 = vrot.slane %v4674_v56, 4  ;;  %v13452_v28 = vadd.f32 %v13317_v21, %v660_v27  ;;  %v4682_v1 = vrot.slane %v4680_v39, 5  ;;  %v10326_v56 = vld [vmem:[%s12504_s15 + $0x80] sm:$0x1] }
 0x11d   : > { %15791 = vst [vmem:[#allocation9_spill] sm:$0xff] %v13391_v61  ;;  %v4653_v61 = vor.u32 %v4652_v63, %v4648_v29  ;;  %v4672_v15 = vrot.slane %v4670_v26, 5  ;;  %v4649_v49 = vsel %vm12530_vm2, %v4644_v4, %v4648_v29  ;;  %v13461_v26 = vadd.f32 %v13328_v41, %v663_v5  ;;  %v12237_v29 = vld [vmem:[%s12504_s15 + $0x90] sm:$0xff]   ;;  %v10328_v4 = vld [vmem:[%s12504_s15 + $0x88] sm:$0xf] }
 0x11e   : > { %v13385_v51 = vpop.f32.mrf.mxu0  ;;  %v13414_v44 = vpop.f32.mrf.mxu1  ;;  %v4667_v59 = vor.u32 %v4666_v8, %v4663_v52  ;;  %15797 = vst [vmem:[#allocation15_spill] sm:$0xff] %v13452_v28  ;;  %v666_v47 = vadd.f32 %v13321_v58, %v13201_v45  ;;  %v4685_v60 = vshrl.u32 %v10324_v48, 16  ;;  %v4688_v52 = vshll.u32 %v10324_v48, 16  ;;  %v10329_v5 = vld [vmem:[%s12504_s15 + $0x8c] sm:$0x1] }
 0x11f   : > { %v4654_v30 = vrot.slane %v4653_v61, 4  ;;  %v4677_v63 = vor.u32 %v4676_v17, %v4672_v15  ;;  %15798 = vst [vmem:[#allocation16_spill] sm:$0xff] %v13461_v26  ;;  %v10327_v61 = vld [vmem:[%s12504_s15 + $0x84] sm:$0xf]  ;;  %11618 = vmatpush3.bf16.msra.mxu0 %v12245_v37  ;;  %v4694_v41 = vshll.u32 %v10325_v34, 16  ;;  %v4698_v8 = vshrl.u32 %v10325_v34, 16 }
 0x120   : > { %v13393_v16 = vpop.f32.mrf.mxu0  ;;  %v13423_v18 = vpop.f32.mrf.mxu1  ;;  %v4668_v27 = vrot.slane %v4667_v59, 4  ;;  %v4687_v17 = vrot.slane %v4685_v60, 4  ;;  %v664_v58 = vadd.f32 %v13201_v45, %v13330_v36  ;;  %v4712_v60 = vshll.u32 %v10327_v61, 16 }
 0x121   : > { %v4659_v40 = vsel %vm12530_vm2, %v4654_v30, %v4658_v14  ;;  %v4678_v39 = vrot.slane %v4677_v63, 4  ;;  %v4696_v48 = vrot.slane %v4694_v41, 5  ;;  %v4700_v63 = vrot.slane %v4698_v8, 4 }
 0x122   : > { %v13409_v24 = vpop.f32.mrf.mxu0  ;;  %v13438_v20 = vpop.f32.mrf.mxu1  ;;  %v10370_v21 = vcombine.low %v4649_v49, %v4659_v40  ;;  %v4673_v37 = vsel %vm12530_vm2, %v4668_v27, %v4672_v15  ;;  %11540 = vmatmul.mubr.bf16.gmra.mxu0 %v12235_v22  ;;  %v4704_v49 = vshll.u32 %v10326_v56, 16  ;;  %v4690_v40 = vrot.slane %v4688_v52, 5 }
 0x123   : > { %15793 = vst [vmem:[#allocation11_spill] sm:$0xff] %v13409_v24  ;;  %v4683_v59 = vsel %vm12530_vm2, %v4678_v39, %v4682_v1  ;;  %11543 = vmatprep.mubr.bf16.mxu0 %v12237_v29  ;;  %v13487_v22 = vadd.f32 %v13361_v25, %v666_v47  ;;  %v4709_v56 = vshrl.u32 %v10327_v61, 16  ;;  %v4701_v27 = vor.u32 %v4700_v63, %v4696_v48  ;;  %v12238_v25 = vld [vmem:[%s12504_s15 + $0x9c] sm:$0xff]  }
 0x124   : > { %v13417_v3 = vpop.f32.mrf.mxu0  ;;  %v13443_v62 = vpop.f32.mrf.mxu1  ;;  %11583 = vmatprep.mubr.bf16.mxu1 %v10370_v21  ;;  %v4706_v15 = vrot.slane %v4704_v49, 5  ;;  %v4691_v36 = vor.u32 %v4690_v40, %v4687_v17  ;;  %v4718_v1 = vshll.u32 %v10328_v4, 16  ;;  %v4722_v52 = vshrl.u32 %v10328_v4, 16 }
 0x125   : > { %15795 = vst [vmem:[#allocation13_spill] sm:$0xff] %v13443_v62  ;;  %15799 = vst [vmem:[#allocation17_spill] sm:$0xff] %v13487_v22  ;;  %v4711_v29 = vrot.slane %v4709_v56, 4  ;;  %v4728_v41 = vshll.u32 %v10329_v5, 16  ;;  %v667_v8 = vadd.f32 %v13354_v6, %v13201_v45  ;;  %v4714_v49 = vrot.slane %v4712_v60, 5 }
 0x126   : > { %v13428_v57 = vpop.f32.mrf.mxu0  ;;  %v13466_v33 = vpop.f32.mrf.mxu1  ;;  %v4692_v47 = vrot.slane %v4691_v36, 4  ;;  %v4720_v17 = vrot.slane %v4718_v1, 5  ;;  %v4724_v40 = vrot.slane %v4722_v52, 4  ;;  %v13498_v63 = vadd.f32 %v13372_v23, %v664_v58  ;;  %v10331_v56 = vld [vmem:[%s12504_s15 + $0x94] sm:$0xf] }
 0x127   : > { %v4715_v5 = vor.u32 %v4714_v49, %v4711_v29  ;;  %v13507_v36 = vadd.f32 %v13380_v10, %v667_v8  ;;  %v4730_v23 = vrot.slane %v4728_v41, 5  ;;  %v670_v58 = vadd.f32 %v13374_v43, %v13201_v45  ;;  %v10333_v29 = vld [vmem:[%s12504_s15 + $0x9c] sm:$0xf] }
 0x128   : > { %v13440_v24 = vpop.f32.mrf.mxu0  ;;  %v13474_v30 = vpop.f32.mrf.mxu1  ;;  %15802 = vst [vmem:[#allocation20_spill] sm:$0xff] %v13498_v63  ;;  %v4697_v4 = vsel %vm12530_vm2, %v4692_v47, %v4696_v48  ;;  %v4725_v52 = vor.u32 %v4724_v40, %v4720_v17  ;;  %v4746_v41 = vshrl.u32 %v10331_v56, 16  ;;  %v668_v43 = vadd.f32 %v13201_v45, %v13385_v51 }
 0x129   : > { %15803 = vst [vmem:[#allocation21_spill] sm:$0xff] %v13507_v36  ;;  %v13532_v51 = vadd.f32 %v13414_v44, %v670_v58 }
 0x12a   : > { %v13447_v11 = vpop.f32.mrf.mxu0  ;;  %v13482_v34 = vpop.f32.mrf.mxu1  ;;  %11544 = vmatmul.mubr.bf16.gmra.mxu0 %v12238_v25  ;;  %v10334_v25 = vld [vmem:[%s12504_s15 + $0xa0] sm:$0xf] }
 0x12b   : > { %15796 = vst [vmem:[#allocation14_spill] sm:$0xff] %v13447_v11  ;;  %v10371_v11 = vcombine.low %v4673_v37, %v4683_v59  ;;  %v4702_v37 = vrot.slane %v4701_v27, 4  ;;  %v12240_v59 = vld [vmem:[%s12504_s15 + $0xa8] sm:$0xff]   ;;  %v10332_v27 = vld [vmem:[%s12504_s15 + $0x98] sm:$0x1]  ;;  %15804 = vst [vmem:[#allocation22_spill] sm:$0xff] %v13532_v51 }
 0x12c   : > { %v13456_v53 = vpop.f32.mrf.mxu0  ;;  %v13489_v39 = vpop.f32.mrf.mxu1  ;;  %11547 = vmatprep.mubr.bf16.mxu0 %v12240_v59  ;;  %v4752_v49 = vshll.u32 %v10332_v27, 16  ;;  %v4748_v27 = vrot.slane %v4746_v41, 4  ;;  %v4766_v22 = vshll.u32 %v10334_v25, 16  ;;  %v4770_v26 = vshrl.u32 %v10334_v25, 16 }
 0x12d   : > { %15800 = vst [vmem:[#allocation18_spill] sm:$0xff] %v13489_v39  ;;  %11584 = vmatmul.mubr.bf16.gmra.mxu1 %v10371_v11  ;;  %v10330_v11 = vld [vmem:[%s12504_s15 + $0x90] sm:$0xf]  ;;  %v4707_v6 = vsel %vm12530_vm2, %v4702_v37, %v4706_v15  ;;  %v4742_v15 = vshll.u32 %v10331_v56, 16  ;;  %v4726_v37 = vrot.slane %v4725_v52, 4  ;;  %v12241_v52 = vld [vmem:[%s12504_s15 + $0xb4] sm:$0xff]   ;;  %v671_v41 = vadd.f32 %v13393_v16, %v13201_v45 }
 0x12e   : > { %v13471_v14 = vpop.f32.mrf.mxu0  ;;  %v13510_v60 = vpop.f32.mrf.mxu1  ;;  %v10372_v1 = vcombine.low %v4697_v4, %v4707_v6  ;;  %v4733_v48 = vshrl.u32 %v10330_v11, 16  ;;  %v4736_v47 = vshll.u32 %v10330_v11, 16  ;;  %v10335_v6 = vld [vmem:[%s12504_s15 + $0xa4] sm:$0x1] }
 0x12f   : > { %v4744_v59 = vrot.slane %v4742_v15, 5  ;;  %v4731_v56 = vsel %vm12530_vm2, %v4726_v37, %v4730_v23  ;;  %v4776_v23 = vshll.u32 %v10335_v6, 16  ;;  %v13550_v6 = vadd.f32 %v13423_v18, %v668_v43 }
 0x130   : > { %v13484_v21 = vpop.f32.mrf.mxu0  ;;  %v13515_v10 = vpop.f32.mrf.mxu1  ;;  %11587 = vmatprep.mubr.bf16.mxu1 %v10372_v1  ;;  %v4735_v11 = vrot.slane %v4733_v48, 4  ;;  %v4738_v4 = vrot.slane %v4736_v47, 5  ;;  %v4754_v1 = vrot.slane %v4752_v49, 5  ;;  %v4760_v48 = vshll.u32 %v10333_v29, 16  ;;  %v12243_v47 = vld [vmem:[%s12504_s15 + $0xc0] sm:$0xff]  }
 0x131   : > { %v4749_v63 = vor.u32 %v4748_v27, %v4744_v59  ;;  %15806 = vst [vmem:[#allocation24_spill] sm:$0xff] %v13550_v6  ;;  %v10337_v27 = vld [vmem:[%s12504_s15 + $0xac] sm:$0xf]  ;;  %v674_v18 = vadd.f32 %v13417_v3, %v13201_v45  ;;  %v672_v3 = vadd.f32 %v13201_v45, %v13428_v57 }
 0x132   : > { %v13495_v61 = vpop.f32.mrf.mxu0  ;;  %v4762_v58 = vrot.slane %v4760_v48, 5  ;;  %11548 = vmatmul.mubr.bf16.gmra.mxu0 %v12241_v52  ;;  %v13560_v52 = vadd.f32 %v13438_v20, %v671_v41  ;;  %v10339_v20 = vld [vmem:[%s12504_s15 + $0xb4] sm:$0xf] }
 0x133   : > { %15801 = vst [vmem:[#allocation19_spill] sm:$0xff] %v13495_v61  ;;  %v4716_v61 = vrot.slane %v4715_v5, 4  ;;  %v13525_v5 = vpop.f32.mrf.mxu1  ;;  %11551 = vmatprep.mubr.bf16.mxu0 %v12243_v47  ;;  %v12244_v47 = vld [vmem:[%s12504_s15 + $0xcc] sm:$0xff]  }
 0x134   : > { %v13517_v8 = vpop.f32.mrf.mxu0  ;;  %15807 = vst [vmem:[#allocation25_spill] sm:$0xff] %v13560_v52 }
 0x135   : > { %v4721_v40 = vsel %vm12530_vm2, %v4716_v61, %v4720_v17  ;;  %v4739_v17 = vor.u32 %v4738_v4, %v4735_v11  ;;  %v4757_v61 = vshrl.u32 %v10333_v29, 16  ;;  %v13536_v15 = vpop.f32.mrf.mxu1  ;;  %v4768_v11 = vrot.slane %v4766_v22, 5 }
 0x136   : > { %v13527_v39 = vpop.f32.mrf.mxu0  ;;  %v10373_v62 = vcombine.low %v4721_v40, %v4731_v56  ;;  %15805 = vst [vmem:[#allocation23_spill] sm:$0xff] %v13536_v15  ;;  %v4750_v40 = vrot.slane %v4749_v63, 4  ;;  %v4772_v4 = vrot.slane %v4770_v26, 4  ;;  %v10336_v56 = vld [vmem:[%s12504_s15 + $0xa8] sm:$0xf]  ;;  %v4778_v63 = vrot.slane %v4776_v23, 5 }
 0x137   : > { %v4740_v37 = vrot.slane %v4739_v17, 4  ;;  %v4759_v44 = vrot.slane %v4757_v61, 4  ;;  %v13542_v49 = vpop.f32.mrf.mxu1  ;;  %v4781_v43 = vshrl.u32 %v10336_v56, 16  ;;  %v4790_v23 = vshll.u32 %v10337_v27, 16 }
 0x138   : > { %v13538_v36 = vpop.f32.mrf.mxu0  ;;  %11588 = vmatmul.mubr.bf16.gmra.mxu1 %v10373_v62  ;;  %v4755_v22 = vsel %vm12530_vm2, %v4750_v40, %v4754_v1  ;;  %v4773_v26 = vor.u32 %v4772_v4, %v4768_v11  ;;  %v4794_v40 = vshrl.u32 %v10337_v27, 16 }
 0x139   : > { %v4745_v25 = vsel %vm12530_vm2, %v4740_v37, %v4744_v59  ;;  %v4763_v62 = vor.u32 %v4762_v58, %v4759_v44  ;;  %v13553_v16 = vpop.f32.mrf.mxu1  ;;  %v10338_v59 = vld [vmem:[%s12504_s15 + $0xb0] sm:$0x1]  ;;  %v4784_v58 = vshll.u32 %v10336_v56, 16  ;;  %v4783_v4 = vrot.slane %v4781_v43, 4 }
 0x13a   : > { %v13544_v29 = vpop.f32.mrf.mxu0  ;;  %v10374_v61 = vcombine.low %v4745_v25, %v4755_v22  ;;  %v4774_v1 = vrot.slane %v4773_v26, 4  ;;  %v4800_v25 = vshll.u32 %v10338_v59, 16  ;;  %v4792_v27 = vrot.slane %v4790_v23, 5  ;;  %11552 = vmatmul.mubr.bf16.gmra.mxu0 %v12244_v47 }
 0x13b   : > { %v4764_v48 = vrot.slane %v4763_v62, 4  ;;  %v13566_v37 = vpop.f32.mrf.mxu1  ;;  %v10340_v62 = vld [vmem:[%s12504_s15 + $0xb8] sm:$0xf]  ;;  %v4786_v26 = vrot.slane %v4784_v58, 5  ;;  %v4796_v52 = vrot.slane %v4794_v40, 4  ;;  %v4805_v59 = vshrl.u32 %v10339_v20, 16 }
 0x13c   : > { %v13555_v17 = vpop.f32.mrf.mxu0  ;;  %11591 = vmatprep.mubr.bf16.mxu1 %v10374_v61  ;;  %v4779_v56 = vsel %vm12530_vm2, %v4774_v1, %v4778_v63  ;;  %v10341_v61 = vld [vmem:[%s12504_s15 + $0xbc] sm:$0x1]  ;;  %v4802_v51 = vrot.slane %v4800_v25, 5  ;;  %v4814_v28 = vshll.u32 %v10340_v62, 16  ;;  %v4818_v1 = vshrl.u32 %v10340_v62, 16 }
 0x13d   : > { %v4769_v41 = vsel %vm12530_vm2, %v4764_v48, %v4768_v11  ;;  %v13576_v22 = vpop.f32.mrf.mxu1  ;;  %v13584_v11 = vadd.f32 %v13466_v33, %v674_v18  ;;  %v4787_v57 = vor.u32 %v4786_v26, %v4783_v4  ;;  %v4797_v43 = vor.u32 %v4796_v52, %v4792_v27  ;;  %v13593_v33 = vld [vmem:[%s15778_s2] ss:$0 sm:$0xff]  ;;  %v10343_v62 = vld [vmem:[%s12504_s15 + $0xc4] sm:$0xf] }
 0x13e   : > { %v13568_v44 = vpop.f32.mrf.mxu0  ;;  %15808 = vst [vmem:[#allocation26_spill] sm:$0xff] %v13576_v22  ;;  %v10375_v6 = vcombine.low %v4769_v41, %v4779_v56  ;;  %v4808_v22 = vshll.u32 %v10339_v20, 16  ;;  %v4807_v63 = vrot.slane %v4805_v59, 4  ;;  %v4824_v58 = vshll.u32 %v10341_v61, 16  ;;  %v10342_v25 = vld [vmem:[%s12504_s15 + $0xc0] sm:$0xf] }
 0x13f   : > { %15809 = vst [vmem:[#allocation27_spill] sm:$0xff] %v13584_v11  ;;  %v13586_v48 = vpop.f32.mrf.mxu1  ;;  %v675_v18 = vadd.f32 %v13593_v33, %v13440_v24  ;;  %v4788_v40 = vrot.slane %v4787_v57, 4  ;;  %v4798_v47 = vrot.slane %v4797_v43, 4  ;;  %v4820_v41 = vrot.slane %v4818_v1, 4 }
 0x140   : > { %v13578_v15 = vpop.f32.mrf.mxu0  ;;  %11592 = vmatmul.mubr.bf16.gmra.mxu1 %v10375_v6  ;;  %v4810_v20 = vrot.slane %v4808_v22, 5  ;;  %v4816_v6 = vrot.slane %v4814_v28, 5  ;;  %v13602_v4 = vadd.f32 %v13474_v30, %v672_v3  ;;  %v10344_v22 = vld [vmem:[%s12504_s15 + $0xc8] sm:$0x1]  ;;  %v4826_v57 = vrot.slane %v4824_v58, 5 }
 0x141   : > { %v13597_v23 = vpop.f32.mrf.mxu1  ;;  %v4793_v24 = vsel %vm12530_vm2, %v4788_v40, %v4792_v27  ;;  %v4803_v61 = vsel %vm12530_vm2, %v4798_v47, %v4802_v51  ;;  %v13615_v28 = vadd.f32 %v13482_v34, %v675_v18  ;;  %v678_v43 = vadd.f32 %v13593_v33, %v13456_v53  ;;  %v10345_v47 = vld [vmem:[%s12504_s15 + $0xcc] sm:$0xf] }
 0x142   : > { %v13588_v45 = vpop.f32.mrf.mxu0  ;;  %15810 = vst [vmem:[#allocation28_spill] sm:$0xff] %v13602_v4  ;;  %v4811_v59 = vor.u32 %v4810_v20, %v4807_v63  ;;  %v10376_v30 = vcombine.low %v4793_v24, %v4803_v61  ;;  %v4821_v3 = vor.u32 %v4820_v41, %v4816_v6  ;;  %v4829_v40 = vshrl.u32 %v10342_v25, 16  ;;  %v10346_v41 = vld [vmem:[%s12504_s15 + $0xd0] sm:$0xf] }
 0x143   : > { %v13606_v56 = vpop.f32.mrf.mxu1  ;;  %15811 = vst [vmem:[#allocation29_spill] sm:$0xff] %v13615_v28  ;;  %v4832_v51 = vshll.u32 %v10342_v25, 16  ;;  %v4838_v63 = vshll.u32 %v10343_v62, 16  ;;  %v4842_v18 = vshrl.u32 %v10343_v62, 16  ;;  %v4848_v20 = vshll.u32 %v10344_v22, 16 }
 0x144   : > { %v13599_v52 = vpop.f32.mrf.mxu0  ;;  %v4812_v27 = vrot.slane %v4811_v59, 4  ;;  %11595 = vmatprep.mubr.bf16.mxu1 %v10376_v30  ;;  %v4822_v34 = vrot.slane %v4821_v3, 4  ;;  %v676_v58 = vadd.f32 %v13593_v33, %v13471_v14  ;;  %v4831_v59 = vrot.slane %v4829_v40, 4  ;;  %v10347_v28 = vld [vmem:[%s12504_s15 + $0xd4] sm:$0x1] }
 0x145   : > { %v13620_v1 = vpop.f32.mrf.mxu1  ;;  %v4834_v25 = vrot.slane %v4832_v51, 5  ;;  %v4844_v22 = vrot.slane %v4842_v18, 4  ;;  %v4850_v14 = vrot.slane %v4848_v20, 5  ;;  %v13638_v30 = vadd.f32 %v13510_v60, %v678_v43  ;;  %v10388_v51 = vld [vmem:[%s12504_s15 + $0x18] sm:$0xe] }
 0x146   : > { %v13608_v26 = vpop.f32.mrf.mxu0  ;;  %15812 = vst [vmem:[#allocation30_spill] sm:$0xff] %v13620_v1  ;;  %v4817_v61 = vsel %vm12530_vm2, %v4812_v27, %v4816_v6  ;;  %v4840_v1 = vrot.slane %v4838_v63, 5  ;;  %v4827_v62 = vsel %vm12530_vm2, %v4822_v34, %v4826_v57  ;;  %v4853_v27 = vshrl.u32 %v10345_v47, 16  ;;  %v10389_v34 = vld [vmem:[%s12504_s15 + $0x1c] sm:$0xf] }
 0x147   : > { %v13628_v24 = vpop.f32.mrf.mxu1  ;;  %15815 = vst [vmem:[#allocation33_spill] sm:$0xff] %v13638_v30  ;;  %v10377_v19 = vcombine.low %v4817_v61, %v4827_v62  ;;  %v4835_v6 = vor.u32 %v4834_v25, %v4831_v59  ;;  %v4856_v40 = vshll.u32 %v10345_v47, 16  ;;  %v4872_v57 = vshll.u32 %v10347_v28, 16  ;;  %v10390_v18 = vld [vmem:[%s12504_s15 + $0x20] sm:$0x1] }
 0x148   : > { %v13622_v4 = vpop.f32.mrf.mxu0  ;;  %v4845_v63 = vor.u32 %v4844_v22, %v4840_v1  ;;  %v4855_v61 = vrot.slane %v4853_v27, 4  ;;  %v679_v47 = vadd.f32 %v13593_v33, %v13484_v21  ;;  %v10391_v25 = vld [vmem:[%s12504_s15 + $0x24] sm:$0xe]  ;;  %v10392_v28 = vld [vmem:[%s12504_s15 + $0x28] sm:$0xf] }
 0x149   : > { %15813 = vst [vmem:[#allocation31_spill] sm:$0xff] %v13622_v4  ;;  %v13640_v3 = vpop.f32.mrf.mxu1  ;;  %v4866_v4 = vshrl.u32 %v10346_v41, 16  ;;  %11596 = vmatmul.mubr.bf16.gmra.mxu1 %v10377_v19  ;;  %v4836_v43 = vrot.slane %v4835_v6, 4  ;;  %v4858_v59 = vrot.slane %v4856_v40, 5  ;;  %v4874_v30 = vrot.slane %v4872_v57, 5 }
 0x14a   : > { %v13630_v53 = vpop.f32.mrf.mxu0  ;;  %15816 = vst [vmem:[#allocation34_spill] sm:$0xff] %v13640_v3  ;;  %v4846_v62 = vrot.slane %v4845_v63, 4  ;;  %v13662_v6 = vadd.f32 %v13515_v10, %v676_v58  ;;  %v10393_v27 = vld [vmem:[%s12504_s15 + $0x2c] sm:$0x1]  ;;  %v10436_v40 = vrot.slane %v10388_v51, 9  ;;  %v5360_v10 = vrot.slane %v10389_v34, 5 }
 0x14b   : > { %15814 = vst [vmem:[#allocation32_spill] sm:$0xff] %v13630_v53  ;;  %v4862_v53 = vshll.u32 %v10346_v41, 16  ;;  %v13647_v20 = vpop.f32.mrf.mxu1  ;;  %v4868_v41 = vrot.slane %v4866_v4, 4  ;;  %v4841_v19 = vsel %vm12530_vm2, %v4836_v43, %v4840_v1  ;;  %v5363_v58 = vrot.slane %v10390_v18, 5  ;;  %v10395_v51 = vld [vmem:[%s12504_s15 + $0x34] sm:$0xf] }
 0x14c   : > { %v13642_v11 = vpop.f32.mrf.mxu0  ;;  %v4851_v21 = vsel %vm12530_vm2, %v4846_v62, %v4850_v14  ;;  %v2068_v14 = vadd.f32 %v13517_v8, %v13249_v55  ;;  %v10437_v62 = vrot.slane %v10391_v25, 9  ;;  %v5362_v18 = vrot.slane %v5360_v10, 4 }
 0x14d   : > { %15817 = vst [vmem:[#allocation35_spill] sm:$0xff] %v13642_v11  ;;  %v4864_v22 = vrot.slane %v4862_v53, 5  ;;  %v13655_v11 = vpop.f32.mrf.mxu1  ;;  %v13668_v53 = vadd.f32 %v13525_v5, %v679_v47  ;;  %v10378_v1 = vcombine.low %v4841_v19, %v4851_v21  ;;  %v10394_v5 = vld [vmem:[%s12504_s15 + $0x30] sm:$0xe]  ;;  %v10396_v47 = vld [vmem:[%s12504_s15 + $0x38] sm:$0x1]  ;;  %v2066_v25 = vadd.f32 %v13527_v39, %v13266_v50 }
 0x14e   : > { %v13649_v60 = vpop.f32.mrf.mxu0  ;;  %15819 = vst [vmem:[#allocation37_spill] sm:$0xff] %v13655_v11  ;;  %v5367_v55 = vrot.slane %v10392_v28, 5  ;;  %v13694_v19 = vadd.f32 %v13542_v49, %v2068_v14  ;;  %v10397_v21 = vld [vmem:[%s12504_s15 + $0x3c] sm:$0xe]  ;;  %v5364_v28 = vsel %vm12705_vm5, %v5362_v18, %v5363_v58  ;;  %v2069_v39 = vadd.f32 %v13538_v36, %v13278_v32  ;;  %v10400_v36 = vld [vmem:[%s12504_s15 + $0x48] sm:$0xe] }
 0x14f   : > { %15818 = vst [vmem:[#allocation36_spill] sm:$0xff] %v13649_v60  ;;  %v4859_v60 = vor.u32 %v4858_v59, %v4855_v61  ;;  %v4869_v4 = vor.u32 %v4868_v41, %v4864_v22  ;;  %v13670_v63 = vpop.f32.mrf.mxu1  ;;  %v657_v61 = vadd.f32 %v13593_v33, %v13259_v13  ;;  %11599 = vmatprep.mubr.bf16.mxu1 %v10378_v1  ;;  %v10438_v14 = vrot.slane %v10394_v5, 9  ;;  %v10402_v18 = vld [vmem:[%s12504_s15 + $0x50] sm:$0x1] }
 0x150   : > { %v13657_v3 = vpop.f32.mrf.mxu0  ;;  %v5361_v13 = vsel %vm12705_vm5, %v10436_v40, %v5360_v10  ;;  %v5368_v38 = vsel %vm12705_vm5, %v10437_v62, %v5367_v55  ;;  %v13710_v49 = vadd.f32 %v13553_v16, %v2066_v25  ;;  %v13714_v40 = vadd.f32 %v13544_v29, %v13285_v35 }
 0x151   : > { %v4860_v43 = vrot.slane %v4859_v60, 4  ;;  %v4870_v59 = vrot.slane %v4869_v4, 4  ;;  %v13681_v41 = vpop.f32.mrf.mxu1  ;;  %v5370_v60 = vrot.slane %v10393_v27, 5  ;;  %v10398_v4 = vld [vmem:[%s12504_s15 + $0x40] sm:$0xf]  ;;  %v10468_v50 = vcombine.low %v5361_v13, %v5364_v28 }
 0x152   : > { %v13672_v57 = vpop.f32.mrf.mxu0  ;;  %v10399_v27 = vld [vmem:[%s12504_s15 + $0x44] sm:$0x1]  ;;  %v5374_v62 = vrot.slane %v10395_v51, 5  ;;  %v5377_v32 = vrot.slane %v10396_v47, 5  ;;  %v1478_v16 = vadd.f32 %v13293_v54, %v657_v61  ;;  %v13725_v35 = vadd.f32 %v13566_v37, %v2069_v39  ;;  %v10401_v13 = vld [vmem:[%s12504_s15 + $0x4c] sm:$0xf] }
 0x153   : > { %v4865_v34 = vsel %vm12530_vm2, %v4860_v43, %v4864_v22  ;;  %v4875_v8 = vsel %vm12530_vm2, %v4870_v59, %v4874_v30  ;;  %v13698_v1 = vpop.f32.mrf.mxu1  ;;  %v5369_v30 = vrot.slane %v5367_v55, 4  ;;  %11619 = vmatprep.mubr.bf16.mxu0 %v10468_v50  ;;  %v2072_v29 = vadd.f32 %v13555_v17, %v13310_v7 }
 0x154   : > { %v13683_v11 = vpop.f32.mrf.mxu0  ;;  %v10379_v43 = vcombine.low %v4865_v34, %v4875_v8  ;;  %v5375_v51 = vsel %vm12705_vm5, %v10438_v14, %v5374_v62  ;;  %v5376_v47 = vrot.slane %v5374_v62, 4  ;;  %v10439_v54 = vrot.slane %v10397_v21, 9  ;;  %v10403_v8 = vld [vmem:[%s12504_s15 + $0x54] sm:$0xe] }
 0x155   : > { %v13716_v10 = vpop.f32.mrf.mxu1  ;;  %v5371_v59 = vsel %vm12705_vm5, %v5369_v30, %v5370_v60  ;;  %v5381_v61 = vrot.slane %v10398_v4, 5  ;;  %v10404_v60 = vld [vmem:[%s12504_s15 + $0x58] sm:$0xf]  ;;  %v5384_v37 = vrot.slane %v10399_v27, 5  ;;  %v2070_v7 = vadd.f32 %v13568_v44, %v13335_v0  ;;  %v10406_v27 = vld [vmem:[%s12504_s15 + $0x60] sm:$0xe] }
 0x156   : > { %v13700_v22 = vpop.f32.mrf.mxu0  ;;  %15820 = vst [vmem:[#allocation38_spill] sm:$0xff] %v13716_v10  ;;  %11600 = vmatmul.mubr.bf16.gmra.mxu1 %v10379_v43  ;;  %v10469_v34 = vcombine.low %v5368_v38, %v5371_v59  ;;  %v13742_v17 = vadd.f32 %v13586_v48, %v2072_v29  ;;  %v2073_v25 = vadd.f32 %v13578_v15, %v13345_v2  ;;  %v10405_v43 = vld [vmem:[%s12504_s15 + $0x5c] sm:$0x1]  ;;  %v10440_v48 = vrot.slane %v10400_v36, 9 }
 0x157   : > { %v13731_v55 = vpop.f32.mrf.mxu1  ;;  %v5378_v21 = vsel %vm12705_vm5, %v5376_v47, %v5377_v32  ;;  %v5382_v4 = vsel %vm12705_vm5, %v10439_v54, %v5381_v61  ;;  %v5383_v30 = vrot.slane %v5381_v61, 4  ;;  %v13757_v0 = vadd.f32 %v13588_v45, %v13357_v9  ;;  %v15824_v61 = vld [vmem:[#allocation10_spill] sm:$0xff] }
 0x158   : > { %v13718_v58 = vpop.f32.mrf.mxu0  ;;  %11620 = vmatmul.mubr.bf16.vlgmr.msra.gmra.mxu0 %v10469_v34  ;;  %v10470_v44 = vcombine.low %v5375_v51, %v5378_v21  ;;  %v13760_v2 = vadd.f32 %v13597_v23, %v2070_v7  ;;  %v13763_v15 = vadd.f32 %v13606_v56, %v2073_v25  ;;  %v5388_v14 = vrot.slane %v10401_v13, 5  ;;  %v10407_v23 = vld [vmem:[%s12504_s15 + $0x64] sm:$0xf]  ;;  %v10408_v34 = vld [vmem:[%s12504_s15 + $0x68] sm:$0x1]  ;;  %v15828_v21 = vld [vmem:[#allocation32_spill] sm:$0xff] }
 0x159   : > { %v13747_v28 = vpop.f32.mrf.mxu1  ;;  %15822 = vst [vmem:[#allocation40_spill] sm:$0xff] %v13757_v0  ;;  %v5385_v59 = vsel %vm12705_vm5, %v5383_v30, %v5384_v37  ;;  %v5391_v9 = vrot.slane %v10402_v18, 5  ;;  %v2076_v45 = vadd.f32 %v13599_v52, %v13377_v42  ;;  %v661_v56 = vadd.f32 %v13593_v33, %v13315_v12  ;;  %v10409_v52 = vld [vmem:[%s12504_s15 + $0x6c] sm:$0xe]  ;;  %v10410_v12 = vld [vmem:[%s12504_s15 + $0x70] sm:$0xf] }
 0x15a   : > { %v13733_v5 = vpop.f32.mrf.mxu0  ;;  %11623 = vmatprep.mubr.bf16.mxu0 %v10470_v44  ;;  %v10471_v62 = vcombine.low %v5382_v4, %v5385_v59  ;;  %v10441_v32 = vrot.slane %v10403_v8, 9  ;;  %v5395_v36 = vrot.slane %v10404_v60, 5  ;;  %v5389_v13 = vsel %vm12705_vm5, %v10440_v48, %v5388_v14  ;;  %v15825_v8 = vld [vmem:[#allocation31_spill] sm:$0xff] }
 0x15b   : > { %15821 = vst [vmem:[#allocation39_spill] sm:$0xff] %v13733_v5  ;;  %v13766_v50 = vpop.f32.mrf.mxu1  ;;  %v5390_v18 = vrot.slane %v5388_v14, 4  ;;  %v5398_v47 = vrot.slane %v10405_v43, 5  ;;  %v2074_v42 = vadd.f32 %v13608_v26, %v13396_v31  ;;  %v13789_v54 = vadd.f32 %v13628_v24, %v2076_v45  ;;  %v13794_v37 = vld [vmem:[%s12504_s15 + $0x74] sm:$0x1]  ;;  %v15827_v31 = vld [vmem:[#allocation34_spill] sm:$0xff] }
 0x15c   : > { %v13749_v38 = vpop.f32.mrf.mxu0  ;;  %v5397_v33 = vrot.slane %v5395_v36, 4  ;;  %v2077_v60 = vadd.f32 %v15825_v8, %v15824_v61  ;;  %v13806_v24 = vadd.f32 %v15828_v21, %v1478_v16  ;;  %v10442_v4 = vrot.slane %v10406_v27, 9  ;;  %v15830_v30 = vld [vmem:[#allocation7_spill] sm:$0xff]  ;;  %v10412_v45 = vld [vmem:[%s12504_s15 + $0x78] sm:$0xe]  ;;  %v15849_v5 = vld [vmem:[#allocation29_spill] sm:$0xff] }
 0x15d   : > { %v13778_v29 = vpop.f32.mrf.mxu1  ;;  %v5392_v43 = vsel %vm12705_vm5, %v5390_v18, %v5391_v9  ;;  %v13803_v26 = vadd.f32 %v15827_v31, %v2074_v42  ;;  %v1482_v44 = vadd.f32 %v15830_v30, %v661_v56  ;;  %v5402_v14 = vrot.slane %v10407_v23, 5  ;;  %v15831_v42 = vld [vmem:[#allocation12_spill] sm:$0xff]  ;;  %v15832_v56 = vld [vmem:[#allocation35_spill] sm:$0xff]  ;;  %v10414_v8 = vld [vmem:[%s12504_s15 + $0x80] sm:$0x1] }
 0x15e   : > { %v13768_v39 = vpop.f32.mrf.mxu0  ;;  %15823 = vst [vmem:[#allocation41_spill] sm:$0xff] %v13778_v29  ;;  %15829 = vst [vmem:[#allocation31_spill] sm:$0xff] %v13806_v24  ;;  %v10472_v48 = vcombine.low %v5389_v13, %v5392_v43  ;;  %v13810_v59 = vadd.f32 %v13647_v20, %v2077_v60  ;;  %v5396_v18 = vsel %vm12705_vm5, %v10441_v32, %v5395_v36  ;;  %v5405_v27 = vrot.slane %v10408_v34, 5  ;;  %v10413_v13 = vld [vmem:[%s12504_s15 + $0x7c] sm:$0xf]  ;;  %v15833_v34 = vld [vmem:[#allocation15_spill] sm:$0xff] }
 0x15f   : > { %v13796_v7 = vpop.f32.mrf.mxu1  ;;  %v5399_v16 = vsel %vm12705_vm5, %v5397_v33, %v5398_v47  ;;  %v5403_v20 = vsel %vm12705_vm5, %v10442_v4, %v5402_v14  ;;  %v5404_v23 = vrot.slane %v5402_v14, 4  ;;  %v10443_v60 = vrot.slane %v10409_v52, 9  ;;  %v15834_v47 = vld [vmem:[#allocation36_spill] sm:$0xff] }
 0x160   : > { %v13780_v51 = vpop.f32.mrf.mxu0  ;;  %11624 = vmatmul.mubr.bf16.gmra.mxu0 %v10471_v62  ;;  %v2080_v62 = vadd.f32 %v15832_v56, %v15831_v42  ;;  %v5409_v43 = vrot.slane %v10410_v12, 5  ;;  %v5412_v36 = vrot.slane %v13794_v37, 5  ;;  %v2078_v33 = vadd.f32 %v15834_v47, %v15833_v34  ;;  %v15835_v30 = vld [vmem:[#allocation16_spill] sm:$0xff]  ;;  %v13845_v37 = vld [vmem:[%s12504_s15 + $0x88] sm:$0xf] }
 0x161   : > { %v13813_v61 = vpop.f32.mrf.mxu1  ;;  %11627 = vmatprep.mubr.bf16.mxu0 %v10472_v48  ;;  %v2081_v48 = vadd.f32 %v13657_v3, %v15835_v30  ;;  %v10473_v42 = vcombine.low %v5396_v18, %v5399_v16  ;;  %v5406_v52 = vsel %vm12705_vm5, %v5404_v23, %v5405_v27  ;;  %v13842_v4 = vadd.f32 %v13672_v57, %v1482_v44  ;;  %v12246_v3 = vld [vmem:[%s15779_s3 + $0x38] sm:$0xff]   ;;  %v10417_v30 = vld [vmem:[%s12504_s15 + $0x8c] sm:$0x1] }
 0x162   : > { %v13798_v25 = vpop.f32.mrf.mxu0  ;;  %v13835_v21 = vadd.f32 %v13670_v63, %v2080_v62  ;;  %v5411_v12 = vrot.slane %v5409_v43, 4  ;;  %v10474_v18 = vcombine.low %v5403_v20, %v5406_v52  ;;  %v13855_v16 = vadd.f32 %v13681_v41, %v2078_v33  ;;  %v15838_v62 = vld [vmem:[#allocation17_spill] sm:$0xff]  ;;  %11651 = vmatprep.subr.bf16.mxu1 %v12246_v3  ;;  %v10419_v41 = vld [vmem:[%s12504_s15 + $0x94] sm:$0xf]  ;;  %v10418_v33 = vld [vmem:[%s12504_s15 + $0x90] sm:$0xe] }
 0x163   : > { %15826 = vst [vmem:[#allocation10_spill] sm:$0xff] %v13798_v25  ;;  %v13827_v31 = vpop.f32.mrf.mxu1  ;;  %15836 = vst [vmem:[#allocation34_spill] sm:$0xff] %v13842_v4  ;;  %v13858_v27 = vadd.f32 %v13698_v1, %v2081_v48  ;;  %v10444_v57 = vrot.slane %v10412_v45, 9  ;;  %v5416_v44 = vrot.slane %v10413_v13, 5  ;;  %v5419_v56 = vrot.slane %v10414_v8, 5  ;;  %11652 = vmatpush3.bf16.msra.mxu1 %v12246_v3  ;;  %v15840_v13 = vld [vmem:[#allocation20_spill] sm:$0xff] }
 0x164   : > { %v13815_v9 = vpop.f32.mrf.mxu0  ;;  %v2084_v23 = vadd.f32 %v13683_v11, %v15838_v62  ;;  %v10415_v20 = vld [vmem:[%s12504_s15 + $0x84] sm:$0xe]  ;;  %v5410_v1 = vsel %vm12705_vm5, %v10443_v60, %v5409_v43  ;;  %v2082_v8 = vadd.f32 %v13700_v22, %v15840_v13  ;;  %v10420_v11 = vld [vmem:[%s12504_s15 + $0x98] sm:$0x1]  ;;  %v5413_v62 = vsel %vm12705_vm5, %v5411_v12, %v5412_v36  ;;  %v10421_v29 = vld [vmem:[%s12504_s15 + $0x9c] sm:$0xe] }
 0x165   : > { %v13847_v14 = vpop.f32.mrf.mxu1  ;;  %v5418_v45 = vrot.slane %v5416_v44, 4  ;;  %v15841_v60 = vld [vmem:[#allocation21_spill] sm:$0xff]  ;;  %v5417_v22 = vsel %vm12705_vm5, %v10444_v57, %v5416_v44  ;;  %v5430_v12 = vrot.slane %v10419_v41, 5  ;;  %v10445_v57 = vrot.slane %v10415_v20, 9  ;;  %v13984_v4 = vld [vmem:[%s12504_s15 + $0xcc] sm:$0xe] }
 0x166   : > { %v13829_v32 = vpop.f32.mrf.mxu0  ;;  %15837 = vst [vmem:[#allocation32_spill] sm:$0xff] %v13847_v14  ;;  %v13883_v3 = vadd.f32 %v13731_v55, %v2084_v23  ;;  %v2085_v43 = vadd.f32 %v13718_v58, %v15841_v60  ;;  %v5426_v44 = vrot.slane %v10417_v30, 5  ;;  %v10446_v14 = vrot.slane %v10418_v33, 9  ;;  %v10423_v20 = vld [vmem:[%s12504_s15 + $0xa4] sm:$0x1]  ;;  %v15844_v30 = vld [vmem:[#allocation24_spill] sm:$0xff] }
 0x167   : > { %v13862_v34 = vpop.f32.mrf.mxu1  ;;  %v5420_v13 = vsel %vm12705_vm5, %v5418_v45, %v5419_v56  ;;  %v15842_v56 = vld [vmem:[#allocation22_spill] sm:$0xff]  ;;  %v5433_v25 = vrot.slane %v10420_v11, 5  ;;  %v5432_v41 = vrot.slane %v5430_v12, 4  ;;  %v12247_v11 = vld [vmem:[%s15779_s3 + $0x30] sm:$0xff]  }
 0x168   : > { %v13849_v63 = vpop.f32.mrf.mxu0  ;;  %11628 = vmatmul.mubr.bf16.gmra.mxu0 %v10473_v42  ;;  %v5423_v42 = vrot.slane %v13845_v37, 5  ;;  %v13902_v58 = vadd.f32 %v13766_v50, %v2085_v43  ;;  %v10475_v37 = vcombine.low %v5410_v1, %v5413_v62  ;;  %v13912_v50 = vld [vmem:[%s12504_s15 + $0xac] sm:$0xf]  ;;  %v2086_v1 = vadd.f32 %v13768_v39, %v15844_v30  ;;  %v15845_v62 = vld [vmem:[#allocation25_spill] sm:$0xff]  ;;  %11653 = vmatprep.subr.bf16.mxu1 %v12247_v11 }
 0x169   : > { %v13875_v48 = vpop.f32.mrf.mxu1  ;;  %11631 = vmatprep.mubr.bf16.mxu0 %v10474_v18  ;;  %v13895_v18 = vld [vmem:[%s12504_s15 + $0xa0] sm:$0xf]  ;;  %v2089_v43 = vadd.f32 %v13780_v51, %v15845_v62  ;;  %v13940_v51 = vld [vmem:[%s12504_s15 + $0xb0] sm:$0x1]  ;;  %11654 = vmatpush3.bf16.msra.mxu1 %v12247_v11  ;;  %v15848_v11 = vld [vmem:[#allocation28_spill] sm:$0xff]  ;;  %v2093_v10 = vadd.f32 %v13849_v63, %v15849_v5 }
 0x16a   : > { %v13864_v47 = vpop.f32.mrf.mxu0  ;;  %v5425_v60 = vrot.slane %v5423_v42, 4  ;;  %v13931_v39 = vadd.f32 %v13813_v61, %v2086_v1  ;;  %v5424_v61 = vsel %vm12705_vm5, %v10445_v57, %v5423_v42  ;;  %v13956_v1 = vld [vmem:[%s12504_s15 + $0xc4] sm:$0xf]  ;;  %v5444_v42 = vrot.slane %v13912_v50, 5  ;;  %v13964_v57 = vld [vmem:[%s12504_s15 + $0xb4] sm:$0xe] }
 0x16b   : > { %15839 = vst [vmem:[#allocation7_spill] sm:$0xff] %v13864_v47  ;;  %v13892_v47 = vadd.f32 %v13747_v28, %v2082_v8  ;;  %v13897_v36 = vpop.f32.mrf.mxu1  ;;  %v2088_v28 = vadd.f32 %v13749_v38, %v15842_v56  ;;  %v10476_v8 = vcombine.low %v5417_v22, %v5420_v13  ;;  %v5437_v13 = vrot.slane %v13895_v18, 5  ;;  %v13937_v56 = vld [vmem:[%s12504_s15 + $0xa8] sm:$0xe]  ;;  %v15847_v18 = vld [vmem:[#allocation27_spill] sm:$0xff] }
 0x16c   : > { %v13877_v52 = vpop.f32.mrf.mxu0  ;;  %v5446_v63 = vrot.slane %v5444_v42, 4 }
 0x16d   : > { %v13906_v23 = vpop.f32.mrf.mxu1  ;;  %v13918_v38 = vadd.f32 %v13796_v7, %v2088_v28  ;;  %v13934_v7 = vadd.f32 %v13827_v31, %v2089_v43  ;;  %v13943_v28 = vld [vmem:[%s12504_s15 + $0xb8] sm:$0xf]  ;;  %v5427_v31 = vsel %vm12705_vm5, %v5425_v60, %v5426_v44  ;;  %v5431_v43 = vsel %vm12705_vm5, %v10446_v14, %v5430_v12  ;;  %v13967_v44 = vld [vmem:[%s12504_s15 + $0xbc] sm:$0x1]  ;;  %v13972_v12 = vld [vmem:[%s12504_s15 + $0xc0] sm:$0xe] }
 0x16e   : > { %v13899_v55 = vpop.f32.mrf.mxu0  ;;  %15843 = vst [vmem:[#allocation12_spill] sm:$0xff] %v13906_v23  ;;  %v2090_v14 = vadd.f32 %v13829_v32, %v15848_v11  ;;  %v5451_v50 = vrot.slane %v13943_v28, 5  ;;  %v10448_v32 = vrot.slane %v13937_v56, 9  ;;  %v5447_v11 = vrot.slane %v13940_v51, 5  ;;  %v13994_v28 = vld [vmem:[%s12504_s15 + $0xd0] sm:$0xf] }
 0x16f   : > { %v13922_v22 = vpop.f32.mrf.mxu1  ;;  %v10449_v51 = vrot.slane %v13964_v57, 9  ;;  %v2094_v57 = vadd.f32 %v13899_v55, %v13662_v6 }
 0x170   : > { %v13908_v45 = vpop.f32.mrf.mxu0  ;;  %11632 = vmatmul.mubr.bf16.gmra.mxu0 %v10475_v37  ;;  %v2092_v37 = vadd.f32 %v13815_v9, %v15847_v18  ;;  %v5439_v9 = vrot.slane %v5437_v13, 4  ;;  %v5440_v18 = vrot.slane %v10423_v20, 5 }
 0x171   : > { %v13945_v30 = vpop.f32.mrf.mxu1  ;;  %11635 = vmatprep.mubr.bf16.mxu0 %v10476_v8  ;;  %v5434_v8 = vsel %vm12705_vm5, %v5432_v41, %v5433_v25  ;;  %v13975_v25 = vld [vmem:[%s12504_s15 + $0xc8] sm:$0x1] }
 0x172   : > { %v13924_v33 = vpop.f32.mrf.mxu0  ;;  %v13979_v41 = vadd.f32 %v13862_v34, %v2092_v37  ;;  %v10478_v0 = vcombine.low %v5431_v43, %v5434_v8  ;;  %v13997_v34 = vld [vmem:[%s12504_s15 + $0xd4] sm:$0x1]  ;;  %v5458_v37 = vrot.slane %v13956_v1, 5  ;;  %v5454_v8 = vrot.slane %v13967_v44, 5 }
 0x173   : > { %15846 = vst [vmem:[#allocation35_spill] sm:$0xff] %v13924_v33  ;;  %v10447_v33 = vrot.slane %v10421_v29, 9  ;;  %v11410_v60 = vpop.f32.mrf.mxu1  ;;  %v10477_v29 = vcombine.low %v5424_v61, %v5427_v31  ;;  %v13991_v61 = vadd.f32 %v13875_v48, %v2090_v14  ;;  %v14002_v31 = vadd.f32 %v13897_v36, %v2093_v10  ;;  %v15852_v14 = vld [vmem:[#allocation33_spill] sm:$0xff] }
 0x174   : > { %v13947_v62 = vpop.f32.mrf.mxu0  ;;  %v5441_v48 = vsel %vm12705_vm5, %v5439_v9, %v5440_v18  ;;  %v10450_v10 = vrot.slane %v13972_v12, 9  ;;  %v5460_v36 = vrot.slane %v5458_v37, 4  ;;  %v5461_v1 = vrot.slane %v13975_v25, 5  ;;  %v12248_v18 = vld [vmem:[%s15779_s3 + $0x28] sm:$0xff]  }
 0x175   : > { %v13986_v20 = vpop.f32.mrf.mxu1  ;;  %v5438_v5 = vsel %vm12705_vm5, %v10447_v33, %v5437_v13  ;;  %v2096_v33 = vadd.f32 %v13877_v52, %v15852_v14  ;;  %v5453_v13 = vrot.slane %v5451_v50, 4  ;;  %v10451_v9 = vrot.slane %v13984_v4, 9  ;;  %11655 = vmatprep.subr.bf16.mxu1 %v12248_v18 }
 0x176   : > { %v3208_v23 = vpop.f32.mrf.mxu0  ;;  %15850 = vst [vmem:[#allocation15_spill] sm:$0xff] %v13986_v20  ;;  %v2097_v52 = vadd.f32 %v13908_v45, %v13668_v53  ;;  %v5445_v12 = vsel %vm12705_vm5, %v10448_v32, %v5444_v42  ;;  %v5465_v4 = vrot.slane %v13994_v28, 5  ;;  %v5468_v6 = vrot.slane %v13997_v34, 5  ;;  %11656 = vmatpush3.bf16.msra.mxu1 %v12248_v18 }
 0x177   : > { %v14005_v43 = vpop.f32.mrf.mxu1  ;;  %v14023_v44 = vadd.f32 %v13922_v22, %v2096_v33  ;;  %v14039_v25 = vadd.f32 %v13945_v30, %v2094_v57  ;;  %v14045_v45 = vadd.f32 %v13947_v62, %v13694_v19  ;;  %v10479_v42 = vcombine.low %v5438_v5, %v5441_v48 }
 0x178   : > { %v11430_v24 = vpop.f32.mrf.mxu0  ;;  %11636 = vmatmul.mubr.bf16.gmra.mxu0 %v10477_v29  ;;  %v14041_v53 = vadd.f32 %v11410_v60, %v2097_v52  ;;  %v14048_v29 = vadd.f32 %v3208_v23, %v13710_v49  ;;  %v5462_v23 = vsel %vm12705_vm5, %v5460_v36, %v5461_v1  ;;  %v5467_v5 = vrot.slane %v5465_v4, 4  ;;  %v12252_v52 = vld [vmem:[%s15779_s3 + $0x70] sm:$0xff]  }
 0x179   : > { %v14017_v20 = vpop.f32.mrf.mxu1  ;;  %11639 = vmatprep.mubr.bf16.mxu0 %v10478_v0  ;;  %v5448_v0 = vsel %vm12705_vm5, %v5446_v63, %v5447_v11  ;;  %v14051_v32 = vadd.f32 %v11430_v24, %v13725_v35  ;;  %v5452_v24 = vsel %vm12705_vm5, %v10449_v51, %v5451_v50 }
 0x17a   : > { %v14007_v56 = vpop.f32.mrf.mxu0  ;;  %v10480_v30 = vcombine.low %v5445_v12, %v5448_v0  ;;  %v5469_v1 = vsel %vm12705_vm5, %v5467_v5, %v5468_v6  ;;  %v12253_v5 = vld [vmem:[%s15779_s3 + $0x10] sm:$0xff]  }
 0x17b   : > { %15851 = vst [vmem:[#allocation36_spill] sm:$0xff] %v14007_v56  ;;  %v14036_v55 = vpop.f32.mrf.mxu1 }
 0x17c   : > { %v11433_v56 = vpop.f32.mrf.mxu0 }
 0x17d   : > { %v14053_v11 = vpop.f32.mrf.mxu1  ;;  %v14056_v60 = vadd.f32 %v11433_v56, %v13742_v17  ;;  %v5455_v17 = vsel %vm12705_vm5, %v5453_v13, %v5454_v8  ;;  %v12249_v56 = vld [vmem:[%s15779_s3 + $0x20] sm:$0xff]   ;;  %v12251_v13 = vld [vmem:[%s15779_s3 + $0x78] sm:$0xff]  }
 0x17e   : > { %v3224_v22 = vpop.f32.mrf.mxu0  ;;  %v10481_v48 = vcombine.low %v5452_v24, %v5455_v17  ;;  %11657 = vmatprep.subr.bf16.mxu1 %v12249_v56  ;;  %11699 = vmatprep.subr.bf16.mxu0 %v12251_v13 }
 0x17f   : > { %v14059_v34 = vadd.f32 %v3224_v22, %v13760_v2  ;;  %v14061_v19 = vpop.f32.mrf.mxu1  ;;  %v5459_v2 = vsel %vm12705_vm5, %v10450_v10, %v5458_v37  ;;  %11658 = vmatpush3.bf16.msra.mxu1 %v12249_v56  ;;  %11700 = vmatpush3.bf16.msra.mxu0 %v12251_v13 }
 0x180   : > { %v11434_v28 = vpop.f32.mrf.mxu0  ;;  %11640 = vmatmul.mubr.bf16.gmra.mxu0 %v10479_v42  ;;  %v10482_v8 = vcombine.low %v5459_v2, %v5462_v23  ;;  %11701 = vmatprep.subr.bf16.mxu0 %v12252_v52 }
 0x181   : > { %v14064_v62 = vadd.f32 %v11434_v28, %v13763_v15  ;;  %v14068_v35 = vpop.f32.mrf.mxu1  ;;  %11643 = vmatprep.mubr.bf16.mxu0 %v10480_v30  ;;  %v12255_v30 = vld [vmem:[%s15779_s3 + $0x60] sm:$0xff]  }
 0x182   : > { %v14066_v49 = vpop.f32.mrf.mxu0 }
 0x183   : > { %v14078_v15 = vpop.f32.mrf.mxu1  ;;  %11702 = vmatpush3.bf16.msra.mxu0 %v12252_v52 }
 0x184   : > { %v11437_v63 = vpop.f32.mrf.mxu0  ;;  %11703 = vmatprep.subr.bf16.mxu0 %v12254_v46 }
 0x185   : > { %v14084_v50 = vadd.f32 %v11437_v63, %v13789_v54  ;;  %v14086_v51 = vpop.f32.mrf.mxu1 }
 0x186   : > { %v3240_v14 = vpop.f32.mrf.mxu0 }
 0x187   : > { %v14089_v37 = vadd.f32 %v3240_v14, %v13803_v26  ;;  %v14091_v33 = vpop.f32.mrf.mxu1  ;;  %v5466_v26 = vsel %vm12705_vm5, %v10451_v9, %v5465_v4  ;;  %v12250_v9 = vld [vmem:[%s15779_s3 + $0x18] sm:$0xff]   ;;  %11704 = vmatpush3.bf16.msra.mxu0 %v12254_v46  ;;  %v12383_v14 = vmov 0.0  }
 0x188   : > { %v11438_v10 = vpop.f32.mrf.mxu0  ;;  %11644 = vmatmul.mubr.bf16.gmra.mxu0 %v10481_v48  ;;  %11659 = vmatprep.subr.bf16.mxu1 %v12250_v9  ;;  %5926 = vst [vmem:[#allocation2 + $0x30] sm:$0xff] %v12383_v14  ;;  %5927 = vst [vmem:[#allocation2 + $0x38] sm:$0xff] %v12383_v14 }
 0x189   : > { %v14097_v54 = vadd.f32 %v11438_v10, %v13810_v59  ;;  %v14099_v36 = vpop.f32.mrf.mxu1  ;;  %11647 = vmatprep.mubr.bf16.mxu0 %v10482_v8  ;;  %v10483_v59 = vcombine.low %v5466_v26, %v5469_v1  ;;  %11660 = vmatpush3.bf16.msra.mxu1 %v12250_v9  ;;  %5920 = vst [vmem:[#allocation2] sm:$0xff] %v12383_v14  ;;  %5921 = vst [vmem:[#allocation2 + $0x8] sm:$0xff] %v12383_v14  ;;  %v12260_v10 = vld [vmem:[%s15779_s3 + $0x48] sm:$0xff]  }
 0x18a   : > { %v14110_v18 = vpop.f32.mrf.mxu0  ;;  %11705 = vmatprep.subr.bf16.mxu0 %v12255_v30  ;;  %11661 = vmatprep.subr.bf16.mxu1 %v12253_v5  ;;  %5922 = vst [vmem:[#allocation2 + $0x10] sm:$0x3] %v12383_v14  ;;  %5923 = vst [vmem:[#allocation2 + $0x18] sm:$0xff] %v12383_v14 }
 0x18b   : > { %v14105_v57 = vpop.f32.mrf.mxu1  ;;  %11706 = vmatpush3.bf16.msra.mxu0 %v12255_v30  ;;  %5924 = vst [vmem:[#allocation2 + $0x20] sm:$0xff] %v12383_v14  ;;  %5925 = vst [vmem:[#allocation2 + $0x28] sm:$0x3] %v12383_v14 }
 0x18c   : > { %5928 = vst [vmem:[#allocation2 + $0x40] sm:$0x3] %v12383_v14  ;;  %5929 = vst [vmem:[#allocation2 + $0x48] sm:$0xff] %v12383_v14 }
 0x18d   : > { %v14112_v12 = vpop.f32.mrf.mxu1  ;;  %11662 = vmatpush3.bf16.msra.mxu1 %v12253_v5  ;;  %5930 = vst [vmem:[#allocation2 + $0x50] sm:$0xff] %v12383_v14  ;;  %5931 = vst [vmem:[#allocation2 + $0x58] sm:$0x3] %v12383_v14 }
 0x18e   : > { %v11441_v0 = vpop.f32.mrf.mxu0  ;;  %5932 = vst [vmem:[#allocation2 + $0x60] sm:$0xff] %v12383_v14  ;;  %5933 = vst [vmem:[#allocation2 + $0x68] sm:$0xff] %v12383_v14 }
 0x18f   : > { %v14121_v4 = vadd.f32 %v11441_v0, %v13835_v21  ;;  %5934 = vst [vmem:[#allocation2 + $0x70] sm:$0x3] %v12383_v14  ;;  %5935 = vst [vmem:[#allocation2 + $0x78] sm:$0xff] %v12383_v14 }
 0x190   : > { %11648 = vmatmul.mubr.bf16.gmra.mxu0 %v10483_v59  ;;  %v14123_v6 = vpop.f32.mrf.mxu1  ;;  %v3256_v22 = vpop.f32.mrf.mxu0  ;;  %5936 = vst [vmem:[#allocation2 + $0x80] sm:$0xff] %v12383_v14  ;;  %5937 = vst [vmem:[#allocation2 + $0x88] sm:$0x3] %v12383_v14  ;;  %v12261_v59 = vld [vmem:[%s15779_s3 + $0x40] sm:$0xff]  }
 0x191   : > { %v14126_v42 = vadd.f32 %v3256_v22, %v13855_v16  ;;  %v12257_v16 = vld [vmem:[%s15779_s3 + $0x58] sm:$0xff]   ;;  %5938 = vst [vmem:[#allocation2 + $0x90] sm:$0xff] %v12383_v14  ;;  %5939 = vst [vmem:[#allocation2 + $0x98] sm:$0xff] %v12383_v14  ;;  %v6416_v0 = vld [vmem:[#allocation2 + $0x9] sm:$0xff] }
 0x192   : > { %v14128_v28 = vpop.f32.mrf.mxu1  ;;  %v11442_v24 = vpop.f32.mrf.mxu0  ;;  %11707 = vmatprep.subr.bf16.mxu0 %v12257_v16  ;;  %5940 = vst [vmem:[#allocation2 + $0xa0] sm:$0x3] %v12383_v14  ;;  %5941 = vst [vmem:[#allocation2 + $0xa8] sm:$0xff] %v12383_v14 }
 0x193   : > { %15853 = vst [vmem:[#allocation16_spill] sm:$0xff] %v14128_v28  ;;  %v14134_v21 = vadd.f32 %v11442_v24, %v13858_v27  ;;  %11708 = vmatpush3.bf16.msra.mxu0 %v12257_v16  ;;  %v14151_v27 = vld [vmem:[%s15779_s3 + $0x50] sm:$0xff]   ;;  %5942 = vst [vmem:[#allocation2 + $0xb0] sm:$0xff] %v12383_v14 }
 0x194   : > { %v14136_v17 = vpop.f32.mrf.mxu1  ;;  %v14141_v2 = vpop.f32.mrf.mxu0  ;;  %11709 = vmatprep.subr.bf16.mxu0 %v14151_v27  ;;  %5943 = vst [vmem:[#allocation2 + $0xb8] sm:$0x3] %v12383_v14  ;;  %5944 = vst [vmem:[#allocation2 + $0xc0] sm:$0xff] %v12383_v14 }
 0x195   : > { %15854 = vst [vmem:[#allocation17_spill] sm:$0xff] %v14134_v21  ;;  %15855 = vst [vmem:[#allocation20_spill] sm:$0xff] %v14136_v17 }
 0x196   : > { %15856 = vst [vmem:[#allocation21_spill] sm:$0xff] %v14141_v2  ;;  %v14143_v23 = vpop.f32.mrf.mxu1  ;;  %5945 = vst [vmem:[#allocation2 + $0xc8] sm:$0xff] %v12383_v14 }
 0x197   : > { %15857 = vst [vmem:[#allocation22_spill] sm:$0xff] %v14143_v23  ;;  %5946 = vst [vmem:[#allocation2 + $0xd0] sm:$0x3] %v12383_v14  ;;  %11710 = vmatpush3.bf16.msra.mxu0 %v14151_v27  ;;  %v12259_v27 = vld [vmem:[%s15779_s3] sm:$0xff]  }
 0x198   : > { %v14156_v48 = vpop.f32.mrf.mxu1  ;;  %5947 = vst [vmem:[#allocation2 + $0xd8] sm:$0xff] %v12383_v14  ;;  %5948 = vst [vmem:[#allocation2 + $0xe0] sm:$0xff] %v12383_v14  ;;  %11711 = vmatprep.subr.bf16.mxu0 %v12260_v10 }
 0x199   : > { %15859 = vst [vmem:[#allocation25_spill] sm:$0xff] %v14156_v48  ;;  %5949 = vst [vmem:[#allocation2 + $0xe8] sm:$0x3] %v12383_v14 }
 0x19a   : > { %v11445_v63 = vpop.f32.mrf.mxu0  ;;  %5950 = vst [vmem:[#allocation2 + $0xf0] sm:$0xff] %v12383_v14  ;;  %5951 = vst [vmem:[#allocation2 + $0xf8] sm:$0xff] %v12383_v14  ;;  %v14162_v13 = vpop.f32.mrf.mxu1 }
 0x19b   : > { %v14154_v56 = vadd.f32 %v11445_v63, %v13883_v3  ;;  %5952 = vst [vmem:[#allocation2 + $0x100] sm:$0x3] %v12383_v14  ;;  %5953 = vst [vmem:[#allocation2 + $0x108] sm:$0xff] %v12383_v14  ;;  %11712 = vmatpush3.bf16.msra.mxu0 %v12260_v10 }
 0x19c   : > { %v3272_v8 = vpop.f32.mrf.mxu0  ;;  %5954 = vst [vmem:[#allocation2 + $0x110] sm:$0xff] %v12383_v14  ;;  %5955 = vst [vmem:[#allocation2 + $0x118] sm:$0x3] %v12383_v14  ;;  %v14171_v52 = vpop.f32.mrf.mxu1  ;;  %11713 = vmatprep.subr.bf16.mxu0 %v12261_v59 }
 0x19d   : > { %15858 = vst [vmem:[#allocation24_spill] sm:$0xff] %v14154_v56  ;;  %5956 = vst [vmem:[#allocation2 + $0x120] sm:$0xff] %v12383_v14  ;;  %v14160_v3 = vadd.f32 %v3272_v8, %v13892_v47  ;;  %v12256_v47 = vld [vmem:[%s15779_s3 + $0x8] sm:$0xff]  }
 0x19e   : > { %5957 = vst [vmem:[#allocation2 + $0x128] sm:$0xff] %v12383_v14  ;;  %5958 = vst [vmem:[#allocation2 + $0x130] sm:$0x3] %v12383_v14  ;;  %v11446_v26 = vpop.f32.mrf.mxu0  ;;  %11663 = vmatprep.subr.bf16.mxu1 %v12256_v47  ;;  %v14181_v46 = vpop.f32.mrf.mxu1 }
 0x19f   : > { %5959 = vst [vmem:[#allocation2 + $0x138] sm:$0xff] %v12383_v14  ;;  %5960 = vst [vmem:[#allocation2 + $0x140] sm:$0xff] %v12383_v14  ;;  %v14169_v1 = vadd.f32 %v11446_v26, %v13902_v58  ;;  %11664 = vmatpush3.bf16.msra.mxu1 %v12256_v47  ;;  %v6415_v58 = vld [vmem:[#allocation2 + $0x1] sm:$0xff]  ;;  %11714 = vmatpush3.bf16.msra.mxu0 %v12261_v59  ;;  %v12384_v47 = vmov 0.0|0.0   ;;  %v14206_v59 = vld [vmem:[%s15779_s3 + $0xb8] sm:$0xff]  }
 0x1a0   : > { %5961 = vst [vmem:[#allocation2 + $0x148] sm:$0x3] %v12383_v14  ;;  %5962 = vst [vmem:[#allocation2 + $0x150] sm:$0xff] %v12383_v14  ;;  %v14179_v9 = vpop.f32.mrf.mxu0  ;;  %v6447_v22 = vpack.c.bf16 %v6416_v0, %v6415_v58  ;;  %11665 = vmatprep.subr.bf16.mxu1 %v12259_v27  ;;  %11667 = vmatprep.mubr.bf16.mxu1 %v12384_v47 }
 0x1a1   : > { %5963 = vst [vmem:[#allocation2 + $0x158] sm:$0xff] %v12383_v14  ;;  %5964 = vst [vmem:[#allocation2 + $0x160] sm:$0x3] %v12383_v14 }
 0x1a2   : > { %5965 = vst [vmem:[#allocation2 + $0x168] sm:$0xff] %v12383_v14  ;;  %5966 = vst [vmem:[#allocation2 + $0x170] sm:$0xff] %v12383_v14  ;;  %v11449_v30 = vpop.f32.mrf.mxu0  ;;  %11715 = vmatprep.mubr.bf16.mxu0 %v6447_v22 }
 0x1a3   : > { %5967 = vst [vmem:[#allocation2 + $0x178] sm:$0x3] %v12383_v14  ;;  %5968 = vst [vmem:[#allocation2 + $0x180] sm:$0xff] %v12383_v14  ;;  %v14184_v24 = vadd.f32 %v11449_v30, %v13918_v38  ;;  %v14186_v16 = vpop.f32.mrf.mxu1  ;;  %11666 = vmatpush3.bf16.msra.mxu1 %v12259_v27 }
 0x1a4   : > { %5969 = vst [vmem:[#allocation2 + $0x188] sm:$0xff] %v12383_v14  ;;  %5970 = vst [vmem:[#allocation2 + $0x190] sm:$0x3] %v12383_v14  ;;  %v3288_v5 = vpop.f32.mrf.mxu0  ;;  %11747 = vmatprep.subr.bf16.mxu1 %v14206_v59 }
 0x1a5   : > { %5971 = vst [vmem:[#allocation2 + $0x198] sm:$0xff] %v12383_v14  ;;  %5972 = vst [vmem:[#allocation2 + $0x1a0] sm:$0xff] %v12383_v14  ;;  %v14192_v63 = vadd.f32 %v3288_v5, %v13931_v39  ;;  %v14194_v8 = vpop.f32.mrf.mxu1 }
 0x1a6   : > { %5973 = vst [vmem:[#allocation2 + $0x1a8] sm:$0x3] %v12383_v14  ;;  %15860 = vst [vmem:[#allocation27_spill] sm:$0xff] %v14160_v3  ;;  %v11450_v14 = vpop.f32.mrf.mxu0 }
 0x1a7   : > { %15861 = vst [vmem:[#allocation28_spill] sm:$0xff] %v14162_v13  ;;  %15862 = vst [vmem:[#allocation29_spill] sm:$0xff] %v14169_v1  ;;  %v14197_v10 = vadd.f32 %v11450_v14, %v13934_v7  ;;  %v14199_v38 = vpop.f32.mrf.mxu1 }
 0x1a8   : > { %15863 = vst [vmem:[#allocation33_spill] sm:$0xff] %v14171_v52  ;;  %15864 = vst [vmem:[#allocation42_spill] sm:$0xff] %v14179_v9  ;;  %v14201_v26 = vpop.f32.mrf.mxu0 }
 0x1a9   : > { %15865 = vst [vmem:[#allocation43_spill] sm:$0xff] %v14181_v46  ;;  %15866 = vst [vmem:[#allocation44_spill] sm:$0xff] %v14184_v24  ;;  %v14208_v39 = vpop.f32.mrf.mxu1 }
 0x1aa   : > { %15867 = vst [vmem:[#allocation45_spill] sm:$0xff] %v14186_v16  ;;  %15868 = vst [vmem:[#allocation46_spill] sm:$0xff] %v14192_v63 }
 0x1ab   : > { %15869 = vst [vmem:[#allocation47_spill] sm:$0xff] %v14194_v8  ;;  %15870 = vst [vmem:[#allocation48_spill] sm:$0xff] %v14197_v10 }
 0x1ac   : > { %15871 = vst [vmem:[#allocation49_spill] sm:$0xff] %v14199_v38  ;;  %15872 = vst [vmem:[#allocation50_spill] sm:$0xff] %v14201_v26 }
 0x1ad   : > { %15873 = vst [vmem:[#allocation51_spill] sm:$0xff] %v14206_v59  ;;  %15874 = vst [vmem:[#allocation52_spill] sm:$0xff] %v14208_v39 }
 0x1ae   : > { %v11453_v58 = vpop.f32.mrf.mxu0 }
 0x1af   : > { %v14212_v7 = vadd.f32 %v11453_v58, %v13979_v41  ;;  %v14217_v30 = vpop.f32.mrf.mxu1 }
 0x1b0   : > { %v3304_v0 = vpop.f32.mrf.mxu0  ;;  %15877 = vst [vmem:[#allocation55_spill] sm:$0xff] %v14217_v30 }
 0x1b1   : > { %15875 = vst [vmem:[#allocation53_spill] sm:$0xff] %v14212_v7  ;;  %v14215_v22 = vadd.f32 %v3304_v0, %v13991_v61  ;;  %v14222_v14 = vpop.f32.mrf.mxu1 }
 0x1b2   : > { %v11454_v5 = vpop.f32.mrf.mxu0  ;;  %15879 = vst [vmem:[#allocation57_spill] sm:$0xff] %v14222_v14 }
 0x1b3   : > { %15876 = vst [vmem:[#allocation54_spill] sm:$0xff] %v14215_v22  ;;  %v14220_v27 = vadd.f32 %v11454_v5, %v14002_v31  ;;  %v14226_v39 = vpop.f32.mrf.mxu1 }
 0x1b4   : > { %v14224_v47 = vpop.f32.mrf.mxu0  ;;  %15881 = vst [vmem:[#allocation59_spill] sm:$0xff] %v14226_v39  ;;  %v14246_v39 = vld [vmem:[%s15779_s3 + $0xf8] sm:$0xff]  }
 0x1b5   : > { %15878 = vst [vmem:[#allocation56_spill] sm:$0xff] %v14220_v27  ;;  %15880 = vst [vmem:[#allocation58_spill] sm:$0xff] %v14224_v47  ;;  %v14231_v7 = vpop.f32.mrf.mxu1  ;;  %11795 = vmatprep.subr.bf16.mxu0 %v14246_v39 }
 0x1b6   : > { %15883 = vst [vmem:[#allocation61_spill] sm:$0xff] %v14231_v7 }
 0x1ba   : > { %v11457_v38 = vpop.f32.mrf.mxu0 }
 0x1bb   : > { %v14229_v41 = vadd.f32 %v11457_v38, %v14023_v44  ;;  %v14241_v27 = vpop.f32.mrf.mxu1 }
 0x1bc   : > { %v3320_v58 = vpop.f32.mrf.mxu0  ;;  %15887 = vst [vmem:[#allocation65_spill] sm:$0xff] %v14241_v27 }
 0x1bd   : > { %15882 = vst [vmem:[#allocation60_spill] sm:$0xff] %v14229_v41  ;;  %v14234_v61 = vadd.f32 %v3320_v58, %v14039_v25  ;;  %v14249_v41 = vpop.f32.mrf.mxu1 }
 0x1be   : > { %v11458_v0 = vpop.f32.mrf.mxu0  ;;  %15888 = vst [vmem:[#allocation66_spill] sm:$0xff] %v14249_v41 }
 0x1bf   : > { %15884 = vst [vmem:[#allocation62_spill] sm:$0xff] %v14234_v61  ;;  %v14237_v31 = vadd.f32 %v11458_v0, %v14041_v53  ;;  %v14251_v61 = vpop.f32.mrf.mxu1 }
 0x1c0   : > { %v14239_v5 = vpop.f32.mrf.mxu0  ;;  %15889 = vst [vmem:[#allocation67_spill] sm:$0xff] %v14251_v61 }
 0x1c1   : > { %15885 = vst [vmem:[#allocation63_spill] sm:$0xff] %v14237_v31  ;;  %15886 = vst [vmem:[#allocation64_spill] sm:$0xff] %v14239_v5  ;;  %v14257_v31 = vpop.f32.mrf.mxu1 }
 0x1c2   : > { %v11525_v44 = vpop.f32.mrf.mxu0  ;;  %15890 = vst [vmem:[#allocation68_spill] sm:$0xff] %v14257_v31 }
 0x1c4   : > { %v4253_v38 = vpop.f32.mrf.mxu0 }
 0x1c6   : > { %v11526_v25 = vpop.f32.mrf.mxu0 }
 0x1c7   : > { %v11573_v7 = vpop.f32.mrf.mxu1 }
 0x1c8   : > { %v4256_v58 = vpop.f32.mrf.mxu0 }
 0x1c9   : > { %v5071_v41 = vpop.f32.mrf.mxu1 }
 0x1ca   : > { %v14253_v53 = vpop.f32.mrf.mxu0 }
 0x1cb   : > { %v11574_v61 = vpop.f32.mrf.mxu1 }
 0x1cc   : > { %v14255_v0 = vpop.f32.mrf.mxu0 }
 0x1cd   : > { %v5074_v31 = vpop.f32.mrf.mxu1 }
 0x1ce   : > { %v14259_v5 = vpop.f32.mrf.mxu0 }
 0x1d0   : > { %v14261_v27 = vpop.f32.mrf.mxu0 }
 0x1d1   : > { %v14279_v16 = vpop.f32.mrf.mxu1 }
 0x1d2   : > { %v14263_v47 = vpop.f32.mrf.mxu0 }
 0x1d3   : > { %v14285_v52 = vpop.f32.mrf.mxu1 }
 0x1d4   : > { %v14265_v14 = vpop.f32.mrf.mxu0 }
 0x1d5   : > { %v14291_v13 = vpop.f32.mrf.mxu1 }
 0x1d6   : > { %v14267_v22 = vpop.f32.mrf.mxu0 }
 0x1d7   : > { %v14297_v56 = vpop.f32.mrf.mxu1 }
 0x1d8   : > { %v14269_v30 = vpop.f32.mrf.mxu0 }
 0x1da   : > { %v14271_v10 = vpop.f32.mrf.mxu0 }
 0x1db   : > { %15891 = vst [vmem:[#allocation69_spill] sm:$0xff] %v14271_v10 }
 0x1dc   : > { %v14273_v26 = vpop.f32.mrf.mxu0 }
 0x1dd   : > { %15892 = vst [vmem:[#allocation70_spill] sm:$0xff] %v14273_v26 }
 0x1de   : > { %v14275_v8 = vpop.f32.mrf.mxu0 }
 0x1df   : > { %15893 = vst [vmem:[#allocation71_spill] sm:$0xff] %v14275_v8 }
 0x1e0   : > { %v14277_v63 = vpop.f32.mrf.mxu0 }
 0x1e1   : > { %15894 = vst [vmem:[#allocation72_spill] sm:$0xff] %v14277_v63 }
 0x1e2   : > { %v14281_v24 = vpop.f32.mrf.mxu0 }
 0x1e3   : > { %15895 = vst [vmem:[#allocation73_spill] sm:$0xff] %v14281_v24  ;;  %v14303_v24 = vpop.f32.mrf.mxu1 }
 0x1e4   : > { %v14283_v46 = vpop.f32.mrf.mxu0 }
 0x1e5   : > { %15896 = vst [vmem:[#allocation74_spill] sm:$0xff] %v14283_v46  ;;  %v14307_v8 = vpop.f32.mrf.mxu1 }
 0x1e6   : > { %v14287_v1 = vpop.f32.mrf.mxu0 }
 0x1e7   : > { %15897 = vst [vmem:[#allocation75_spill] sm:$0xff] %v14287_v1 }
 0x1e8   : > { %v14289_v9 = vpop.f32.mrf.mxu0 }
 0x1e9   : > { %15898 = vst [vmem:[#allocation76_spill] sm:$0xff] %v14289_v9  ;;  %v14311_v9 = vpop.f32.mrf.mxu1 }
 0x1ea   : > { %v14293_v3 = vpop.f32.mrf.mxu0  ;;  %15905 = vst [vmem:[#allocation83_spill] sm:$0xff] %v14311_v9 }
 0x1eb   : > { %15899 = vst [vmem:[#allocation77_spill] sm:$0xff] %v14293_v3  ;;  %v14315_v3 = vpop.f32.mrf.mxu1 }
 0x1ec   : > { %v14295_v48 = vpop.f32.mrf.mxu0  ;;  %15907 = vst [vmem:[#allocation85_spill] sm:$0xff] %v14315_v3 }
 0x1ed   : > { %15900 = vst [vmem:[#allocation78_spill] sm:$0xff] %v14295_v48  ;;  %v14319_v26 = vpop.f32.mrf.mxu1 }
 0x1ee   : > { %v14299_v63 = vpop.f32.mrf.mxu0  ;;  %15909 = vst [vmem:[#allocation87_spill] sm:$0xff] %v14319_v26 }
 0x1ef   : > { %15901 = vst [vmem:[#allocation79_spill] sm:$0xff] %v14299_v63 }
 0x1f0   : > { %v14301_v59 = vpop.f32.mrf.mxu0 }
 0x1f1   : > { %15902 = vst [vmem:[#allocation80_spill] sm:$0xff] %v14301_v59  ;;  %v14323_v59 = vpop.f32.mrf.mxu1 }
 0x1f2   : > { %v14305_v46 = vpop.f32.mrf.mxu0  ;;  %15911 = vst [vmem:[#allocation89_spill] sm:$0xff] %v14323_v59 }
 0x1f3   : > { %15903 = vst [vmem:[#allocation81_spill] sm:$0xff] %v14305_v46  ;;  %v14327_v46 = vpop.f32.mrf.mxu1 }
 0x1f4   : > { %v14309_v1 = vpop.f32.mrf.mxu0  ;;  %15913 = vst [vmem:[#allocation91_spill] sm:$0xff] %v14327_v46 }
 0x1f5   : > { %15904 = vst [vmem:[#allocation82_spill] sm:$0xff] %v14309_v1  ;;  %v15915_v1 = vld [vmem:[#allocation26_spill] sm:$0xff]  ;;  %v14335_v3 = vpop.f32.mrf.mxu1 }
 0x1f6   : > { %v14313_v23 = vpop.f32.mrf.mxu0  ;;  %v2518_v10 = vadd.f32 %v15915_v1, %v13714_v40  ;;  %15916 = vst [vmem:[#allocation26_spill] sm:$0xff] %v14335_v3  ;;  %v15919_v3 = vld [vmem:[#allocation30_spill] sm:$0xff] }
 0x1f7   : > { %15906 = vst [vmem:[#allocation84_spill] sm:$0xff] %v14313_v23  ;;  %v3931_v23 = vadd.f32 %v14005_v43, %v14045_v45  ;;  %v15918_v45 = vld [vmem:[#allocation40_spill] sm:$0xff] }
 0x1f8   : > { %v14317_v48 = vpop.f32.mrf.mxu0  ;;  %v14344_v46 = vpop.f32.mrf.mxu1  ;;  %v2522_v2 = vadd.f32 %v15919_v3, %v15918_v45 }
 0x1f9   : > { %15908 = vst [vmem:[#allocation86_spill] sm:$0xff] %v14317_v48  ;;  %v3929_v48 = vadd.f32 %v14017_v20, %v14048_v29  ;;  %v4382_v59 = vadd.f32 %v11525_v44, %v3931_v23  ;;  %v3935_v20 = vadd.f32 %v14061_v19, %v14056_v60 }
 0x1fa   : > { %v14321_v63 = vpop.f32.mrf.mxu0 }
 0x1fb   : > { %15910 = vst [vmem:[#allocation88_spill] sm:$0xff] %v14321_v63  ;;  %v15917_v63 = vld [vmem:[#allocation36_spill] sm:$0xff]  ;;  %v5200_v1 = vadd.f32 %v11573_v7, %v4382_v59  ;;  %v3936_v59 = vadd.f32 %v14078_v15, %v14064_v62  ;;  %v15920_v62 = vld [vmem:[#allocation31_spill] sm:$0xff]  ;;  %v15921_v15 = vld [vmem:[#allocation37_spill] sm:$0xff] }
 0x1fc   : > { %v14325_v17 = vpop.f32.mrf.mxu0  ;;  %v3336_v26 = vadd.f32 %v15917_v63, %v2518_v10 }
 0x1fd   : > { %15912 = vst [vmem:[#allocation90_spill] sm:$0xff] %v14325_v17  ;;  %v3932_v17 = vadd.f32 %v14036_v55, %v14051_v32  ;;  %v3933_v55 = vadd.f32 %v14068_v35, %v14059_v34  ;;  %v3340_v32 = vadd.f32 %v14066_v49, %v2522_v2 }
 0x1fe   : > { %v14329_v21 = vpop.f32.mrf.mxu0  ;;  %v3930_v40 = vadd.f32 %v14053_v11, %v3336_v26 }
 0x1ff   : > { %15914 = vst [vmem:[#allocation92_spill] sm:$0xff] %v14329_v21  ;;  %v4380_v21 = vadd.f32 %v4253_v38, %v3929_v48  ;;  %v4383_v43 = vadd.f32 %v11526_v25, %v3932_v17  ;;  %v14354_v48 = vpop.f32.mrf.mxu1  ;;  %v4386_v17 = vadd.f32 %v14253_v53, %v3935_v20  ;;  %v3934_v49 = vadd.f32 %v14086_v51, %v3340_v32 }
 0x200   : > { %v14340_v9 = vpop.f32.mrf.mxu0  ;;  %v4381_v23 = vadd.f32 %v4256_v58, %v3930_v40  ;;  %v3939_v38 = vadd.f32 %v14091_v33, %v14084_v50  ;;  %v15922_v40 = vld [vmem:[#allocation8_spill] sm:$0xff]  ;;  %v3937_v50 = vadd.f32 %v14099_v36, %v14089_v37  ;;  %v3940_v37 = vadd.f32 %v14105_v57, %v14097_v54  ;;  %v15923_v54 = vld [vmem:[#allocation9_spill] sm:$0xff] }
 0x201   : > { %v5198_v29 = vadd.f32 %v5071_v41, %v4380_v21  ;;  %v5201_v10 = vadd.f32 %v11574_v61, %v4383_v43  ;;  %v14361_v35 = vpop.f32.mrf.mxu1  ;;  %v5204_v7 = vadd.f32 %v14279_v16, %v4386_v17  ;;  %v4387_v41 = vadd.f32 %v14259_v5, %v3936_v59  ;;  %v14374_v5 = vld [vmem:[%s15778_s2] ss:$0 sm:$0xff]  ;;  %v15925_v59 = vld [vmem:[#allocation34_spill] sm:$0xff] }
 0x202   : > { %v5199_v19 = vadd.f32 %v5074_v31, %v4381_v23  ;;  %v2526_v31 = vadd.f32 %v15921_v15, %v15920_v62  ;;  %v4385_v25 = vadd.f32 %v14261_v27, %v3934_v49  ;;  %v4390_v27 = vadd.f32 %v14263_v47, %v3939_v38  ;;  %v15929_v15 = vld [vmem:[#allocation83_spill] sm:$0xff]  ;;  %v15930_v38 = vld [vmem:[#allocation69_spill] sm:$0xff] }
 0x203   : > { %v5205_v45 = vadd.f32 %v14291_v13, %v4387_v41  ;;  %v4388_v47 = vadd.f32 %v14265_v14, %v3937_v50  ;;  %v15927_v41 = vld [vmem:[#allocation16_spill] sm:$0xff]  ;;  %v15932_v50 = vld [vmem:[#allocation17_spill] sm:$0xff] }
 0x204   : > { %v3344_v33 = vadd.f32 %v14110_v18, %v2526_v31  ;;  %v5203_v18 = vadd.f32 %v14297_v56, %v4385_v25  ;;  %v5208_v56 = vadd.f32 %v14303_v24, %v4390_v27 }
 0x206   : > { %v3938_v13 = vadd.f32 %v14112_v12, %v3344_v33  ;;  %v12270_v12 = vld [vmem:[%s15779_s3 + $0xe8] sm:$0xff]   ;;  %v15933_v33 = vld [vmem:[#allocation20_spill] sm:$0xff] }
 0x207   : > { %v3944_v27 = vadd.f32 %v15933_v33, %v15932_v50 }
 0x218   : > { %v11621_v28 = vpop.f32.mrf.mxu0 }
 0x219   : > { %v5794_v63 = vadd.f32 %v11621_v28, %v5200_v1  ;;  %v4384_v28 = vadd.f32 %v14255_v0, %v3933_v55  ;;  %v665_v1 = vadd.f32 %v14374_v5, %v15922_v40  ;;  %v15931_v40 = vld [vmem:[#allocation39_spill] sm:$0xff] }
 0x21a   : > { %v5665_v11 = vpop.f32.mrf.mxu0 }
 0x21b   : > { %v5890_v26 = vmax.f32 %v5794_v63, 0.0  ;;  %v5792_v3 = vadd.f32 %v5665_v11, %v5198_v29  ;;  %v5202_v51 = vadd.f32 %v14285_v52, %v4384_v28  ;;  %v14382_v52 = vpop.f32.mrf.mxu1  ;;  %v12268_v63 = vld [vmem:[%s15779_s3 + $0xf0] sm:$0xff]   ;;  %v4391_v11 = vadd.f32 %v14267_v22, %v3940_v37 }
 0x21c   : > { %v11622_v60 = vpop.f32.mrf.mxu0  ;;  %v1486_v57 = vadd.f32 %v15923_v54, %v665_v1  ;;  %v4389_v28 = vadd.f32 %v14269_v30, %v3938_v13  ;;  %v15938_v54 = vld [vmem:[#allocation51_spill] sm:$0xff] }
 0x21d   : > { %5977 = vst [vmem:[#allocation2 + $0x31] sm:$0xff] %v5890_v26  ;;  %v5888_v21 = vmax.f32 %v5792_v3, 0.0  ;;  %v5795_v34 = vadd.f32 %v11622_v60, %v5201_v10  ;;  %v14394_v10 = vpop.f32.mrf.mxu1  ;;  %v15924_v3 = vld [vmem:[#allocation11_spill] sm:$0xff]  ;;  %v15926_v60 = vld [vmem:[#allocation38_spill] sm:$0xff]  ;;  %v5209_v31 = vadd.f32 %v15929_v15, %v4391_v11 }
 0x21e   : > { %v5668_v2 = vpop.f32.mrf.mxu0  ;;  %v669_v22 = vadd.f32 %v14374_v5, %v15924_v3  ;;  %v2083_v1 = vadd.f32 %v15931_v40, %v1486_v57  ;;  %v15939_v57 = vld [vmem:[#allocation13_spill] sm:$0xff] }
 0x21f   : > { %5975 = vst [vmem:[#allocation2 + $0x19] sm:$0xff] %v5888_v21  ;;  %v5891_v61 = vmax.f32 %v5795_v34, 0.0  ;;  %v5793_v44 = vadd.f32 %v5668_v2, %v5199_v19  ;;  %v2530_v19 = vadd.f32 %v15926_v60, %v15925_v59  ;;  %v12264_v60 = vld [vmem:[%s15779_s3 + $0xa8] sm:$0xff]  }
 0x220   : > { %v11625_v58 = vpop.f32.mrf.mxu0 }
 0x221   : > { %5978 = vst [vmem:[#allocation2 + $0x39] sm:$0xff] %v5891_v61  ;;  %v5889_v53 = vmax.f32 %v5793_v44, 0.0  ;;  %v5798_v0 = vadd.f32 %v11625_v58, %v5204_v7  ;;  %v6449_v16 = vpack.c.bf16 %v5891_v61, %v5890_v26  ;;  %v3941_v61 = vadd.f32 %v15927_v41, %v14126_v42  ;;  %v15928_v44 = vld [vmem:[#allocation21_spill] sm:$0xff]  ;;  %v12263_v42 = vld [vmem:[%s15779_s3 + $0xb0] sm:$0xff]  }
 0x222   : > { %v5681_v43 = vpop.f32.mrf.mxu0  ;;  %v3348_v62 = vadd.f32 %v15928_v44, %v2530_v19  ;;  %v15941_v19 = vld [vmem:[#allocation14_spill] sm:$0xff] }
 0x223   : > { %5976 = vst [vmem:[#allocation2 + $0x21] sm:$0xff] %v5889_v53  ;;  %v5894_v20 = vmax.f32 %v5798_v0, 0.0  ;;  %v5796_v29 = vadd.f32 %v5681_v43, %v5202_v51  ;;  %v6448_v23 = vpack.c.bf16 %v5889_v53, %v5888_v21  ;;  %v5206_v21 = vadd.f32 %v14307_v8, %v4388_v47  ;;  %v15936_v47 = vld [vmem:[#allocation22_spill] sm:$0xff] }
 0x224   : > { %v11626_v36 = vpop.f32.mrf.mxu0  ;;  %v6050_v0 = vld [vmem:[#allocation2 + $0x30] sm:$0xff] }
 0x225   : > { %5981 = vst [vmem:[#allocation2 + $0x61] sm:$0xff] %v5894_v20  ;;  %v5892_v55 = vmax.f32 %v5796_v29, 0.0  ;;  %v5799_v32 = vadd.f32 %v11626_v36, %v5205_v45  ;;  %11716 = vmatmul.mubr.bf16.vlgmr.msra.gmra.mxu0 %v6448_v23  ;;  %v15935_v23 = vld [vmem:[#allocation70_spill] sm:$0xff] }
 0x226   : > { %v5684_v17 = vpop.f32.mrf.mxu0  ;;  %11719 = vmatprep.mubr.bf16.mxu0 %v6449_v16  ;;  %11796 = vmatpush3.bf16.msra.mxu0 %v14246_v39  ;;  %v3943_v39 = vadd.f32 %v14123_v6, %v14121_v4  ;;  %v14415_v4 = vpop.f32.mrf.mxu1  ;;  %v6048_v30 = vld [vmem:[#allocation2 + $0x18] sm:$0xff] }
 0x227   : > { %5979 = vst [vmem:[#allocation2 + $0x49] sm:$0xff] %v5892_v55  ;;  %v5895_v14 = vmax.f32 %v5799_v32, 0.0  ;;  %v5797_v26 = vadd.f32 %v5684_v17, %v5203_v18  ;;  %11797 = vmatprep.subr.bf16.mxu0 %v12268_v63  ;;  %v12271_v18 = vld [vmem:[%s15779_s3 + $0xe0] sm:$0xff]   ;;  %v15937_v32 = vld [vmem:[#allocation71_spill] sm:$0xff] }
 0x228   : > { %v11629_v24 = vpop.f32.mrf.mxu0  ;;  %v6051_v2 = vld [vmem:[#allocation2 + $0x38] sm:$0xff]  ;;  %v4394_v25 = vadd.f32 %v15930_v38, %v3943_v39  ;;  %v4395_v13 = vadd.f32 %v15937_v32, %v3944_v27  ;;  %v14435_v11 = vpop.f32.mrf.mxu1  ;;  %v673_v39 = vadd.f32 %v14374_v5, %v15941_v19  ;;  %v15947_v38 = vld [vmem:[#allocation27_spill] sm:$0xff] }
 0x229   : > { %5982 = vst [vmem:[#allocation2 + $0x69] sm:$0xff] %v5895_v14  ;;  %v5893_v34 = vmax.f32 %v5797_v26, 0.0  ;;  %v5802_v49 = vadd.f32 %v11629_v24, %v5208_v56  ;;  %v6451_v7 = vpack.c.bf16 %v5895_v14, %v5894_v20  ;;  %v14425_v45 = vpack.c.bf16 %v6051_v2, %v6050_v0  ;;  %v15934_v20 = vld [vmem:[#allocation85_spill] sm:$0xff]  ;;  %v15940_v14 = vld [vmem:[#allocation87_spill] sm:$0xff] }
 0x22a   : > { %v5697_v6 = vpop.f32.mrf.mxu0  ;;  %v6049_v58 = vld [vmem:[#allocation2 + $0x20] sm:$0xff]  ;;  %11798 = vmatpush3.bf16.msra.mxu0 %v12268_v63  ;;  %v5207_v29 = vadd.f32 %v15934_v20, %v4389_v28  ;;  %v4392_v63 = vadd.f32 %v15935_v23, %v3941_v61  ;;  %v1490_v56 = vadd.f32 %v15939_v57, %v669_v22  ;;  %v5212_v26 = vadd.f32 %v15940_v14, %v4394_v25  ;;  %v15945_v22 = vld [vmem:[#allocation72_spill] sm:$0xff]  ;;  %v15956_v57 = vld [vmem:[#allocation74_spill] sm:$0xff] }
 0x22b   : > { %5980 = vst [vmem:[#allocation2 + $0x51] sm:$0xff] %v5893_v34  ;;  %v5898_v8 = vmax.f32 %v5802_v49, 0.0  ;;  %v5800_v51 = vadd.f32 %v5697_v6, %v5206_v21  ;;  %v14417_v53 = vpack.c.bf16 %v6049_v58, %v6048_v30  ;;  %v6450_v16 = vpack.c.bf16 %v5893_v34, %v5892_v55  ;;  %11799 = vmatprep.subr.bf16.mxu0 %v12270_v12  ;;  %v15942_v28 = vld [vmem:[#allocation41_spill] sm:$0xff]  ;;  %v15943_v21 = vld [vmem:[#allocation24_spill] sm:$0xff]  ;;  %v15949_v30 = vld [vmem:[#allocation42_spill] sm:$0xff] }
 0x22c   : > { %v11630_v43 = vpop.f32.mrf.mxu0  ;;  %v3942_v55 = vadd.f32 %v15936_v47, %v3348_v62  ;;  %v2534_v24 = vadd.f32 %v15942_v28, %v2083_v1  ;;  %v15944_v34 = vld [vmem:[#allocation25_spill] sm:$0xff]  ;;  %v15948_v25 = vld [vmem:[#allocation28_spill] sm:$0xff]  ;;  %v14456_v1 = vpop.f32.mrf.mxu1  ;;  %v15958_v28 = vld [vmem:[#allocation43_spill] sm:$0xff] }
 0x22d   : > { %5985 = vst [vmem:[#allocation2 + $0x91] sm:$0xff] %v5898_v8  ;;  %v5896_v37 = vmax.f32 %v5800_v51, 0.0  ;;  %v5803_v36 = vadd.f32 %v11630_v43, %v5209_v31  ;;  %11668 = vmatmul.mubr.bf16.vlgmr.msra.gmra.mxu1 %v14417_v53  ;;  %11720 = vmatmul.mubr.bf16.gmra.mxu0 %v6450_v16  ;;  %v3947_v49 = vadd.f32 %v15944_v34, %v15943_v21  ;;  %v15946_v61 = vld [vmem:[#allocation89_spill] sm:$0xff]  ;;  %v15950_v51 = vld [vmem:[#allocation91_spill] sm:$0xff]  ;;  %v12273_v23 = vld [vmem:[%s15779_s3 + $0xd8] sm:$0xff]  }
 0x22e   : > { %v5700_v17 = vpop.f32.mrf.mxu0  ;;  %11671 = vmatprep.mubr.bf16.mxu1 %v14425_v45  ;;  %11748 = vmatpush3.bf16.msra.mxu1 %v15938_v54  ;;  %v4393_v2 = vadd.f32 %v15945_v22, %v3942_v55  ;;  %v5210_v44 = vadd.f32 %v15946_v61, %v4392_v63  ;;  %v3945_v6 = vadd.f32 %v15948_v25, %v15947_v38  ;;  %v15951_v16 = vld [vmem:[#allocation73_spill] sm:$0xff]  ;;  %v6052_v50 = vld [vmem:[#allocation2 + $0x48] sm:$0xff]  ;;  %v15959_v21 = vld [vmem:[#allocation75_spill] sm:$0xff]  ;;  %v14480_v34 = vpop.f32.mrf.mxu1 }
 0x22f   : > { %5983 = vst [vmem:[#allocation2 + $0x79] sm:$0xff] %v5896_v37  ;;  %v5899_v3 = vmax.f32 %v5803_v36, 0.0  ;;  %v5801_v59 = vadd.f32 %v5700_v17, %v5207_v29  ;;  %11749 = vmatprep.subr.bf16.mxu1 %v12263_v42  ;;  %11723 = vmatprep.mubr.bf16.mxu0 %v6451_v7  ;;  %v3352_v58 = vadd.f32 %v15949_v30, %v2534_v24  ;;  %v6054_v20 = vld [vmem:[#allocation2 + $0x60] sm:$0xff]  ;;  %v15952_v63 = vld [vmem:[#allocation10_spill] sm:$0xff]  ;;  %v15960_v22 = vld [vmem:[#allocation19_spill] sm:$0xff] }
 0x230   : > { %v11633_v41 = vpop.f32.mrf.mxu0  ;;  %11800 = vmatpush3.bf16.msra.mxu0 %v12270_v12  ;;  %v6055_v15 = vld [vmem:[#allocation2 + $0x68] sm:$0xff]  ;;  %v5213_v0 = vadd.f32 %v15950_v51, %v4395_v13  ;;  %v4398_v40 = vadd.f32 %v15951_v16, %v3947_v49  ;;  %v2087_v36 = vadd.f32 %v15952_v63, %v1490_v56  ;;  %v15953_v47 = vld [vmem:[#allocation29_spill] sm:$0xff]  ;;  %v4396_v14 = vadd.f32 %v15956_v57, %v3945_v6  ;;  %v12274_v56 = vld [vmem:[%s15779_s3 + $0xd0] sm:$0xff]  }
 0x231   : > { %5986 = vst [vmem:[#allocation2 + $0x99] sm:$0xff] %v5899_v3  ;;  %v5897_v7 = vmax.f32 %v5801_v59, 0.0  ;;  %v5806_v62 = vadd.f32 %v11633_v41, %v5212_v26  ;;  %v6453_v31 = vpack.c.bf16 %v5899_v3, %v5898_v8  ;;  %11801 = vmatprep.subr.bf16.mxu0 %v12271_v18  ;;  %v15954_v55 = vld [vmem:[#allocation33_spill] sm:$0xff]  ;;  %v14466_v17 = vpack.c.bf16 %v6055_v15, %v6054_v20  ;;  %v15955_v54 = vld [vmem:[#allocation26_spill] sm:$0xff]  ;;  %v15964_v25 = vld [vmem:[#allocation76_spill] sm:$0xff] }
 0x232   : > { %v5713_v12 = vpop.f32.mrf.mxu0  ;;  %v6053_v33 = vld [vmem:[#allocation2 + $0x50] sm:$0xff]  ;;  %11750 = vmatpush3.bf16.msra.mxu1 %v12263_v42  ;;  %v3948_v32 = vadd.f32 %v15954_v55, %v15953_v47  ;;  %v12265_v42 = vld [vmem:[%s15779_s3 + $0xa0] sm:$0xff]   ;;  %v15957_v59 = vld [vmem:[#allocation18_spill] sm:$0xff]  ;;  %v3946_v24 = vadd.f32 %v15958_v28, %v3352_v58  ;;  %v5216_v41 = vadd.f32 %v14344_v46, %v4398_v40  ;;  %v5214_v46 = vadd.f32 %v14354_v48, %v4396_v14 }
 0x233   : > { %5984 = vst [vmem:[#allocation2 + $0x81] sm:$0xff] %v5897_v7  ;;  %v5902_v27 = vmax.f32 %v5806_v62, 0.0  ;;  %v5804_v43 = vadd.f32 %v5713_v12, %v5210_v44  ;;  %v14458_v8 = vpack.c.bf16 %v6053_v33, %v6052_v50  ;;  %v6452_v29 = vpack.c.bf16 %v5897_v7, %v5896_v37  ;;  %11751 = vmatprep.subr.bf16.mxu1 %v12264_v60  ;;  %v15962_v62 = vld [vmem:[#allocation44_spill] sm:$0xff]  ;;  %v15963_v15 = vld [vmem:[#allocation45_spill] sm:$0xff]  ;;  %v15966_v16 = vld [vmem:[#allocation47_spill] sm:$0xff] }
 0x234   : > { %v11634_v13 = vpop.f32.mrf.mxu0  ;;  %11802 = vmatpush3.bf16.msra.mxu0 %v12271_v18  ;;  %v5211_v37 = vadd.f32 %v15955_v54, %v4393_v2  ;;  %v1494_v19 = vadd.f32 %v15957_v59, %v673_v39  ;;  %v4399_v18 = vadd.f32 %v15959_v21, %v3948_v32  ;;  %v677_v2 = vadd.f32 %v14374_v5, %v15960_v22  ;;  %v15961_v39 = vld [vmem:[#allocation32_spill] sm:$0xff]  ;;  %v15967_v12 = vld [vmem:[#allocation50_spill] sm:$0xff]  ;;  %v6058_v55 = vld [vmem:[#allocation2 + $0x90] sm:$0xff] }
 0x235   : > { %5989 = vst [vmem:[#allocation2 + $0xc1] sm:$0xff] %v5902_v27  ;;  %v5900_v26 = vmax.f32 %v5804_v43, 0.0  ;;  %v5807_v3 = vadd.f32 %v11634_v13, %v5213_v0  ;;  %11672 = vmatmul.mubr.bf16.gmra.mxu1 %v14458_v8  ;;  %11724 = vmatmul.mubr.bf16.gmra.mxu0 %v6452_v29  ;;  %v2538_v7 = vadd.f32 %v15961_v39, %v2087_v36  ;;  %v12266_v5 = vld [vmem:[%s15779_s3 + $0x98] sm:$0xff]   ;;  %v15965_v0 = vld [vmem:[#allocation46_spill] sm:$0xff]  ;;  %v15968_v43 = vld [vmem:[#allocation77_spill] sm:$0xff]  ;;  %v14501_v29 = vpop.f32.mrf.mxu1 }
 0x236   : > { %v5716_v49 = vpop.f32.mrf.mxu0  ;;  %11675 = vmatprep.mubr.bf16.mxu1 %v14466_v17  ;;  %11727 = vmatprep.mubr.bf16.mxu0 %v6453_v31  ;;  %v3951_v38 = vadd.f32 %v15963_v15, %v15962_v62  ;;  %v4397_v6 = vadd.f32 %v15964_v25, %v3946_v24  ;;  %v3949_v40 = vadd.f32 %v15966_v16, %v15965_v0  ;;  %v6056_v48 = vld [vmem:[#allocation2 + $0x78] sm:$0xff]  ;;  %v15969_v13 = vld [vmem:[#allocation7_spill] sm:$0xff]  ;;  %v15971_v57 = vld [vmem:[#allocation49_spill] sm:$0xff] }
 0x237   : > { %5987 = vst [vmem:[#allocation2 + $0xa9] sm:$0xff] %v5900_v26  ;;  %v5903_v61 = vmax.f32 %v5807_v3, 0.0  ;;  %v5805_v44 = vadd.f32 %v5716_v49, %v5211_v37  ;;  %11752 = vmatpush3.bf16.msra.mxu1 %v12264_v60  ;;  %11803 = vmatprep.subr.bf16.mxu0 %v12273_v23  ;;  %v3356_v50 = vadd.f32 %v15967_v12, %v2538_v7  ;;  %v15970_v37 = vld [vmem:[#allocation48_spill] sm:$0xff]  ;;  %v12269_v28 = vld [vmem:[%s15779_s3 + $0x90] sm:$0xff]   ;;  %v15980_v12 = vld [vmem:[#allocation54_spill] sm:$0xff] }
 0x238   : > { %v11637_v30 = vpop.f32.mrf.mxu0  ;;  %11753 = vmatprep.subr.bf16.mxu1 %v12265_v42  ;;  %11804 = vmatpush3.bf16.msra.mxu0 %v12273_v23  ;;  %v6059_v58 = vld [vmem:[#allocation2 + $0x98] sm:$0xff]  ;;  %v5217_v33 = vadd.f32 %v14361_v35, %v4399_v18  ;;  %v4402_v20 = vadd.f32 %v15968_v43, %v3951_v38  ;;  %v12276_v35 = vld [vmem:[%s15779_s3 + $0xc8] sm:$0xff]   ;;  %v2091_v54 = vadd.f32 %v15969_v13, %v1494_v19  ;;  %v12277_v19 = vld [vmem:[%s15779_s3 + $0xc0] sm:$0xff]  }
 0x239   : > { %5990 = vst [vmem:[#allocation2 + $0xc9] sm:$0xff] %v5903_v61  ;;  %v14494_v31 = vmax.f32 %v5805_v44, 0.0  ;;  %v5810_v60 = vadd.f32 %v11637_v30, %v5216_v41  ;;  %v6455_v51 = vpack.c.bf16 %v5903_v61, %v5902_v27  ;;  %11805 = vmatprep.subr.bf16.mxu0 %v12274_v56  ;;  %v3952_v14 = vadd.f32 %v15971_v57, %v15970_v37  ;;  %v15973_v49 = vld [vmem:[#allocation52_spill] sm:$0xff]  ;;  %v15974_v41 = vld [vmem:[#allocation79_spill] sm:$0xff]  ;;  %v14526_v44 = vpop.f32.mrf.mxu1  ;;  %v15982_v43 = vld [vmem:[#allocation58_spill] sm:$0xff] }
 0x23a   : > { %v5729_v23 = vpop.f32.mrf.mxu0  ;;  %v6057_v63 = vld [vmem:[#allocation2 + $0x80] sm:$0xff]  ;;  %v14513_v59 = vpack.c.bf16 %v6059_v58, %v6058_v55  ;;  %v3950_v22 = vadd.f32 %v15973_v49, %v3356_v50  ;;  %v5220_v7 = vadd.f32 %v14394_v10, %v4402_v20  ;;  %v15976_v38 = vld [vmem:[#allocation12_spill] sm:$0xff]  ;;  %v15978_v30 = vld [vmem:[#allocation55_spill] sm:$0xff] }
 0x23b   : > { %5988 = vst [vmem:[#allocation2 + $0xb1] sm:$0xff] %v14494_v31  ;;  %v5906_v36 = vmax.f32 %v5810_v60, 0.0  ;;  %v5808_v47 = vadd.f32 %v5729_v23, %v5214_v46  ;;  %v14504_v27 = vpack.c.bf16 %v6057_v63, %v6056_v48  ;;  %v6454_v32 = vpack.c.bf16 %v14494_v31, %v5900_v26  ;;  %11754 = vmatpush3.bf16.msra.mxu1 %v12265_v42  ;;  %v15972_v26 = vld [vmem:[#allocation78_spill] sm:$0xff]  ;;  %v15979_v60 = vld [vmem:[#allocation80_spill] sm:$0xff]  ;;  %v15981_v50 = vld [vmem:[#allocation57_spill] sm:$0xff] }
 0x23c   : > { %v11638_v3 = vpop.f32.mrf.mxu0  ;;  %11755 = vmatprep.subr.bf16.mxu1 %v12266_v5  ;;  %11806 = vmatpush3.bf16.msra.mxu0 %v12274_v56  ;;  %v5215_v42 = vadd.f32 %v14382_v52, %v4397_v6  ;;  %v4400_v24 = vadd.f32 %v15972_v26, %v3949_v40  ;;  %v4403_v61 = vadd.f32 %v15974_v41, %v3952_v14  ;;  %v15975_v52 = vld [vmem:[#allocation23_spill] sm:$0xff]  ;;  %v15977_v6 = vld [vmem:[#allocation53_spill] sm:$0xff]  ;;  %v15987_v49 = vld [vmem:[#allocation82_spill] sm:$0xff] }
 0x23d   : > { %5993 = vst [vmem:[#allocation2 + $0xf1] sm:$0xff] %v5906_v36  ;;  %v5904_v21 = vmax.f32 %v5808_v47, 0.0  ;;  %v5811_v18 = vadd.f32 %v11638_v3, %v5217_v33  ;;  %11676 = vmatmul.mubr.bf16.gmra.mxu1 %v14504_v27  ;;  %11728 = vmatmul.mubr.bf16.gmra.mxu0 %v6454_v32  ;;  %v1498_v39 = vadd.f32 %v15975_v52, %v677_v2  ;;  %v12272_v2 = vld [vmem:[%s15779_s3 + $0x88] sm:$0xff]   ;;  %v15983_v48 = vld [vmem:[#allocation81_spill] sm:$0xff]  ;;  %v14548_v47 = vpop.f32.mrf.mxu1  ;;  %v15984_v57 = vld [vmem:[#allocation35_spill] sm:$0xff] }
 0x23e   : > { %v5732_v56 = vpop.f32.mrf.mxu0  ;;  %11679 = vmatprep.mubr.bf16.mxu1 %v14513_v59  ;;  %11731 = vmatprep.mubr.bf16.mxu0 %v6455_v51  ;;  %v2542_v25 = vadd.f32 %v15976_v38, %v2091_v54  ;;  %v3955_v46 = vadd.f32 %v15978_v30, %v15977_v6  ;;  %v4401_v58 = vadd.f32 %v15979_v60, %v3950_v22  ;;  %v6060_v55 = vld [vmem:[#allocation2 + $0xa8] sm:$0xff]  ;;  %v15985_v3 = vld [vmem:[#allocation56_spill] sm:$0xff]  ;;  %v15990_v6 = vld [vmem:[#allocation15_spill] sm:$0xff] }
 0x23f   : > { %5991 = vst [vmem:[#allocation2 + $0xd9] sm:$0xff] %v5904_v21  ;;  %v14531_v62 = vmax.f32 %v5811_v18, 0.0  ;;  %v5809_v15 = vadd.f32 %v5732_v56, %v5215_v42  ;;  %11756 = vmatpush3.bf16.msra.mxu1 %v12266_v5  ;;  %11807 = vmatprep.subr.bf16.mxu0 %v12276_v35  ;;  %v5218_v10 = vadd.f32 %v14415_v4, %v4400_v24  ;;  %v15986_v42 = vld [vmem:[#allocation59_spill] sm:$0xff]  ;;  %v15988_v56 = vld [vmem:[#allocation61_spill] sm:$0xff] }
 0x240   : > { %v11641_v0 = vpop.f32.mrf.mxu0  ;;  %11757 = vmatprep.subr.bf16.mxu1 %v12269_v28  ;;  %11808 = vmatpush3.bf16.msra.mxu0 %v12276_v35  ;;  %v6063_v16 = vld [vmem:[#allocation2 + $0xc8] sm:$0xff]  ;;  %v3953_v33 = vadd.f32 %v15981_v50, %v15980_v12  ;;  %v3360_v20 = vadd.f32 %v15982_v43, %v2542_v25  ;;  %v5221_v23 = vadd.f32 %v14435_v11, %v4403_v61  ;;  %v14557_v11 = vld [vmem:[%s15779_s3 + $0x178] sm:$0xff]   ;;  %v15992_v60 = vld [vmem:[#allocation65_spill] sm:$0xff] }
 0x241   : > { %5994 = vst [vmem:[#allocation2 + $0xf9] sm:$0xff] %v14531_v62  ;;  %v5905_v5 = vmax.f32 %v5809_v15, 0.0  ;;  %v5814_v51 = vadd.f32 %v11641_v0, %v5220_v7  ;;  %v6457_v40 = vpack.c.bf16 %v14531_v62, %v5906_v36  ;;  %11809 = vmatprep.subr.bf16.mxu0 %v12277_v19  ;;  %v4406_v63 = vadd.f32 %v15983_v48, %v3955_v46  ;;  %v6062_v36 = vld [vmem:[#allocation2 + $0xc0] sm:$0xff]  ;;  %v11601_v15 = vpop.f32.mrf.mxu1  ;;  %v15991_v46 = vld [vmem:[#allocation60_spill] sm:$0xff]  ;;  %v15993_v0 = vld [vmem:[#allocation86_spill] sm:$0xff] }
 0x242   : > { %v5745_v4 = vpop.f32.mrf.mxu0  ;;  %v6061_v32 = vld [vmem:[#allocation2 + $0xb0] sm:$0xff]  ;;  %v2095_v14 = vadd.f32 %v15984_v57, %v1498_v39  ;;  %v3956_v26 = vadd.f32 %v15986_v42, %v15985_v3  ;;  %v14562_v18 = vpack.c.bf16 %v6063_v16, %v6062_v36  ;;  %v4404_v22 = vadd.f32 %v15987_v49, %v3953_v33  ;;  %v15989_v39 = vld [vmem:[#allocation84_spill] sm:$0xff]  ;;  %v15994_v50 = vld [vmem:[#allocation62_spill] sm:$0xff] }
 0x243   : > { %5992 = vst [vmem:[#allocation2 + $0xe1] sm:$0xff] %v5905_v5  ;;  %v5910_v35 = vmax.f32 %v5814_v51, 0.0  ;;  %v5812_v13 = vadd.f32 %v5745_v4, %v5218_v10  ;;  %v14550_v54 = vpack.c.bf16 %v6061_v32, %v6060_v55  ;;  %v14552_v37 = vpack.c.bf16 %v5905_v5, %v5904_v21  ;;  %11758 = vmatpush3.bf16.msra.mxu1 %v12269_v28  ;;  %v12275_v21 = vld [vmem:[%s15779_s3 + $0x80] sm:$0xff]   ;;  %v15995_v33 = vld [vmem:[#allocation66_spill] sm:$0xff]  ;;  %v5183_v55 = vpop.f32.mrf.mxu1  ;;  %v15998_v42 = vld [vmem:[#allocation63_spill] sm:$0xff] }
 0x244   : > { %v11642_v24 = vpop.f32.mrf.mxu0  ;;  %11759 = vmatprep.subr.bf16.mxu1 %v12272_v2  ;;  %11810 = vmatpush3.bf16.msra.mxu0 %v12277_v19  ;;  %v5219_v28 = vadd.f32 %v14456_v1, %v4401_v58  ;;  %v3954_v52 = vadd.f32 %v15988_v56, %v3360_v20  ;;  %v4407_v7 = vadd.f32 %v15989_v39, %v3956_v26  ;;  %v15996_v20 = vld [vmem:[#allocation64_spill] sm:$0xff]  ;;  %v6066_v3 = vld [vmem:[#allocation2 + $0xf0] sm:$0xff] }
 0x245   : > { %5997 = vst [vmem:[#allocation2 + $0x121] sm:$0xff] %v5910_v35  ;;  %v5908_v41 = vmax.f32 %v5812_v13, 0.0  ;;  %v5815_v61 = vadd.f32 %v11642_v24, %v5221_v23  ;;  %11680 = vmatmul.mubr.bf16.gmra.mxu1 %v14550_v54  ;;  %11732 = vmatmul.mubr.bf16.gmra.mxu0 %v14552_v37  ;;  %v5224_v1 = vadd.f32 %v14480_v34, %v4406_v63  ;;  %v14585_v34 = vld [vmem:[%s15779_s3 + $0x138] sm:$0xff]   ;;  %v15999_v26 = vld [vmem:[#allocation67_spill] sm:$0xff] }
 0x246   : > { %v5748_v38 = vpop.f32.mrf.mxu0  ;;  %11683 = vmatprep.mubr.bf16.mxu1 %v14562_v18  ;;  %11735 = vmatprep.mubr.bf16.mxu0 %v6457_v40  ;;  %v2546_v30 = vadd.f32 %v15990_v6, %v2095_v14  ;;  %v3959_v58 = vadd.f32 %v15992_v60, %v15991_v46  ;;  %v4405_v10 = vadd.f32 %v15993_v0, %v3954_v52  ;;  %v15997_v63 = vld [vmem:[#allocation88_spill] sm:$0xff] }
 0x247   : > { %5995 = vst [vmem:[#allocation2 + $0x109] sm:$0xff] %v5908_v41  ;;  %v14575_v19 = vmax.f32 %v5815_v61, 0.0  ;;  %v5813_v25 = vadd.f32 %v5748_v38, %v5219_v28  ;;  %11760 = vmatpush3.bf16.msra.mxu1 %v12272_v2  ;;  %11891 = vmatprep.subr.bf16.mxu0 %v14557_v11  ;;  %v5222_v51 = vadd.f32 %v14501_v29, %v4404_v22  ;;  %v6064_v13 = vld [vmem:[#allocation2 + $0xd8] sm:$0xff]  ;;  %v16000_v22 = vld [vmem:[#allocation90_spill] sm:$0xff]  ;;  %v11602_v38 = vpop.f32.mrf.mxu1 }
 0x248   : > { %v11645_v5 = vpop.f32.mrf.mxu0  ;;  %11761 = vmatprep.subr.bf16.mxu1 %v12275_v21  ;;  %v6067_v40 = vld [vmem:[#allocation2 + $0xf8] sm:$0xff]  ;;  %v3957_v43 = vadd.f32 %v15995_v33, %v15994_v50  ;;  %v3364_v23 = vadd.f32 %v15996_v20, %v2546_v30  ;;  %v5225_v48 = vadd.f32 %v14526_v44, %v4407_v7  ;;  %v4410_v4 = vadd.f32 %v15997_v63, %v3959_v58 }
 0x249   : > { %5998 = vst [vmem:[#allocation2 + $0x129] sm:$0xff] %v14575_v19  ;;  %v5909_v2 = vmax.f32 %v5813_v25, 0.0  ;;  %v5818_v16 = vadd.f32 %v11645_v5, %v5224_v1  ;;  %v6459_v12 = vpack.c.bf16 %v14575_v19, %v5910_v35  ;;  %v3960_v24 = vadd.f32 %v15999_v26, %v15998_v42  ;;  %v16002_v39 = vld [vmem:[#allocation92_spill] sm:$0xff] }
 0x24a   : > { %v5761_v32 = vpop.f32.mrf.mxu0  ;;  %v6065_v29 = vld [vmem:[#allocation2 + $0xe0] sm:$0xff]  ;;  %v14601_v44 = vpack.c.bf16 %v6067_v40, %v6066_v3  ;;  %v5223_v49 = vadd.f32 %v14548_v47, %v4405_v10  ;;  %v4408_v61 = vadd.f32 %v16000_v22, %v3957_v43  ;;  %v5228_v25 = vadd.f32 %v11601_v15, %v4410_v4 }
 0x24b   : > { %5996 = vst [vmem:[#allocation2 + $0x111] sm:$0xff] %v5909_v2  ;;  %v5914_v36 = vmax.f32 %v5818_v16, 0.0  ;;  %v5816_v57 = vadd.f32 %v5761_v32, %v5222_v51  ;;  %v14595_v14 = vpack.c.bf16 %v6065_v29, %v6064_v13  ;;  %v14597_v35 = vpack.c.bf16 %v5909_v2, %v5908_v41  ;;  %11762 = vmatpush3.bf16.msra.mxu1 %v12275_v21  ;;  %v16001_v21 = vld [vmem:[#allocation68_spill] sm:$0xff]  ;;  %v5186_v2 = vpop.f32.mrf.mxu1  ;;  %v6785_v22 = vld [vmem:[#allocation2 + $0x2] sm:$0xff] }
 0x24c   : > { %v11646_v28 = vpop.f32.mrf.mxu0  ;;  %11843 = vmatprep.subr.bf16.mxu1 %v14585_v34  ;;  %v3958_v41 = vadd.f32 %v16001_v21, %v3364_v23  ;;  %v4411_v7 = vadd.f32 %v16002_v39, %v3960_v24  ;;  %v5226_v60 = vadd.f32 %v5183_v55, %v4408_v61  ;;  %v6070_v43 = vld [vmem:[#allocation2 + $0x120] sm:$0xff]  ;;  %v6786_v61 = vld [vmem:[#allocation2 + $0xa] sm:$0xff] }
 0x24d   : > { %6001 = vst [vmem:[#allocation2 + $0x151] sm:$0xff] %v5914_v36  ;;  %v5912_v56 = vmax.f32 %v5816_v57, 0.0  ;;  %v5819_v52 = vadd.f32 %v11646_v28, %v5225_v48  ;;  %11684 = vmatmul.mubr.bf16.gmra.mxu1 %v14595_v14  ;;  %11736 = vmatmul.mubr.bf16.gmra.mxu0 %v14597_v35  ;;  %v6817_v21 = vpack.c.bf16 %v6786_v61, %v6785_v22  ;;  %v12284_v39 = vld [vmem:[%s15779_s3 + $0x170] sm:$0xff]  }
 0x24e   : > { %v5764_v1 = vpop.f32.mrf.mxu0  ;;  %11687 = vmatprep.mubr.bf16.mxu1 %v14601_v44  ;;  %11739 = vmatprep.mubr.bf16.mxu0 %v6459_v12  ;;  %v4409_v30 = vadd.f32 %v14340_v9, %v3958_v41  ;;  %v5229_v51 = vadd.f32 %v11602_v38, %v4411_v7  ;;  %v6068_v40 = vld [vmem:[#allocation2 + $0x108] sm:$0xff] }
 0x24f   : > { %5999 = vst [vmem:[#allocation2 + $0x139] sm:$0xff] %v5912_v56  ;;  %v5915_v47 = vmax.f32 %v5819_v52, 0.0  ;;  %v5817_v6 = vadd.f32 %v5764_v1, %v5223_v49  ;;  %v6788_v7 = vld [vmem:[#allocation2 + $0x22] sm:$0xff]  ;;  %v6789_v1 = vld [vmem:[#allocation2 + $0x32] sm:$0xff] }
 0x250   : > { %v11649_v46 = vpop.f32.mrf.mxu0  ;;  %v6071_v10 = vld [vmem:[#allocation2 + $0x128] sm:$0xff]  ;;  %v5227_v48 = vadd.f32 %v5186_v2, %v4409_v30 }
 0x251   : > { %6002 = vst [vmem:[#allocation2 + $0x159] sm:$0xff] %v5915_v47  ;;  %v5913_v58 = vmax.f32 %v5817_v6, 0.0  ;;  %v5822_v0 = vadd.f32 %v11649_v46, %v5228_v25  ;;  %v14612_v5 = vpack.c.bf16 %v5915_v47, %v5914_v36  ;;  %v14618_v23 = vpack.c.bf16 %v6071_v10, %v6070_v43  ;;  %v12286_v38 = vld [vmem:[%s15779_s3 + $0x168] sm:$0xff]   ;;  %v6790_v25 = vld [vmem:[#allocation2 + $0x3a] sm:$0xff]  ;;  %v6792_v46 = vld [vmem:[#allocation2 + $0x52] sm:$0xff] }
 0x252   : > { %v5777_v16 = vpop.f32.mrf.mxu0  ;;  %v6069_v50 = vld [vmem:[#allocation2 + $0x110] sm:$0xff]  ;;  %v14653_v6 = vpack.c.bf16 %v6790_v25, %v6789_v1  ;;  %v6796_v2 = vld [vmem:[#allocation2 + $0x82] sm:$0xff] }
 0x253   : > { %6000 = vst [vmem:[#allocation2 + $0x141] sm:$0xff] %v5913_v58  ;;  %v5918_v15 = vmax.f32 %v5822_v0, 0.0  ;;  %v5820_v12 = vadd.f32 %v5777_v16, %v5226_v60  ;;  %v14614_v33 = vpack.c.bf16 %v6069_v50, %v6068_v40  ;;  %v14616_v9 = vpack.c.bf16 %v5913_v58, %v5912_v56  ;;  %v6791_v30 = vld [vmem:[#allocation2 + $0x4a] sm:$0xff]  ;;  %v6793_v60 = vld [vmem:[#allocation2 + $0x62] sm:$0xff]  ;;  %v12282_v16 = vld [vmem:[%s15779_s3 + $0x118] sm:$0xff]  }
 0x254   : > { %v11650_v20 = vpop.f32.mrf.mxu0  ;;  %v6074_v24 = vld [vmem:[#allocation2 + $0x150] sm:$0xff]  ;;  %v14666_v58 = vpack.c.bf16 %v6792_v46, %v6791_v30  ;;  %v12293_v43 = vld [vmem:[%s15779_s3 + $0x140] sm:$0xff]  }
 0x255   : > { %6005 = vst [vmem:[#allocation2 + $0x181] sm:$0xff] %v5918_v15  ;;  %v5916_v63 = vmax.f32 %v5820_v12, 0.0  ;;  %v5823_v4 = vadd.f32 %v11650_v20, %v5229_v51  ;;  %11688 = vmatmul.mubr.bf16.gmra.mxu1 %v14614_v33  ;;  %11740 = vmatmul.mubr.bf16.gmra.mxu0 %v14616_v9  ;;  %v12290_v10 = vld [vmem:[%s15779_s3 + $0x150] sm:$0xff]   ;;  %v6795_v51 = vld [vmem:[#allocation2 + $0x7a] sm:$0xff] }
 0x256   : > { %v5780_v55 = vpop.f32.mrf.mxu0  ;;  %11691 = vmatprep.mubr.bf16.mxu1 %v14618_v23  ;;  %11743 = vmatprep.mubr.bf16.mxu0 %v14612_v5  ;;  %v6072_v3 = vld [vmem:[#allocation2 + $0x138] sm:$0xff]  ;;  %v14686_v50 = vpack.c.bf16 %v6796_v2, %v6795_v51  ;;  %v12285_v12 = vld [vmem:[%s15779_s3 + $0x110] sm:$0xff]  }
 0x257   : > { %6003 = vst [vmem:[#allocation2 + $0x169] sm:$0xff] %v5916_v63  ;;  %v5919_v32 = vmax.f32 %v5823_v4, 0.0  ;;  %v5821_v13 = vadd.f32 %v5780_v55, %v5227_v48  ;;  %v6797_v40 = vld [vmem:[#allocation2 + $0x92] sm:$0xff]  ;;  %v6799_v20 = vld [vmem:[#allocation2 + $0xaa] sm:$0xff]  ;;  %v6801_v4 = vld [vmem:[#allocation2 + $0xc2] sm:$0xff] }
 0x258   : > { %v6075_v36 = vld [vmem:[#allocation2 + $0x158] sm:$0xff]  ;;  %v7529_v2 = vld [vmem:[#allocation2 + $0x49] sm:$0xff] }
 0x259   : > { %6006 = vst [vmem:[#allocation2 + $0x189] sm:$0xff] %v5919_v32  ;;  %v5917_v29 = vmax.f32 %v5821_v13, 0.0  ;;  %v14624_v57 = vpack.c.bf16 %v5919_v32, %v5918_v15  ;;  %v14630_v49 = vpack.c.bf16 %v6075_v36, %v6074_v24  ;;  %v6800_v48 = vld [vmem:[#allocation2 + $0xb2] sm:$0xff]  ;;  %v12291_v13 = vld [vmem:[%s15779_s3 + $0x100] sm:$0xff]  }
 0x25a   : > { %v6073_v42 = vld [vmem:[#allocation2 + $0x140] sm:$0xff]  ;;  %v14706_v55 = vpack.c.bf16 %v6800_v48, %v6799_v20  ;;  %v12305_v20 = vld [vmem:[%s15779_s3 + $0x1d8] sm:$0xff]  }
 0x25b   : > { %6004 = vst [vmem:[#allocation2 + $0x171] sm:$0xff] %v5917_v29  ;;  %v14626_v26 = vpack.c.bf16 %v6073_v42, %v6072_v3  ;;  %v14628_v28 = vpack.c.bf16 %v5917_v29, %v5916_v63  ;;  %v12288_v63 = vld [vmem:[%s15779_s3 + $0x108] sm:$0xff]   ;;  %v6803_v29 = vld [vmem:[#allocation2 + $0xda] sm:$0xff]  ;;  %v6805_v42 = vld [vmem:[#allocation2 + $0xf2] sm:$0xff] }
 0x25c   : > { %v6804_v36 = vld [vmem:[#allocation2 + $0xe2] sm:$0xff]  ;;  %v12294_v3 = vld [vmem:[%s15779_s3 + $0x1b8] sm:$0xff]  }
 0x25d   : > { %11692 = vmatmul.mubr.bf16.gmra.mxu1 %v14626_v26  ;;  %11744 = vmatmul.mubr.bf16.gmra.mxu0 %v14628_v28  ;;  %v6806_v24 = vld [vmem:[#allocation2 + $0xfa] sm:$0xff]  ;;  %v14723_v22 = vpack.c.bf16 %v6804_v36, %v6803_v29  ;;  %v12301_v36 = vld [vmem:[%s15779_s3 + $0x190] sm:$0xff]  }
 0x25e   : > { %11695 = vmatprep.mubr.bf16.mxu1 %v14630_v49  ;;  %11811 = vmatprep.mubr.bf16.mxu0 %v14417_v53  ;;  %v6076_v56 = vld [vmem:[#allocation2 + $0x168] sm:$0xff]  ;;  %v6787_v53 = vld [vmem:[#allocation2 + $0x1a] sm:$0xff]  ;;  %v14725_v61 = vpack.c.bf16 %v6806_v24, %v6805_v42 }
 0x25f   : > { %v14648_v47 = vpack.c.bf16 %v6788_v7, %v6787_v53  ;;  %v6812_v53 = vld [vmem:[#allocation2 + $0x142] sm:$0xff]  ;;  %v7525_v46 = vld [vmem:[#allocation2 + $0x19] sm:$0xff] }
 0x260   : > { %v7186_v7 = vld [vmem:[#allocation2 + $0x188] sm:$0xff]  ;;  %v7185_v1 = vld [vmem:[#allocation2 + $0x180] sm:$0xff] }
 0x261   : > { %v12304_v42 = vld [vmem:[%s15779_s3 + $0x188] sm:$0xff]  }
 0x262   : > { %v6077_v52 = vld [vmem:[#allocation2 + $0x170] sm:$0xff]  ;;  %v7539_v24 = vld [vmem:[#allocation2 + $0xc1] sm:$0xff] }
 0x263   : > { %v14636_v41 = vpack.c.bf16 %v6077_v52, %v6076_v56  ;;  %v6809_v56 = vld [vmem:[#allocation2 + $0x122] sm:$0xff]  ;;  %v6810_v52 = vld [vmem:[#allocation2 + $0x12a] sm:$0xff] }
 0x265   : > { %11696 = vmatmul.mubr.bf16.gmra.mxu1 %v14636_v41  ;;  %11812 = vmatmul.mubr.bf16.vlgmr.msra.gmra.mxu0 %v14425_v45  ;;  %v12279_v45 = vld [vmem:[%s15779_s3 + $0x130] sm:$0xff]  }
 0x266   : > { %11763 = vmatprep.mubr.bf16.mxu1 %v6817_v21  ;;  %11815 = vmatprep.mubr.bf16.mxu0 %v14458_v8  ;;  %v12287_v8 = vld [vmem:[%s15779_s3 + $0x160] sm:$0xff]  }
 0x267   : > { %11892 = vmatpush3.bf16.msra.mxu0 %v14557_v11  ;;  %v12280_v11 = vld [vmem:[%s15779_s3 + $0x128] sm:$0xff]  }
 0x268   : > { %11893 = vmatprep.subr.bf16.mxu0 %v12284_v39 }
 0x26b   : > { %11894 = vmatpush3.bf16.msra.mxu0 %v12284_v39  ;;  %v14733_v39 = vpack.c.bf16 %v6810_v52, %v6809_v56  ;;  %v7926_v52 = vld [vmem:[#allocation2 + $0x18a] sm:$0xff] }
 0x26c   : > { %11895 = vmatprep.subr.bf16.mxu0 %v12286_v38 }
 0x26d   : > { %11764 = vmatmul.mubr.bf16.vlgmr.msra.gmra.mxu1 %v14648_v47  ;;  %11816 = vmatmul.mubr.bf16.gmra.mxu0 %v14466_v17  ;;  %v6794_v17 = vld [vmem:[#allocation2 + $0x6a] sm:$0xff] }
 0x26e   : > { %11767 = vmatprep.mubr.bf16.mxu1 %v14653_v6  ;;  %11844 = vmatpush3.bf16.msra.mxu1 %v14585_v34  ;;  %v12289_v34 = vld [vmem:[%s15779_s3 + $0x158] sm:$0xff]   ;;  %v14671_v0 = vpack.c.bf16 %v6794_v17, %v6793_v60  ;;  %v12300_v17 = vld [vmem:[%s15779_s3 + $0x1f0] sm:$0xff]  }
 0x26f   : > { %11845 = vmatprep.subr.bf16.mxu1 %v12279_v45  ;;  %11819 = vmatprep.mubr.bf16.mxu0 %v14504_v27  ;;  %v12281_v27 = vld [vmem:[%s15779_s3 + $0x120] sm:$0xff]  }
 0x270   : > { %11896 = vmatpush3.bf16.msra.mxu0 %v12286_v38  ;;  %v6814_v38 = vld [vmem:[#allocation2 + $0x15a] sm:$0xff] }
 0x271   : > { %11897 = vmatprep.subr.bf16.mxu0 %v12287_v8 }
 0x272   : > { %11846 = vmatpush3.bf16.msra.mxu1 %v12279_v45  ;;  %v14741_v45 = vpack.c.bf16 %v7186_v7, %v7185_v1  ;;  %v8270_v1 = vld [vmem:[#allocation2 + $0x60] sm:$0xff] }
 0x273   : > { %11847 = vmatprep.subr.bf16.mxu1 %v12280_v11 }
 0x274   : > { %11898 = vmatpush3.bf16.msra.mxu0 %v12287_v8 }
 0x275   : > { %11768 = vmatmul.mubr.bf16.gmra.mxu1 %v14666_v58  ;;  %11820 = vmatmul.mubr.bf16.gmra.mxu0 %v14513_v59  ;;  %v6798_v59 = vld [vmem:[#allocation2 + $0x9a] sm:$0xff] }
 0x276   : > { %11771 = vmatprep.mubr.bf16.mxu1 %v14671_v0  ;;  %11823 = vmatprep.mubr.bf16.mxu0 %v14550_v54  ;;  %v12292_v54 = vld [vmem:[%s15779_s3 + $0x148] sm:$0xff]   ;;  %v14691_v15 = vpack.c.bf16 %v6798_v59, %v6797_v40 }
 0x277   : > { %11848 = vmatpush3.bf16.msra.mxu1 %v12280_v11  ;;  %11899 = vmatprep.subr.bf16.mxu0 %v12289_v34  ;;  %v7526_v11 = vld [vmem:[#allocation2 + $0x21] sm:$0xff]  ;;  %v7532_v59 = vld [vmem:[#allocation2 + $0x69] sm:$0xff] }
 0x278   : > { %11849 = vmatprep.subr.bf16.mxu1 %v12281_v27  ;;  %11900 = vmatpush3.bf16.msra.mxu0 %v12289_v34  ;;  %v7557_v60 = vpack.c.bf16 %v7526_v11, %v7525_v46  ;;  %v12302_v34 = vld [vmem:[%s15779_s3 + $0x1e8] sm:$0xff]  }
 0x279   : > { %11901 = vmatprep.subr.bf16.mxu0 %v12290_v10  ;;  %v12296_v40 = vld [vmem:[%s15779_s3 + $0x1a8] sm:$0xff]  }
 0x27b   : > { %11850 = vmatpush3.bf16.msra.mxu1 %v12281_v27  ;;  %v7530_v27 = vld [vmem:[#allocation2 + $0x51] sm:$0xff] }
 0x27c   : > { %11851 = vmatprep.subr.bf16.mxu1 %v12282_v16  ;;  %11902 = vmatpush3.bf16.msra.mxu0 %v12290_v10  ;;  %v7527_v10 = vld [vmem:[#allocation2 + $0x31] sm:$0xff] }
 0x27d   : > { %11772 = vmatmul.mubr.bf16.gmra.mxu1 %v14686_v50  ;;  %11824 = vmatmul.mubr.bf16.gmra.mxu0 %v14562_v18  ;;  %v6802_v18 = vld [vmem:[#allocation2 + $0xca] sm:$0xff] }
 0x27e   : > { %11775 = vmatprep.mubr.bf16.mxu1 %v14691_v15  ;;  %11827 = vmatprep.mubr.bf16.mxu0 %v14595_v14  ;;  %v12299_v14 = vld [vmem:[%s15779_s3 + $0x1f8] sm:$0xff]   ;;  %v14711_v32 = vpack.c.bf16 %v6802_v18, %v6801_v4 }
 0x27f   : > { %11852 = vmatpush3.bf16.msra.mxu1 %v12282_v16  ;;  %11903 = vmatprep.subr.bf16.mxu0 %v12292_v54  ;;  %v12295_v16 = vld [vmem:[%s15779_s3 + $0x1b0] sm:$0xff]   ;;  %v7536_v4 = vld [vmem:[#allocation2 + $0x99] sm:$0xff] }
 0x280   : > { %11853 = vmatprep.subr.bf16.mxu1 %v12285_v12  ;;  %11904 = vmatpush3.bf16.msra.mxu0 %v12292_v54  ;;  %v7534_v54 = vld [vmem:[#allocation2 + $0x81] sm:$0xff]  ;;  %v12298_v18 = vld [vmem:[%s15779_s3 + $0x198] sm:$0xff]  }
 0x281   : > { %11905 = vmatprep.subr.bf16.mxu0 %v12293_v43 }
 0x283   : > { %11854 = vmatpush3.bf16.msra.mxu1 %v12285_v12  ;;  %v7531_v12 = vld [vmem:[#allocation2 + $0x61] sm:$0xff] }
 0x284   : > { %11855 = vmatprep.subr.bf16.mxu1 %v12288_v63  ;;  %11906 = vmatpush3.bf16.msra.mxu0 %v12293_v43  ;;  %v7533_v43 = vld [vmem:[#allocation2 + $0x79] sm:$0xff] }
 0x285   : > { %11776 = vmatmul.mubr.bf16.gmra.mxu1 %v14706_v55  ;;  %11828 = vmatmul.mubr.bf16.gmra.mxu0 %v14601_v44  ;;  %v6807_v44 = vld [vmem:[#allocation2 + $0x10a] sm:$0xff]  ;;  %v14782_v48 = vpack.c.bf16 %v7534_v54, %v7533_v43 }
 0x286   : > { %11779 = vmatprep.mubr.bf16.mxu1 %v14711_v32  ;;  %11831 = vmatprep.mubr.bf16.mxu0 %v14614_v33  ;;  %v6808_v33 = vld [vmem:[#allocation2 + $0x112] sm:$0xff] }
 0x287   : > { %11856 = vmatpush3.bf16.msra.mxu1 %v12288_v63  ;;  %11987 = vmatprep.subr.bf16.mxu0 %v12299_v14  ;;  %v14731_v21 = vpack.c.bf16 %v6808_v33, %v6807_v44  ;;  %v12306_v63 = vld [vmem:[%s15779_s3 + $0x1d0] sm:$0xff]   ;;  %v12310_v33 = vld [vmem:[%s15779_s3 + $0x238] sm:$0xff]  }
 0x288   : > { %11857 = vmatprep.subr.bf16.mxu1 %v12291_v13  ;;  %v8274_v54 = vld [vmem:[#allocation2 + $0x90] sm:$0xff] }
 0x28b   : > { %11858 = vmatpush3.bf16.msra.mxu1 %v12291_v13 }
 0x28c   : > { %11939 = vmatprep.subr.bf16.mxu1 %v12294_v3 }
 0x28d   : > { %11780 = vmatmul.mubr.bf16.gmra.mxu1 %v14723_v22  ;;  %11832 = vmatmul.mubr.bf16.gmra.mxu0 %v14618_v23  ;;  %v6811_v23 = vld [vmem:[#allocation2 + $0x13a] sm:$0xff] }
 0x28e   : > { %11783 = vmatprep.mubr.bf16.mxu1 %v14725_v61  ;;  %11835 = vmatprep.mubr.bf16.mxu0 %v14626_v26  ;;  %v6813_v26 = vld [vmem:[#allocation2 + $0x152] sm:$0xff]  ;;  %v14739_v25 = vpack.c.bf16 %v6812_v53, %v6811_v23 }
 0x28f   : > { %v14743_v8 = vpack.c.bf16 %v6814_v38, %v6813_v26  ;;  %v8269_v53 = vld [vmem:[#allocation2 + $0x50] sm:$0xff]  ;;  %v8268_v26 = vld [vmem:[#allocation2 + $0x48] sm:$0xff] }
 0x290   : > { %v8299_v38 = vpack.c.bf16 %v8269_v53, %v8268_v26  ;;  %v12315_v26 = vld [vmem:[%s15779_s3 + $0x210] sm:$0xff]  }
 0x295   : > { %11784 = vmatmul.mubr.bf16.gmra.mxu1 %v14731_v21  ;;  %11836 = vmatmul.mubr.bf16.gmra.mxu0 %v14630_v49  ;;  %v6815_v49 = vld [vmem:[#allocation2 + $0x16a] sm:$0xff] }
 0x296   : > { %11787 = vmatprep.mubr.bf16.mxu1 %v14733_v39  ;;  %11839 = vmatprep.mubr.bf16.mxu0 %v14636_v41  ;;  %v6816_v41 = vld [vmem:[#allocation2 + $0x172] sm:$0xff] }
 0x297   : > { %v14749_v30 = vpack.c.bf16 %v6816_v41, %v6815_v49 }
 0x29d   : > { %11788 = vmatmul.mubr.bf16.gmra.mxu1 %v14739_v25  ;;  %11840 = vmatmul.mubr.bf16.gmra.mxu0 %v14741_v45 }
 0x29e   : > { %11791 = vmatprep.mubr.bf16.mxu1 %v14743_v8  ;;  %11907 = vmatprep.mubr.bf16.mxu0 %v14648_v47  ;;  %v7528_v47 = vld [vmem:[#allocation2 + $0x39] sm:$0xff] }
 0x29f   : > { %v14760_v51 = vpack.c.bf16 %v7528_v47, %v7527_v10 }
 0x2a5   : > { %11792 = vmatmul.mubr.bf16.gmra.mxu1 %v14749_v30  ;;  %11908 = vmatmul.mubr.bf16.vlgmr.msra.gmra.mxu0 %v14653_v6  ;;  %v14765_v6 = vpack.c.bf16 %v7530_v27, %v7529_v2  ;;  %v8647_v27 = vld [vmem:[#allocation2 + $0xb1] sm:$0xff] }
 0x2a6   : > { %11859 = vmatprep.mubr.bf16.mxu1 %v7557_v60  ;;  %11911 = vmatprep.mubr.bf16.mxu0 %v14666_v58  ;;  %v12303_v58 = vld [vmem:[%s15779_s3 + $0x1e0] sm:$0xff]   ;;  %v12312_v60 = vld [vmem:[%s15779_s3 + $0x228] sm:$0xff]  }
 0x2a7   : > { %11988 = vmatpush3.bf16.msra.mxu0 %v12299_v14  ;;  %v14797_v14 = vld [vmem:[#allocation2 + $0xa9] sm:$0xff] }
 0x2a8   : > { %11989 = vmatprep.subr.bf16.mxu0 %v12300_v17  ;;  %v7563_v29 = vpack.c.bf16 %v14494_v31, %v14797_v14  ;;  %v7540_v31 = vld [vmem:[#allocation2 + $0xc9] sm:$0xff] }
 0x2a9   : > { %v14818_v44 = vpack.c.bf16 %v7540_v31, %v7539_v24  ;;  %v12314_v31 = vld [vmem:[%s15779_s3 + $0x218] sm:$0xff]   ;;  %v8279_v24 = vld [vmem:[#allocation2 + $0xc8] sm:$0xff] }
 0x2ab   : > { %11990 = vmatpush3.bf16.msra.mxu0 %v12300_v17 }
 0x2ac   : > { %11991 = vmatprep.subr.bf16.mxu0 %v12302_v34 }
 0x2ad   : > { %11860 = vmatmul.mubr.bf16.vlgmr.msra.gmra.mxu1 %v14760_v51  ;;  %11912 = vmatmul.mubr.bf16.gmra.mxu0 %v14671_v0  ;;  %v14777_v0 = vpack.c.bf16 %v7532_v59, %v7531_v12 }
 0x2ae   : > { %11863 = vmatprep.mubr.bf16.mxu1 %v14765_v6  ;;  %11940 = vmatpush3.bf16.msra.mxu1 %v12294_v3  ;;  %v12309_v3 = vld [vmem:[%s15779_s3 + $0x1c0] sm:$0xff]  }
 0x2af   : > { %11941 = vmatprep.subr.bf16.mxu1 %v12295_v16  ;;  %11915 = vmatprep.mubr.bf16.mxu0 %v14686_v50  ;;  %v12297_v50 = vld [vmem:[%s15779_s3 + $0x1a0] sm:$0xff]  }
 0x2b0   : > { %11992 = vmatpush3.bf16.msra.mxu0 %v12302_v34  ;;  %v8273_v34 = vld [vmem:[#allocation2 + $0x80] sm:$0xff] }
 0x2b1   : > { %11993 = vmatprep.subr.bf16.mxu0 %v12303_v58 }
 0x2b2   : > { %11942 = vmatpush3.bf16.msra.mxu1 %v12295_v16 }
 0x2b3   : > { %11943 = vmatprep.subr.bf16.mxu1 %v12296_v40 }
 0x2b4   : > { %11994 = vmatpush3.bf16.msra.mxu0 %v12303_v58  ;;  %v8272_v58 = vld [vmem:[#allocation2 + $0x78] sm:$0xff] }
 0x2b5   : > { %11864 = vmatmul.mubr.bf16.gmra.mxu1 %v14777_v0  ;;  %11916 = vmatmul.mubr.bf16.gmra.mxu0 %v14691_v15  ;;  %v7535_v15 = vld [vmem:[#allocation2 + $0x91] sm:$0xff]  ;;  %v8301_v59 = vpack.c.bf16 %v8273_v34, %v8272_v58 }
 0x2b6   : > { %11867 = vmatprep.mubr.bf16.mxu1 %v14782_v48  ;;  %11919 = vmatprep.mubr.bf16.mxu0 %v14706_v55  ;;  %v14799_v13 = vpack.c.bf16 %v7536_v4, %v7535_v15  ;;  %v12308_v55 = vld [vmem:[%s15779_s3 + $0x1c8] sm:$0xff]  }
 0x2b7   : > { %11944 = vmatpush3.bf16.msra.mxu1 %v12296_v40  ;;  %11995 = vmatprep.subr.bf16.mxu0 %v12305_v20 }
 0x2b8   : > { %11945 = vmatprep.subr.bf16.mxu1 %v12297_v50  ;;  %11996 = vmatpush3.bf16.msra.mxu0 %v12305_v20 }
 0x2b9   : > { %11997 = vmatprep.subr.bf16.mxu0 %v12306_v63 }
 0x2bb   : > { %11946 = vmatpush3.bf16.msra.mxu1 %v12297_v50  ;;  %v12313_v50 = vld [vmem:[%s15779_s3 + $0x220] sm:$0xff]  }
 0x2bc   : > { %11947 = vmatprep.subr.bf16.mxu1 %v12298_v18  ;;  %11998 = vmatpush3.bf16.msra.mxu0 %v12306_v63 }
 0x2bd   : > { %11868 = vmatmul.mubr.bf16.gmra.mxu1 %v14799_v13  ;;  %11920 = vmatmul.mubr.bf16.gmra.mxu0 %v14711_v32  ;;  %v12307_v32 = vld [vmem:[%s15779_s3 + $0x180] sm:$0xff]  }
 0x2be   : > { %11871 = vmatprep.mubr.bf16.mxu1 %v7563_v29  ;;  %11923 = vmatprep.mubr.bf16.mxu0 %v14723_v22  ;;  %v14827_v22 = vld [vmem:[#allocation2 + $0xf1] sm:$0xff] }
 0x2bf   : > { %11948 = vmatpush3.bf16.msra.mxu1 %v12298_v18  ;;  %11999 = vmatprep.subr.bf16.mxu0 %v12308_v55  ;;  %v7566_v56 = vpack.c.bf16 %v14531_v62, %v14827_v22  ;;  %v7925_v62 = vld [vmem:[#allocation2 + $0x182] sm:$0xff] }
 0x2c0   : > { %11949 = vmatprep.subr.bf16.mxu1 %v12301_v36  ;;  %12000 = vmatpush3.bf16.msra.mxu0 %v12308_v55 }
 0x2c1   : > { %12001 = vmatprep.subr.bf16.mxu0 %v12309_v3 }
 0x2c3   : > { %11950 = vmatpush3.bf16.msra.mxu1 %v12301_v36  ;;  %v8277_v36 = vld [vmem:[#allocation2 + $0xb0] sm:$0xff] }
 0x2c4   : > { %11951 = vmatprep.subr.bf16.mxu1 %v12304_v42  ;;  %12002 = vmatpush3.bf16.msra.mxu0 %v12309_v3  ;;  %v8651_v3 = vld [vmem:[#allocation2 + $0xe1] sm:$0xff] }
 0x2c5   : > { %11872 = vmatmul.mubr.bf16.gmra.mxu1 %v14818_v44  ;;  %11924 = vmatmul.mubr.bf16.gmra.mxu0 %v14725_v61 }
 0x2c6   : > { %11875 = vmatprep.mubr.bf16.mxu1 %v14552_v37  ;;  %11927 = vmatprep.mubr.bf16.mxu0 %v14731_v21  ;;  %v14837_v37 = vld [vmem:[#allocation2 + $0x121] sm:$0xff]  ;;  %v14844_v21 = vpack.c.bf16 %v7926_v52, %v7925_v62  ;;  %v8650_v62 = vld [vmem:[#allocation2 + $0xd9] sm:$0xff] }
 0x2c7   : > { %11952 = vmatpush3.bf16.msra.mxu1 %v12304_v42  ;;  %v7568_v61 = vpack.c.bf16 %v14575_v19, %v14837_v37  ;;  %v8267_v19 = vld [vmem:[#allocation2 + $0x38] sm:$0xff] }
 0x2c8   : > { %11953 = vmatprep.subr.bf16.mxu1 %v12307_v32 }
 0x2cb   : > { %11954 = vmatpush3.bf16.msra.mxu1 %v12307_v32 }
 0x2cc   : > { %12035 = vmatprep.subr.bf16.mxu1 %v12310_v33 }
 0x2cd   : > { %11876 = vmatmul.mubr.bf16.gmra.mxu1 %v7566_v56  ;;  %11928 = vmatmul.mubr.bf16.gmra.mxu0 %v14733_v39 }
 0x2ce   : > { %11879 = vmatprep.mubr.bf16.mxu1 %v14597_v35  ;;  %11931 = vmatprep.mubr.bf16.mxu0 %v14739_v25  ;;  %v8266_v35 = vld [vmem:[#allocation2 + $0x30] sm:$0xff] }
 0x2cf   : > { %v8298_v39 = vpack.c.bf16 %v8267_v19, %v8266_v35  ;;  %v8278_v35 = vld [vmem:[#allocation2 + $0xc0] sm:$0xff] }
 0x2d5   : > { %11880 = vmatmul.mubr.bf16.gmra.mxu1 %v7568_v61  ;;  %11932 = vmatmul.mubr.bf16.gmra.mxu0 %v14743_v8  ;;  %v8276_v61 = vld [vmem:[#allocation2 + $0xa8] sm:$0xff] }
 0x2d6   : > { %11883 = vmatprep.mubr.bf16.mxu1 %v14616_v9  ;;  %11935 = vmatprep.mubr.bf16.mxu0 %v14749_v30  ;;  %v8303_v19 = vpack.c.bf16 %v8277_v36, %v8276_v61 }
 0x2dd   : > { %11884 = vmatmul.mubr.bf16.gmra.mxu1 %v14612_v5  ;;  %11936 = vmatmul.mubr.bf16.gmra.mxu0 %v14844_v21  ;;  %v8271_v5 = vld [vmem:[#allocation2 + $0x68] sm:$0xff] }
 0x2de   : > { %11887 = vmatprep.mubr.bf16.mxu1 %v14628_v28  ;;  %12003 = vmatprep.mubr.bf16.mxu0 %v14760_v51  ;;  %v14856_v28 = vld [vmem:[%s15780_s4] ss:$0 sm:$0xff]  ;;  %v8300_v8 = vpack.c.bf16 %v8271_v5, %v8270_v1  ;;  %v8275_v51 = vld [vmem:[#allocation2 + $0x98] sm:$0xff]  ;;  %v8304_v5 = vpack.c.bf16 %v8279_v24, %v8278_v35 }
 0x2e5   : > { %11888 = vmatmul.mubr.bf16.gmra.mxu1 %v14624_v57  ;;  %v11717_v9 = vpop.f32.mrf.mxu0  ;;  %12004 = vmatmul.mubr.bf16.vlgmr.msra.gmra.mxu0 %v14765_v6  ;;  %v12311_v57 = vld [vmem:[%s15779_s3 + $0x230] sm:$0xff]  }
 0x2e6   : > { %11955 = vmatprep.mubr.bf16.mxu1 %v8298_v39  ;;  %12007 = vmatprep.mubr.bf16.mxu0 %v14777_v0  ;;  %v8673_v0 = vpack.c.bf16 %v8647_v27, %v14797_v14  ;;  %v8657_v27 = vld [vmem:[#allocation2 + $0x129] sm:$0xff] }
 0x2e7   : > { %v6594_v23 = vpop.f32.mrf.mxu0 }
 0x2e9   : > { %v11718_v7 = vpop.f32.mrf.mxu0 }
 0x2eb   : > { %v6597_v25 = vpop.f32.mrf.mxu0 }
 0x2ed   : > { %v11669_v49 = vpop.f32.mrf.mxu1  ;;  %11956 = vmatmul.mubr.bf16.vlgmr.msra.gmra.mxu1 %v8299_v38  ;;  %v11721_v41 = vpop.f32.mrf.mxu0  ;;  %12008 = vmatmul.mubr.bf16.gmra.mxu0 %v14782_v48  ;;  %v8302_v48 = vpack.c.bf16 %v8275_v51, %v8274_v54 }
 0x2ee   : > { %v6353_v11 = vadd.f32 %v11669_v49, %v14856_v28  ;;  %11959 = vmatprep.mubr.bf16.mxu1 %v8300_v8  ;;  %12036 = vmatpush3.bf16.msra.mxu1 %v12310_v33  ;;  %v8653_v33 = vld [vmem:[#allocation2 + $0xf9] sm:$0xff] }
 0x2ef   : > { %v6224_v30 = vpop.f32.mrf.mxu1  ;;  %12037 = vmatprep.subr.bf16.mxu1 %v12311_v57  ;;  %12011 = vmatprep.mubr.bf16.mxu0 %v14799_v13  ;;  %v6610_v46 = vpop.f32.mrf.mxu0 }
 0x2f0   : > { %v14867_v17 = vadd.f32 %v11717_v9, %v6353_v11  ;;  %v6351_v47 = vadd.f32 %v14856_v28, %v6224_v30  ;;  %v8675_v9 = vpack.c.bf16 %v8651_v3, %v8650_v62  ;;  %v8281_v11 = vld [vmem:[#allocation2 + $0xe0] sm:$0xff]  ;;  %v8655_v30 = vld [vmem:[#allocation2 + $0x111] sm:$0xff] }
 0x2f1   : > { %v11670_v10 = vpop.f32.mrf.mxu1  ;;  %v11722_v2 = vpop.f32.mrf.mxu0 }
 0x2f2   : > { %v14870_v16 = vadd.f32 %v6594_v23, %v6351_v47  ;;  %v6354_v6 = vadd.f32 %v11670_v10, %v14856_v28  ;;  %12038 = vmatpush3.bf16.msra.mxu1 %v12311_v57  ;;  %v8283_v47 = vld [vmem:[#allocation2 + $0xf8] sm:$0xff] }
 0x2f3   : > { %v6227_v40 = vpop.f32.mrf.mxu1  ;;  %v6613_v12 = vpop.f32.mrf.mxu0  ;;  %12039 = vmatprep.subr.bf16.mxu1 %v12312_v60 }
 0x2f4   : > { %v14874_v43 = vadd.f32 %v11718_v7, %v6354_v6  ;;  %v6352_v20 = vadd.f32 %v14856_v28, %v6227_v40  ;;  %v8676_v7 = vpack.c.bf16 %v8653_v33, %v14827_v22  ;;  %v8654_v6 = vld [vmem:[#allocation2 + $0x109] sm:$0xff] }
 0x2f5   : > { %v11673_v63 = vpop.f32.mrf.mxu1  ;;  %11960 = vmatmul.mubr.bf16.gmra.mxu1 %v8301_v59  ;;  %v11725_v4 = vpop.f32.mrf.mxu0  ;;  %12012 = vmatmul.mubr.bf16.gmra.mxu0 %v8673_v0  ;;  %v8282_v59 = vld [vmem:[#allocation2 + $0xf0] sm:$0xff] }
 0x2f6   : > { %v14880_v18 = vadd.f32 %v6597_v25, %v6352_v20  ;;  %v6357_v15 = vadd.f32 %v11673_v63, %v14856_v28  ;;  %11963 = vmatprep.mubr.bf16.mxu1 %v8302_v48  ;;  %12015 = vmatprep.mubr.bf16.mxu0 %v14818_v44  ;;  %v8306_v48 = vpack.c.bf16 %v8283_v47, %v8282_v59  ;;  %v12317_v63 = vld [vmem:[%s15779_s3 + $0x200] sm:$0xff]  }
 0x2f7   : > { %v6240_v14 = vpop.f32.mrf.mxu1  ;;  %12040 = vmatpush3.bf16.msra.mxu1 %v12312_v60  ;;  %v6626_v13 = vpop.f32.mrf.mxu0 }
 0x2f8   : > { %v14884_v55 = vadd.f32 %v11721_v41, %v6357_v15  ;;  %v6355_v29 = vadd.f32 %v14856_v28, %v6240_v14  ;;  %12041 = vmatprep.subr.bf16.mxu1 %v12313_v50 }
 0x2f9   : > { %v11674_v42 = vpop.f32.mrf.mxu1  ;;  %v11726_v32 = vpop.f32.mrf.mxu0 }
 0x2fa   : > { %v14890_v56 = vadd.f32 %v6610_v46, %v6355_v29  ;;  %v6358_v44 = vadd.f32 %v11674_v42, %v14856_v28  ;;  %v12316_v46 = vld [vmem:[%s15779_s3 + $0x208] sm:$0xff]  }
 0x2fb   : > { %v6243_v52 = vpop.f32.mrf.mxu1  ;;  %v6629_v39 = vpop.f32.mrf.mxu0  ;;  %12042 = vmatpush3.bf16.msra.mxu1 %v12313_v50  ;;  %v8678_v50 = vpack.c.bf16 %v8657_v27, %v14837_v37  ;;  %v8659_v42 = vld [vmem:[#allocation2 + $0x141] sm:$0xff]  ;;  %v8663_v27 = vld [vmem:[#allocation2 + $0x171] sm:$0xff] }
 0x2fc   : > { %v14893_v23 = vadd.f32 %v11722_v2, %v6358_v44  ;;  %v6356_v53 = vadd.f32 %v14856_v28, %v6243_v52  ;;  %12043 = vmatprep.subr.bf16.mxu1 %v12314_v31  ;;  %v8280_v2 = vld [vmem:[#allocation2 + $0xd8] sm:$0xff]  ;;  %v8284_v52 = vld [vmem:[#allocation2 + $0x108] sm:$0xff] }
 0x2fd   : > { %v11677_v38 = vpop.f32.mrf.mxu1  ;;  %11964 = vmatmul.mubr.bf16.gmra.mxu1 %v8303_v19  ;;  %v11729_v1 = vpop.f32.mrf.mxu0  ;;  %12016 = vmatmul.mubr.bf16.gmra.mxu0 %v8675_v9  ;;  %v8305_v40 = vpack.c.bf16 %v8281_v11, %v8280_v2  ;;  %v8661_v44 = vld [vmem:[#allocation2 + $0x159] sm:$0xff] }
 0x2fe   : > { %v14900_v25 = vadd.f32 %v6613_v12, %v6356_v53  ;;  %v6361_v57 = vadd.f32 %v11677_v38, %v14856_v28  ;;  %11967 = vmatprep.mubr.bf16.mxu1 %v8304_v5  ;;  %12019 = vmatprep.mubr.bf16.mxu0 %v8676_v7  ;;  %v8677_v12 = vpack.c.bf16 %v8655_v30, %v8654_v6  ;;  %v8658_v19 = vld [vmem:[#allocation2 + $0x139] sm:$0xff]  ;;  %v8660_v7 = vld [vmem:[#allocation2 + $0x151] sm:$0xff] }
 0x2ff   : > { %v6256_v8 = vpop.f32.mrf.mxu1  ;;  %v6642_v49 = vpop.f32.mrf.mxu0  ;;  %12044 = vmatpush3.bf16.msra.mxu1 %v12314_v31  ;;  %v8285_v31 = vld [vmem:[#allocation2 + $0x110] sm:$0xff]  ;;  %v8286_v9 = vld [vmem:[#allocation2 + $0x120] sm:$0xff]  ;;  %v8679_v5 = vpack.c.bf16 %v8659_v42, %v8658_v19  ;;  %v8291_v2 = vld [vmem:[#allocation2 + $0x158] sm:$0xff] }
 0x300   : > { %v14903_v41 = vadd.f32 %v11725_v4, %v6361_v57  ;;  %v6359_v22 = vadd.f32 %v14856_v28, %v6256_v8  ;;  %12045 = vmatprep.subr.bf16.mxu1 %v12315_v26  ;;  %v8680_v57 = vpack.c.bf16 %v8661_v44, %v8660_v7  ;;  %v8666_v44 = vld [vmem:[#allocation2 + $0x199] sm:$0xff] }
 0x301   : > { %v11678_v60 = vpop.f32.mrf.mxu1  ;;  %v11730_v34 = vpop.f32.mrf.mxu0 }
 0x302   : > { %v14909_v10 = vadd.f32 %v6626_v13, %v6359_v22  ;;  %v6362_v51 = vadd.f32 %v11678_v60, %v14856_v28 }
 0x303   : > { %v6259_v58 = vpop.f32.mrf.mxu1  ;;  %v6645_v54 = vpop.f32.mrf.mxu0  ;;  %12046 = vmatpush3.bf16.msra.mxu1 %v12315_v26 }
 0x304   : > { %v14912_v0 = vadd.f32 %v11726_v32, %v6362_v51  ;;  %v6360_v20 = vadd.f32 %v14856_v28, %v6259_v58  ;;  %12047 = vmatprep.subr.bf16.mxu1 %v12316_v46  ;;  %v8287_v32 = vld [vmem:[#allocation2 + $0x128] sm:$0xff] }
 0x305   : > { %v11681_v4 = vpop.f32.mrf.mxu1  ;;  %11968 = vmatmul.mubr.bf16.gmra.mxu1 %v8305_v40  ;;  %v11733_v15 = vpop.f32.mrf.mxu0  ;;  %12020 = vmatmul.mubr.bf16.gmra.mxu0 %v8677_v12  ;;  %v8665_v58 = vld [vmem:[#allocation2 + $0x189] sm:$0xff] }
 0x306   : > { %v14919_v14 = vadd.f32 %v6629_v39, %v6360_v20  ;;  %v6365_v13 = vadd.f32 %v11681_v4, %v14856_v28  ;;  %11971 = vmatprep.mubr.bf16.mxu1 %v8306_v48  ;;  %12023 = vmatprep.mubr.bf16.mxu0 %v8678_v50  ;;  %v8307_v39 = vpack.c.bf16 %v8285_v31, %v8284_v52  ;;  %v8662_v12 = vld [vmem:[#allocation2 + $0x169] sm:$0xff] }
 0x307   : > { %v6272_v29 = vpop.f32.mrf.mxu1  ;;  %v6658_v36 = vpop.f32.mrf.mxu0  ;;  %12048 = vmatpush3.bf16.msra.mxu1 %v12316_v46  ;;  %v8290_v50 = vld [vmem:[#allocation2 + $0x150] sm:$0xff]  ;;  %v8681_v4 = vpack.c.bf16 %v8663_v27, %v8662_v12 }
 0x308   : > { %v14922_v3 = vadd.f32 %v11729_v1, %v6365_v13  ;;  %v6363_v37 = vadd.f32 %v14856_v28, %v6272_v29  ;;  %12049 = vmatprep.subr.bf16.mxu1 %v12317_v63  ;;  %v8308_v1 = vpack.c.bf16 %v8287_v32, %v8286_v9 }
 0x309   : > { %v11682_v24 = vpop.f32.mrf.mxu1  ;;  %v11734_v33 = vpop.f32.mrf.mxu0 }
 0x30a   : > { %v14925_v61 = vadd.f32 %v6642_v49, %v6363_v37  ;;  %v6366_v62 = vadd.f32 %v11682_v24, %v14856_v28  ;;  %v8310_v37 = vpack.c.bf16 %v8291_v2, %v8290_v50 }
 0x30b   : > { %v6275_v35 = vpop.f32.mrf.mxu1  ;;  %v6661_v53 = vpop.f32.mrf.mxu0  ;;  %12050 = vmatpush3.bf16.msra.mxu1 %v12317_v63 }
 0x30c   : > { %v14928_v26 = vadd.f32 %v11730_v34, %v6366_v62  ;;  %v6364_v38 = vadd.f32 %v14856_v28, %v6275_v35  ;;  %v8289_v34 = vld [vmem:[#allocation2 + $0x140] sm:$0xff] }
 0x30d   : > { %v11685_v8 = vpop.f32.mrf.mxu1  ;;  %11972 = vmatmul.mubr.bf16.gmra.mxu1 %v8307_v39  ;;  %v11737_v49 = vpop.f32.mrf.mxu0  ;;  %12024 = vmatmul.mubr.bf16.gmra.mxu0 %v8679_v5  ;;  %v8667_v62 = vld [vmem:[#allocation2 + $0x1a1] sm:$0xff]  ;;  %v8293_v39 = vld [vmem:[#allocation2 + $0x170] sm:$0xff] }
 0x30e   : > { %v14931_v22 = vadd.f32 %v6645_v54, %v6364_v38  ;;  %v6369_v11 = vadd.f32 %v11685_v8, %v14856_v28  ;;  %11975 = vmatprep.mubr.bf16.mxu1 %v8308_v1  ;;  %12027 = vmatprep.mubr.bf16.mxu0 %v8680_v57  ;;  %v8288_v54 = vld [vmem:[#allocation2 + $0x138] sm:$0xff]  ;;  %v8683_v7 = vpack.c.bf16 %v8667_v62, %v8666_v44  ;;  %v8292_v1 = vld [vmem:[#allocation2 + $0x168] sm:$0xff] }
 0x30f   : > { %v6288_v30 = vpop.f32.mrf.mxu1  ;;  %v6674_v46 = vpop.f32.mrf.mxu0  ;;  %v8309_v48 = vpack.c.bf16 %v8289_v34, %v8288_v54  ;;  %v8311_v8 = vpack.c.bf16 %v8293_v39, %v8292_v1  ;;  %v12320_v54 = vld [vmem:[#allocation2] sm:$0xff]  ;;  %v9008_v39 = vld [vmem:[#allocation2 + $0x4a] sm:$0xff] }
 0x310   : > { %v14934_v60 = vadd.f32 %v11733_v15, %v6369_v11  ;;  %v6367_v47 = vadd.f32 %v14856_v28, %v6288_v30  ;;  %v8664_v15 = vld [vmem:[#allocation2 + $0x181] sm:$0xff]  ;;  %v8313_v12 = vpack.c.bf16 %v12320_v54, %v12320_v54 }
 0x311   : > { %v11686_v51 = vpop.f32.mrf.mxu1  ;;  %v11738_v6 = vpop.f32.mrf.mxu0  ;;  %v8682_v31 = vpack.c.bf16 %v8665_v58, %v8664_v15 }
 0x312   : > { %v14937_v40 = vadd.f32 %v6658_v36, %v6367_v47  ;;  %v6370_v59 = vadd.f32 %v11686_v51, %v14856_v28 }
 0x313   : > { %v6291_v20 = vpop.f32.mrf.mxu1  ;;  %v6677_v63 = vpop.f32.mrf.mxu0 }
 0x314   : > { %v14940_v13 = vadd.f32 %v11734_v33, %v6370_v59  ;;  %v6368_v29 = vadd.f32 %v14856_v28, %v6291_v20  ;;  %v9006_v20 = vld [vmem:[#allocation2 + $0x32] sm:$0xff] }
 0x315   : > { %v11689_v42 = vpop.f32.mrf.mxu1  ;;  %11976 = vmatmul.mubr.bf16.gmra.mxu1 %v8309_v48  ;;  %v11741_v36 = vpop.f32.mrf.mxu0  ;;  %12028 = vmatmul.mubr.bf16.gmra.mxu0 %v8681_v4  ;;  %v9007_v48 = vld [vmem:[#allocation2 + $0x3a] sm:$0xff] }
 0x316   : > { %v14943_v24 = vadd.f32 %v6661_v53, %v6368_v29  ;;  %v6373_v32 = vadd.f32 %v11689_v42, %v14856_v28  ;;  %11979 = vmatprep.mubr.bf16.mxu1 %v8310_v37  ;;  %12031 = vmatprep.mubr.bf16.mxu0 %v8682_v31  ;;  %v9038_v31 = vpack.c.bf16 %v9007_v48, %v9006_v20 }
 0x317   : > { %v6304_v52 = vpop.f32.mrf.mxu1  ;;  %v6690_v19 = vpop.f32.mrf.mxu0 }
 0x318   : > { %v14946_v33 = vadd.f32 %v11737_v49, %v6373_v32  ;;  %v6371_v35 = vadd.f32 %v14856_v28, %v6304_v52 }
 0x319   : > { %v11690_v9 = vpop.f32.mrf.mxu1  ;;  %v11742_v5 = vpop.f32.mrf.mxu0 }
 0x31a   : > { %v14949_v38 = vadd.f32 %v6674_v46, %v6371_v35  ;;  %v6374_v53 = vadd.f32 %v11690_v9, %v14856_v28  ;;  %v9009_v9 = vld [vmem:[#allocation2 + $0x52] sm:$0xff] }
 0x31b   : > { %v6307_v57 = vpop.f32.mrf.mxu1  ;;  %v6693_v11 = vpop.f32.mrf.mxu0 }
 0x31c   : > { %v14952_v30 = vadd.f32 %v11738_v6, %v6374_v53  ;;  %v6372_v47 = vadd.f32 %v14856_v28, %v6307_v57  ;;  %v9011_v53 = vld [vmem:[#allocation2 + $0x6a] sm:$0xff] }
 0x31d   : > { %v11693_v49 = vpop.f32.mrf.mxu1  ;;  %11980 = vmatmul.mubr.bf16.gmra.mxu1 %v8311_v8  ;;  %v11745_v34 = vpop.f32.mrf.mxu0  ;;  %12032 = vmatmul.mubr.bf16.gmra.mxu0 %v8683_v7  ;;  %v9010_v7 = vld [vmem:[#allocation2 + $0x62] sm:$0xff] }
 0x31e   : > { %v14955_v27 = vadd.f32 %v6677_v63, %v6372_v47  ;;  %v6377_v51 = vadd.f32 %v11693_v49, %v14856_v28  ;;  %11983 = vmatprep.mubr.bf16.mxu1 %v14741_v45  ;;  %v9039_v47 = vpack.c.bf16 %v9009_v9, %v9008_v39 }
 0x31f   : > { %v6320_v46 = vpop.f32.mrf.mxu1  ;;  %v6706_v2 = vpop.f32.mrf.mxu0 }
 0x320   : > { %v14959_v58 = vadd.f32 %v11741_v36, %v6377_v51  ;;  %v6375_v59 = vadd.f32 %v14856_v28, %v6320_v46  ;;  %v9040_v46 = vpack.c.bf16 %v9011_v53, %v9010_v7 }
 0x321   : > { %v11694_v6 = vpop.f32.mrf.mxu1  ;;  %v11746_v50 = vpop.f32.mrf.mxu0 }
 0x322   : > { %v14962_v4 = vadd.f32 %v6690_v19, %v6375_v59  ;;  %v6378_v63 = vadd.f32 %v11694_v6, %v14856_v28 }
 0x323   : > { %v6323_v15 = vpop.f32.mrf.mxu1  ;;  %v6709_v29 = vpop.f32.mrf.mxu0 }
 0x324   : > { %v14965_v37 = vadd.f32 %v11742_v5, %v6378_v63  ;;  %v6376_v45 = vadd.f32 %v14856_v28, %v6323_v15  ;;  %v9012_v15 = vld [vmem:[#allocation2 + $0x7a] sm:$0xff] }
 0x325   : > { %v11697_v42 = vpop.f32.mrf.mxu1  ;;  %11984 = vmatmul.mubr.bf16.gmra.mxu1 %v8313_v12  ;;  %v11813_v36 = vpop.f32.mrf.mxu0 }
 0x326   : > { %v14968_v32 = vadd.f32 %v6693_v11, %v6376_v45  ;;  %v6381_v44 = vadd.f32 %v11697_v42, %v14856_v28  ;;  %12051 = vmatprep.mubr.bf16.mxu1 %v9038_v31  ;;  %v9014_v31 = vld [vmem:[#allocation2 + $0x92] sm:$0xff] }
 0x327   : > { %v6336_v62 = vpop.f32.mrf.mxu1  ;;  %v7334_v52 = vpop.f32.mrf.mxu0 }
 0x328   : > { %v14971_v19 = vadd.f32 %v11745_v34, %v6381_v44  ;;  %v6379_v35 = vadd.f32 %v14856_v28, %v6336_v62 }
 0x329   : > { %v11698_v5 = vpop.f32.mrf.mxu1  ;;  %v11814_v1 = vpop.f32.mrf.mxu0 }
 0x32a   : > { %v14974_v57 = vadd.f32 %v6706_v2, %v6379_v35  ;;  %v6382_v8 = vadd.f32 %v11698_v5, %v14856_v28 }
 0x32b   : > { %v6339_v11 = vpop.f32.mrf.mxu1  ;;  %v7337_v49 = vpop.f32.mrf.mxu0 }
 0x32c   : > { %v14977_v51 = vadd.f32 %v11746_v50, %v6382_v8  ;;  %v6380_v34 = vadd.f32 %v14856_v28, %v6339_v11  ;;  %v9013_v50 = vld [vmem:[#allocation2 + $0x82] sm:$0xff]  ;;  %v9015_v28 = vld [vmem:[#allocation2 + $0x9a] sm:$0xff] }
 0x32d   : > { %v11765_v59 = vpop.f32.mrf.mxu1  ;;  %12052 = vmatmul.mubr.bf16.vlgmr.msra.gmra.mxu1 %v9039_v47  ;;  %v11817_v6 = vpop.f32.mrf.mxu0  ;;  %v9041_v35 = vpack.c.bf16 %v9013_v50, %v9012_v15  ;;  %v9042_v9 = vpack.c.bf16 %v9015_v28, %v9014_v31  ;;  %v9016_v47 = vld [vmem:[#allocation2 + $0xaa] sm:$0xff] }
 0x32e   : > { %v14980_v54 = vadd.f32 %v6709_v29, %v6380_v34  ;;  %v7093_v12 = vadd.f32 %v11765_v59, %v14867_v17  ;;  %12055 = vmatprep.mubr.bf16.mxu1 %v9040_v46  ;;  %v9018_v46 = vld [vmem:[#allocation2 + $0xc2] sm:$0xff] }
 0x32f   : > { %v6964_v2 = vpop.f32.mrf.mxu1  ;;  %v7350_v20 = vpop.f32.mrf.mxu0 }
 0x330   : > { %v14983_v48 = vadd.f32 %v11813_v36, %v7093_v12  ;;  %v7091_v63 = vadd.f32 %v6964_v2, %v14870_v16 }
 0x331   : > { %v11766_v45 = vpop.f32.mrf.mxu1  ;;  %v11818_v42 = vpop.f32.mrf.mxu0 }
 0x332   : > { %v14986_v44 = vadd.f32 %v7334_v52, %v7091_v63  ;;  %v7094_v29 = vadd.f32 %v11766_v45, %v14874_v43 }
 0x333   : > { %v6967_v62 = vpop.f32.mrf.mxu1  ;;  %v7353_v17 = vpop.f32.mrf.mxu0 }
 0x334   : > { %v14989_v39 = vadd.f32 %v11814_v1, %v7094_v29  ;;  %v7092_v36 = vadd.f32 %v6967_v62, %v14880_v18  ;;  %v9017_v1 = vld [vmem:[#allocation2 + $0xb2] sm:$0xff]  ;;  %v9019_v18 = vld [vmem:[#allocation2 + $0xca] sm:$0xff] }
 0x335   : > { %v11769_v5 = vpop.f32.mrf.mxu1  ;;  %12056 = vmatmul.mubr.bf16.gmra.mxu1 %v9041_v35  ;;  %v11821_v16 = vpop.f32.mrf.mxu0  ;;  %v9043_v63 = vpack.c.bf16 %v9017_v1, %v9016_v47  ;;  %v9044_v50 = vpack.c.bf16 %v9019_v18, %v9018_v46  ;;  %v9020_v35 = vld [vmem:[#allocation2 + $0xda] sm:$0xff] }
 0x336   : > { %v14992_v7 = vadd.f32 %v7337_v49, %v7092_v36  ;;  %v7097_v53 = vadd.f32 %v11769_v5, %v14884_v55  ;;  %12059 = vmatprep.mubr.bf16.mxu1 %v9042_v9  ;;  %v9022_v9 = vld [vmem:[#allocation2 + $0xf2] sm:$0xff] }
 0x337   : > { %v6980_v52 = vpop.f32.mrf.mxu1  ;;  %v7366_v8 = vpop.f32.mrf.mxu0 }
 0x338   : > { %v14995_v11 = vadd.f32 %v11817_v6, %v7097_v53  ;;  %v7095_v43 = vadd.f32 %v6980_v52, %v14890_v56 }
 0x339   : > { %v11770_v34 = vpop.f32.mrf.mxu1  ;;  %v11822_v59 = vpop.f32.mrf.mxu0 }
 0x33a   : > { %v14998_v12 = vadd.f32 %v7350_v20, %v7095_v43  ;;  %v7098_v49 = vadd.f32 %v11770_v34, %v14893_v23 }
 0x33b   : > { %v6983_v2 = vpop.f32.mrf.mxu1  ;;  %v7369_v55 = vpop.f32.mrf.mxu0 }
 0x33c   : > { %v15001_v15 = vadd.f32 %v11818_v42, %v7098_v49  ;;  %v7096_v6 = vadd.f32 %v6983_v2, %v14900_v25  ;;  %v9021_v42 = vld [vmem:[#allocation2 + $0xe2] sm:$0xff]  ;;  %v9023_v25 = vld [vmem:[#allocation2 + $0xfa] sm:$0xff] }
 0x33d   : > { %v11773_v45 = vpop.f32.mrf.mxu1  ;;  %12060 = vmatmul.mubr.bf16.gmra.mxu1 %v9043_v63  ;;  %v11825_v56 = vpop.f32.mrf.mxu0  ;;  %v9045_v43 = vpack.c.bf16 %v9021_v42, %v9020_v35  ;;  %v9046_v1 = vpack.c.bf16 %v9023_v25, %v9022_v9  ;;  %v9024_v63 = vld [vmem:[#allocation2 + $0x10a] sm:$0xff] }
 0x33e   : > { %v15004_v31 = vadd.f32 %v7353_v17, %v7096_v6  ;;  %v7101_v28 = vadd.f32 %v11773_v45, %v14903_v41  ;;  %12063 = vmatprep.mubr.bf16.mxu1 %v9044_v50  ;;  %v9026_v50 = vld [vmem:[#allocation2 + $0x122] sm:$0xff] }
 0x33f   : > { %v6996_v20 = vpop.f32.mrf.mxu1  ;;  %v7382_v29 = vpop.f32.mrf.mxu0 }
 0x340   : > { %v15007_v62 = vadd.f32 %v11821_v16, %v7101_v28  ;;  %v7099_v23 = vadd.f32 %v6996_v20, %v14909_v10 }
 0x341   : > { %v11774_v36 = vpop.f32.mrf.mxu1  ;;  %v11826_v5 = vpop.f32.mrf.mxu0 }
 0x342   : > { %v15010_v53 = vadd.f32 %v7366_v8, %v7099_v23  ;;  %v7102_v17 = vadd.f32 %v11774_v36, %v14912_v0 }
 0x343   : > { %v6999_v52 = vpop.f32.mrf.mxu1  ;;  %v7385_v41 = vpop.f32.mrf.mxu0 }
 0x344   : > { %v15013_v47 = vadd.f32 %v11822_v59, %v7102_v17  ;;  %v7100_v16 = vadd.f32 %v6999_v52, %v14919_v14  ;;  %v9025_v59 = vld [vmem:[#allocation2 + $0x112] sm:$0xff]  ;;  %v9027_v14 = vld [vmem:[#allocation2 + $0x12a] sm:$0xff] }
 0x345   : > { %v11777_v34 = vpop.f32.mrf.mxu1  ;;  %12064 = vmatmul.mubr.bf16.gmra.mxu1 %v9045_v43  ;;  %v11829_v10 = vpop.f32.mrf.mxu0  ;;  %v9047_v23 = vpack.c.bf16 %v9025_v59, %v9024_v63  ;;  %v9048_v42 = vpack.c.bf16 %v9027_v14, %v9026_v50  ;;  %v9028_v43 = vld [vmem:[#allocation2 + $0x13a] sm:$0xff] }
 0x346   : > { %v15016_v46 = vadd.f32 %v7369_v55, %v7100_v16  ;;  %v7105_v18 = vadd.f32 %v11777_v34, %v14922_v3  ;;  %12067 = vmatprep.mubr.bf16.mxu1 %v9046_v1  ;;  %v9030_v1 = vld [vmem:[#allocation2 + $0x152] sm:$0xff] }
 0x347   : > { %v7012_v8 = vpop.f32.mrf.mxu1  ;;  %v7398_v49 = vpop.f32.mrf.mxu0 }
 0x348   : > { %v15019_v2 = vadd.f32 %v11825_v56, %v7105_v18  ;;  %v7103_v0 = vadd.f32 %v7012_v8, %v14925_v61 }
 0x349   : > { %v11778_v6 = vpop.f32.mrf.mxu1  ;;  %v11830_v45 = vpop.f32.mrf.mxu0 }
 0x34a   : > { %v15022_v28 = vadd.f32 %v7382_v29, %v7103_v0  ;;  %v7106_v55 = vadd.f32 %v11778_v6, %v14928_v26 }
 0x34b   : > { %v7015_v20 = vpop.f32.mrf.mxu1  ;;  %v7401_v3 = vpop.f32.mrf.mxu0 }
 0x34c   : > { %v15025_v35 = vadd.f32 %v11826_v5, %v7106_v55  ;;  %v7104_v56 = vadd.f32 %v7015_v20, %v14931_v22  ;;  %v9029_v5 = vld [vmem:[#allocation2 + $0x142] sm:$0xff]  ;;  %v9031_v22 = vld [vmem:[#allocation2 + $0x15a] sm:$0xff] }
 0x34d   : > { %v11781_v36 = vpop.f32.mrf.mxu1  ;;  %12068 = vmatmul.mubr.bf16.gmra.mxu1 %v9047_v23  ;;  %v11833_v61 = vpop.f32.mrf.mxu0  ;;  %v9049_v0 = vpack.c.bf16 %v9029_v5, %v9028_v43  ;;  %v9050_v59 = vpack.c.bf16 %v9031_v22, %v9030_v1  ;;  %v9032_v23 = vld [vmem:[#allocation2 + $0x16a] sm:$0xff] }
 0x34e   : > { %v15028_v9 = vadd.f32 %v7385_v41, %v7104_v56  ;;  %v7109_v25 = vadd.f32 %v11781_v36, %v14934_v60  ;;  %12071 = vmatprep.mubr.bf16.mxu1 %v9048_v42 }
 0x34f   : > { %v7028_v29 = vpop.f32.mrf.mxu1  ;;  %v7414_v17 = vpop.f32.mrf.mxu0 }
 0x350   : > { %v15031_v52 = vadd.f32 %v11829_v10, %v7109_v25  ;;  %v7107_v26 = vadd.f32 %v7028_v29, %v14937_v40 }
 0x351   : > { %v11782_v16 = vpop.f32.mrf.mxu1  ;;  %v11834_v34 = vpop.f32.mrf.mxu0 }
 0x352   : > { %v15034_v18 = vadd.f32 %v7398_v49, %v7107_v26  ;;  %v7110_v41 = vadd.f32 %v11782_v16, %v14940_v13  ;;  %v9037_v16 = vld [vmem:[#allocation2 + $0x1a2] sm:$0xff] }
 0x353   : > { %v7031_v8 = vpop.f32.mrf.mxu1  ;;  %v7417_v60 = vpop.f32.mrf.mxu0 }
 0x354   : > { %v15037_v63 = vadd.f32 %v11830_v45, %v7110_v41  ;;  %v7108_v10 = vadd.f32 %v7031_v8, %v14943_v24  ;;  %v9033_v45 = vld [vmem:[#allocation2 + $0x172] sm:$0xff] }
 0x355   : > { %v11785_v6 = vpop.f32.mrf.mxu1  ;;  %12072 = vmatmul.mubr.bf16.gmra.mxu1 %v9049_v0  ;;  %v11837_v40 = vpop.f32.mrf.mxu0 }
 0x356   : > { %v15040_v50 = vadd.f32 %v7401_v3, %v7108_v10  ;;  %v7113_v14 = vadd.f32 %v11785_v6, %v14946_v33  ;;  %12075 = vmatprep.mubr.bf16.mxu1 %v9050_v59  ;;  %v9051_v3 = vpack.c.bf16 %v9033_v45, %v9032_v23 }
 0x357   : > { %v7044_v49 = vpop.f32.mrf.mxu1  ;;  %v7430_v55 = vpop.f32.mrf.mxu0 }
 0x358   : > { %v15043_v20 = vadd.f32 %v11833_v61, %v7113_v14  ;;  %v7111_v13 = vadd.f32 %v7044_v49, %v14949_v38 }
 0x359   : > { %v11786_v56 = vpop.f32.mrf.mxu1  ;;  %v11838_v42 = vpop.f32.mrf.mxu0 }
 0x35a   : > { %v15046_v24 = vadd.f32 %v7414_v17, %v7111_v13  ;;  %v7114_v36 = vadd.f32 %v11786_v56, %v14952_v30  ;;  %v9036_v17 = vld [vmem:[#allocation2 + $0x19a] sm:$0xff] }
 0x35b   : > { %v7047_v25 = vpop.f32.mrf.mxu1  ;;  %v7433_v29 = vpop.f32.mrf.mxu0  ;;  %v9053_v8 = vpack.c.bf16 %v9037_v16, %v9036_v17 }
 0x35c   : > { %v15049_v26 = vadd.f32 %v11834_v34, %v7114_v36  ;;  %v7112_v33 = vadd.f32 %v7047_v25, %v14955_v27 }
 0x35d   : > { %v11789_v43 = vpop.f32.mrf.mxu1  ;;  %12076 = vmatmul.mubr.bf16.gmra.mxu1 %v9051_v3  ;;  %v11841_v61 = vpop.f32.mrf.mxu0 }
 0x35e   : > { %v15052_v5 = vadd.f32 %v7417_v60, %v7112_v33  ;;  %v7117_v38 = vadd.f32 %v11789_v43, %v14959_v58  ;;  %12079 = vmatprep.mubr.bf16.mxu1 %v14844_v21 }
 0x35f   : > { %v7060_v1 = vpop.f32.mrf.mxu1  ;;  %v7446_v30 = vpop.f32.mrf.mxu0 }
 0x360   : > { %v15056_v22 = vadd.f32 %v11837_v40, %v7117_v38  ;;  %v7115_v34 = vadd.f32 %v7060_v1, %v14962_v4 }
 0x361   : > { %v11790_v41 = vpop.f32.mrf.mxu1  ;;  %v11842_v27 = vpop.f32.mrf.mxu0 }
 0x362   : > { %v15059_v0 = vadd.f32 %v7430_v55, %v7115_v34  ;;  %v7118_v60 = vadd.f32 %v11790_v41, %v14965_v37 }
 0x363   : > { %v7063_v10 = vpop.f32.mrf.mxu1  ;;  %v7449_v59 = vpop.f32.mrf.mxu0 }
 0x364   : > { %v15062_v58 = vadd.f32 %v11838_v42, %v7118_v60  ;;  %v7116_v21 = vadd.f32 %v7063_v10, %v14968_v32 }
 0x365   : > { %v11793_v6 = vpop.f32.mrf.mxu1  ;;  %12080 = vmatmul.mubr.bf16.gmra.mxu1 %v9053_v8  ;;  %v15065_v14 = vpop.f32.mrf.mxu0 }
 0x366   : > { %v15067_v40 = vadd.f32 %v7433_v29, %v7116_v21  ;;  %v7121_v4 = vadd.f32 %v11793_v6, %v14971_v19 }
 0x367   : > { %v7076_v49 = vpop.f32.mrf.mxu1  ;;  %v15070_v13 = vpop.f32.mrf.mxu0 }
 0x368   : > { %v15072_v55 = vadd.f32 %v11841_v61, %v7121_v4  ;;  %v7119_v37 = vadd.f32 %v7076_v49, %v14974_v57 }
 0x369   : > { %v11794_v23 = vpop.f32.mrf.mxu1  ;;  %v15075_v45 = vpop.f32.mrf.mxu0 }
 0x36a   : > { %v15077_v56 = vadd.f32 %v7446_v30, %v7119_v37  ;;  %v7122_v32 = vadd.f32 %v11794_v23, %v14977_v51 }
 0x36b   : > { %v7079_v42 = vpop.f32.mrf.mxu1  ;;  %v15080_v36 = vpop.f32.mrf.mxu0 }
 0x36c   : > { %v15082_v25 = vadd.f32 %v11842_v27, %v7122_v32  ;;  %v7120_v19 = vadd.f32 %v7079_v42, %v14980_v54 }
 0x36d   : > { %v11861_v3 = vpop.f32.mrf.mxu1  ;;  %v15085_v29 = vpop.f32.mrf.mxu0 }
 0x36e   : > { %v15087_v33 = vadd.f32 %v7449_v59, %v7120_v19  ;;  %v15090_v57 = vadd.f32 %v11861_v3, %v14983_v48 }
 0x36f   : > { %v7704_v43 = vpop.f32.mrf.mxu1  ;;  %v15092_v61 = vpop.f32.mrf.mxu0 }
 0x370   : > { %v15095_v51 = vadd.f32 %v7704_v43, %v14986_v44 }
 0x371   : > { %v11862_v38 = vpop.f32.mrf.mxu1  ;;  %v15097_v17 = vpop.f32.mrf.mxu0 }
 0x372   : > { %v15100_v16 = vadd.f32 %v11862_v38, %v14989_v39 }
 0x373   : > { %v7707_v54 = vpop.f32.mrf.mxu1  ;;  %v15102_v1 = vpop.f32.mrf.mxu0 }
 0x374   : > { %v15105_v30 = vadd.f32 %v7707_v54, %v14992_v7 }
 0x375   : > { %v11865_v48 = vpop.f32.mrf.mxu1  ;;  %v15107_v34 = vpop.f32.mrf.mxu0 }
 0x376   : > { %v15110_v41 = vadd.f32 %v11865_v48, %v14995_v11 }
 0x377   : > { %v7720_v44 = vpop.f32.mrf.mxu1  ;;  %v15112_v8 = vpop.f32.mrf.mxu0 }
 0x378   : > { %v15115_v27 = vadd.f32 %v7720_v44, %v14998_v12 }
 0x379   : > { %v11866_v39 = vpop.f32.mrf.mxu1  ;;  %v15117_v60 = vpop.f32.mrf.mxu0 }
 0x37a   : > { %v15120_v10 = vadd.f32 %v11866_v39, %v15001_v15 }
 0x37b   : > { %v7723_v7 = vpop.f32.mrf.mxu1  ;;  %v15122_v59 = vpop.f32.mrf.mxu0 }
 0x37c   : > { %v15125_v21 = vadd.f32 %v7723_v7, %v15004_v31 }
 0x37d   : > { %v11869_v11 = vpop.f32.mrf.mxu1  ;;  %v15127_v6 = vpop.f32.mrf.mxu0 }
 0x37e   : > { %v15130_v4 = vadd.f32 %v11869_v11, %v15007_v62 }
 0x37f   : > { %v7736_v12 = vpop.f32.mrf.mxu1  ;;  %v15132_v49 = vpop.f32.mrf.mxu0 }
 0x380   : > { %v15135_v37 = vadd.f32 %v7736_v12, %v15010_v53 }
 0x381   : > { %v11870_v15 = vpop.f32.mrf.mxu1  ;;  %v15137_v23 = vpop.f32.mrf.mxu0 }
 0x382   : > { %v15140_v32 = vadd.f32 %v11870_v15, %v15013_v47 }
 0x383   : > { %v7739_v31 = vpop.f32.mrf.mxu1  ;;  %v15142_v42 = vpop.f32.mrf.mxu0 }
 0x384   : > { %v15145_v19 = vadd.f32 %v7739_v31, %v15016_v46 }
 0x385   : > { %v11873_v62 = vpop.f32.mrf.mxu1  ;;  %v15147_v3 = vpop.f32.mrf.mxu0 }
 0x386   : > { %16003 = vst [vmem:[#allocation36_spill] sm:$0xff] %v15147_v3  ;;  %v15150_v43 = vadd.f32 %v11873_v62, %v15019_v2 }
 0x387   : > { %v7752_v53 = vpop.f32.mrf.mxu1  ;;  %v15152_v38 = vpop.f32.mrf.mxu0 }
 0x388   : > { %16004 = vst [vmem:[#allocation40_spill] sm:$0xff] %v15152_v38  ;;  %v15155_v54 = vadd.f32 %v7752_v53, %v15022_v28 }
 0x389   : > { %v11874_v47 = vpop.f32.mrf.mxu1  ;;  %v15157_v48 = vpop.f32.mrf.mxu0 }
 0x38a   : > { %16005 = vst [vmem:[#allocation30_spill] sm:$0xff] %v15157_v48  ;;  %v15160_v44 = vadd.f32 %v11874_v47, %v15025_v35 }
 0x38b   : > { %v7755_v46 = vpop.f32.mrf.mxu1  ;;  %v15162_v39 = vpop.f32.mrf.mxu0 }
 0x38c   : > { %16006 = vst [vmem:[#allocation31_spill] sm:$0xff] %v15162_v39  ;;  %v15165_v7 = vadd.f32 %v7755_v46, %v15028_v9 }
 0x38d   : > { %v11877_v2 = vpop.f32.mrf.mxu1  ;;  %v15167_v11 = vpop.f32.mrf.mxu0 }
 0x38e   : > { %16007 = vst [vmem:[#allocation37_spill] sm:$0xff] %v15167_v11  ;;  %v15170_v12 = vadd.f32 %v11877_v2, %v15031_v52 }
 0x38f   : > { %v7768_v28 = vpop.f32.mrf.mxu1  ;;  %v15172_v15 = vpop.f32.mrf.mxu0 }
 0x390   : > { %16008 = vst [vmem:[#allocation8_spill] sm:$0xff] %v15172_v15  ;;  %v15175_v31 = vadd.f32 %v7768_v28, %v15034_v18 }
 0x391   : > { %v11878_v35 = vpop.f32.mrf.mxu1  ;;  %v15177_v62 = vpop.f32.mrf.mxu0 }
 0x392   : > { %16009 = vst [vmem:[#allocation9_spill] sm:$0xff] %v15175_v31  ;;  %16010 = vst [vmem:[#allocation11_spill] sm:$0xff] %v15177_v62  ;;  %v15180_v53 = vadd.f32 %v11878_v35, %v15037_v63 }
 0x393   : > { %v7771_v9 = vpop.f32.mrf.mxu1  ;;  %v15182_v47 = vpop.f32.mrf.mxu0 }
 0x394   : > { %16011 = vst [vmem:[#allocation34_spill] sm:$0xff] %v15180_v53  ;;  %16012 = vst [vmem:[#allocation38_spill] sm:$0xff] %v15182_v47  ;;  %v15185_v46 = vadd.f32 %v7771_v9, %v15040_v50  ;;  %v10699_v53 = vld [vmem:[%s12504_s15 + $0x24] sm:$0xff]  }
 0x395   : > { %v11881_v52 = vpop.f32.mrf.mxu1  ;;  %v15187_v2 = vpop.f32.mrf.mxu0 }
 0x396   : > { %16013 = vst [vmem:[#allocation16_spill] sm:$0xff] %v15185_v46  ;;  %16014 = vst [vmem:[#allocation21_spill] sm:$0xff] %v15187_v2  ;;  %v15190_v15 = vadd.f32 %v11881_v52, %v15043_v20 }
 0x397   : > { %v7784_v18 = vpop.f32.mrf.mxu1  ;;  %v15192_v28 = vpop.f32.mrf.mxu0 }
 0x398   : > { %16015 = vst [vmem:[#allocation83_spill] sm:$0xff] %v15190_v15  ;;  %16016 = vst [vmem:[#allocation69_spill] sm:$0xff] %v15192_v28  ;;  %v15195_v62 = vadd.f32 %v7784_v18, %v15046_v24 }
 0x399   : > { %v11882_v63 = vpop.f32.mrf.mxu1  ;;  %v15197_v35 = vpop.f32.mrf.mxu0 }
 0x39a   : > { %16017 = vst [vmem:[#allocation39_spill] sm:$0xff] %v15195_v62  ;;  %16018 = vst [vmem:[#allocation17_spill] sm:$0xff] %v15197_v35  ;;  %v15200_v47 = vadd.f32 %v11882_v63, %v15049_v26 }
 0x39b   : > { %v7787_v50 = vpop.f32.mrf.mxu1  ;;  %v15202_v9 = vpop.f32.mrf.mxu0 }
 0x39c   : > { %16019 = vst [vmem:[#allocation20_spill] sm:$0xff] %v15200_v47  ;;  %16020 = vst [vmem:[#allocation85_spill] sm:$0xff] %v15202_v9  ;;  %v15205_v2 = vadd.f32 %v7787_v50, %v15052_v5 }
 0x39d   : > { %v11885_v20 = vpop.f32.mrf.mxu1  ;;  %v15207_v52 = vpop.f32.mrf.mxu0 }
 0x39e   : > { %16021 = vst [vmem:[#allocation70_spill] sm:$0xff] %v15205_v2  ;;  %16022 = vst [vmem:[#allocation22_spill] sm:$0xff] %v15207_v52  ;;  %v15210_v28 = vadd.f32 %v11885_v20, %v15056_v22 }
 0x39f   : > { %v7800_v24 = vpop.f32.mrf.mxu1  ;;  %v15215_v62 = vpop.f32.mrf.mxu0 }
 0x3a0   : > { %16023 = vst [vmem:[#allocation71_spill] sm:$0xff] %v15210_v28  ;;  %v15213_v18 = vadd.f32 %v7800_v24, %v15059_v0  ;;  %16025 = vst [vmem:[#allocation13_spill] sm:$0xff] %v15215_v62 }
 0x3a1   : > { %v11886_v35 = vpop.f32.mrf.mxu1  ;;  %v15223_v9 = vpop.f32.mrf.mxu0 }
 0x3a2   : > { %16024 = vst [vmem:[#allocation51_spill] sm:$0xff] %v15213_v18  ;;  %v15218_v26 = vadd.f32 %v11886_v35, %v15062_v58  ;;  %16028 = vst [vmem:[#allocation41_spill] sm:$0xff] %v15223_v9 }
 0x3a3   : > { %v7803_v63 = vpop.f32.mrf.mxu1  ;;  %v15231_v52 = vpop.f32.mrf.mxu0 }
 0x3a4   : > { %16026 = vst [vmem:[#allocation87_spill] sm:$0xff] %v15218_v26  ;;  %v15221_v5 = vadd.f32 %v7803_v63, %v15067_v40  ;;  %16031 = vst [vmem:[#allocation72_spill] sm:$0xff] %v15231_v52 }
 0x3a5   : > { %v11889_v50 = vpop.f32.mrf.mxu1  ;;  %v15241_v9 = vpop.f32.mrf.mxu0 }
 0x3a6   : > { %16027 = vst [vmem:[#allocation14_spill] sm:$0xff] %v15221_v5  ;;  %v15226_v22 = vadd.f32 %v11889_v50, %v15072_v55 }
 0x3a7   : > { %v7816_v20 = vpop.f32.mrf.mxu1  ;;  %v15245_v50 = vpop.f32.mrf.mxu0 }
 0x3a8   : > { %16029 = vst [vmem:[#allocation24_spill] sm:$0xff] %v15226_v22  ;;  %v15229_v0 = vadd.f32 %v7816_v20, %v15077_v56 }
 0x3a9   : > { %v11890_v24 = vpop.f32.mrf.mxu1  ;;  %v15251_v52 = vpop.f32.mrf.mxu0 }
 0x3aa   : > { %16030 = vst [vmem:[#allocation25_spill] sm:$0xff] %v15229_v0  ;;  %v15234_v58 = vadd.f32 %v11890_v24, %v15082_v25 }
 0x3ab   : > { %v7819_v35 = vpop.f32.mrf.mxu1 }
 0x3ac   : > { %16032 = vst [vmem:[#allocation89_spill] sm:$0xff] %v15234_v58  ;;  %v15237_v40 = vadd.f32 %v7819_v35, %v15087_v33  ;;  %v15257_v33 = vpop.f32.mrf.mxu0 }
 0x3ad   : > { %v15239_v63 = vpop.f32.mrf.mxu1  ;;  %16035 = vst [vmem:[#allocation42_spill] sm:$0xff] %v15257_v33  ;;  %v10701_v33 = vld [vmem:[%s12504_s15 + $0x2c] sm:$0x1] }
 0x3ae   : > { %16033 = vst [vmem:[#allocation27_spill] sm:$0xff] %v15237_v40  ;;  %v15263_v58 = vpop.f32.mrf.mxu0 }
 0x3af   : > { %v15243_v55 = vpop.f32.mrf.mxu1  ;;  %16038 = vst [vmem:[#allocation10_spill] sm:$0xff] %v15263_v58  ;;  %v10704_v58 = vld [vmem:[%s12504_s15 + $0x38] sm:$0x1] }
 0x3b0   : > { %v15269_v22 = vpop.f32.mrf.mxu0 }
 0x3b1   : > { %v15247_v56 = vpop.f32.mrf.mxu1  ;;  %16041 = vst [vmem:[#allocation26_spill] sm:$0xff] %v15269_v22  ;;  %v10780_v22 = vld [vmem:[%s12504_s15 + $0x30] sm:$0xff]  }
 0x3b2   : > { %v15275_v18 = vpop.f32.mrf.mxu0  ;;  %v10753_v38 = vunpack.c.l.bf16 %v10780_v22  ;;  %v10754_v31 = vunpack.c.h.bf16 %v10780_v22  ;;  %v10781_v22 = vld [vmem:[%s12504_s15 + $0x48] sm:$0xff]  }
 0x3b3   : > { %v15249_v20 = vpop.f32.mrf.mxu1  ;;  %16044 = vst [vmem:[#allocation43_spill] sm:$0xff] %v15275_v18  ;;  %v10758_v3 = vunpack.c.h.bf16 %v10781_v22 }
 0x3b4   : > { %v15281_v47 = vpop.f32.mrf.mxu0 }
 0x3b5   : > { %v15253_v25 = vpop.f32.mrf.mxu1  ;;  %16047 = vst [vmem:[#allocation32_spill] sm:$0xff] %v15281_v47  ;;  %v10779_v47 = vld [vmem:[%s12504_s15 + $0x18] sm:$0xff]  }
 0x3b7   : > { %v15255_v24 = vpop.f32.mrf.mxu1 }
 0x3b8   : > { %16034 = vst [vmem:[#allocation28_spill] sm:$0xff] %v15255_v24  ;;  %v10757_v24 = vunpack.c.l.bf16 %v10781_v22  ;;  %v10711_v22 = vld [vmem:[%s12504_s15 + $0x54] sm:$0xff]  }
 0x3b9   : > { %v15259_v35 = vpop.f32.mrf.mxu1 }
 0x3ba   : > { %16036 = vst [vmem:[#allocation91_spill] sm:$0xff] %v15259_v35 }
 0x3bb   : > { %v15261_v40 = vpop.f32.mrf.mxu1 }
 0x3bc   : > { %16037 = vst [vmem:[#allocation73_spill] sm:$0xff] %v15261_v40  ;;  %v10698_v40 = vld [vmem:[%s12504_s15 + $0x20] sm:$0x1] }
 0x3bd   : > { %v15265_v62 = vpop.f32.mrf.mxu1 }
 0x3be   : > { %16039 = vst [vmem:[#allocation29_spill] sm:$0xff] %v15265_v62 }
 0x3bf   : > { %v15267_v0 = vpop.f32.mrf.mxu1 }
 0x3c0   : > { %16040 = vst [vmem:[#allocation33_spill] sm:$0xff] %v15267_v0  ;;  %v15287_v0 = vpop.f32.mrf.mxu0 }
 0x3c1   : > { %v15271_v5 = vpop.f32.mrf.mxu1  ;;  %16050 = vst [vmem:[#allocation76_spill] sm:$0xff] %v15287_v0 }
 0x3c2   : > { %16042 = vst [vmem:[#allocation74_spill] sm:$0xff] %v15271_v5 }
 0x3c3   : > { %v15273_v26 = vpop.f32.mrf.mxu1 }
 0x3c4   : > { %16043 = vst [vmem:[#allocation18_spill] sm:$0xff] %v15273_v26  ;;  %v15293_v26 = vpop.f32.mrf.mxu0 }
 0x3c5   : > { %v15277_v28 = vpop.f32.mrf.mxu1  ;;  %16053 = vst [vmem:[#allocation50_spill] sm:$0xff] %v15293_v26 }
 0x3c6   : > { %16045 = vst [vmem:[#allocation75_spill] sm:$0xff] %v15277_v28  ;;  %v15300_v46 = vpop.f32.mrf.mxu0 }
 0x3c7   : > { %v15279_v2 = vpop.f32.mrf.mxu1  ;;  %16056 = vst [vmem:[#allocation48_spill] sm:$0xff] %v15300_v46 }
 0x3c8   : > { %16046 = vst [vmem:[#allocation19_spill] sm:$0xff] %v15279_v2  ;;  %v15307_v18 = vpop.f32.mrf.mxu0 }
 0x3c9   : > { %v15283_v11 = vpop.f32.mrf.mxu1  ;;  %16059 = vst [vmem:[#allocation52_spill] sm:$0xff] %v15307_v18 }
 0x3ca   : > { %16048 = vst [vmem:[#allocation44_spill] sm:$0xff] %v15283_v11  ;;  %v10693_v11 = vld [vmem:[%s12504_s15 + $0xc] sm:$0xff]  }
 0x3cb   : > { %v15285_v15 = vpop.f32.mrf.mxu1  ;;  %v9424_v62 = vunpack.c.l.bf16 %v10693_v11 }
 0x3cc   : > { %16049 = vst [vmem:[#allocation45_spill] sm:$0xff] %v15285_v15 }
 0x3cd   : > { %v15289_v39 = vpop.f32.mrf.mxu1 }
 0x3ce   : > { %16051 = vst [vmem:[#allocation46_spill] sm:$0xff] %v15289_v39  ;;  %v10749_v39 = vunpack.c.l.bf16 %v10779_v47 }
 0x3cf   : > { %v15291_v5 = vpop.f32.mrf.mxu1 }
 0x3d0   : > { %16052 = vst [vmem:[#allocation47_spill] sm:$0xff] %v15291_v5  ;;  %v10750_v5 = vunpack.c.h.bf16 %v10779_v47  ;;  %v9526_v46 = vrot.slane %v10749_v39, 1  ;;  %v15318_v47 = vpop.f32.mrf.mxu0  ;;  %v8203_v39 = vadd.f32 %v15065_v14, %v15090_v57  ;;  %v15339_v14 = vadd.f32 %v15080_v36, %v15105_v30 }
 0x3d1   : > { %v15295_v28 = vpop.f32.mrf.mxu1  ;;  %16062 = vst [vmem:[#allocation12_spill] sm:$0xff] %v15318_v47  ;;  %v15343_v57 = vadd.f32 %v15085_v29, %v15110_v41  ;;  %v10710_v29 = vld [vmem:[%s12504_s15 + $0x50] sm:$0x1]  ;;  %v15356_v41 = vadd.f32 %v15092_v61, %v15115_v27  ;;  %v10707_v27 = vld [vmem:[%s12504_s15 + $0x44] sm:$0x1] }
 0x3d2   : > { %16054 = vst [vmem:[#allocation77_spill] sm:$0xff] %v15295_v28  ;;  %v9425_v28 = vunpack.c.h.bf16 %v10693_v11 }
 0x3d3   : > { %v15297_v2 = vpop.f32.mrf.mxu1 }
 0x3d4   : > { %16055 = vst [vmem:[#allocation7_spill] sm:$0xff] %v15297_v2  ;;  %v10695_v2 = vld [vmem:[%s12504_s15 + $0x14] sm:$0x1]  ;;  %v9522_v11 = vrot.slane %v9425_v28, 1  ;;  %v9435_v28 = vunpack.c.l.bf16 %v10704_v58  ;;  %v9536_v58 = vrot.slane %v10753_v38, 1  ;;  %v15362_v38 = vadd.f32 %v15097_v17, %v15120_v10 }
 0x3d5   : > { %v15302_v15 = vpop.f32.mrf.mxu1  ;;  %v9426_v35 = vunpack.c.l.bf16 %v10695_v2  ;;  %v8201_v2 = vadd.f32 %v15070_v13, %v15095_v51 }
 0x3d6   : > { %16057 = vst [vmem:[#allocation49_spill] sm:$0xff] %v15302_v15  ;;  %v9527_v15 = vrot.slane %v10750_v5, 1  ;;  %v9431_v5 = vunpack.c.h.bf16 %v10699_v53 }
 0x3d7   : > { %v15305_v0 = vpop.f32.mrf.mxu1  ;;  %v9524_v51 = vrot.slane %v9426_v35, 1  ;;  %v9539_v35 = vrot.slane %v9435_v28, 1 }
 0x3d8   : > { %16058 = vst [vmem:[#allocation78_spill] sm:$0xff] %v15305_v0  ;;  %v9429_v0 = vunpack.c.l.bf16 %v10698_v40  ;;  %v15329_v40 = vadd.f32 %v15075_v45, %v15100_v16  ;;  %v10705_v45 = vld [vmem:[%s12504_s15 + $0x3c] sm:$0xff]   ;;  %v15346_v16 = vpop.f32.mrf.mxu0  ;;  %v9532_v30 = vrot.slane %v9431_v5, 1 }
 0x3d9   : > { %v15309_v26 = vpop.f32.mrf.mxu1  ;;  %v15372_v61 = vsel %vm9520_vm6, %v9522_v11, %v9524_v51 }
 0x3da   : > { %16060 = vst [vmem:[#allocation79_spill] sm:$0xff] %v15309_v26  ;;  %v9521_v26 = vrot.slane %v9424_v62, 1  ;;  %v15334_v62 = vsel %vm9520_vm6, %v9526_v46, %v9527_v15  ;;  %v9529_v13 = vrot.slane %v9429_v0, 1  ;;  %v15379_v5 = vpop.f32.mrf.mxu0 }
 0x3db   : > { %v15314_v48 = vpop.f32.mrf.mxu1 }
 0x3dc   : > { %16061 = vst [vmem:[#allocation23_spill] sm:$0xff] %v15314_v48  ;;  %v9430_v48 = vunpack.c.l.bf16 %v10699_v53  ;;  %v15351_v46 = vsel %vm9520_vm6, %v9521_v26, %v9522_v11  ;;  %v9437_v26 = vunpack.c.h.bf16 %v10705_v45  ;;  %v15389_v11 = vadd.f32 %v15112_v8, %v15135_v37 }
 0x3dd   : > { %v15320_v18 = vpop.f32.mrf.mxu1  ;;  %v8574_v8 = vadd.f32 %v15239_v63, %v8203_v39  ;;  %v8572_v63 = vadd.f32 %v15243_v55, %v8201_v2  ;;  %v8575_v55 = vadd.f32 %v15247_v56, %v15329_v40  ;;  %v8573_v56 = vadd.f32 %v15249_v20, %v15339_v14 }
 0x3de   : > { %16063 = vst [vmem:[#allocation53_spill] sm:$0xff] %v15320_v18  ;;  %v9432_v18 = vunpack.c.l.bf16 %v10701_v33  ;;  %v9531_v36 = vrot.slane %v9430_v48, 1  ;;  %v15366_v48 = vadd.f32 %v15102_v1, %v15125_v21  ;;  %v15377_v33 = vadd.f32 %v15107_v34, %v15130_v4 }
 0x3df   : > { %v15331_v47 = vpop.f32.mrf.mxu1  ;;  %v9441_v21 = vunpack.c.l.bf16 %v10710_v29  ;;  %v9546_v34 = vrot.slane %v10757_v24, 1  ;;  %v9547_v4 = vrot.slane %v10758_v3, 1  ;;  %v15402_v29 = vadd.f32 %v15117_v60, %v15140_v32  ;;  %v10716_v3 = vld [vmem:[%s12504_s15 + $0x68] sm:$0x1] }
 0x3e0   : > { %16064 = vst [vmem:[#allocation55_spill] sm:$0xff] %v15331_v47  ;;  %v9537_v47 = vrot.slane %v10754_v31, 1  ;;  %v15369_v31 = vsel %vm9520_vm6, %v9527_v15, %v9529_v13  ;;  %v9534_v1 = vrot.slane %v9432_v18, 1  ;;  %v10782_v15 = vld [vmem:[%s12504_s15 + $0x60] sm:$0xff]   ;;  %v15392_v28 = vsel %vm9520_vm6, %v9531_v36, %v9532_v30  ;;  %v15406_v36 = vpop.f32.mrf.mxu0 }
 0x3e1   : > { %v15348_v53 = vpop.f32.mrf.mxu1  ;;  %v9542_v18 = vrot.slane %v9437_v26, 1  ;;  %v10761_v37 = vunpack.c.l.bf16 %v10782_v15  ;;  %v10762_v24 = vunpack.c.h.bf16 %v10782_v15  ;;  %v9443_v26 = vunpack.c.h.bf16 %v10711_v22 }
 0x3e2   : > { %16065 = vst [vmem:[#allocation80_spill] sm:$0xff] %v15348_v53  ;;  %v9436_v53 = vunpack.c.l.bf16 %v10705_v45  ;;  %v15384_v10 = vsel %vm9520_vm6, %v9536_v58, %v9537_v47  ;;  %v15398_v51 = vsel %vm9520_vm6, %v9537_v47, %v9539_v35  ;;  %v9438_v58 = vunpack.c.l.bf16 %v10707_v27  ;;  %v10713_v27 = vld [vmem:[%s12504_s15 + $0x5c] sm:$0x1]  ;;  %v15439_v15 = vpop.f32.mrf.mxu0 }
 0x3e3   : > { %v15358_v0 = vpop.f32.mrf.mxu1  ;;  %v15411_v47 = vsel %vm9520_vm6, %v9532_v30, %v9534_v1  ;;  %v9442_v35 = vunpack.c.l.bf16 %v10711_v22  ;;  %v15415_v60 = vadd.f32 %v15122_v59, %v15145_v19  ;;  %v15419_v32 = vadd.f32 %v15127_v6, %v15150_v43 }
 0x3e4   : > { %v9541_v45 = vrot.slane %v9436_v53, 1  ;;  %v9549_v53 = vrot.slane %v9441_v21, 1  ;;  %v15423_v39 = vsel %vm9520_vm6, %v9546_v34, %v9547_v4  ;;  %v15428_v30 = vadd.f32 %v15132_v49, %v15155_v54 }
 0x3e5   : > { %v15381_v17 = vpop.f32.mrf.mxu1  ;;  %v9544_v19 = vrot.slane %v9438_v58, 1  ;;  %v9447_v6 = vunpack.c.l.bf16 %v10716_v3  ;;  %v8944_v43 = vadd.f32 %v15241_v9, %v8574_v8  ;;  %v9556_v2 = vrot.slane %v10761_v37, 1  ;;  %v10783_v3 = vld [vmem:[%s12504_s15 + $0x78] sm:$0xff]  }
 0x3e6   : > { %v15434_v59 = vsel %vm9520_vm6, %v9541_v45, %v9542_v18  ;;  %v9557_v21 = vrot.slane %v10762_v24, 1  ;;  %v15442_v54 = vsel %vm9520_vm6, %v9547_v4, %v9549_v53  ;;  %v9551_v34 = vrot.slane %v9442_v35, 1  ;;  %v15474_v53 = vpop.f32.mrf.mxu0 }
 0x3e7   : > { %v15395_v13 = vpop.f32.mrf.mxu1  ;;  %v9552_v22 = vrot.slane %v9443_v26, 1  ;;  %v9444_v45 = vunpack.c.l.bf16 %v10713_v27  ;;  %v15446_v58 = vadd.f32 %v15137_v23, %v15160_v44  ;;  %v8942_v9 = vadd.f32 %v15245_v50, %v8572_v63 }
 0x3e8   : > { %16066 = vst [vmem:[#allocation54_spill] sm:$0xff] %v15395_v13  ;;  %v15455_v4 = vadd.f32 %v15142_v42, %v15165_v7  ;;  %v8578_v8 = vadd.f32 %v15253_v25, %v15343_v57  ;;  %v15460_v24 = vsel %vm9520_vm6, %v9542_v18, %v9544_v19  ;;  %v9559_v23 = vrot.slane %v9447_v6, 1  ;;  %v16067_v42 = vld [vmem:[#allocation36_spill] sm:$0xff] }
 0x3e9   : > { %v15408_v13 = vpop.f32.mrf.mxu1  ;;  %v8945_v44 = vadd.f32 %v15251_v52, %v8575_v55  ;;  %v15465_v14 = vsel %vm9520_vm6, %v9556_v2, %v9557_v21  ;;  %v15470_v7 = vadd.f32 %v16067_v42, %v15170_v12  ;;  %v16068_v25 = vld [vmem:[#allocation28_spill] sm:$0xff]  ;;  %v15477_v35 = vsel %vm9520_vm6, %v9551_v34, %v9552_v22  ;;  %v16070_v12 = vld [vmem:[#allocation9_spill] sm:$0xff]  ;;  %v15502_v42 = vpop.f32.mrf.mxu0 }
 0x3ea   : > { %v8576_v57 = vadd.f32 %v16068_v25, %v15356_v41  ;;  %v9554_v52 = vrot.slane %v9444_v45, 1  ;;  %v16071_v6 = vld [vmem:[#allocation40_spill] sm:$0xff]  ;;  %v16072_v41 = vld [vmem:[#allocation10_spill] sm:$0xff]  ;;  %v10765_v34 = vunpack.c.l.bf16 %v10783_v3  ;;  %v16073_v45 = vld [vmem:[#allocation91_spill] sm:$0xff] }
 0x3eb   : > { %v15430_v1 = vpop.f32.mrf.mxu1  ;;  %v8948_v55 = vadd.f32 %v16072_v41, %v8578_v8  ;;  %v16074_v8 = vld [vmem:[#allocation34_spill] sm:$0xff] }
 0x3ec   : > { %v15505_v25 = vsel %vm9520_vm6, %v9552_v22, %v9554_v52 }
 0x3ed   : > { %v12053_v49 = vpop.f32.mrf.mxu1 }
 0x3ee   : > { %v9314_v40 = vadd.f32 %v12053_v49, %v8944_v43  ;;  %v15483_v43 = vadd.f32 %v16071_v6, %v16070_v12  ;;  %v15487_v49 = vsel %vm9520_vm6, %v9557_v21, %v9559_v23  ;;  %v16076_v21 = vld [vmem:[#allocation26_spill] sm:$0xff] }
 0x3ef   : > { %v9185_v37 = vpop.f32.mrf.mxu1  ;;  %v8946_v23 = vadd.f32 %v16076_v21, %v8576_v57 }
 0x3f0   : > { %v9667_v50 = vadd.f32 %v15334_v62, %v9314_v40  ;;  %v9312_v20 = vadd.f32 %v9185_v37, %v8942_v9  ;;  %v16069_v62 = vld [vmem:[#allocation42_spill] sm:$0xff]  ;;  %v8579_v9 = vadd.f32 %v16073_v45, %v15362_v38  ;;  %v16079_v45 = vld [vmem:[#allocation43_spill] sm:$0xff] }
 0x3f1   : > { %v12054_v18 = vpop.f32.mrf.mxu1  ;;  %v8943_v26 = vadd.f32 %v16069_v62, %v8573_v56  ;;  %v10717_v37 = vld [vmem:[%s12504_s15 + $0x6c] sm:$0xff]   ;;  %v16077_v62 = vld [vmem:[#allocation73_spill] sm:$0xff] }
 0x3f2   : > { %v9699_v63 = vmax.f32 %v9667_v50, 0.0  ;;  %v9665_v27 = vadd.f32 %v15351_v46, %v9312_v20  ;;  %v9315_v19 = vadd.f32 %v12054_v18, %v8945_v44  ;;  %v10722_v44 = vld [vmem:[%s12504_s15 + $0x80] sm:$0x1]  ;;  %v16075_v50 = vld [vmem:[#allocation30_spill] sm:$0xff]  ;;  %v10766_v18 = vunpack.c.h.bf16 %v10783_v3 }
 0x3f3   : > { %v9188_v2 = vpop.f32.mrf.mxu1  ;;  %v15499_v20 = vadd.f32 %v16075_v50, %v16074_v8  ;;  %v9448_v6 = vunpack.c.l.bf16 %v10717_v37  ;;  %v9449_v41 = vunpack.c.h.bf16 %v10717_v37  ;;  %v8949_v22 = vadd.f32 %v16079_v45, %v8579_v9  ;;  %v16083_v9 = vld [vmem:[#allocation32_spill] sm:$0xff] }
 0x3f4   : > { %9731 = vst [vmem:[%s15491_s6 + $0x10] sm:$0xff] %v9699_v63  ;;  %v9697_v46 = vmax.f32 %v9665_v27, 0.0  ;;  %v9668_v56 = vadd.f32 %v15369_v31, %v9315_v19  ;;  %v9313_v40 = vadd.f32 %v9188_v2, %v8943_v26  ;;  %v8577_v31 = vadd.f32 %v16077_v62, %v15366_v48  ;;  %v16078_v19 = vld [vmem:[#allocation29_spill] sm:$0xff]  ;;  %v16084_v62 = vld [vmem:[#allocation76_spill] sm:$0xff] }
 0x3f5   : > { %v12057_v38 = vpop.f32.mrf.mxu1  ;;  %v8582_v12 = vadd.f32 %v16078_v19, %v15377_v33  ;;  %v9453_v2 = vunpack.c.l.bf16 %v10722_v44  ;;  %v9566_v44 = vrot.slane %v10765_v34, 1  ;;  %v9567_v8 = vrot.slane %v10766_v18, 1 }
 0x3f6   : > { %9729 = vst [vmem:[%s15491_s6] sm:$0xff] %v9697_v46  ;;  %v9700_v26 = vmax.f32 %v9668_v56, 0.0  ;;  %v9666_v63 = vadd.f32 %v15372_v61, %v9313_v40  ;;  %v9318_v27 = vadd.f32 %v12057_v38, %v8948_v55  ;;  %v16080_v46 = vld [vmem:[#allocation16_spill] sm:$0xff]  ;;  %v16081_v56 = vld [vmem:[#allocation31_spill] sm:$0xff]  ;;  %v16082_v55 = vld [vmem:[#allocation33_spill] sm:$0xff]  ;;  %v15522_v40 = vpop.f32.mrf.mxu0  ;;  %v8947_v50 = vadd.f32 %v16083_v9, %v8577_v31 }
 0x3f7   : > { %v9201_v57 = vpop.f32.mrf.mxu1  ;;  %v15518_v61 = vadd.f32 %v16081_v56, %v16080_v46  ;;  %v8580_v33 = vadd.f32 %v16082_v55, %v15389_v11  ;;  %v10719_v38 = vld [vmem:[%s12504_s15 + $0x74] sm:$0x1]  ;;  %v9562_v11 = vrot.slane %v9449_v41, 1  ;;  %v9569_v19 = vrot.slane %v9453_v2, 1  ;;  %v16089_v2 = vld [vmem:[#allocation18_spill] sm:$0xff] }
 0x3f8   : > { %9732 = vst [vmem:[%s15491_s6 + $0x18] sm:$0xff] %v9700_v26  ;;  %v9698_v3 = vmax.f32 %v9666_v63, 0.0  ;;  %v9671_v48 = vadd.f32 %v15384_v10, %v9318_v27  ;;  %v9316_v52 = vadd.f32 %v9201_v57, %v8946_v23  ;;  %v8952_v26 = vadd.f32 %v16084_v62, %v8582_v12  ;;  %v16085_v57 = vld [vmem:[#allocation74_spill] sm:$0xff]  ;;  %v16090_v9 = vld [vmem:[#allocation39_spill] sm:$0xff] }
 0x3f9   : > { %v12058_v37 = vpop.f32.mrf.mxu1  ;;  %v9561_v27 = vrot.slane %v9448_v6, 1  ;;  %v8583_v45 = vadd.f32 %v16085_v57, %v15402_v29  ;;  %v15541_v41 = vsel %vm9520_vm6, %v9566_v44, %v9567_v8  ;;  %v9450_v29 = vunpack.c.l.bf16 %v10719_v38  ;;  %v16093_v38 = vld [vmem:[#allocation48_spill] sm:$0xff]  ;;  %v10723_v57 = vld [vmem:[%s12504_s15 + $0x84] sm:$0xff]  }
 0x3fa   : > { %9730 = vst [vmem:[%s15491_s6 + $0x8] sm:$0xff] %v9698_v3  ;;  %v9703_v21 = vmax.f32 %v9671_v48, 0.0  ;;  %v9669_v10 = vadd.f32 %v15392_v28, %v9316_v52  ;;  %v9319_v23 = vadd.f32 %v12058_v37, %v8949_v22  ;;  %v16086_v3 = vld [vmem:[#allocation83_spill] sm:$0xff]  ;;  %v16087_v28 = vld [vmem:[#allocation37_spill] sm:$0xff]  ;;  %v16088_v48 = vld [vmem:[#allocation50_spill] sm:$0xff]  ;;  %v15538_v52 = vpop.f32.mrf.mxu0  ;;  %v8581_v46 = vadd.f32 %v16089_v2, %v15415_v60 }
 0x3fb   : > { %v9204_v63 = vpop.f32.mrf.mxu1  ;;  %v15535_v22 = vadd.f32 %v16087_v28, %v16086_v3  ;;  %v8950_v12 = vadd.f32 %v16088_v48, %v8580_v33  ;;  %v10784_v37 = vld [vmem:[%s12504_s15 + $0x90] sm:$0xff]   ;;  %v16091_v33 = vld [vmem:[#allocation8_spill] sm:$0xff]  ;;  %v15558_v60 = vsel %vm9520_vm6, %v9567_v8, %v9569_v19  ;;  %v8953_v62 = vadd.f32 %v16093_v38, %v8583_v45 }
 0x3fc   : > { %9735 = vst [vmem:[%s15491_s6 + $0x30] sm:$0xff] %v9703_v21  ;;  %v9701_v34 = vmax.f32 %v9669_v10, 0.0  ;;  %v9672_v18 = vadd.f32 %v15398_v51, %v9319_v23  ;;  %v9317_v31 = vadd.f32 %v9204_v63, %v8947_v50  ;;  %v15550_v50 = vadd.f32 %v16091_v33, %v16090_v9  ;;  %v16092_v21 = vld [vmem:[#allocation75_spill] sm:$0xff]  ;;  %v16095_v19 = vld [vmem:[#allocation52_spill] sm:$0xff] }
 0x3fd   : > { %v12061_v6 = vpop.f32.mrf.mxu1  ;;  %v8586_v10 = vadd.f32 %v16092_v21, %v15419_v32  ;;  %v15555_v23 = vsel %vm9520_vm6, %v9561_v27, %v9562_v11  ;;  %v9564_v27 = vrot.slane %v9450_v29, 1  ;;  %v10769_v3 = vunpack.c.l.bf16 %v10784_v37  ;;  %v16097_v2 = vld [vmem:[#allocation11_spill] sm:$0xff] }
 0x3fe   : > { %9733 = vst [vmem:[%s15491_s6 + $0x20] sm:$0xff] %v9701_v34  ;;  %v9704_v51 = vmax.f32 %v9672_v18, 0.0  ;;  %v9670_v56 = vadd.f32 %v15411_v47, %v9317_v31  ;;  %v9322_v55 = vadd.f32 %v12061_v6, %v8952_v26  ;;  %v16094_v34 = vld [vmem:[#allocation19_spill] sm:$0xff]  ;;  %v15566_v18 = vpop.f32.mrf.mxu0  ;;  %v10770_v8 = vunpack.c.h.bf16 %v10784_v37  ;;  %v16099_v37 = vld [vmem:[#allocation44_spill] sm:$0xff] }
 0x3ff   : > { %v9217_v44 = vpop.f32.mrf.mxu1  ;;  %v8584_v32 = vadd.f32 %v16094_v34, %v15428_v30  ;;  %v8951_v28 = vadd.f32 %v16095_v19, %v8581_v46  ;;  %v16098_v30 = vld [vmem:[#allocation12_spill] sm:$0xff]  ;;  %v9454_v9 = vunpack.c.l.bf16 %v10723_v57  ;;  %v9455_v29 = vunpack.c.h.bf16 %v10723_v57 }
 0x400   : > { %9736 = vst [vmem:[%s15491_s6 + $0x38] sm:$0xff] %v9704_v51  ;;  %v9702_v47 = vmax.f32 %v9670_v56, 0.0  ;;  %v9675_v26 = vadd.f32 %v15423_v39, %v9322_v55  ;;  %v9320_v63 = vadd.f32 %v9217_v44, %v8950_v12  ;;  %v10728_v39 = vld [vmem:[%s12504_s15 + $0x98] sm:$0x1]  ;;  %v8956_v56 = vadd.f32 %v16098_v30, %v8586_v10  ;;  %v15582_v38 = vpop.f32.mrf.mxu0 }
 0x401   : > { %v12062_v31 = vpop.f32.mrf.mxu1  ;;  %v16096_v12 = vld [vmem:[#allocation20_spill] sm:$0xff]  ;;  %v8587_v33 = vadd.f32 %v16099_v37, %v15446_v58  ;;  %v8954_v44 = vadd.f32 %v15346_v16, %v8584_v32  ;;  %v15585_v10 = vsel %vm9520_vm6, %v9562_v11, %v9564_v27  ;;  %v16101_v16 = vld [vmem:[#allocation46_spill] sm:$0xff]  ;;  %v9572_v11 = vrot.slane %v9455_v29, 1  ;;  %v16105_v29 = vld [vmem:[#allocation71_spill] sm:$0xff] }
 0x402   : > { %9734 = vst [vmem:[%s15491_s6 + $0x28] sm:$0xff] %v9702_v47  ;;  %v9707_v45 = vmax.f32 %v9675_v26, 0.0  ;;  %v9673_v48 = vadd.f32 %v15434_v59, %v9320_v63  ;;  %v9323_v6 = vadd.f32 %v12062_v31, %v8953_v62  ;;  %v15574_v51 = vadd.f32 %v16097_v2, %v16096_v12  ;;  %v16100_v63 = vld [vmem:[#allocation45_spill] sm:$0xff]  ;;  %v10725_v31 = vld [vmem:[%s12504_s15 + $0x8c] sm:$0x1]  ;;  %v16104_v12 = vld [vmem:[#allocation47_spill] sm:$0xff] }
 0x403   : > { %v9220_v55 = vpop.f32.mrf.mxu1  ;;  %v9576_v47 = vrot.slane %v10769_v3, 1  ;;  %v9459_v26 = vunpack.c.l.bf16 %v10728_v39  ;;  %v8585_v58 = vadd.f32 %v16100_v63, %v15455_v4  ;;  %v8590_v32 = vadd.f32 %v16101_v16, %v15470_v7  ;;  %v16103_v39 = vld [vmem:[#allocation38_spill] sm:$0xff]  ;;  %v15603_v7 = vpop.f32.mrf.mxu0  ;;  %v16106_v37 = vld [vmem:[#allocation21_spill] sm:$0xff]  ;;  %v16110_v16 = vld [vmem:[#allocation7_spill] sm:$0xff] }
 0x404   : > { %9739 = vst [vmem:[%s15491_s6 + $0x50] sm:$0xff] %v9707_v45  ;;  %v9705_v46 = vmax.f32 %v9673_v48, 0.0  ;;  %v9676_v59 = vadd.f32 %v15442_v54, %v9323_v6  ;;  %v9321_v21 = vadd.f32 %v9220_v55, %v8951_v28  ;;  %v9577_v28 = vrot.slane %v10770_v8, 1  ;;  %v16102_v6 = vld [vmem:[#allocation70_spill] sm:$0xff] }
 0x405   : > { %v12065_v62 = vpop.f32.mrf.mxu1  ;;  %v9571_v45 = vrot.slane %v9454_v9, 1  ;;  %v8957_v27 = vadd.f32 %v15379_v5, %v8587_v33  ;;  %v8588_v2 = vadd.f32 %v16104_v12, %v15483_v43  ;;  %v9579_v30 = vrot.slane %v9459_v26, 1  ;;  %v10785_v63 = vld [vmem:[%s12504_s15 + $0xa8] sm:$0xff]  }
 0x406   : > { %9737 = vst [vmem:[%s15491_s6 + $0x40] sm:$0xff] %v9705_v46  ;;  %v9708_v57 = vmax.f32 %v9676_v59, 0.0  ;;  %v9674_v34 = vadd.f32 %v15460_v24, %v9321_v21  ;;  %v9326_v54 = vadd.f32 %v12065_v62, %v8956_v56  ;;  %v15599_v24 = vadd.f32 %v16103_v39, %v16102_v6 }
 0x407   : > { %v9233_v19 = vpop.f32.mrf.mxu1  ;;  %v9456_v56 = vunpack.c.l.bf16 %v10725_v31  ;;  %v8955_v5 = vadd.f32 %v15406_v36, %v8585_v58  ;;  %v15610_v33 = vadd.f32 %v16106_v37, %v16105_v29  ;;  %v8960_v43 = vadd.f32 %v15439_v15, %v8590_v32  ;;  %v16107_v36 = vld [vmem:[#allocation77_spill] sm:$0xff]  ;;  %v16108_v58 = vld [vmem:[#allocation51_spill] sm:$0xff] }
 0x408   : > { %9740 = vst [vmem:[%s15491_s6 + $0x58] sm:$0xff] %v9708_v57  ;;  %v9706_v3 = vmax.f32 %v9674_v34, 0.0  ;;  %v9679_v4 = vadd.f32 %v15465_v14, %v9326_v54  ;;  %v9324_v48 = vadd.f32 %v9233_v19, %v8954_v44  ;;  %v15614_v59 = vsel %vm9520_vm6, %v9576_v47, %v9577_v28  ;;  %v16109_v15 = vld [vmem:[#allocation69_spill] sm:$0xff]  ;;  %v15629_v34 = vpop.f32.mrf.mxu0 }
 0x409   : > { %v12066_v8 = vpop.f32.mrf.mxu1  ;;  %v15617_v21 = vsel %vm9520_vm6, %v9571_v45, %v9572_v11  ;;  %v8591_v44 = vadd.f32 %v16107_v36, %v15499_v20  ;;  %v15626_v57 = vadd.f32 %v16109_v15, %v16108_v58  ;;  %v8958_v47 = vadd.f32 %v15474_v53, %v8588_v2  ;;  %v16112_v53 = vld [vmem:[#allocation17_spill] sm:$0xff] }
 0x40a   : > { %9738 = vst [vmem:[%s15491_s6 + $0x48] sm:$0xff] %v9706_v3  ;;  %v9711_v55 = vmax.f32 %v9679_v4, 0.0  ;;  %v9677_v14 = vadd.f32 %v15477_v35, %v9324_v48  ;;  %v9327_v9 = vadd.f32 %v12066_v8, %v8957_v27  ;;  %v15632_v31 = vsel %vm9520_vm6, %v9577_v28, %v9579_v30  ;;  %v10729_v27 = vld [vmem:[%s12504_s15 + $0x9c] sm:$0xff]   ;;  %v16111_v3 = vld [vmem:[#allocation87_spill] sm:$0xff] }
 0x40b   : > { %v9236_v46 = vpop.f32.mrf.mxu1  ;;  %v9574_v20 = vrot.slane %v9456_v56, 1  ;;  %v8589_v32 = vadd.f32 %v16110_v16, %v15518_v61  ;;  %v15641_v4 = vadd.f32 %v16112_v53, %v16111_v3  ;;  %v16113_v48 = vld [vmem:[#allocation49_spill] sm:$0xff]  ;;  %v10773_v39 = vunpack.c.l.bf16 %v10785_v63  ;;  %v10734_v30 = vld [vmem:[%s12504_s15 + $0xb0] sm:$0x1]  ;;  %v16114_v56 = vld [vmem:[#allocation78_spill] sm:$0xff] }
 0x40c   : > { %9743 = vst [vmem:[%s15491_s6 + $0x70] sm:$0xff] %v9711_v55  ;;  %v9709_v35 = vmax.f32 %v9677_v14, 0.0  ;;  %v9680_v62 = vadd.f32 %v15487_v49, %v9327_v9  ;;  %v9325_v26 = vadd.f32 %v9236_v46, %v8955_v5  ;;  %v8594_v6 = vadd.f32 %v16113_v48, %v15535_v22  ;;  %v15651_v55 = vpop.f32.mrf.mxu0  ;;  %v10731_v46 = vld [vmem:[%s12504_s15 + $0xa4] sm:$0x1]  ;;  %v16116_v16 = vld [vmem:[#allocation23_spill] sm:$0xff] }
 0x40d   : > { %v12069_v54 = vpop.f32.mrf.mxu1  ;;  %v10774_v12 = vunpack.c.h.bf16 %v10785_v63  ;;  %v8961_v61 = vadd.f32 %v15502_v42, %v8591_v44  ;;  %v8592_v5 = vadd.f32 %v16114_v56, %v15550_v50  ;;  %v15654_v22 = vsel %vm9520_vm6, %v9572_v11, %v9574_v20  ;;  %v16115_v11 = vld [vmem:[#allocation79_spill] sm:$0xff] }
 0x40e   : > { %9741 = vst [vmem:[%s15491_s6 + $0x60] sm:$0xff] %v9709_v35  ;;  %v9712_v49 = vmax.f32 %v9680_v62, 0.0  ;;  %v9678_v19 = vadd.f32 %v15505_v25, %v9325_v26  ;;  %v9330_v45 = vadd.f32 %v12069_v54, %v8960_v43  ;;  %v9460_v9 = vunpack.c.l.bf16 %v10729_v27 }
 0x40f   : > { %v9249_v28 = vpop.f32.mrf.mxu1  ;;  %v9461_v29 = vunpack.c.h.bf16 %v10729_v27  ;;  %v8959_v42 = vadd.f32 %v15522_v40, %v8589_v32  ;;  %v8964_v36 = vadd.f32 %v15538_v52, %v8594_v6  ;;  %v9586_v44 = vrot.slane %v10773_v39, 1 }
 0x410   : > { %9744 = vst [vmem:[%s15491_s6 + $0x78] sm:$0xff] %v9712_v49  ;;  %v9710_v2 = vmax.f32 %v9678_v19, 0.0  ;;  %v9683_v25 = vadd.f32 %v15541_v41, %v9330_v45  ;;  %v9328_v8 = vadd.f32 %v9249_v28, %v8958_v47  ;;  %v9587_v35 = vrot.slane %v10774_v12, 1  ;;  %v16117_v45 = vld [vmem:[#allocation14_spill] sm:$0xff] }
 0x411   : > { %v12070_v14 = vpop.f32.mrf.mxu1  ;;  %v9465_v62 = vunpack.c.l.bf16 %v10734_v30  ;;  %v8595_v26 = vadd.f32 %v16115_v11, %v15574_v51  ;;  %v8962_v15 = vadd.f32 %v15566_v18, %v8592_v5  ;;  %v9581_v54 = vrot.slane %v9460_v9, 1  ;;  %v16119_v18 = vld [vmem:[#allocation53_spill] sm:$0xff] }
 0x412   : > { %9742 = vst [vmem:[%s15491_s6 + $0x68] sm:$0xff] %v9710_v2  ;;  %v9715_v37 = vmax.f32 %v9683_v25, 0.0  ;;  %v9681_v41 = vadd.f32 %v15555_v23, %v9328_v8  ;;  %v9331_v43 = vadd.f32 %v12070_v14, %v8961_v61  ;;  %v12030_v23 = vpop.f32.mrf.mxu0  ;;  %v9582_v52 = vrot.slane %v9461_v29, 1  ;;  %v16120_v61 = vld [vmem:[#allocation24_spill] sm:$0xff]  ;;  %v16121_v2 = vld [vmem:[#allocation22_spill] sm:$0xff]  ;;  %v16122_v8 = vld [vmem:[#allocation55_spill] sm:$0xff] }
 0x413   : > { %v9252_v50 = vpop.f32.mrf.mxu1  ;;  %v9462_v20 = vunpack.c.l.bf16 %v10731_v46  ;;  %v8593_v32 = vadd.f32 %v16116_v16, %v15599_v24  ;;  %v8598_v3 = vadd.f32 %v16119_v18, %v15610_v33  ;;  %v9588_v48 = vsel %vm9520_vm6, %v9586_v44, %v9587_v35  ;;  %v16125_v44 = vld [vmem:[#allocation80_spill] sm:$0xff]  ;;  %v10740_v16 = vld [vmem:[%s12504_s15 + $0xc8] sm:$0x1] }
 0x414   : > { %9747 = vst [vmem:[%s15491_s6 + $0x90] sm:$0xff] %v9715_v37  ;;  %v9713_v63 = vmax.f32 %v9681_v41, 0.0  ;;  %v9684_v40 = vadd.f32 %v15558_v60, %v9331_v43  ;;  %v9329_v58 = vadd.f32 %v9252_v50, %v8959_v42  ;;  %v16118_v60 = vld [vmem:[#allocation85_spill] sm:$0xff]  ;;  %v9589_v6 = vrot.slane %v9465_v62, 1  ;;  %v8914_v33 = vpop.f32.mrf.mxu0 }
 0x415   : > { %v12073_v47 = vpop.f32.mrf.mxu1  ;;  %v8226_v27 = vadd.f32 %v16118_v60, %v16117_v45  ;;  %v8965_v28 = vadd.f32 %v15582_v38, %v8595_v26  ;;  %v8231_v25 = vadd.f32 %v16121_v2, %v16120_v61  ;;  %v8596_v30 = vadd.f32 %v16122_v8, %v15626_v57  ;;  %v16123_v42 = vld [vmem:[#allocation25_spill] sm:$0xff]  ;;  %v10735_v26 = vld [vmem:[%s12504_s15 + $0xb4] sm:$0xff]  }
 0x416   : > { %9745 = vst [vmem:[%s15491_s6 + $0x80] sm:$0xff] %v9713_v63  ;;  %v9716_v49 = vmax.f32 %v9684_v40, 0.0  ;;  %v9682_v51 = vadd.f32 %v15585_v10, %v9329_v58  ;;  %v9334_v19 = vadd.f32 %v12073_v47, %v8964_v36  ;;  %v10786_v10 = vld [vmem:[%s12504_s15 + $0xc0] sm:$0xff]   ;;  %v9583_v5 = vsel %vm9520_vm6, %v9581_v54, %v9582_v52  ;;  %v12033_v57 = vpop.f32.mrf.mxu0 }
 0x417   : > { %v9265_v53 = vpop.f32.mrf.mxu1  ;;  %v9584_v14 = vrot.slane %v9462_v20, 1  ;;  %v8963_v38 = vadd.f32 %v15603_v7, %v8593_v32  ;;  %v16124_v37 = vld [vmem:[#allocation13_spill] sm:$0xff]  ;;  %v8968_v43 = vadd.f32 %v15629_v34, %v8598_v3  ;;  %v9590_v36 = vsel %vm9520_vm6, %v9587_v35, %v9589_v6  ;;  %v16128_v3 = vld [vmem:[#allocation27_spill] sm:$0xff] }
 0x418   : > { %9748 = vst [vmem:[%s15491_s6 + $0x98] sm:$0xff] %v9716_v49  ;;  %v9714_v24 = vmax.f32 %v9682_v51, 0.0  ;;  %v9687_v39 = vadd.f32 %v15614_v59, %v9334_v19  ;;  %v9332_v12 = vadd.f32 %v9265_v53, %v8962_v15  ;;  %v8229_v41 = vadd.f32 %v16124_v37, %v16123_v42  ;;  %v16126_v63 = vld [vmem:[#allocation89_spill] sm:$0xff]  ;;  %v8927_v49 = vpop.f32.mrf.mxu0  ;;  %v16129_v53 = vld [vmem:[#allocation72_spill] sm:$0xff] }
 0x419   : > { %v12074_v56 = vpop.f32.mrf.mxu1  ;;  %v10777_v50 = vunpack.c.l.bf16 %v10786_v10  ;;  %v8599_v7 = vadd.f32 %v16125_v44, %v15641_v4  ;;  %v16127_v40 = vld [vmem:[#allocation41_spill] sm:$0xff]  ;;  %v8966_v34 = vadd.f32 %v15651_v55, %v8596_v30  ;;  %v9585_v35 = vsel %vm9520_vm6, %v9582_v52, %v9584_v14 }
 0x41a   : > { %9746 = vst [vmem:[%s15491_s6 + $0x88] sm:$0xff] %v9714_v24  ;;  %v9719_v9 = vmax.f32 %v9687_v39, 0.0  ;;  %v9685_v59 = vadd.f32 %v15617_v21, %v9332_v12  ;;  %v9335_v29 = vadd.f32 %v12074_v56, %v8965_v28  ;;  %v8232_v58 = vadd.f32 %v16127_v40, %v16126_v63 }
 0x41b   : > { %v9268_v46 = vpop.f32.mrf.mxu1  ;;  %v10778_v47 = vunpack.c.h.bf16 %v10786_v10  ;;  %v8597_v54 = vadd.f32 %v15358_v0, %v8226_v27  ;;  %v8602_v32 = vadd.f32 %v15381_v17, %v8231_v25  ;;  %v9596_v55 = vrot.slane %v10777_v50, 1  ;;  %v10737_v27 = vld [vmem:[%s12504_s15 + $0xbc] sm:$0x1]  ;;  %v12034_v25 = vpop.f32.mrf.mxu0  ;;  %s10746_s15 = sshll.u32 %s12439_s22, 12  ;;  %s12321_s22 = scalar_lea.vmem %s15730_s7, 4096 }
 0x41c   : > { %9751 = vst [vmem:[%s15491_s6 + $0xb0] sm:$0xff] %v9719_v9  ;;  %v9717_v62 = vmax.f32 %v9685_v59, 0.0  ;;  %v9688_v21 = vadd.f32 %v15632_v31, %v9335_v29  ;;  %v9333_v11 = vadd.f32 %v9268_v46, %v8963_v38  ;;  %v9466_v19 = vunpack.c.l.bf16 %v10735_v26  ;;  %s15728_s10 = scalar_lea.hbm %s15781_s5, %s10746_s15  ;;  %p12322_p11 = scmp.ne.s32.totalorder %s15730_s7, %s12321_s22 }
 0x41d   : > { %v12077_v15 = vpop.f32.mrf.mxu1  ;;  %v9467_v45 = vunpack.c.h.bf16 %v10735_v26  ;;  %v8969_v60 = vadd.f32 %v12030_v23, %v8599_v7  ;;  %v8230_v6 = vadd.f32 %v16129_v53, %v16128_v3  ;;  %v9597_v17 = vrot.slane %v10778_v47, 1  ;;  %v8930_v46 = vpop.f32.mrf.mxu0  ;;  %p12329_p1 = scmp.lt.s32.totalorder %s12327_s14, %s12321_s22 }
 0x41e   : > { %9749 = vst [vmem:[%s15491_s6 + $0xa0] sm:$0xff] %v9717_v62  ;;  %v9720_v4 = vmax.f32 %v9688_v21, 0.0  ;;  %v9686_v20 = vadd.f32 %v15654_v22, %v9333_v11  ;;  %v9338_v31 = vadd.f32 %v12077_v15, %v8968_v43  ;;  %v16130_v22 = vld [vmem:[#allocation54_spill] sm:$0xff]  ;;  %v9471_v39 = vunpack.c.l.bf16 %v10740_v16  ;;  %p12323_p12 = pnand %p12322_p11, %p12456_p5 }
 0x41f   : > { %v9281_v51 = vpop.f32.mrf.mxu1  ;;  %v8600_v28 = vadd.f32 %v16130_v22, %v8229_v41  ;;  %v8967_v12 = vadd.f32 %v8914_v33, %v8597_v54  ;;  %v8972_v23 = vadd.f32 %v12033_v57, %v8602_v32  ;;  %v9591_v8 = vrot.slane %v9466_v19, 1  ;;  %p12330_p2 = por %p12329_p1, %p12328_p0 }
 0x420   : > { %9752 = vst [vmem:[%s15491_s6 + $0xb8] sm:$0xff] %v9720_v4  ;;  %v9718_v52 = vmax.f32 %v9686_v20, 0.0  ;;  %v9691_v18 = vadd.f32 %v9588_v48, %v9338_v31  ;;  %v9336_v0 = vadd.f32 %v9281_v51, %v8966_v34  ;;  %v9592_v30 = vrot.slane %v9467_v45, 1  ;;  %p12324_p13 = pneg %p12323_p12 }
 0x421   : > { %v12078_v24 = vpop.f32.mrf.mxu1  ;;  %v9468_v56 = vunpack.c.l.bf16 %v10737_v27  ;;  %v8603_v14 = vadd.f32 %v15408_v13, %v8232_v58  ;;  %v8970_v29 = vadd.f32 %v8927_v49, %v8600_v28  ;;  %v9598_v42 = vsel %vm9520_vm6, %v9596_v55, %v9597_v17 }
 0x422   : > { %9750 = vst [vmem:[%s15491_s6 + $0xa8] sm:$0xff] %v9718_v52  ;;  %v9723_v10 = vmax.f32 %v9691_v18, 0.0  ;;  %v9689_v61 = vadd.f32 %v9583_v5, %v9336_v0  ;;  %v9339_v2 = vadd.f32 %v12078_v24, %v8969_v60  ;;  %v9599_v5 = vrot.slane %v9471_v39, 1  ;;  %p12331_p3 = pnand %p12330_p2, %p12324_p13 }
 0x423   : > { %v9284_v48 = vpop.f32.mrf.mxu1  ;;  %v8601_v37 = vadd.f32 %v15430_v1, %v8230_v6  ;;  %v9593_v13 = vsel %vm9520_vm6, %v9591_v8, %v9592_v30  ;;  %v8973_v44 = vadd.f32 %v12034_v25, %v8603_v14 }
 0x424   : > { %9755 = vst [vmem:[%s15491_s6 + $0xd0] sm:$0xff] %v9723_v10  ;;  %v9721_v38 = vmax.f32 %v9689_v61, 0.0  ;;  %v9692_v9 = vadd.f32 %v9590_v36, %v9339_v2  ;;  %v9337_v59 = vadd.f32 %v9284_v48, %v8967_v12  ;;  %v9594_v36 = vrot.slane %v9468_v56, 1 }
 0x425   : > { %v12081_v33 = vpop.f32.mrf.mxu1  ;;  %v9600_v11 = vsel %vm9520_vm6, %v9597_v17, %v9599_v5  ;;  %v8971_v26 = vadd.f32 %v8930_v46, %v8601_v37 }
 0x426   : > { %9753 = vst [vmem:[%s15491_s6 + $0xc0] sm:$0xff] %v9721_v38  ;;  %v9724_v41 = vmax.f32 %v9692_v9, 0.0  ;;  %v9690_v43 = vadd.f32 %v9585_v35, %v9337_v59  ;;  %v9342_v57 = vadd.f32 %v12081_v33, %v8972_v23  ;;  %v9595_v15 = vsel %vm9520_vm6, %v9592_v30, %v9594_v36 }
 0x427   : > { %v9297_v50 = vpop.f32.mrf.mxu1 }
 0x428   : > { %9756 = vst [vmem:[%s15491_s6 + $0xd8] sm:$0xff] %v9724_v41  ;;  %v9722_v7 = vmax.f32 %v9690_v43, 0.0  ;;  %v9695_v62 = vadd.f32 %v9598_v42, %v9342_v57  ;;  %v9340_v21 = vadd.f32 %v9297_v50, %v8970_v29 }
 0x429   : > { %v12082_v1 = vpop.f32.mrf.mxu1 }
 0x42a   : > { %9754 = vst [vmem:[%s15491_s6 + $0xc8] sm:$0xff] %v9722_v7  ;;  %v9727_v63 = vmax.f32 %v9695_v62, 0.0  ;;  %v9693_v40 = vadd.f32 %v9593_v13, %v9340_v21  ;;  %v9343_v58 = vadd.f32 %v12082_v1, %v8973_v44 }
 0x42b   : > { %v9300_v34 = vpop.f32.mrf.mxu1 }
 0x42c   : > { %9759 = vst [vmem:[%s15491_s6 + $0xf0] sm:$0xff] %v9727_v63  ;;  %v9725_v35 = vmax.f32 %v9693_v40, 0.0  ;;  %v9696_v47 = vadd.f32 %v9600_v11, %v9343_v58  ;;  %v9341_v54 = vadd.f32 %v9300_v34, %v8971_v26 }
 0x42e   : > { %9757 = vst [vmem:[%s15491_s6 + $0xe0] sm:$0xff] %v9725_v35  ;;  %v9728_v4 = vmax.f32 %v9696_v47, 0.0  ;;  %v9694_v20 = vadd.f32 %v9595_v15, %v9341_v54 }
 0x430   : > { %9760 = vst [vmem:[%s15491_s6 + $0xf8] sm:$0xff] %v9728_v4  ;;  %v9726_v31 = vmax.f32 %v9694_v20, 0.0 }
 0x432   : > { %9758 = vst [vmem:[%s15491_s6 + $0xe8] sm:$0xff] %v9726_v31 }
 0x433   : > { %12334 = shalt.err (!%p12331_p3)
}
 0x434   : > { %s12335_s16 = scalar_lea.hbm %s15728_s10, 4096  ;;  %s12339_s25 = scalar_lea.hbm %s15781_s5, 8192 }
 0x435   : > { %p12336_p4 = scmp.ne.s32.totalorder %s15728_s10, %s12335_s16  ;;  %p12340_p9 = scmp.lt.s32.totalorder %s15728_s10, %s15781_s5 }
 0x436   : > { %p12341_p10 = scmp.lt.s32.totalorder %s12339_s25, %s12335_s16 }
 0x437   : > { %p12337_p7 = pnand %p12336_p4, %p12456_p5 }
 0x438   : > { %p12342_p11 = por %p12341_p10, %p12340_p9 }
 0x439   : > { %p12338_p8 = pneg %p12337_p7 }
 0x43b   : > { %p12343_p12 = pnand %p12342_p11, %p12338_p8 }
 0x43d   : > { %12346 = shalt.err (!%p12343_p12)
}
 0x43e   : > { %s12386_s6 = smov 128   ;;  %s12387_s15 = smov 8  }
 0x43f   : > { %12084 = dma.vmem_to_hbm [thread:$0]  (%p12456_p5), %s15730_s7, 4096, %s15728_s10, %s15736_s11, %s12386_s6, %s12386_s6, %s12387_s15  }
 0x440 PF: > { %p12090_p13 = scmp.ge.s32.totalorder %s12381_s21, 2  ;;  %s9790_s8 = sand.u32 1, %s12369_s18  }
 0x441   : > { %s9791_s9 = scalar_lea.sflag [#allocation5], %s9790_s8 }
 0x442   : > { %p12087_p0 = pnand %p12090_p13, %p12460_p6 }
 0x444   : > { %p12088_p1 = pneg %p12087_p0 }
 0x446   : > { %12364 = dma.done.wait (%p12088_p1), %s9791_s9, 4096  }
 0x447   : > { %12366 = vsyncadd (%p12088_p1), %s9791_s9, 4294963200  ;;  %p15_p2 = scmp.ge.s32.totalorder %s12443_s24, 4   ;;  %s16131_s18 = smov %s12373_s19 }
 0x448   : > { %s16132_s19 = smov %s12377_s20  ;;  %s16133_s20 = smov %s12454_s27 }
 0x449   : > { %s16134_s21 = smov %s12443_s24  ;;  %17 = sbr.rel (!%p15_p2) target bundleno = 3 (0x3), region = 95 }
 0x44e   :  { %9796 = vsyncpa [#allocation5], 1 }
 0x44f   :  { %9798 = vsyncpa [#allocation5 + $0x1], 1 }

</bundles_post_ra>
